<compile_context>
chip_gen: v7x
topology: tpu7x:2x2x1
jax: 0.10.0
libtpu: 0.0.40
codegen_flags: <defaults>
</compile_context>

<pallas_src>
import jax
import jax.numpy as jnp
import numpy as np
from jax.experimental import pallas as pl
from jax.experimental.pallas import tpu as pltpu

# Set to jnp.bfloat16 on v6e/v7x for ~2x MXU throughput and half the weight
# traffic (accumulation stays f32).  f32 keeps the test bit-comparable.
MATMUL_DTYPE = jnp.float32

# ---------------------------------------------------------------------------
# Fixed geometry implied by the model (fc1 expects 9216 = 64*12*12 -> 28x28 in)
# ---------------------------------------------------------------------------
KH = KW = 3
H1 = W1 = 28                       # conv1 input spatial
OH1 = OW1 = 26                     # conv1 output spatial
C2, O2 = 32, 64                    # conv2 in/out channels
H2 = W2 = 26                       # conv2 input spatial
OH2 = OW2 = 24                     # conv2 output spatial
ROWS_PAD = OH2 * W2                # 624: conv2 out rows in padded (oh*26+ow) layout
ROWS_ACC = (OH2 - 1) * W2 + OW2    # 622: last valid row index + 1
POOL_H = POOL_W = 12
FC1_IN = POOL_H * POOL_W * O2      # 9216


# ---------------------------------------------------------------------------
# Generic tiled GEMM (+bias, +relu / +log_softmax) kernel
#   grid = (M_tiles [parallel], K_tiles [arbitrary]); full N in one block;
#   f32 VMEM accumulator with pl.when init / finalize.
# ---------------------------------------------------------------------------
def _gemm_kernel_factory(activation):
    def kernel(x_ref, w_ref, b_ref, o_ref, acc_ref):
        k = pl.program_id(1)

        @pl.when(k == 0)
        def _init():
            acc_ref[...] = jnp.zeros_like(acc_ref)

        acc_ref[...] += jnp.dot(x_ref[...].astype(w_ref.dtype), w_ref[...],
                                preferred_element_type=jnp.float32)

        @pl.when(k == pl.num_programs(1) - 1)
        def _finalize():
            r = acc_ref[...] + b_ref[...]          # (TM, N) + (1, N)
            if activation == "relu":
                r = jnp.maximum(r, 0.0)
            elif activation == "log_softmax":
                r = r - jnp.max(r, axis=-1, keepdims=True)
                r = r - jnp.log(jnp.sum(jnp.exp(r), axis=-1, keepdims=True))
            o_ref[...] = r.astype(o_ref.dtype)

    return kernel


def _choose_tile_k(K, cap=2304):
    """Largest multiple-of-128 divisor of K that is <= cap (else full K)."""
    if K <= cap or K % 128 != 0:
        return K
    for tk in range(cap - cap % 128, 0, -128):
        if K % tk == 0:
            return tk
    return K


def matmul_bias(x, w, b2d, activation=None, tile_m=512, tile_k_cap=2304):
    """x: (M, K) @ w: (K, N) + b2d: (1, N), fused activation. f32 output."""
    M, K = x.shape
    K2, N = w.shape
    assert K == K2 and b2d.shape == (1, N)
    TM = M if M <= tile_m else tile_m          # full M if small, else 512 (mult of 8)
    TK = _choose_tile_k(K, tile_k_cap)
    grid = (pl.cdiv(M, TM), pl.cdiv(K, TK))

    flops = 2 * M * K * N
    transcendentals = M * N if activation == "log_softmax" else 0
    bytes_accessed = (x.size * x.dtype.itemsize + w.size * w.dtype.itemsize
                      + b2d.size * 4 + M * N * 4)

    return pl.pallas_call(
        _gemm_kernel_factory(activation),
        out_shape=jax.ShapeDtypeStruct((M, N), jnp.float32),
        grid=grid,
        in_specs=[
            pl.BlockSpec((TM, TK), lambda i, k: (i, k)),
            pl.BlockSpec((TK, N), lambda i, k: (k, 0)),
            pl.BlockSpec((1, N), lambda i, k: (0, 0)),
        ],
        out_specs=pl.BlockSpec((TM, N), lambda i, k: (i, 0)),
        scratch_shapes=[pltpu.VMEM((TM, N), jnp.float32)],
        compiler_params=pltpu.CompilerParams(
            dimension_semantics=("parallel", "arbitrary")),
        cost_estimate=pl.CostEstimate(flops=flops,
                                      transcendentals=transcendentals,
                                      bytes_accessed=bytes_accessed),
    )(x, w, b2d)


# ---------------------------------------------------------------------------
# conv2 (+ReLU): per-image kernel, im2col folded in as 9 tap matmuls.
#   Input  : (N, H2*W2, C2)  flattened NHWC rows  (row = h*26 + w)
#   Output : (N, 624, O2)    rows t = oh*26 + ow  (ow >= 24 are junk columns,
#                            dropped by the pooling kernel)
# ---------------------------------------------------------------------------
def _conv2_kernel(x_ref, w_ref, b_ref, o_ref, acc_ref):
    first = True
    for kh in range(KH):
        for kw in range(KW):
            start = kh * W2 + kw                                # 0 .. 54 (static)
            xs = x_ref[0, start:start + ROWS_ACC, :]            # (622, C2)
            tap = jnp.dot(xs.astype(w_ref.dtype), w_ref[kh, kw],
                          preferred_element_type=jnp.float32)   # (622, O2)
            if first:
                acc_ref[...] = tap
                first = False
            else:
                acc_ref[...] += tap
    y = jnp.maximum(acc_ref[...] + b_ref[...], 0.0)
    o_ref[0, :ROWS_ACC, :] = y.astype(o_ref.dtype)
    o_ref[0, ROWS_ACC:, :] = jnp.zeros((ROWS_PAD - ROWS_ACC, O2), o_ref.dtype)


def conv2_relu(x_flat, w2, b2):
    N = x_flat.shape[0]
    flops = 2 * N * KH * KW * ROWS_ACC * C2 * O2
    bytes_accessed = (x_flat.size * x_flat.dtype.itemsize
                      + w2.size * w2.dtype.itemsize
                      + b2.size * 4 + N * ROWS_PAD * O2 * 4)
    return pl.pallas_call(
        _conv2_kernel,
        out_shape=jax.ShapeDtypeStruct((N, ROWS_PAD, O2), jnp.float32),
        grid=(N,),
        in_specs=[
            pl.BlockSpec((1, H2 * W2, C2), lambda n: (n, 0, 0)),
            pl.BlockSpec((KH, KW, C2, O2), lambda n: (0, 0, 0, 0)),
            pl.BlockSpec((1, O2), lambda n: (0, 0)),
        ],
        out_specs=pl.BlockSpec((1, ROWS_PAD, O2), lambda n: (n, 0, 0)),
        scratch_shapes=[pltpu.VMEM((ROWS_ACC, O2), jnp.float32)],
        compiler_params=pltpu.CompilerParams(dimension_semantics=("parallel",)),
        cost_estimate=pl.CostEstimate(flops=flops, transcendentals=0,
                                      bytes_accessed=bytes_accessed),
    )(x_flat, w2, b2)


# ---------------------------------------------------------------------------
# 2x2 max-pool: single read of the conv2 output.
#   Free row-major reshape packs rows as (h2, hh, w2, ww*64+c): the h-pair max
#   is an outer-dim index, the w-pair max is a 64-lane roll, junk columns
#   (w2 == 12) and the duplicated lane half are sliced away before the store.
# ---------------------------------------------------------------------------
def _pool_kernel(x_ref, o_ref):
    a = x_ref[0, :, 0, :, :]                     # (12, 13, 128) even oh rows
    b = x_ref[0, :, 1, :, :]                     # (12, 13, 128) odd  oh rows
    m = jnp.maximum(a, b)
    m = jnp.maximum(m, pltpu.roll(m, shift=O2, axis=2))   # pair even/odd ow
    o_ref[0] = m[:, :POOL_W, :O2]                # (12, 12, 64)


def max_pool_2x2(y_pad):
    N = y_pad.shape[0]
    v = y_pad.reshape(N, POOL_H, 2, POOL_W + 1, 2 * O2)   # free reshape
    return pl.pallas_call(
        _pool_kernel,
        out_shape=jax.ShapeDtypeStruct((N, POOL_H, POOL_W, O2), jnp.float32),
        grid=(N,),
        in_specs=[pl.BlockSpec((1, POOL_H, 2, POOL_W + 1, 2 * O2),
                               lambda n: (n, 0, 0, 0, 0))],
        out_specs=pl.BlockSpec((1, POOL_H, POOL_W, O2), lambda n: (n, 0, 0, 0)),
        compiler_params=pltpu.CompilerParams(dimension_semantics=("parallel",)),
    )(v)


# ---------------------------------------------------------------------------
# conv1 glue: single-channel im2col (tiny: 9 columns) -> tiled Pallas GEMM.
# ---------------------------------------------------------------------------
def _im2col_1ch(x0):
    """x0: (N, 28, 28) -> (N*26*26, 9), rows ordered (n, oh, ow), cols (kh, kw)."""
    N = x0.shape[0]
    taps = [x0[:, i:i + OH1, j:j + OW1] for i in range(KH) for j in range(KW)]
    cols = jnp.stack(taps, axis=-1)              # (N, 26, 26, 9)
    return cols.reshape(N * OH1 * OW1, KH * KW)


# ---------------------------------------------------------------------------
# Parameters: PyTorch-layout init + one-time preprocessing for the kernels.
# ---------------------------------------------------------------------------
def init_params(key):
    ks = jax.random.split(key, 8)

    def uniform(k, shape, fan_in):
        bound = 1.0 / np.sqrt(fan_in)
        return jax.random.uniform(k, shape, jnp.float32, -bound, bound)

    return {
        "conv1_w": uniform(ks[0], (32, 1, 3, 3), 1 * 3 * 3),
        "conv1_b": uniform(ks[1], (32,), 1 * 3 * 3),
        "conv2_w": uniform(ks[2], (64, 32, 3, 3), 32 * 3 * 3),
        "conv2_b": uniform(ks[3], (64,), 32 * 3 * 3),
        "fc1_w": uniform(ks[4], (128, 9216), 9216),   # PyTorch Linear: (out, in)
        "fc1_b": uniform(ks[5], (128,), 9216),
        "fc2_w": uniform(ks[6], (10, 128), 128),
        "fc2_b": uniform(ks[7], (10,), 128),
    }


def prepare_params(params, matmul_dtype=MATMUL_DTYPE):
    """One-time weight relayout: all transposes / NHWC permutes happen here."""
    w1 = params["conv1_w"].reshape(32, KH * KW).T.astype(matmul_dtype)      # (9, 32)
    w2 = params["conv2_w"].transpose(2, 3, 1, 0).astype(matmul_dtype)       # (3,3,32,64)
    # fc1 weight permuted so it consumes the NHWC (h, w, c) flatten order.
    w_fc1 = (params["fc1_w"].reshape(128, O2, POOL_H, POOL_W)
             .transpose(2, 3, 1, 0).reshape(FC1_IN, 128).astype(matmul_dtype))
    w_fc2 = params["fc2_w"].T.astype(matmul_dtype)                          # (128, 10)
    return {
        "w1": w1, "b1": params["conv1_b"].reshape(1, 32).astype(jnp.float32),
        "w2": w2, "b2": params["conv2_b"].reshape(1, O2).astype(jnp.float32),
        "w_fc1": w_fc1, "b_fc1": params["fc1_b"].reshape(1, 128).astype(jnp.float32),
        "w_fc2": w_fc2, "b_fc2": params["fc2_b"].reshape(1, 10).astype(jnp.float32),
    }


# ---------------------------------------------------------------------------
# Forward pass (NHWC throughout; all layer math in Pallas kernels)
# ---------------------------------------------------------------------------
def net_forward(prepped, x):
    # x: (N, 1, 28, 28) NCHW float32
    N = x.shape[0]
    x0 = x[:, 0]                                                    # (N, 28, 28)

    cols = _im2col_1ch(x0)                                          # (N*676, 9)
    y1 = matmul_bias(cols, prepped["w1"], prepped["b1"], "relu")    # (N*676, 32)
    y1 = y1.reshape(N, H2 * W2, C2)                                 # rows = h*26 + w

    y2 = conv2_relu(y1, prepped["w2"], prepped["b2"])               # (N, 624, 64)
    pooled = max_pool_2x2(y2)                                       # (N, 12, 12, 64)
    # dropout1: identity (eval)
    feat = pooled.reshape(N, FC1_IN)                                # NHWC flatten (free)

    h = matmul_bias(feat, prepped["w_fc1"], prepped["b_fc1"], "relu")        # (N, 128)
    # dropout2: identity (eval)
    return matmul_bias(h, prepped["w_fc2"], prepped["b_fc2"], "log_softmax")  # (N, 10)


# ---------------------------------------------------------------------------
# Pure-jnp reference (PyTorch semantics) for correctness cross-check
# ---------------------------------------------------------------------------
def net_forward_ref(params, x):
    def conv(x, w, b):
        y = jax.lax.conv_general_dilated(
            x, w, window_strides=(1, 1), padding="VALID",
            dimension_numbers=("NCHW", "OIHW", "NCHW"))
        return y + b.reshape(1, -1, 1, 1)

    x = jax.nn.relu(conv(x, params["conv1_w"], params["conv1_b"]))
    x = jax.nn.relu(conv(x, params["conv2_w"], params["conv2_b"]))
    N, C, H, W = x.shape
    x = x.reshape(N, C, H // 2, 2, W // 2, 2).max(axis=(3, 5))
    x = x.reshape(N, -1)
    x = jax.nn.relu(x @ params["fc1_w"].T + params["fc1_b"])
    logits = x @ params["fc2_w"].T + params["fc2_b"]
    return jax.nn.log_softmax(logits, axis=1)


if __name__ == "__main__":
    key = jax.random.PRNGKey(0)
    k_param, k_x = jax.random.split(key)
    params = init_params(k_param)
    prepped = prepare_params(params)

    # MNIST-shaped input: fc1 expects 9216 = 64*12*12, which fixes H=W=28.
    x = jax.random.normal(k_x, (2, 1, 28, 28), dtype=jnp.float32)

    out = jax.block_until_ready(jax.jit(net_forward)(prepped, x))
    ref = jax.block_until_ready(jax.jit(net_forward_ref)(params, x))

    np.testing.assert_allclose(np.asarray(out), np.asarray(ref),
                               atol=1e-3, rtol=1e-3)
    assert out.shape == (2, 10)
    print("KERNEL_OK")
</pallas_src>

<mosaic_0001>
module attributes {stable_mosaic.version = 11 : i64} {
  func.func @kernel(%arg0: i32, %arg1: i32, %arg2: memref<512x9xf32, #tpu.memory_space<vmem>>, %arg3: memref<9x32xf32, #tpu.memory_space<vmem>>, %arg4: memref<1x32xf32, #tpu.memory_space<vmem>>, %arg5: memref<512x32xf32, #tpu.memory_space<vmem>>, %arg6: memref<512x32xf32, #tpu.memory_space<vmem>>) attributes {dimension_semantics = [#tpu.dimension_semantics<parallel>, #tpu.dimension_semantics<arbitrary>], iteration_bounds = array<i64: 3, 1>, scalar_prefetch = 0 : i64, scratch_operands = 1 : i64, tpu.core_type = #tpu.core_type<tc>, window_params = [{transform_indices = @transform_0, window_bounds = array<i64: 512, 9>}, {transform_indices = @transform_1, window_bounds = array<i64: 9, 32>}, {pipeline_mode = #tpu.pipeline_mode<synchronous>, transform_indices = @transform_2, window_bounds = array<i64: 1, 32>}, {transform_indices = @transform_3, window_bounds = array<i64: 512, 32>}]} {
    %c0_i32 = arith.constant 0 : i32
    %0 = arith.cmpi eq, %arg1, %c0_i32 : i32
    %1 = arith.extui %0 : i1 to i32
    %c0_i32_0 = arith.constant 0 : i32
    %2 = arith.cmpi ne, %1, %c0_i32_0 : i32
    scf.if %2 {
      %cst_10 = arith.constant 0.000000e+00 : f32
      %12 = vector.broadcast %cst_10 : f32 to vector<512x32xf32>
      %c0_11 = arith.constant 0 : index
      %c0_12 = arith.constant 0 : index
      %13 = vector.load %arg6[%c0_11, %c0_12] : memref<512x32xf32, #tpu.memory_space<vmem>>, vector<512x32xf32>
      tpu.vector_store %arg6[%c0_11, %c0_12], %12 {strides = array<i32>} : memref<512x32xf32, #tpu.memory_space<vmem>>, vector<512x32xf32>,
    } else {
    }
    %c0 = arith.constant 0 : index
    %c0_1 = arith.constant 0 : index
    %3 = vector.load %arg6[%c0, %c0_1] : memref<512x32xf32, #tpu.memory_space<vmem>>, vector<512x32xf32>
    %c0_2 = arith.constant 0 : index
    %c0_3 = arith.constant 0 : index
    %4 = vector.load %arg2[%c0_2, %c0_3] : memref<512x9xf32, #tpu.memory_space<vmem>>, vector<512x9xf32>
    %c0_4 = arith.constant 0 : index
    %c0_5 = arith.constant 0 : index
    %5 = vector.load %arg3[%c0_4, %c0_5] : memref<9x32xf32, #tpu.memory_space<vmem>>, vector<9x32xf32>
    %cst = arith.constant dense<0.000000e+00> : vector<512x32xf32>
    %6 = tpu.matmul %4, %5, %cst {dimension_numbers = #tpu.dot_dimension_numbers<[1], [0], [0], [1], [0, 0, 1, 1], [], []>} : vector<512x9xf32>, vector<9x32xf32>, vector<512x32xf32> -> vector<512x32xf32>
    %7 = arith.addf %3, %6 : vector<512x32xf32>
    %c0_6 = arith.constant 0 : index
    %c0_7 = arith.constant 0 : index
    %8 = vector.load %arg6[%c0_6, %c0_7] : memref<512x32xf32, #tpu.memory_space<vmem>>, vector<512x32xf32>
    tpu.vector_store %arg6[%c0_6, %c0_7], %7 {strides = array<i32>} : memref<512x32xf32, #tpu.memory_space<vmem>>, vector<512x32xf32>,
    %c0_i32_8 = arith.constant 0 : i32
    %9 = arith.cmpi eq, %arg1, %c0_i32_8 : i32
    %10 = arith.extui %9 : i1 to i32
    %c0_i32_9 = arith.constant 0 : i32
    %11 = arith.cmpi ne, %10, %c0_i32_9 : i32
    scf.if %11 {
      %c0_10 = arith.constant 0 : index
      %c0_11 = arith.constant 0 : index
      %12 = vector.load %arg6[%c0_10, %c0_11] : memref<512x32xf32, #tpu.memory_space<vmem>>, vector<512x32xf32>
      %c0_12 = arith.constant 0 : index
      %c0_13 = arith.constant 0 : index
      %13 = vector.load %arg4[%c0_12, %c0_13] : memref<1x32xf32, #tpu.memory_space<vmem>>, vector<1x32xf32>
      %14 = vector.broadcast %13 : vector<1x32xf32> to vector<512x32xf32>
      %15 = arith.addf %12, %14 : vector<512x32xf32>
      %cst_14 = arith.constant 0.000000e+00 : f32
      %16 = vector.broadcast %cst_14 : f32 to vector<512x32xf32>
      %17 = arith.maximumf %15, %16 : vector<512x32xf32>
      %c0_15 = arith.constant 0 : index
      %c0_16 = arith.constant 0 : index
      %18 = vector.load %arg5[%c0_15, %c0_16] : memref<512x32xf32, #tpu.memory_space<vmem>>, vector<512x32xf32>
      tpu.vector_store %arg5[%c0_15, %c0_16], %17 {strides = array<i32>} : memref<512x32xf32, #tpu.memory_space<vmem>>, vector<512x32xf32>,
    } else {
    }
    return
  }
  func.func @transform_0(%arg0: i32, %arg1: i32) -> (i32, i32) {
    %c0_i32 = arith.constant 0 : i32
    return %arg0, %arg1 : i32, i32
  }
  func.func @transform_1(%arg0: i32, %arg1: i32) -> (i32, i32) {
    %c0_i32 = arith.constant 0 : i32
    %c0_i32_0 = arith.constant 0 : i32
    return %arg1, %c0_i32 : i32, i32
  }
  func.func @transform_2(%arg0: i32, %arg1: i32) -> (i32, i32) {
    %c0_i32 = arith.constant 0 : i32
    %c0_i32_0 = arith.constant 0 : i32
    %c0_i32_1 = arith.constant 0 : i32
    return %c0_i32, %c0_i32_0 : i32, i32
  }
  func.func @transform_3(%arg0: i32, %arg1: i32) -> (i32, i32) {
    %c0_i32 = arith.constant 0 : i32
    %c0_i32_0 = arith.constant 0 : i32
    return %arg0, %c0_i32 : i32, i32
  }
}

module attributes {stable_mosaic.version = 11 : i64} {
  func.func @_conv2_kernel(%arg0: i32, %arg1: memref<1x676x32xf32, #tpu.memory_space<vmem>>, %arg2: memref<3x3x32x64xf32, #tpu.memory_space<vmem>>, %arg3: memref<1x64xf32, #tpu.memory_space<vmem>>, %arg4: memref<1x624x64xf32, #tpu.memory_space<vmem>>, %arg5: memref<622x64xf32, #tpu.memory_space<vmem>>) attributes {dimension_semantics = [#tpu.dimension_semantics<parallel>], iteration_bounds = array<i64: 2>, scalar_prefetch = 0 : i64, scratch_operands = 1 : i64, tpu.core_type = #tpu.core_type<tc>, window_params = [{transform_indices = @transform_0, window_bounds = array<i64: 1, 676, 32>}, {pipeline_mode = #tpu.pipeline_mode<synchronous>, transform_indices = @transform_1, window_bounds = array<i64: 3, 3, 32, 64>}, {pipeline_mode = #tpu.pipeline_mode<synchronous>, transform_indices = @transform_2, window_bounds = array<i64: 1, 64>}, {transform_indices = @transform_3, window_bounds = array<i64: 1, 624, 64>}]} {
    %c0 = arith.constant 0 : index
    %c0_0 = arith.constant 0 : index
    %c0_1 = arith.constant 0 : index
    %0 = vector.load %arg1[%c0, %c0_0, %c0_1] : memref<1x676x32xf32, #tpu.memory_space<vmem>>, vector<1x622x32xf32>
    %1 = vector.shape_cast %0 : vector<1x622x32xf32> to vector<622x32xf32>
    %c0_2 = arith.constant 0 : index
    %c0_3 = arith.constant 0 : index
    %c0_4 = arith.constant 0 : index
    %c0_5 = arith.constant 0 : index
    %2 = vector.load %arg2[%c0_2, %c0_3, %c0_4, %c0_5] : memref<3x3x32x64xf32, #tpu.memory_space<vmem>>, vector<1x1x32x64xf32>
    %3 = vector.shape_cast %2 : vector<1x1x32x64xf32> to vector<32x64xf32>
    %cst = arith.constant dense<0.000000e+00> : vector<622x64xf32>
    %4 = tpu.matmul %1, %3, %cst {dimension_numbers = #tpu.dot_dimension_numbers<[1], [0], [0], [1], [0, 0, 1, 1], [], []>} : vector<622x32xf32>, vector<32x64xf32>, vector<622x64xf32> -> vector<622x64xf32>
    %c0_6 = arith.constant 0 : index
    %c0_7 = arith.constant 0 : index
    %5 = vector.load %arg5[%c0_6, %c0_7] : memref<622x64xf32, #tpu.memory_space<vmem>>, vector<622x64xf32>
    tpu.vector_store %arg5[%c0_6, %c0_7], %4 {strides = array<i32>} : memref<622x64xf32, #tpu.memory_space<vmem>>, vector<622x64xf32>,
    %c0_8 = arith.constant 0 : index
    %c1 = arith.constant 1 : index
    %c0_9 = arith.constant 0 : index
    %6 = vector.load %arg1[%c0_8, %c1, %c0_9] : memref<1x676x32xf32, #tpu.memory_space<vmem>>, vector<1x622x32xf32>
    %7 = vector.shape_cast %6 : vector<1x622x32xf32> to vector<622x32xf32>
    %c0_10 = arith.constant 0 : index
    %c1_11 = arith.constant 1 : index
    %c0_12 = arith.constant 0 : index
    %c0_13 = arith.constant 0 : index
    %8 = vector.load %arg2[%c0_10, %c1_11, %c0_12, %c0_13] : memref<3x3x32x64xf32, #tpu.memory_space<vmem>>, vector<1x1x32x64xf32>
    %9 = vector.shape_cast %8 : vector<1x1x32x64xf32> to vector<32x64xf32>
    %cst_14 = arith.constant dense<0.000000e+00> : vector<622x64xf32>
    %10 = tpu.matmul %7, %9, %cst_14 {dimension_numbers = #tpu.dot_dimension_numbers<[1], [0], [0], [1], [0, 0, 1, 1], [], []>} : vector<622x32xf32>, vector<32x64xf32>, vector<622x64xf32> -> vector<622x64xf32>
    %c0_15 = arith.constant 0 : index
    %c0_16 = arith.constant 0 : index
    %11 = vector.load %arg5[%c0_15, %c0_16] : memref<622x64xf32, #tpu.memory_space<vmem>>, vector<622x64xf32>
    %12 = arith.addf %11, %10 : vector<622x64xf32>
    %c0_17 = arith.constant 0 : index
    %c0_18 = arith.constant 0 : index
    %13 = vector.load %arg5[%c0_17, %c0_18] : memref<622x64xf32, #tpu.memory_space<vmem>>, vector<622x64xf32>
    tpu.vector_store %arg5[%c0_17, %c0_18], %12 {strides = array<i32>} : memref<622x64xf32, #tpu.memory_space<vmem>>, vector<622x64xf32>,
    %c0_19 = arith.constant 0 : index
    %c2 = arith.constant 2 : index
    %c0_20 = arith.constant 0 : index
    %14 = vector.load %arg1[%c0_19, %c2, %c0_20] : memref<1x676x32xf32, #tpu.memory_space<vmem>>, vector<1x622x32xf32>
    %15 = vector.shape_cast %14 : vector<1x622x32xf32> to vector<622x32xf32>
    %c0_21 = arith.constant 0 : index
    %c2_22 = arith.constant 2 : index
    %c0_23 = arith.constant 0 : index
    %c0_24 = arith.constant 0 : index
    %16 = vector.load %arg2[%c0_21, %c2_22, %c0_23, %c0_24] : memref<3x3x32x64xf32, #tpu.memory_space<vmem>>, vector<1x1x32x64xf32>
    %17 = vector.shape_cast %16 : vector<1x1x32x64xf32> to vector<32x64xf32>
    %cst_25 = arith.constant dense<0.000000e+00> : vector<622x64xf32>
    %18 = tpu.matmul %15, %17, %cst_25 {dimension_numbers = #tpu.dot_dimension_numbers<[1], [0], [0], [1], [0, 0, 1, 1], [], []>} : vector<622x32xf32>, vector<32x64xf32>, vector<622x64xf32> -> vector<622x64xf32>
    %c0_26 = arith.constant 0 : index
    %c0_27 = arith.constant 0 : index
    %19 = vector.load %arg5[%c0_26, %c0_27] : memref<622x64xf32, #tpu.memory_space<vmem>>, vector<622x64xf32>
    %20 = arith.addf %19, %18 : vector<622x64xf32>
    %c0_28 = arith.constant 0 : index
    %c0_29 = arith.constant 0 : index
    %21 = vector.load %arg5[%c0_28, %c0_29] : memref<622x64xf32, #tpu.memory_space<vmem>>, vector<622x64xf32>
    tpu.vector_store %arg5[%c0_28, %c0_29], %20 {strides = array<i32>} : memref<622x64xf32, #tpu.memory_space<vmem>>, vector<622x64xf32>,
    %c0_30 = arith.constant 0 : index
    %c26 = arith.constant 26 : index
    %c0_31 = arith.constant 0 : index
    %22 = vector.load %arg1[%c0_30, %c26, %c0_31] : memref<1x676x32xf32, #tpu.memory_space<vmem>>, vector<1x622x32xf32>
    %23 = vector.shape_cast %22 : vector<1x622x32xf32> to vector<622x32xf32>
    %c1_32 = arith.constant 1 : index
    %c0_33 = arith.constant 0 : index
    %c0_34 = arith.constant 0 : index
    %c0_35 = arith.constant 0 : index
    %24 = vector.load %arg2[%c1_32, %c0_33, %c0_34, %c0_35] : memref<3x3x32x64xf32, #tpu.memory_space<vmem>>, vector<1x1x32x64xf32>
    %25 = vector.shape_cast %24 : vector<1x1x32x64xf32> to vector<32x64xf32>
    %cst_36 = arith.constant dense<0.000000e+00> : vector<622x64xf32>
    %26 = tpu.matmul %23, %25, %cst_36 {dimension_numbers = #tpu.dot_dimension_numbers<[1], [0], [0], [1], [0, 0, 1, 1], [], []>} : vector<622x32xf32>, vector<32x64xf32>, vector<622x64xf32> -> vector<622x64xf32>
    %c0_37 = arith.constant 0 : index
    %c0_38 = arith.constant 0 : index
    %27 = vector.load %arg5[%c0_37, %c0_38] : memref<622x64xf32, #tpu.memory_space<vmem>>, vector<622x64xf32>
    %28 = arith.addf %27, %26 : vector<622x64xf32>
    %c0_39 = arith.constant 0 : index
    %c0_40 = arith.constant 0 : index
    %29 = vector.load %arg5[%c0_39, %c0_40] : memref<622x64xf32, #tpu.memory_space<vmem>>, vector<622x64xf32>
    tpu.vector_store %arg5[%c0_39, %c0_40], %28 {strides = array<i32>} : memref<622x64xf32, #tpu.memory_space<vmem>>, vector<622x64xf32>,
    %c0_41 = arith.constant 0 : index
    %c27 = arith.constant 27 : index
    %c0_42 = arith.constant 0 : index
    %30 = vector.load %arg1[%c0_41, %c27, %c0_42] : memref<1x676x32xf32, #tpu.memory_space<vmem>>, vector<1x622x32xf32>
    %31 = vector.shape_cast %30 : vector<1x622x32xf32> to vector<622x32xf32>
    %c1_43 = arith.constant 1 : index
    %c1_44 = arith.constant 1 : index
    %c0_45 = arith.constant 0 : index
    %c0_46 = arith.constant 0 : index
    %32 = vector.load %arg2[%c1_43, %c1_44, %c0_45, %c0_46] : memref<3x3x32x64xf32, #tpu.memory_space<vmem>>, vector<1x1x32x64xf32>
    %33 = vector.shape_cast %32 : vector<1x1x32x64xf32> to vector<32x64xf32>
    %cst_47 = arith.constant dense<0.000000e+00> : vector<622x64xf32>
    %34 = tpu.matmul %31, %33, %cst_47 {dimension_numbers = #tpu.dot_dimension_numbers<[1], [0], [0], [1], [0, 0, 1, 1], [], []>} : vector<622x32xf32>, vector<32x64xf32>, vector<622x64xf32> -> vector<622x64xf32>
    %c0_48 = arith.constant 0 : index
    %c0_49 = arith.constant 0 : index
    %35 = vector.load %arg5[%c0_48, %c0_49] : memref<622x64xf32, #tpu.memory_space<vmem>>, vector<622x64xf32>
    %36 = arith.addf %35, %34 : vector<622x64xf32>
    %c0_50 = arith.constant 0 : index
    %c0_51 = arith.constant 0 : index
    %37 = vector.load %arg5[%c0_50, %c0_51] : memref<622x64xf32, #tpu.memory_space<vmem>>, vector<622x64xf32>
    tpu.vector_store %arg5[%c0_50, %c0_51], %36 {strides = array<i32>} : memref<622x64xf32, #tpu.memory_space<vmem>>, vector<622x64xf32>,
    %c0_52 = arith.constant 0 : index
    %c28 = arith.constant 28 : index
    %c0_53 = arith.constant 0 : index
    %38 = vector.load %arg1[%c0_52, %c28, %c0_53] : memref<1x676x32xf32, #tpu.memory_space<vmem>>, vector<1x622x32xf32>
    %39 = vector.shape_cast %38 : vector<1x622x32xf32> to vector<622x32xf32>
    %c1_54 = arith.constant 1 : index
    %c2_55 = arith.constant 2 : index
    %c0_56 = arith.constant 0 : index
    %c0_57 = arith.constant 0 : index
    %40 = vector.load %arg2[%c1_54, %c2_55, %c0_56, %c0_57] : memref<3x3x32x64xf32, #tpu.memory_space<vmem>>, vector<1x1x32x64xf32>
    %41 = vector.shape_cast %40 : vector<1x1x32x64xf32> to vector<32x64xf32>
    %cst_58 = arith.constant dense<0.000000e+00> : vector<622x64xf32>
    %42 = tpu.matmul %39, %41, %cst_58 {dimension_numbers = #tpu.dot_dimension_numbers<[1], [0], [0], [1], [0, 0, 1, 1], [], []>} : vector<622x32xf32>, vector<32x64xf32>, vector<622x64xf32> -> vector<622x64xf32>
    %c0_59 = arith.constant 0 : index
    %c0_60 = arith.constant 0 : index
    %43 = vector.load %arg5[%c0_59, %c0_60] : memref<622x64xf32, #tpu.memory_space<vmem>>, vector<622x64xf32>
    %44 = arith.addf %43, %42 : vector<622x64xf32>
    %c0_61 = arith.constant 0 : index
    %c0_62 = arith.constant 0 : index
    %45 = vector.load %arg5[%c0_61, %c0_62] : memref<622x64xf32, #tpu.memory_space<vmem>>, vector<622x64xf32>
    tpu.vector_store %arg5[%c0_61, %c0_62], %44 {strides = array<i32>} : memref<622x64xf32, #tpu.memory_space<vmem>>, vector<622x64xf32>,
    %c0_63 = arith.constant 0 : index
    %c52 = arith.constant 52 : index
    %c0_64 = arith.constant 0 : index
    %46 = vector.load %arg1[%c0_63, %c52, %c0_64] : memref<1x676x32xf32, #tpu.memory_space<vmem>>, vector<1x622x32xf32>
    %47 = vector.shape_cast %46 : vector<1x622x32xf32> to vector<622x32xf32>
    %c2_65 = arith.constant 2 : index
    %c0_66 = arith.constant 0 : index
    %c0_67 = arith.constant 0 : index
    %c0_68 = arith.constant 0 : index
    %48 = vector.load %arg2[%c2_65, %c0_66, %c0_67, %c0_68] : memref<3x3x32x64xf32, #tpu.memory_space<vmem>>, vector<1x1x32x64xf32>
    %49 = vector.shape_cast %48 : vector<1x1x32x64xf32> to vector<32x64xf32>
    %cst_69 = arith.constant dense<0.000000e+00> : vector<622x64xf32>
    %50 = tpu.matmul %47, %49, %cst_69 {dimension_numbers = #tpu.dot_dimension_numbers<[1], [0], [0], [1], [0, 0, 1, 1], [], []>} : vector<622x32xf32>, vector<32x64xf32>, vector<622x64xf32> -> vector<622x64xf32>
    %c0_70 = arith.constant 0 : index
    %c0_71 = arith.constant 0 : index
    %51 = vector.load %arg5[%c0_70, %c0_71] : memref<622x64xf32, #tpu.memory_space<vmem>>, vector<622x64xf32>
    %52 = arith.addf %51, %50 : vector<622x64xf32>
    %c0_72 = arith.constant 0 : index
    %c0_73 = arith.constant 0 : index
    %53 = vector.load %arg5[%c0_72, %c0_73] : memref<622x64xf32, #tpu.memory_space<vmem>>, vector<622x64xf32>
    tpu.vector_store %arg5[%c0_72, %c0_73], %52 {strides = array<i32>} : memref<622x64xf32, #tpu.memory_space<vmem>>, vector<622x64xf32>,
    %c0_74 = arith.constant 0 : index
    %c53 = arith.constant 53 : index
    %c0_75 = arith.constant 0 : index
    %54 = vector.load %arg1[%c0_74, %c53, %c0_75] : memref<1x676x32xf32, #tpu.memory_space<vmem>>, vector<1x622x32xf32>
    %55 = vector.shape_cast %54 : vector<1x622x32xf32> to vector<622x32xf32>
    %c2_76 = arith.constant 2 : index
    %c1_77 = arith.constant 1 : index
    %c0_78 = arith.constant 0 : index
    %c0_79 = arith.constant 0 : index
    %56 = vector.load %arg2[%c2_76, %c1_77, %c0_78, %c0_79] : memref<3x3x32x64xf32, #tpu.memory_space<vmem>>, vector<1x1x32x64xf32>
    %57 = vector.shape_cast %56 : vector<1x1x32x64xf32> to vector<32x64xf32>
    %cst_80 = arith.constant dense<0.000000e+00> : vector<622x64xf32>
    %58 = tpu.matmul %55, %57, %cst_80 {dimension_numbers = #tpu.dot_dimension_numbers<[1], [0], [0], [1], [0, 0, 1, 1], [], []>} : vector<622x32xf32>, vector<32x64xf32>, vector<622x64xf32> -> vector<622x64xf32>
    %c0_81 = arith.constant 0 : index
    %c0_82 = arith.constant 0 : index
    %59 = vector.load %arg5[%c0_81, %c0_82] : memref<622x64xf32, #tpu.memory_space<vmem>>, vector<622x64xf32>
    %60 = arith.addf %59, %58 : vector<622x64xf32>
    %c0_83 = arith.constant 0 : index
    %c0_84 = arith.constant 0 : index
    %61 = vector.load %arg5[%c0_83, %c0_84] : memref<622x64xf32, #tpu.memory_space<vmem>>, vector<622x64xf32>
    tpu.vector_store %arg5[%c0_83, %c0_84], %60 {strides = array<i32>} : memref<622x64xf32, #tpu.memory_space<vmem>>, vector<622x64xf32>,
    %c0_85 = arith.constant 0 : index
    %c54 = arith.constant 54 : index
    %c0_86 = arith.constant 0 : index
    %62 = vector.load %arg1[%c0_85, %c54, %c0_86] : memref<1x676x32xf32, #tpu.memory_space<vmem>>, vector<1x622x32xf32>
    %63 = vector.shape_cast %62 : vector<1x622x32xf32> to vector<622x32xf32>
    %c2_87 = arith.constant 2 : index
    %c2_88 = arith.constant 2 : index
    %c0_89 = arith.constant 0 : index
    %c0_90 = arith.constant 0 : index
    %64 = vector.load %arg2[%c2_87, %c2_88, %c0_89, %c0_90] : memref<3x3x32x64xf32, #tpu.memory_space<vmem>>, vector<1x1x32x64xf32>
    %65 = vector.shape_cast %64 : vector<1x1x32x64xf32> to vector<32x64xf32>
    %cst_91 = arith.constant dense<0.000000e+00> : vector<622x64xf32>
    %66 = tpu.matmul %63, %65, %cst_91 {dimension_numbers = #tpu.dot_dimension_numbers<[1], [0], [0], [1], [0, 0, 1, 1], [], []>} : vector<622x32xf32>, vector<32x64xf32>, vector<622x64xf32> -> vector<622x64xf32>
    %c0_92 = arith.constant 0 : index
    %c0_93 = arith.constant 0 : index
    %67 = vector.load %arg5[%c0_92, %c0_93] : memref<622x64xf32, #tpu.memory_space<vmem>>, vector<622x64xf32>
    %68 = arith.addf %67, %66 : vector<622x64xf32>
    %c0_94 = arith.constant 0 : index
    %c0_95 = arith.constant 0 : index
    %69 = vector.load %arg5[%c0_94, %c0_95] : memref<622x64xf32, #tpu.memory_space<vmem>>, vector<622x64xf32>
    tpu.vector_store %arg5[%c0_94, %c0_95], %68 {strides = array<i32>} : memref<622x64xf32, #tpu.memory_space<vmem>>, vector<622x64xf32>,
    %c0_96 = arith.constant 0 : index
    %c0_97 = arith.constant 0 : index
    %70 = vector.load %arg5[%c0_96, %c0_97] : memref<622x64xf32, #tpu.memory_space<vmem>>, vector<622x64xf32>
    %c0_98 = arith.constant 0 : index
    %c0_99 = arith.constant 0 : index
    %71 = vector.load %arg3[%c0_98, %c0_99] : memref<1x64xf32, #tpu.memory_space<vmem>>, vector<1x64xf32>
    %72 = vector.broadcast %71 : vector<1x64xf32> to vector<622x64xf32>
    %73 = arith.addf %70, %72 : vector<622x64xf32>
    %cst_100 = arith.constant 0.000000e+00 : f32
    %74 = vector.broadcast %cst_100 : f32 to vector<622x64xf32>
    %75 = arith.maximumf %73, %74 : vector<622x64xf32>
    %c0_101 = arith.constant 0 : index
    %c0_102 = arith.constant 0 : index
    %c0_103 = arith.constant 0 : index
    %76 = vector.load %arg4[%c0_101, %c0_102, %c0_103] : memref<1x624x64xf32, #tpu.memory_space<vmem>>, vector<1x622x64xf32>
    %77 = vector.shape_cast %76 : vector<1x622x64xf32> to vector<622x64xf32>
    %78 = vector.shape_cast %75 : vector<622x64xf32> to vector<1x622x64xf32>
    tpu.vector_store %arg4[%c0_101, %c0_102, %c0_103], %78 {strides = array<i32>} : memref<1x624x64xf32, #tpu.memory_space<vmem>>, vector<1x622x64xf32>,
    %cst_104 = arith.constant 0.000000e+00 : f32
    %79 = vector.broadcast %cst_104 : f32 to vector<2x64xf32>
    %c0_105 = arith.constant 0 : index
    %c622 = arith.constant 622 : index
    %c0_106 = arith.constant 0 : index
    %80 = vector.load %arg4[%c0_105, %c622, %c0_106] : memref<1x624x64xf32, #tpu.memory_space<vmem>>, vector<1x2x64xf32>
    %81 = vector.shape_cast %80 : vector<1x2x64xf32> to vector<2x64xf32>
    %82 = vector.shape_cast %79 : vector<2x64xf32> to vector<1x2x64xf32>
    tpu.vector_store %arg4[%c0_105, %c622, %c0_106], %82 {strides = array<i32>} : memref<1x624x64xf32, #tpu.memory_space<vmem>>, vector<1x2x64xf32>,
    return
  }
  func.func @transform_0(%arg0: i32) -> (i32, i32, i32) {
    %c0_i32 = arith.constant 0 : i32
    %c0_i32_0 = arith.constant 0 : i32
    %c0_i32_1 = arith.constant 0 : i32
    return %arg0, %c0_i32, %c0_i32_0 : i32, i32, i32
  }
  func.func @transform_1(%arg0: i32) -> (i32, i32, i32, i32) {
    %c0_i32 = arith.constant 0 : i32
    %c0_i32_0 = arith.constant 0 : i32
    %c0_i32_1 = arith.constant 0 : i32
    %c0_i32_2 = arith.constant 0 : i32
    %c0_i32_3 = arith.constant 0 : i32
    return %c0_i32, %c0_i32_0, %c0_i32_1, %c0_i32_2 : i32, i32, i32, i32
  }
  func.func @transform_2(%arg0: i32) -> (i32, i32) {
    %c0_i32 = arith.constant 0 : i32
    %c0_i32_0 = arith.constant 0 : i32
    %c0_i32_1 = arith.constant 0 : i32
    return %c0_i32, %c0_i32_0 : i32, i32
  }
  func.func @transform_3(%arg0: i32) -> (i32, i32, i32) {
    %c0_i32 = arith.constant 0 : i32
    %c0_i32_0 = arith.constant 0 : i32
    %c0_i32_1 = arith.constant 0 : i32
    return %arg0, %c0_i32, %c0_i32_0 : i32, i32, i32
  }
}

module attributes {stable_mosaic.version = 11 : i64} {
  func.func @_pool_kernel(%arg0: i32, %arg1: memref<1x12x2x13x128xf32, #tpu.memory_space<vmem>>, %arg2: memref<1x12x12x64xf32, #tpu.memory_space<vmem>>) attributes {dimension_semantics = [#tpu.dimension_semantics<parallel>], iteration_bounds = array<i64: 2>, scalar_prefetch = 0 : i64, scratch_operands = 0 : i64, tpu.core_type = #tpu.core_type<tc>, window_params = [{transform_indices = @transform_0, window_bounds = array<i64: 1, 12, 2, 13, 128>}, {transform_indices = @transform_1, window_bounds = array<i64: 1, 12, 12, 64>}]} {
    %c0 = arith.constant 0 : index
    %c0_0 = arith.constant 0 : index
    %c0_1 = arith.constant 0 : index
    %c0_2 = arith.constant 0 : index
    %c0_3 = arith.constant 0 : index
    %0 = vector.load %arg1[%c0, %c0_0, %c0_1, %c0_2, %c0_3] : memref<1x12x2x13x128xf32, #tpu.memory_space<vmem>>, vector<1x12x1x13x128xf32>
    %1 = vector.shape_cast %0 : vector<1x12x1x13x128xf32> to vector<12x13x128xf32>
    %c0_4 = arith.constant 0 : index
    %c0_5 = arith.constant 0 : index
    %c1 = arith.constant 1 : index
    %c0_6 = arith.constant 0 : index
    %c0_7 = arith.constant 0 : index
    %2 = vector.load %arg1[%c0_4, %c0_5, %c1, %c0_6, %c0_7] : memref<1x12x2x13x128xf32, #tpu.memory_space<vmem>>, vector<1x12x1x13x128xf32>
    %3 = vector.shape_cast %2 : vector<1x12x1x13x128xf32> to vector<12x13x128xf32>
    %4 = arith.maximumf %1, %3 : vector<12x13x128xf32>
    %c64_i32 = arith.constant 64 : i32
    %5 = tpu.dynamic_rotate %4 by %c64_i32 dim 2 : vector<12x13x128xf32>, i32 -> vector<12x13x128xf32>
    %6 = arith.maximumf %4, %5 : vector<12x13x128xf32>
    %7 = vector.extract_strided_slice %6 {offsets = [0, 0, 0], sizes = [12, 12, 64], strides = [1, 1, 1]} : vector<12x13x128xf32> to vector<12x12x64xf32>
    %c0_8 = arith.constant 0 : index
    %c0_9 = arith.constant 0 : index
    %c0_10 = arith.constant 0 : index
    %c0_11 = arith.constant 0 : index
    %8 = vector.load %arg2[%c0_8, %c0_9, %c0_10, %c0_11] : memref<1x12x12x64xf32, #tpu.memory_space<vmem>>, vector<1x12x12x64xf32>
    %9 = vector.shape_cast %8 : vector<1x12x12x64xf32> to vector<12x12x64xf32>
    %10 = vector.shape_cast %7 : vector<12x12x64xf32> to vector<1x12x12x64xf32>
    tpu.vector_store %arg2[%c0_8, %c0_9, %c0_10, %c0_11], %10 {strides = array<i32>} : memref<1x12x12x64xf32, #tpu.memory_space<vmem>>, vector<1x12x12x64xf32>,
    return
  }
  func.func @transform_0(%arg0: i32) -> (i32, i32, i32, i32, i32) {
    %c0_i32 = arith.constant 0 : i32
    %c0_i32_0 = arith.constant 0 : i32
    %c0_i32_1 = arith.constant 0 : i32
    %c0_i32_2 = arith.constant 0 : i32
    %c0_i32_3 = arith.constant 0 : i32
    return %arg0, %c0_i32, %c0_i32_0, %c0_i32_1, %c0_i32_2 : i32, i32, i32, i32, i32
  }
  func.func @transform_1(%arg0: i32) -> (i32, i32, i32, i32) {
    %c0_i32 = arith.constant 0 : i32
    %c0_i32_0 = arith.constant 0 : i32
    %c0_i32_1 = arith.constant 0 : i32
    %c0_i32_2 = arith.constant 0 : i32
    return %arg0, %c0_i32, %c0_i32_0, %c0_i32_1 : i32, i32, i32, i32
  }
}

module attributes {stable_mosaic.version = 11 : i64} {
  func.func @kernel(%arg0: i32, %arg1: i32, %arg2: memref<2x128xf32, #tpu.memory_space<vmem>>, %arg3: memref<128x10xf32, #tpu.memory_space<vmem>>, %arg4: memref<1x10xf32, #tpu.memory_space<vmem>>, %arg5: memref<2x10xf32, #tpu.memory_space<vmem>>, %arg6: memref<2x10xf32, #tpu.memory_space<vmem>>) attributes {dimension_semantics = [#tpu.dimension_semantics<parallel>, #tpu.dimension_semantics<arbitrary>], iteration_bounds = array<i64: 1, 1>, scalar_prefetch = 0 : i64, scratch_operands = 1 : i64, tpu.core_type = #tpu.core_type<tc>, window_params = [{transform_indices = @transform_0, window_bounds = array<i64: 2, 128>}, {transform_indices = @transform_1, window_bounds = array<i64: 128, 10>}, {pipeline_mode = #tpu.pipeline_mode<synchronous>, transform_indices = @transform_2, window_bounds = array<i64: 1, 10>}, {transform_indices = @transform_3, window_bounds = array<i64: 2, 10>}]} {
    %c0_i32 = arith.constant 0 : i32
    %0 = arith.cmpi eq, %arg1, %c0_i32 : i32
    %1 = arith.extui %0 : i1 to i32
    %c0_i32_0 = arith.constant 0 : i32
    %2 = arith.cmpi ne, %1, %c0_i32_0 : i32
    scf.if %2 {
      %cst_10 = arith.constant 0.000000e+00 : f32
      %12 = vector.broadcast %cst_10 : f32 to vector<2x10xf32>
      %c0_11 = arith.constant 0 : index
      %c0_12 = arith.constant 0 : index
      %13 = vector.load %arg6[%c0_11, %c0_12] : memref<2x10xf32, #tpu.memory_space<vmem>>, vector<2x10xf32>
      tpu.vector_store %arg6[%c0_11, %c0_12], %12 {strides = array<i32>} : memref<2x10xf32, #tpu.memory_space<vmem>>, vector<2x10xf32>,
    } else {
    }
    %c0 = arith.constant 0 : index
    %c0_1 = arith.constant 0 : index
    %3 = vector.load %arg6[%c0, %c0_1] : memref<2x10xf32, #tpu.memory_space<vmem>>, vector<2x10xf32>
    %c0_2 = arith.constant 0 : index
    %c0_3 = arith.constant 0 : index
    %4 = vector.load %arg2[%c0_2, %c0_3] : memref<2x128xf32, #tpu.memory_space<vmem>>, vector<2x128xf32>
    %c0_4 = arith.constant 0 : index
    %c0_5 = arith.constant 0 : index
    %5 = vector.load %arg3[%c0_4, %c0_5] : memref<128x10xf32, #tpu.memory_space<vmem>>, vector<128x10xf32>
    %cst = arith.constant dense<0.000000e+00> : vector<2x10xf32>
    %6 = tpu.matmul %4, %5, %cst {dimension_numbers = #tpu.dot_dimension_numbers<[1], [0], [0], [1], [0, 0, 1, 1], [], []>} : vector<2x128xf32>, vector<128x10xf32>, vector<2x10xf32> -> vector<2x10xf32>
    %7 = arith.addf %3, %6 : vector<2x10xf32>
    %c0_6 = arith.constant 0 : index
    %c0_7 = arith.constant 0 : index
    %8 = vector.load %arg6[%c0_6, %c0_7] : memref<2x10xf32, #tpu.memory_space<vmem>>, vector<2x10xf32>
    tpu.vector_store %arg6[%c0_6, %c0_7], %7 {strides = array<i32>} : memref<2x10xf32, #tpu.memory_space<vmem>>, vector<2x10xf32>,
    %c0_i32_8 = arith.constant 0 : i32
    %9 = arith.cmpi eq, %arg1, %c0_i32_8 : i32
    %10 = arith.extui %9 : i1 to i32
    %c0_i32_9 = arith.constant 0 : i32
    %11 = arith.cmpi ne, %10, %c0_i32_9 : i32
    scf.if %11 {
      %c0_10 = arith.constant 0 : index
      %c0_11 = arith.constant 0 : index
      %12 = vector.load %arg6[%c0_10, %c0_11] : memref<2x10xf32, #tpu.memory_space<vmem>>, vector<2x10xf32>
      %c0_12 = arith.constant 0 : index
      %c0_13 = arith.constant 0 : index
      %13 = vector.load %arg4[%c0_12, %c0_13] : memref<1x10xf32, #tpu.memory_space<vmem>>, vector<1x10xf32>
      %14 = vector.broadcast %13 : vector<1x10xf32> to vector<2x10xf32>
      %15 = arith.addf %12, %14 : vector<2x10xf32>
      %cst_14 = arith.constant dense<0xFF800000> : vector<2xf32>
      %16 = vector.multi_reduction <maximumf>, %15, %cst_14 [1] : vector<2x10xf32> to vector<2xf32>
      %17 = vector.shape_cast %16 : vector<2xf32> to vector<2x1xf32>
      %18 = vector.broadcast %17 : vector<2x1xf32> to vector<2x10xf32>
      %19 = arith.subf %15, %18 : vector<2x10xf32>
      %20 = math.exp %19 : vector<2x10xf32>
      %cst_15 = arith.constant dense<0.000000e+00> : vector<2xf32>
      %21 = vector.multi_reduction <add>, %20, %cst_15 [1] : vector<2x10xf32> to vector<2xf32>
      %22 = vector.shape_cast %21 : vector<2xf32> to vector<2x1xf32>
      %23 = math.log %22 : vector<2x1xf32>
      %24 = vector.broadcast %23 : vector<2x1xf32> to vector<2x10xf32>
      %25 = arith.subf %19, %24 : vector<2x10xf32>
      %c0_16 = arith.constant 0 : index
      %c0_17 = arith.constant 0 : index
      %26 = vector.load %arg5[%c0_16, %c0_17] : memref<2x10xf32, #tpu.memory_space<vmem>>, vector<2x10xf32>
      tpu.vector_store %arg5[%c0_16, %c0_17], %25 {strides = array<i32>} : memref<2x10xf32, #tpu.memory_space<vmem>>, vector<2x10xf32>,
    } else {
    }
    return
  }
  func.func @transform_0(%arg0: i32, %arg1: i32) -> (i32, i32) {
    %c0_i32 = arith.constant 0 : i32
    return %arg0, %arg1 : i32, i32
  }
  func.func @transform_1(%arg0: i32, %arg1: i32) -> (i32, i32) {
    %c0_i32 = arith.constant 0 : i32
    %c0_i32_0 = arith.constant 0 : i32
    return %arg1, %c0_i32 : i32, i32
  }
  func.func @transform_2(%arg0: i32, %arg1: i32) -> (i32, i32) {
    %c0_i32 = arith.constant 0 : i32
    %c0_i32_0 = arith.constant 0 : i32
    %c0_i32_1 = arith.constant 0 : i32
    return %c0_i32, %c0_i32_0 : i32, i32
  }
  func.func @transform_3(%arg0: i32, %arg1: i32) -> (i32, i32) {
    %c0_i32 = arith.constant 0 : i32
    %c0_i32_0 = arith.constant 0 : i32
    return %arg0, %c0_i32 : i32, i32
  }
}

module attributes {stable_mosaic.version = 11 : i64} {
  func.func @kernel(%arg0: i32, %arg1: i32, %arg2: memref<2x2304xf32, #tpu.memory_space<vmem>>, %arg3: memref<2304x128xf32, #tpu.memory_space<vmem>>, %arg4: memref<1x128xf32, #tpu.memory_space<vmem>>, %arg5: memref<2x128xf32, #tpu.memory_space<vmem>>, %arg6: memref<2x128xf32, #tpu.memory_space<vmem>>) attributes {dimension_semantics = [#tpu.dimension_semantics<parallel>, #tpu.dimension_semantics<arbitrary>], iteration_bounds = array<i64: 1, 4>, scalar_prefetch = 0 : i64, scratch_operands = 1 : i64, tpu.core_type = #tpu.core_type<tc>, window_params = [{transform_indices = @transform_0, window_bounds = array<i64: 2, 2304>}, {transform_indices = @transform_1, window_bounds = array<i64: 2304, 128>}, {pipeline_mode = #tpu.pipeline_mode<synchronous>, transform_indices = @transform_2, window_bounds = array<i64: 1, 128>}, {transform_indices = @transform_3, window_bounds = array<i64: 2, 128>}]} {
    %c0_i32 = arith.constant 0 : i32
    %0 = arith.cmpi eq, %arg1, %c0_i32 : i32
    %1 = arith.extui %0 : i1 to i32
    %c0_i32_0 = arith.constant 0 : i32
    %2 = arith.cmpi ne, %1, %c0_i32_0 : i32
    scf.if %2 {
      %cst_9 = arith.constant 0.000000e+00 : f32
      %12 = vector.broadcast %cst_9 : f32 to vector<2x128xf32>
      %c0_10 = arith.constant 0 : index
      %c0_11 = arith.constant 0 : index
      %13 = vector.load %arg6[%c0_10, %c0_11] : memref<2x128xf32, #tpu.memory_space<vmem>>, vector<2x128xf32>
      tpu.vector_store %arg6[%c0_10, %c0_11], %12 {strides = array<i32>} : memref<2x128xf32, #tpu.memory_space<vmem>>, vector<2x128xf32>,
    } else {
    }
    %c0 = arith.constant 0 : index
    %c0_1 = arith.constant 0 : index
    %3 = vector.load %arg6[%c0, %c0_1] : memref<2x128xf32, #tpu.memory_space<vmem>>, vector<2x128xf32>
    %c0_2 = arith.constant 0 : index
    %c0_3 = arith.constant 0 : index
    %4 = vector.load %arg2[%c0_2, %c0_3] : memref<2x2304xf32, #tpu.memory_space<vmem>>, vector<2x2304xf32>
    %c0_4 = arith.constant 0 : index
    %c0_5 = arith.constant 0 : index
    %5 = vector.load %arg3[%c0_4, %c0_5] : memref<2304x128xf32, #tpu.memory_space<vmem>>, vector<2304x128xf32>
    %cst = arith.constant dense<0.000000e+00> : vector<2x128xf32>
    %6 = tpu.matmul %4, %5, %cst {dimension_numbers = #tpu.dot_dimension_numbers<[1], [0], [0], [1], [0, 0, 1, 1], [], []>} : vector<2x2304xf32>, vector<2304x128xf32>, vector<2x128xf32> -> vector<2x128xf32>
    %7 = arith.addf %3, %6 : vector<2x128xf32>
    %c0_6 = arith.constant 0 : index
    %c0_7 = arith.constant 0 : index
    %8 = vector.load %arg6[%c0_6, %c0_7] : memref<2x128xf32, #tpu.memory_space<vmem>>, vector<2x128xf32>
    tpu.vector_store %arg6[%c0_6, %c0_7], %7 {strides = array<i32>} : memref<2x128xf32, #tpu.memory_space<vmem>>, vector<2x128xf32>,
    %c3_i32 = arith.constant 3 : i32
    %9 = arith.cmpi eq, %arg1, %c3_i32 : i32
    %10 = arith.extui %9 : i1 to i32
    %c0_i32_8 = arith.constant 0 : i32
    %11 = arith.cmpi ne, %10, %c0_i32_8 : i32
    scf.if %11 {
      %c0_9 = arith.constant 0 : index
      %c0_10 = arith.constant 0 : index
      %12 = vector.load %arg6[%c0_9, %c0_10] : memref<2x128xf32, #tpu.memory_space<vmem>>, vector<2x128xf32>
      %c0_11 = arith.constant 0 : index
      %c0_12 = arith.constant 0 : index
      %13 = vector.load %arg4[%c0_11, %c0_12] : memref<1x128xf32, #tpu.memory_space<vmem>>, vector<1x128xf32>
      %14 = vector.broadcast %13 : vector<1x128xf32> to vector<2x128xf32>
      %15 = arith.addf %12, %14 : vector<2x128xf32>
      %cst_13 = arith.constant 0.000000e+00 : f32
      %16 = vector.broadcast %cst_13 : f32 to vector<2x128xf32>
      %17 = arith.maximumf %15, %16 : vector<2x128xf32>
      %c0_14 = arith.constant 0 : index
      %c0_15 = arith.constant 0 : index
      %18 = vector.load %arg5[%c0_14, %c0_15] : memref<2x128xf32, #tpu.memory_space<vmem>>, vector<2x128xf32>
      tpu.vector_store %arg5[%c0_14, %c0_15], %17 {strides = array<i32>} : memref<2x128xf32, #tpu.memory_space<vmem>>, vector<2x128xf32>,
    } else {
    }
    return
  }
  func.func @transform_0(%arg0: i32, %arg1: i32) -> (i32, i32) {
    %c0_i32 = arith.constant 0 : i32
    return %arg0, %arg1 : i32, i32
  }
  func.func @transform_1(%arg0: i32, %arg1: i32) -> (i32, i32) {
    %c0_i32 = arith.constant 0 : i32
    %c0_i32_0 = arith.constant 0 : i32
    return %arg1, %c0_i32 : i32, i32
  }
  func.func @transform_2(%arg0: i32, %arg1: i32) -> (i32, i32) {
    %c0_i32 = arith.constant 0 : i32
    %c0_i32_0 = arith.constant 0 : i32
    %c0_i32_1 = arith.constant 0 : i32
    return %c0_i32, %c0_i32_0 : i32, i32
  }
  func.func @transform_3(%arg0: i32, %arg1: i32) -> (i32, i32) {
    %c0_i32 = arith.constant 0 : i32
    %c0_i32_0 = arith.constant 0 : i32
    return %arg0, %c0_i32 : i32, i32
  }
}

</mosaic_0001>

<bundles_post_ra>
// kernel: net_forward.7
= control target key start
LH: loop header
LB: loop body
LE: loop exit
PB: predicated region body
PF: predicated region fallthrough
CT: control target
= control target key end

     0   :  { %s406_s6 = smov 0   ;;  %s647_s0 = inlined_call_operand.vmem [shape: f32[2,12,2,13,128], index: 0, kind: input, shape index: {}]   ;;  %s648_s1 = inlined_call_operand.vmem [shape: f32[2,12,12,64], index: 1, kind: output, shape index: {}]  }
   0x1 LB: > { %s343_s7 = sadd.s32 4294967295, %s393_s6   ;;  %p347_p0 = scmp.ge.s32.totalorder %s393_s6, 1  ;;  %s393_s6 = sphi %s406_s6, %s11_s6  }
   0x2   : > { %p87_p1 = scmp.lt.s32.totalorder %s393_s6, 3 }
   0x4   : > { %p88_p2 = pnand %p347_p0, %p87_p1 }
   0x5   : > { %p107_p3 = scmp.lt.s32.totalorder (!%p88_p2), %s343_s7, 1  ;;  %s395_s12 = smov (!%p88_p2), 64   ;;  %vm262_vm0 = vcmask (!%p88_p2), 523264   ;;  %vm264_vm1 = vcmask (!%p88_p2), 519168  }
   0x6   : > { %91 = sbr.rel (%p88_p2) target bundleno = 183 (0xb7), region = 24 }
   0xd   : > { %s650_s7 = smov (!%p107_p3, %s343_s7), 1 }
   0xe   : > { %s376_s8 = smul.u32 384, %s650_s7 }
   0xf   : > { %s377_s13 = smul.u32 192, %s650_s7 }
  0x10   : > { %s420_s11 = scalar_lea.vmem %s647_s0, %s376_s8 }
  0x11   : > { %v119_v0 = vld [vmem:[%s420_s11 + $0x20] sm:$0xff]  ;;  %v352_v1 = vld [vmem:[%s420_s11 + $0x30] sm:$0xff]  ;;  %v120_v5 = vld [vmem:[%s420_s11 + $0x28] sm:$0x1f]  ;;  %s570_s16 = scalar_lea.vmem %s648_s1, %s377_s13 }
  0x12   : > { %v117_v2 = vld [vmem:[%s420_s11] sm:$0xff]  ;;  %v425_v3 = vmax.f32 %v119_v0, %v352_v1  ;;  %v350_v4 = vld [vmem:[%s420_s11 + $0x10] sm:$0xff]  ;;  %v353_v6 = vld [vmem:[%s420_s11 + $0x38] sm:$0x1f] }
  0x13   : > { %v430_v7 = vmax.f32 %v117_v2, %v350_v4  ;;  %v118_v8 = vld [vmem:[%s420_s11 + $0x8] sm:$0x1f]  ;;  %v351_v9 = vld [vmem:[%s420_s11 + $0x18] sm:$0x1f]  ;;  %v436_v10 = vmax.f32 %v120_v5, %v353_v6  ;;  %v121_v14 = vld [vmem:[%s420_s11 + $0x40] sm:$0xff] }
  0x14   : > { %194 = vrot.lane.b32.xlu1 %v425_v3, %s395_s12  ;;  %v440_v11 = vmax.f32 %v118_v8, %v351_v9  ;;  %v122_v12 = vld [vmem:[%s420_s11 + $0x48] sm:$0x1f]  ;;  %v355_v13 = vld [vmem:[%s420_s11 + $0x58] sm:$0x1f]  ;;  %v354_v15 = vld [vmem:[%s420_s11 + $0x50] sm:$0xff] }
  0x15   : > { %190 = vrot.lane.b32.xlu0 %v430_v7, %s395_s12  ;;  %v448_v16 = vmax.f32 %v122_v12, %v355_v13  ;;  %v452_v17 = vmax.f32 %v121_v14, %v354_v15  ;;  %v124_v18 = vld [vmem:[%s420_s11 + $0x68] sm:$0x1f]  ;;  %v357_v19 = vld [vmem:[%s420_s11 + $0x78] sm:$0x1f]  ;;  %v123_v20 = vld [vmem:[%s420_s11 + $0x60] sm:$0xff] }
  0x16   : > { %v356_v21 = vld [vmem:[%s420_s11 + $0x70] sm:$0xff]  ;;  %v460_v22 = vmax.f32 %v124_v18, %v357_v19  ;;  %v126_v24 = vld [vmem:[%s420_s11 + $0x88] sm:$0x1f]  ;;  %v359_v25 = vld [vmem:[%s420_s11 + $0x98] sm:$0x1f] }
  0x17   : > { %v464_v23 = vmax.f32 %v123_v20, %v356_v21  ;;  %v125_v26 = vld [vmem:[%s420_s11 + $0x80] sm:$0xff]  ;;  %v358_v27 = vld [vmem:[%s420_s11 + $0x90] sm:$0xff]  ;;  %v472_v28 = vmax.f32 %v126_v24, %v359_v25  ;;  %v128_v30 = vld [vmem:[%s420_s11 + $0xa8] sm:$0x1f] }
  0x18   : > { %196 = vrot.lane.b32.xlu1 %v436_v10, %s395_s12  ;;  %v476_v29 = vmax.f32 %v125_v26, %v358_v27  ;;  %v361_v31 = vld [vmem:[%s420_s11 + $0xb8] sm:$0x1f]  ;;  %v127_v32 = vld [vmem:[%s420_s11 + $0xa0] sm:$0xff]  ;;  %v360_v33 = vld [vmem:[%s420_s11 + $0xb0] sm:$0xff] }
  0x19   : > { %192 = vrot.lane.b32.xlu0 %v440_v11, %s395_s12  ;;  %v484_v34 = vmax.f32 %v128_v30, %v361_v31  ;;  %v488_v35 = vmax.f32 %v127_v32, %v360_v33  ;;  %v130_v36 = vld [vmem:[%s420_s11 + $0xc8] sm:$0x1f]  ;;  %v363_v37 = vld [vmem:[%s420_s11 + $0xd8] sm:$0x1f]  ;;  %v129_v38 = vld [vmem:[%s420_s11 + $0xc0] sm:$0xff] }
  0x1a   : > { %v362_v39 = vld [vmem:[%s420_s11 + $0xd0] sm:$0xff]  ;;  %v496_v40 = vmax.f32 %v130_v36, %v363_v37  ;;  %v132_v42 = vld [vmem:[%s420_s11 + $0xe8] sm:$0x1f]  ;;  %v365_v43 = vld [vmem:[%s420_s11 + $0xf8] sm:$0x1f] }
  0x1b   : > { %v500_v41 = vmax.f32 %v129_v38, %v362_v39  ;;  %v131_v44 = vld [vmem:[%s420_s11 + $0xe0] sm:$0xff]  ;;  %v364_v45 = vld [vmem:[%s420_s11 + $0xf0] sm:$0xff]  ;;  %v508_v46 = vmax.f32 %v132_v42, %v365_v43  ;;  %v134_v48 = vld [vmem:[%s420_s11 + $0x108] sm:$0x1f] }
  0x1c   : > { %200 = vrot.lane.b32.xlu1 %v448_v16, %s395_s12  ;;  %v512_v47 = vmax.f32 %v131_v44, %v364_v45  ;;  %v367_v49 = vld [vmem:[%s420_s11 + $0x118] sm:$0x1f]  ;;  %v133_v50 = vld [vmem:[%s420_s11 + $0x100] sm:$0xff]  ;;  %v366_v51 = vld [vmem:[%s420_s11 + $0x110] sm:$0xff] }
  0x1d   : > { %198 = vrot.lane.b32.xlu0 %v452_v17, %s395_s12  ;;  %v520_v52 = vmax.f32 %v134_v48, %v367_v49  ;;  %v524_v53 = vmax.f32 %v133_v50, %v366_v51  ;;  %v136_v54 = vld [vmem:[%s420_s11 + $0x128] sm:$0x1f]  ;;  %v369_v55 = vld [vmem:[%s420_s11 + $0x138] sm:$0x1f]  ;;  %v135_v56 = vld [vmem:[%s420_s11 + $0x120] sm:$0xff] }
  0x1e   : > { %v368_v57 = vld [vmem:[%s420_s11 + $0x130] sm:$0xff]  ;;  %v532_v58 = vmax.f32 %v136_v54, %v369_v55  ;;  %v138_v60 = vld [vmem:[%s420_s11 + $0x148] sm:$0x1f]  ;;  %v371_v61 = vld [vmem:[%s420_s11 + $0x158] sm:$0x1f] }
  0x1f   : > { %v536_v59 = vmax.f32 %v135_v56, %v368_v57  ;;  %v137_v62 = vld [vmem:[%s420_s11 + $0x140] sm:$0xff]  ;;  %v370_v63 = vld [vmem:[%s420_s11 + $0x150] sm:$0xff]  ;;  %v544_v0 = vmax.f32 %v138_v60, %v371_v61  ;;  %v140_v2 = vld [vmem:[%s420_s11 + $0x168] sm:$0x1f] }
  0x20   : > { %204 = vrot.lane.b32.xlu1 %v460_v22, %s395_s12  ;;  %v548_v1 = vmax.f32 %v137_v62, %v370_v63  ;;  %v373_v4 = vld [vmem:[%s420_s11 + $0x178] sm:$0x1f]  ;;  %v139_v5 = vld [vmem:[%s420_s11 + $0x160] sm:$0xff]  ;;  %v372_v6 = vld [vmem:[%s420_s11 + $0x170] sm:$0xff] }
  0x21   : > { %202 = vrot.lane.b32.xlu0 %v464_v23, %s395_s12  ;;  %v556_v8 = vmax.f32 %v140_v2, %v373_v4  ;;  %v560_v9 = vmax.f32 %v139_v5, %v372_v6 }
  0x24   : > { %208 = vrot.lane.b32.xlu1 %v472_v28, %s395_s12 }
  0x25   : > { %206 = vrot.lane.b32.xlu0 %v476_v29, %s395_s12 }
  0x28   : > { %212 = vrot.lane.b32.xlu1 %v484_v34, %s395_s12 }
  0x29   : > { %210 = vrot.lane.b32.xlu0 %v488_v35, %s395_s12 }
  0x2c   : > { %216 = vrot.lane.b32.xlu1 %v496_v40, %s395_s12 }
  0x2d   : > { %214 = vrot.lane.b32.xlu0 %v500_v41, %s395_s12 }
  0x30   : > { %220 = vrot.lane.b32.xlu1 %v508_v46, %s395_s12 }
  0x31   : > { %218 = vrot.lane.b32.xlu0 %v512_v47, %s395_s12 }
  0x34   : > { %224 = vrot.lane.b32.xlu1 %v520_v52, %s395_s12 }
  0x35   : > { %222 = vrot.lane.b32.xlu0 %v524_v53, %s395_s12 }
  0x38   : > { %228 = vrot.lane.b32.xlu1 %v532_v58, %s395_s12 }
  0x39   : > { %226 = vrot.lane.b32.xlu0 %v536_v59, %s395_s12 }
  0x3c   : > { %232 = vrot.lane.b32.xlu1 %v544_v0, %s395_s12 }
  0x3d   : > { %230 = vrot.lane.b32.xlu0 %v548_v1, %s395_s12 }
  0x40   : > { %236 = vrot.lane.b32.xlu1 %v556_v8, %s395_s12 }
  0x41   : > { %234 = vrot.lane.b32.xlu0 %v560_v9, %s395_s12 }
  0x86   : > { %v195_v12 = vpop.permute.xlu1 %194 }
  0x87   : > { %v240_v13 = vmax.f32 %v425_v3, %v195_v12  ;;  %v191_v14 = vpop.permute.xlu0 %190 }
  0x88   : > { %v238_v15 = vmax.f32 %v430_v7, %v191_v14 }
  0x89   : > { %266 = vst.msk [vmem:[%s570_s16 + $0x10] sm:$0xff] %vm262_vm0, %v240_v13 }
  0x8a   : > { %263 = vst.msk [vmem:[%s570_s16] sm:$0xff] %vm262_vm0, %v238_v15  ;;  %v197_v18 = vpop.permute.xlu1 %196 }
  0x8b   : > { %v241_v19 = vmax.f32 %v436_v10, %v197_v18  ;;  %v193_v20 = vpop.permute.xlu0 %192 }
  0x8c   : > { %v239_v21 = vmax.f32 %v440_v11, %v193_v20 }
  0x8d   : > { %267 = vst.msk [vmem:[%s570_s16 + $0x18] sm:$0xf] %vm264_vm1, %v241_v19 }
  0x8e   : > { %265 = vst.msk [vmem:[%s570_s16 + $0x8] sm:$0xf] %vm264_vm1, %v239_v21  ;;  %v201_v3 = vpop.permute.xlu1 %200 }
  0x8f   : > { %v243_v7 = vmax.f32 %v448_v16, %v201_v3  ;;  %v199_v24 = vpop.permute.xlu0 %198 }
  0x90   : > { %v242_v25 = vmax.f32 %v452_v17, %v199_v24 }
  0x91   : > { %269 = vst.msk [vmem:[%s570_s16 + $0x28] sm:$0xf] %vm264_vm1, %v243_v7 }
  0x92   : > { %268 = vst.msk [vmem:[%s570_s16 + $0x20] sm:$0xff] %vm262_vm0, %v242_v25  ;;  %v205_v10 = vpop.permute.xlu1 %204 }
  0x93   : > { %v245_v11 = vmax.f32 %v460_v22, %v205_v10  ;;  %v203_v26 = vpop.permute.xlu0 %202 }
  0x94   : > { %v244_v27 = vmax.f32 %v464_v23, %v203_v26 }
  0x95   : > { %271 = vst.msk [vmem:[%s570_s16 + $0x38] sm:$0xf] %vm264_vm1, %v245_v11 }
  0x96   : > { %270 = vst.msk [vmem:[%s570_s16 + $0x30] sm:$0xff] %vm262_vm0, %v244_v27  ;;  %v209_v16 = vpop.permute.xlu1 %208 }
  0x97   : > { %v247_v17 = vmax.f32 %v472_v28, %v209_v16  ;;  %v207_v30 = vpop.permute.xlu0 %206 }
  0x98   : > { %v246_v31 = vmax.f32 %v476_v29, %v207_v30 }
  0x99   : > { %273 = vst.msk [vmem:[%s570_s16 + $0x48] sm:$0xf] %vm264_vm1, %v247_v17 }
  0x9a   : > { %272 = vst.msk [vmem:[%s570_s16 + $0x40] sm:$0xff] %vm262_vm0, %v246_v31  ;;  %v213_v22 = vpop.permute.xlu1 %212 }
  0x9b   : > { %v249_v23 = vmax.f32 %v484_v34, %v213_v22  ;;  %v211_v32 = vpop.permute.xlu0 %210 }
  0x9c   : > { %v248_v33 = vmax.f32 %v488_v35, %v211_v32 }
  0x9d   : > { %275 = vst.msk [vmem:[%s570_s16 + $0x58] sm:$0xf] %vm264_vm1, %v249_v23 }
  0x9e   : > { %274 = vst.msk [vmem:[%s570_s16 + $0x50] sm:$0xff] %vm262_vm0, %v248_v33  ;;  %v217_v28 = vpop.permute.xlu1 %216 }
  0x9f   : > { %v251_v29 = vmax.f32 %v496_v40, %v217_v28  ;;  %v215_v36 = vpop.permute.xlu0 %214 }
  0xa0   : > { %v250_v37 = vmax.f32 %v500_v41, %v215_v36 }
  0xa1   : > { %277 = vst.msk [vmem:[%s570_s16 + $0x68] sm:$0xf] %vm264_vm1, %v251_v29 }
  0xa2   : > { %276 = vst.msk [vmem:[%s570_s16 + $0x60] sm:$0xff] %vm262_vm0, %v250_v37  ;;  %v221_v34 = vpop.permute.xlu1 %220 }
  0xa3   : > { %v253_v35 = vmax.f32 %v508_v46, %v221_v34  ;;  %v219_v38 = vpop.permute.xlu0 %218 }
  0xa4   : > { %v252_v39 = vmax.f32 %v512_v47, %v219_v38 }
  0xa5   : > { %279 = vst.msk [vmem:[%s570_s16 + $0x78] sm:$0xf] %vm264_vm1, %v253_v35 }
  0xa6   : > { %278 = vst.msk [vmem:[%s570_s16 + $0x70] sm:$0xff] %vm262_vm0, %v252_v39  ;;  %v225_v40 = vpop.permute.xlu1 %224 }
  0xa7   : > { %v255_v41 = vmax.f32 %v520_v52, %v225_v40  ;;  %v223_v42 = vpop.permute.xlu0 %222 }
  0xa8   : > { %v254_v43 = vmax.f32 %v524_v53, %v223_v42 }
  0xa9   : > { %281 = vst.msk [vmem:[%s570_s16 + $0x88] sm:$0xf] %vm264_vm1, %v255_v41 }
  0xaa   : > { %280 = vst.msk [vmem:[%s570_s16 + $0x80] sm:$0xff] %vm262_vm0, %v254_v43  ;;  %v229_v44 = vpop.permute.xlu1 %228 }
  0xab   : > { %v257_v45 = vmax.f32 %v532_v58, %v229_v44  ;;  %v227_v46 = vpop.permute.xlu0 %226 }
  0xac   : > { %v256_v47 = vmax.f32 %v536_v59, %v227_v46 }
  0xad   : > { %283 = vst.msk [vmem:[%s570_s16 + $0x98] sm:$0xf] %vm264_vm1, %v257_v45 }
  0xae   : > { %282 = vst.msk [vmem:[%s570_s16 + $0x90] sm:$0xff] %vm262_vm0, %v256_v47  ;;  %v233_v48 = vpop.permute.xlu1 %232 }
  0xaf   : > { %v259_v49 = vmax.f32 %v544_v0, %v233_v48  ;;  %v231_v50 = vpop.permute.xlu0 %230 }
  0xb0   : > { %v258_v51 = vmax.f32 %v548_v1, %v231_v50 }
  0xb1   : > { %285 = vst.msk [vmem:[%s570_s16 + $0xa8] sm:$0xf] %vm264_vm1, %v259_v49 }
  0xb2   : > { %284 = vst.msk [vmem:[%s570_s16 + $0xa0] sm:$0xff] %vm262_vm0, %v258_v51  ;;  %v237_v52 = vpop.permute.xlu1 %236 }
  0xb3   : > { %v261_v53 = vmax.f32 %v556_v8, %v237_v52  ;;  %v235_v54 = vpop.permute.xlu0 %234 }
  0xb4   : > { %v260_v55 = vmax.f32 %v560_v9, %v235_v54 }
  0xb5   : > { %287 = vst.msk [vmem:[%s570_s16 + $0xb8] sm:$0xf] %vm264_vm1, %v261_v53 }
  0xb6   : > { %286 = vst.msk [vmem:[%s570_s16 + $0xb0] sm:$0xff] %vm262_vm0, %v260_v55 }
  0xb7 PF: > { %s11_s6 = sadd.s32 1, %s393_s6  }
  0xb8   : > { %p8_p4 = scmp.ge.s32.totalorder %s11_s6, 4  }
  0xba   :  { %10 = sbr.rel (!%p8_p4) target bundleno = 1 (0x1), region = 55 }

// kernel: net_forward.5
= control target key start
LH: loop header
LB: loop body
LE: loop exit
PB: predicated region body
PF: predicated region fallthrough
CT: control target
= control target key end

     0   :  { %8 = vsyncpa [#allocation4], 0  ;;  %s3379_s0 = inlined_call_operand.vmem [shape: f32[1352,9], index: 0, kind: input, shape index: {}]   ;;  %s3380_s1 = inlined_call_operand.hbm [shape: f32[9,32], index: 1, kind: input, shape index: {}]   ;;  %s3381_s2 = inlined_call_operand.hbm [shape: f32[1,32], index: 2, kind: input, shape index: {}]   ;;  %s3382_s3 = inlined_call_operand.vmem [shape: f32[1352,32], index: 3, kind: output, shape index: {}]  }
   0x1   :  { %9 = vsyncpa [#allocation6], 0  ;;  %s2525_s12 = smov 0   ;;  %s2527_s13 = smov 0  }
   0x2   :  { %s2529_s14 = smov 0   ;;  %s2531_s15 = smov 0  }
   0x3   :  { %s2533_s16 = smov 0  }
   0x4 LB: > { %s1930_s17 = sadd.s32 4294967295, %s2465_s16   ;;  %s27_s18 = sadd.s32 1, %s2461_s15  ;;  %s2465_s16 = sphi %s2533_s16, %s15_s16   ;;  %s2461_s15 = sphi %s2531_s15, %s3401_s15   ;;  %s2457_s14 = sphi %s2529_s14, %s3400_s14   ;;  %s2453_s13 = sphi %s2527_s13, %s3399_s13   ;;  %s2449_s12 = sphi %s2525_s12, %s3398_s12  }
   0x5   : > { %p29_p0 = scmp.ge.s32.totalorder %s27_s18, 3  ;;  %s109_s19 = sadd.s32 1, %s2453_s13 }
   0x6   : > { %p119_p1 = scmp.ne.s32.totalorder %s2453_s13, %s2449_s12  ;;  %p120_p2 = scmp.eq.s32.totalorder %s1930_s17, 2 }
   0x7   : > { %s3403_s18 = smov (%p29_p0, %s27_s18), 0  ;;  %p1932_p4 = scmp.ge.s32.totalorder %s2465_s16, 1 }
   0x8   : > { %p2557_p3 = por %p120_p2, %p119_p1  ;;  %s106_s21 = ssub.s32 %s2461_s15, %s3403_s18 }
   0x9   : > { %p133_p5 = scmp.lt.s32.totalorder %s2465_s16, 4  ;;  %p107_p6 = scmp.eq.s32.totalorder %s106_s21, 0 }
   0xa   : > { %s3386_s20 = scalar_select %p2557_p3, 1, 0 }
   0xb   : > { %p2565_p7 = pnand %p1932_p4, %p133_p5  ;;  %p2569_p8 = scmp.eq.s32.totalorder %s1930_s17, 0 }
   0xc   : > { %s2574_s24 = scalar_select %p107_p6, %s2453_s13, %s109_s19  }
   0xd   : > { %s3387_s22 = scalar_select %p2565_p7, 1, 0 }
   0xe   : > { %s3388_s23 = scalar_select %p2569_p8, 1, 0 }
   0xf   : > { %p2210_p9 = pneg %p2565_p7  ;;  %s2499_s25 = smov [#allocation3]  }
  0x10   : > { %s148_s26 = sshll.u32 %s2499_s25, 4  ;;  %s2500_s28 = smov [#allocation5]   ;;  %s149_s26 = int_to_ptr.vmem [resolvable:$true] %s148_s26 }
  0x11   : > { %p2580_p10 = pnand %p2569_p8, %p2210_p9  ;;  %s162_s29 = sshll.u32 %s2500_s28, 4  ;;  %s163_s29 = int_to_ptr.vmem [resolvable:$true] %s162_s29 }
  0x12   : > { %s2331_s5 = scalar_lea.hbm %s3380_s1, 256 }
  0x13   : > { %p2332_p11 = scmp.ne.s32.totalorder %s3380_s1, %s2331_s5  ;;  %p2333_p12 = pneg %p2580_p10 }
  0x14   : > { %p2338_p1 = scmp.lt.u32.totalorder %s2331_s5, %s3380_s1 }
  0x15   : > { %p2334_p13 = pnand %p2333_p12, %p2332_p11 }
  0x17   : > { %p2335_p0 = pneg %p2334_p13 }
  0x19   : > { %p2340_p2 = pnand %p2338_p1, %p2335_p0 }
  0x1b   : > { %2343 = shalt.err (!%p2340_p2)
}
  0x1c   : > { %s2344_s10 = scalar_lea.vmem %s149_s26, 256  ;;  %p2352_p9 = scmp.lt.s32.totalorder %s149_s26, %s149_s26 }
  0x1d   : > { %p2345_p4 = scmp.ne.s32.totalorder %s149_s26, %s2344_s10  ;;  %p2353_p3 = scmp.lt.s32.totalorder %s2344_s10, %s2344_s10 }
  0x1f   : > { %p2347_p5 = pnand %p2345_p4, %p2333_p12  ;;  %p2354_p8 = por %p2353_p3, %p2352_p9 }
  0x21   : > { %p2348_p6 = pneg %p2347_p5 }
  0x23   : > { %p2355_p7 = pnand %p2354_p8, %p2348_p6 }
  0x25   : > { %2358 = shalt.err (!%p2355_p7)
}
  0x26   : > { %s2501_s11 = smov 128   ;;  %s2502_s17 = smov 8  }
  0x27   : > { %2213 = dma.hbm_to_vmem [thread:$0]  (!%p2580_p10), %s3380_s1, 256, %s149_s26, [#allocation4], %s2501_s11, %s2501_s11, %s2502_s17  }
  0x28   : > { %s2359_s30 = scalar_lea.hbm %s3381_s2, 16 }
  0x29   : > { %p2360_p3 = scmp.ne.s32.totalorder %s3381_s2, %s2359_s30  ;;  %p2366_p11 = scmp.lt.u32.totalorder %s2359_s30, %s3381_s2 }
  0x2b   : > { %p2362_p7 = pnand %p2360_p3, %p2333_p12 }
  0x2d   : > { %p2363_p8 = pneg %p2362_p7 }
  0x2f   : > { %p2368_p13 = pnand %p2366_p11, %p2363_p8 }
  0x31   : > { %2371 = shalt.err (!%p2368_p13)
}
  0x32   : > { %s2372_s26 = scalar_lea.vmem %s163_s29, 16  ;;  %s2379_s8 = scalar_lea.vmem %s163_s29, 32 }
  0x33   : > { %p2373_p0 = scmp.ne.s32.totalorder %s163_s29, %s2372_s26  ;;  %p2380_p4 = scmp.lt.s32.totalorder %s163_s29, %s163_s29 }
  0x34   : > { %p2381_p5 = scmp.lt.s32.totalorder %s2379_s8, %s2372_s26 }
  0x35   : > { %p2375_p1 = pnand %p2373_p0, %p2333_p12 }
  0x36   : > { %p2382_p6 = por %p2381_p5, %p2380_p4 }
  0x37   : > { %p2376_p2 = pneg %p2375_p1 }
  0x39   : > { %p2383_p9 = pnand %p2382_p6, %p2376_p2 }
  0x3b   : > { %2386 = shalt.err (!%p2383_p9)
}
  0x3c   : > { %2216 = dma.hbm_to_vmem [thread:$0]  (!%p2580_p10), %s3381_s2, 16, %s163_s29, [#allocation6]  }
  0x3d   : > { %p3390_p3 = scmp.ne.s32.totalorder %s3387_s22, 0 }
  0x3e   : > { %p3391_p7 = scmp.ne.s32.totalorder (!%p3390_p3), %s3388_s23, 0 }
  0x3f   : > { %195 = sbr.rel (%p3390_p3) target bundleno = 475 (0x1db), region = 32 }
  0x46   : > { %2440 = dma.done.wait (%p3391_p7), [#allocation4], 256  }
  0x47   : > { %2442 = vsyncadd (%p3391_p7), [#allocation4], 4294967040 }
  0x48   : > { %2444 = dma.done.wait (%p3391_p7), [#allocation6], 16  }
  0x49   : > { %2446 = vsyncadd (%p3391_p7), [#allocation6], 4294967280  ;;  %s2637_s27 = sshll.u32 %s2457_s14, 6  ;;  %vm256_vm0 = vcmask 261120   ;;  %v2503_v0 = vmov 0.0   ;;  %vm644_vm1 = vcmask 1040384  }
  0x4a   : > { %p234_p10 = scmp.lt.s32.totalorder %s2637_s27, 168  ;;  %258 = vst.msk [vmem:[#allocation2 + $0x8] sm:$0xff] %vm256_vm0, %v2503_v0  ;;  %257 = vst.msk [vmem:[#allocation2] sm:$0xff] %vm256_vm0, %v2503_v0  ;;  %vm451_vm2 = vcmask 72704   ;;  %vm2504_vm3 = vmmov 1   ;;  %v449_v1 = vld [vmem:[#allocation3] sm:$0xff] }
  0x4b   : > { %259 = vst.msk [vmem:[#allocation2 + $0x10] sm:$0xff] %vm256_vm0, %v2503_v0  ;;  %260 = vst.msk [vmem:[#allocation2 + $0x18] sm:$0xff] %vm256_vm0, %v2503_v0  ;;  %v450_v2 = vld [vmem:[#allocation3 + $0x8] sm:$0x1]  ;;  %s226_s19 = sand.u32 1, %s2449_s12   ;;  %p3392_p12 = scmp.ne.s32.totalorder %s3386_s20, 0 }
  0x4c   : > { %261 = vst.msk [vmem:[#allocation2 + $0x20] sm:$0xff] %vm256_vm0, %v2503_v0  ;;  %262 = vst.msk [vmem:[#allocation2 + $0x28] sm:$0xff] %vm256_vm0, %v2503_v0  ;;  %s235_s22 = scalar_select %p234_p10, %s2637_s27, 168  ;;  %v2194_v4 = vpack.c.bf16 %v450_v2, %v449_v1 }
  0x4d   : > { %263 = vst.msk [vmem:[#allocation2 + $0x30] sm:$0xff] %vm256_vm0, %v2503_v0  ;;  %264 = vst.msk [vmem:[#allocation2 + $0x38] sm:$0xff] %vm256_vm0, %v2503_v0  ;;  %s2915_s21 = sshll.u32 %s226_s19, 9  ;;  %s1436_s25 = ssub.s32 (%p3392_p12), 169, %s2637_s27 }
  0x4e   : > { %265 = vst.msk [vmem:[#allocation2 + $0x40] sm:$0xff] %vm256_vm0, %v2503_v0  ;;  %266 = vst.msk [vmem:[#allocation2 + $0x48] sm:$0xff] %vm256_vm0, %v2503_v0  ;;  %s1941_s23 = sshll.u32 %s235_s22, 3  ;;  %s2926_s12 = scalar_lea.vmem [#allocation7], %s2915_s21  }
  0x4f   : > { %267 = vst.msk [vmem:[#allocation2 + $0x50] sm:$0xff] %vm256_vm0, %v2503_v0  ;;  %268 = vst.msk [vmem:[#allocation2 + $0x58] sm:$0xff] %vm256_vm0, %v2503_v0  ;;  %s2774_s17 = scalar_lea.vmem %s3379_s0, %s1941_s23  ;;  %s2025_s28 = sshll.u32 (%p3392_p12), %s2457_s14, 9 }
  0x50   : > { %269 = vst.msk [vmem:[#allocation2 + $0x60] sm:$0xff] %vm256_vm0, %v2503_v0  ;;  %270 = vst.msk [vmem:[#allocation2 + $0x68] sm:$0xff] %vm256_vm0, %v2503_v0  ;;  %v385_v3 = vld [vmem:[%s2774_s17] sm:$0xff]  ;;  %v386_v6 = vld [vmem:[%s2774_s17 + $0x8] sm:$0xff]  ;;  %p1437_p8 = scmp.lt.s32.totalorder (%p3392_p12), %s1436_s25, 64  ;;  %s3175_s5 = scalar_lea.vmem (%p3392_p12), %s3382_s3, %s2025_s28  }
  0x51   : > { %271 = vst.msk [vmem:[#allocation2 + $0x70] sm:$0xff] %vm256_vm0, %v2503_v0  ;;  %272 = vst.msk [vmem:[#allocation2 + $0x78] sm:$0xff] %vm256_vm0, %v2503_v0  ;;  %2098 = vmatprep.mubr.msk.f32.mxu0 %vm451_vm2, %v385_v3  ;;  %v417_v5 = vld [vmem:[%s2774_s17 + $0x100] sm:$0xff]  ;;  %v418_v7 = vld [vmem:[%s2774_s17 + $0x108] sm:$0xff] }
  0x52   : > { %273 = vst.msk [vmem:[#allocation2 + $0x80] sm:$0xff] %vm256_vm0, %v2503_v0  ;;  %274 = vst.msk [vmem:[#allocation2 + $0x88] sm:$0xff] %vm256_vm0, %v2503_v0  ;;  %2146 = vmatprep.mubr.msk.f32.mxu1 %vm451_vm2, %v417_v5  ;;  %v387_v8 = vld [vmem:[%s2774_s17 + $0x10] sm:$0xff]  ;;  %v388_v10 = vld [vmem:[%s2774_s17 + $0x18] sm:$0xff] }
  0x53   : > { %275 = vst.msk [vmem:[#allocation2 + $0x90] sm:$0xff] %vm256_vm0, %v2503_v0  ;;  %276 = vst.msk [vmem:[#allocation2 + $0x98] sm:$0xff] %vm256_vm0, %v2503_v0  ;;  %v419_v9 = vld [vmem:[%s2774_s17 + $0x110] sm:$0xff]  ;;  %v420_v11 = vld [vmem:[%s2774_s17 + $0x118] sm:$0xff] }
  0x54   : > { %277 = vst.msk [vmem:[#allocation2 + $0xa0] sm:$0xff] %vm256_vm0, %v2503_v0  ;;  %278 = vst.msk [vmem:[#allocation2 + $0xa8] sm:$0xff] %vm256_vm0, %v2503_v0  ;;  %v389_v12 = vld [vmem:[%s2774_s17 + $0x20] sm:$0xff]  ;;  %v390_v14 = vld [vmem:[%s2774_s17 + $0x28] sm:$0xff] }
  0x55   : > { %279 = vst.msk [vmem:[#allocation2 + $0xb0] sm:$0xff] %vm256_vm0, %v2503_v0  ;;  %280 = vst.msk [vmem:[#allocation2 + $0xb8] sm:$0xff] %vm256_vm0, %v2503_v0  ;;  %v421_v13 = vld [vmem:[%s2774_s17 + $0x120] sm:$0xff]  ;;  %v422_v15 = vld [vmem:[%s2774_s17 + $0x128] sm:$0xff] }
  0x56   : > { %281 = vst.msk [vmem:[#allocation2 + $0xc0] sm:$0xff] %vm256_vm0, %v2503_v0  ;;  %282 = vst.msk [vmem:[#allocation2 + $0xc8] sm:$0xff] %vm256_vm0, %v2503_v0  ;;  %v391_v16 = vld [vmem:[%s2774_s17 + $0x30] sm:$0xff]  ;;  %v392_v18 = vld [vmem:[%s2774_s17 + $0x38] sm:$0xff] }
  0x57   : > { %283 = vst.msk [vmem:[#allocation2 + $0xd0] sm:$0xff] %vm256_vm0, %v2503_v0  ;;  %284 = vst.msk [vmem:[#allocation2 + $0xd8] sm:$0xff] %vm256_vm0, %v2503_v0  ;;  %v423_v17 = vld [vmem:[%s2774_s17 + $0x130] sm:$0xff]  ;;  %v424_v19 = vld [vmem:[%s2774_s17 + $0x138] sm:$0xff] }
  0x58   : > { %285 = vst.msk [vmem:[#allocation2 + $0xe0] sm:$0xff] %vm256_vm0, %v2503_v0  ;;  %286 = vst.msk [vmem:[#allocation2 + $0xe8] sm:$0xff] %vm256_vm0, %v2503_v0  ;;  %v393_v20 = vld [vmem:[%s2774_s17 + $0x40] sm:$0xff]  ;;  %v394_v22 = vld [vmem:[%s2774_s17 + $0x48] sm:$0xff] }
  0x59   : > { %287 = vst.msk [vmem:[#allocation2 + $0xf0] sm:$0xff] %vm256_vm0, %v2503_v0  ;;  %288 = vst.msk [vmem:[#allocation2 + $0xf8] sm:$0xff] %vm256_vm0, %v2503_v0  ;;  %v425_v21 = vld [vmem:[%s2774_s17 + $0x140] sm:$0xff]  ;;  %v426_v23 = vld [vmem:[%s2774_s17 + $0x148] sm:$0xff] }
  0x5a   : > { %289 = vst.msk [vmem:[#allocation2 + $0x100] sm:$0xff] %vm256_vm0, %v2503_v0  ;;  %290 = vst.msk [vmem:[#allocation2 + $0x108] sm:$0xff] %vm256_vm0, %v2503_v0  ;;  %v395_v24 = vld [vmem:[%s2774_s17 + $0x50] sm:$0xff]  ;;  %v396_v26 = vld [vmem:[%s2774_s17 + $0x58] sm:$0xff] }
  0x5b   : > { %291 = vst.msk [vmem:[#allocation2 + $0x110] sm:$0xff] %vm256_vm0, %v2503_v0  ;;  %292 = vst.msk [vmem:[#allocation2 + $0x118] sm:$0xff] %vm256_vm0, %v2503_v0  ;;  %v427_v25 = vld [vmem:[%s2774_s17 + $0x150] sm:$0xff]  ;;  %v428_v27 = vld [vmem:[%s2774_s17 + $0x158] sm:$0xff] }
  0x5c   : > { %293 = vst.msk [vmem:[#allocation2 + $0x120] sm:$0xff] %vm256_vm0, %v2503_v0  ;;  %294 = vst.msk [vmem:[#allocation2 + $0x128] sm:$0xff] %vm256_vm0, %v2503_v0  ;;  %v397_v28 = vld [vmem:[%s2774_s17 + $0x60] sm:$0xff]  ;;  %v398_v30 = vld [vmem:[%s2774_s17 + $0x68] sm:$0xff] }
  0x5d   : > { %295 = vst.msk [vmem:[#allocation2 + $0x130] sm:$0xff] %vm256_vm0, %v2503_v0  ;;  %296 = vst.msk [vmem:[#allocation2 + $0x138] sm:$0xff] %vm256_vm0, %v2503_v0  ;;  %v429_v29 = vld [vmem:[%s2774_s17 + $0x160] sm:$0xff]  ;;  %v430_v31 = vld [vmem:[%s2774_s17 + $0x168] sm:$0xff] }
  0x5e   : > { %297 = vst.msk [vmem:[#allocation2 + $0x140] sm:$0xff] %vm256_vm0, %v2503_v0  ;;  %298 = vst.msk [vmem:[#allocation2 + $0x148] sm:$0xff] %vm256_vm0, %v2503_v0  ;;  %v399_v32 = vld [vmem:[%s2774_s17 + $0x70] sm:$0xff]  ;;  %v400_v34 = vld [vmem:[%s2774_s17 + $0x78] sm:$0xff] }
  0x5f   : > { %299 = vst.msk [vmem:[#allocation2 + $0x150] sm:$0xff] %vm256_vm0, %v2503_v0  ;;  %300 = vst.msk [vmem:[#allocation2 + $0x158] sm:$0xff] %vm256_vm0, %v2503_v0  ;;  %v431_v33 = vld [vmem:[%s2774_s17 + $0x170] sm:$0xff]  ;;  %v432_v35 = vld [vmem:[%s2774_s17 + $0x178] sm:$0xff] }
  0x60   : > { %301 = vst.msk [vmem:[#allocation2 + $0x160] sm:$0xff] %vm256_vm0, %v2503_v0  ;;  %302 = vst.msk [vmem:[#allocation2 + $0x168] sm:$0xff] %vm256_vm0, %v2503_v0  ;;  %v401_v36 = vld [vmem:[%s2774_s17 + $0x80] sm:$0xff]  ;;  %v402_v38 = vld [vmem:[%s2774_s17 + $0x88] sm:$0xff] }
  0x61   : > { %303 = vst.msk [vmem:[#allocation2 + $0x170] sm:$0xff] %vm256_vm0, %v2503_v0  ;;  %304 = vst.msk [vmem:[#allocation2 + $0x178] sm:$0xff] %vm256_vm0, %v2503_v0  ;;  %v433_v37 = vld [vmem:[%s2774_s17 + $0x180] sm:$0xff]  ;;  %v434_v39 = vld [vmem:[%s2774_s17 + $0x188] sm:$0xff] }
  0x62   : > { %305 = vst.msk [vmem:[#allocation2 + $0x180] sm:$0xff] %vm256_vm0, %v2503_v0  ;;  %306 = vst.msk [vmem:[#allocation2 + $0x188] sm:$0xff] %vm256_vm0, %v2503_v0  ;;  %v403_v40 = vld [vmem:[%s2774_s17 + $0x90] sm:$0xff]  ;;  %v404_v42 = vld [vmem:[%s2774_s17 + $0x98] sm:$0xff] }
  0x63   : > { %307 = vst.msk [vmem:[#allocation2 + $0x190] sm:$0xff] %vm256_vm0, %v2503_v0  ;;  %308 = vst.msk [vmem:[#allocation2 + $0x198] sm:$0xff] %vm256_vm0, %v2503_v0  ;;  %v435_v41 = vld [vmem:[%s2774_s17 + $0x190] sm:$0xff]  ;;  %v436_v43 = vld [vmem:[%s2774_s17 + $0x198] sm:$0xff] }
  0x64   : > { %309 = vst.msk [vmem:[#allocation2 + $0x1a0] sm:$0xff] %vm256_vm0, %v2503_v0  ;;  %310 = vst.msk [vmem:[#allocation2 + $0x1a8] sm:$0xff] %vm256_vm0, %v2503_v0  ;;  %v405_v44 = vld [vmem:[%s2774_s17 + $0xa0] sm:$0xff]  ;;  %v406_v46 = vld [vmem:[%s2774_s17 + $0xa8] sm:$0xff] }
  0x65   : > { %311 = vst.msk [vmem:[#allocation2 + $0x1b0] sm:$0xff] %vm256_vm0, %v2503_v0  ;;  %312 = vst.msk [vmem:[#allocation2 + $0x1b8] sm:$0xff] %vm256_vm0, %v2503_v0  ;;  %v437_v45 = vld [vmem:[%s2774_s17 + $0x1a0] sm:$0xff]  ;;  %v438_v47 = vld [vmem:[%s2774_s17 + $0x1a8] sm:$0xff] }
  0x66   : > { %313 = vst.msk [vmem:[#allocation2 + $0x1c0] sm:$0xff] %vm256_vm0, %v2503_v0  ;;  %314 = vst.msk [vmem:[#allocation2 + $0x1c8] sm:$0xff] %vm256_vm0, %v2503_v0  ;;  %v407_v48 = vld [vmem:[%s2774_s17 + $0xb0] sm:$0xff]  ;;  %v408_v50 = vld [vmem:[%s2774_s17 + $0xb8] sm:$0xff] }
  0x67   : > { %315 = vst.msk [vmem:[#allocation2 + $0x1d0] sm:$0xff] %vm256_vm0, %v2503_v0  ;;  %316 = vst.msk [vmem:[#allocation2 + $0x1d8] sm:$0xff] %vm256_vm0, %v2503_v0  ;;  %v439_v49 = vld [vmem:[%s2774_s17 + $0x1b0] sm:$0xff]  ;;  %v440_v51 = vld [vmem:[%s2774_s17 + $0x1b8] sm:$0xff] }
  0x68   : > { %317 = vst.msk [vmem:[#allocation2 + $0x1e0] sm:$0xff] %vm256_vm0, %v2503_v0  ;;  %318 = vst.msk [vmem:[#allocation2 + $0x1e8] sm:$0xff] %vm256_vm0, %v2503_v0  ;;  %v409_v52 = vld [vmem:[%s2774_s17 + $0xc0] sm:$0xff]  ;;  %v410_v54 = vld [vmem:[%s2774_s17 + $0xc8] sm:$0xff] }
  0x69   : > { %319 = vst.msk [vmem:[#allocation2 + $0x1f0] sm:$0xff] %vm256_vm0, %v2503_v0  ;;  %320 = vst.msk [vmem:[#allocation2 + $0x1f8] sm:$0xff] %vm256_vm0, %v2503_v0  ;;  %v441_v53 = vld [vmem:[%s2774_s17 + $0x1c0] sm:$0xff]  ;;  %v442_v55 = vld [vmem:[%s2774_s17 + $0x1c8] sm:$0xff] }
  0x6a   : > { %vm2195_vm4 = vmpackc.low %vm644_vm1, %vm2504_vm3  ;;  %v411_v56 = vld [vmem:[%s2774_s17 + $0xd0] sm:$0xff]  ;;  %v412_v58 = vld [vmem:[%s2774_s17 + $0xd8] sm:$0xff] }
  0x6b   : > { %2196 = vmatprep.subr.msk.bf16.mxu0 %vm2195_vm4, %v2194_v4  ;;  %2200 = vmatprep.subr.msk.bf16.mxu1 %vm2195_vm4, %v2194_v4  ;;  %v443_v57 = vld [vmem:[%s2774_s17 + $0x1d0] sm:$0xff]  ;;  %v444_v59 = vld [vmem:[%s2774_s17 + $0x1d8] sm:$0xff]  ;;  %v413_v60 = vld [vmem:[%s2774_s17 + $0xe0] sm:$0xff] }
  0x6c   : > { %2199 = vmatpush3.bf16.msk.msra.mxu0 %vm2195_vm4, %v2194_v4  ;;  %2201 = vmatpush3.bf16.msk.msra.mxu1 %vm2195_vm4, %v2194_v4  ;;  %v445_v61 = vld [vmem:[%s2774_s17 + $0x1e0] sm:$0xff]  ;;  %v414_v62 = vld [vmem:[%s2774_s17 + $0xe8] sm:$0xff]  ;;  %v415_v0 = vld [vmem:[%s2774_s17 + $0xf0] sm:$0xff] }
  0x6d   : > { %v446_v63 = vld [vmem:[%s2774_s17 + $0x1e8] sm:$0xff]  ;;  %v447_v1 = vld [vmem:[%s2774_s17 + $0x1f0] sm:$0xff]  ;;  %v416_v2 = vld [vmem:[%s2774_s17 + $0xf8] sm:$0xff] }
  0x6e   : > { %v448_v3 = vld [vmem:[%s2774_s17 + $0x1f8] sm:$0xff]  ;;  %v322_v4 = vld [vmem:[#allocation2 + $0x8] sm:$0xff] }
  0x6f   : > { %2099 = vmatmul.mubr.msk.f32.vlgmr.msra.gmra.mrb[0].mxu0 %vm451_vm2, %v386_v6  ;;  %2147 = vmatmul.mubr.msk.f32.vlgmr.msra.gmra.mrb[0].mxu1 %vm451_vm2, %v418_v7  ;;  %v354_v5 = vld [vmem:[#allocation2 + $0x108] sm:$0xff]  ;;  %v321_v6 = vld [vmem:[#allocation2] sm:$0xff] }
  0x70   : > { %2101 = vmatprep.mubr.msk.f32.mxu0 %vm451_vm2, %v387_v8  ;;  %2149 = vmatprep.mubr.msk.f32.mxu1 %vm451_vm2, %v419_v9  ;;  %v353_v7 = vld [vmem:[#allocation2 + $0x100] sm:$0xff] }
  0x73   : > { %2102 = vmatmul.mubr.msk.f32.gmra.mrb[2].mxu0 %vm451_vm2, %v388_v10  ;;  %2150 = vmatmul.mubr.msk.f32.gmra.mrb[2].mxu1 %vm451_vm2, %v420_v11 }
  0x74   : > { %2104 = vmatprep.mubr.msk.f32.mxu0 %vm451_vm2, %v389_v12  ;;  %2152 = vmatprep.mubr.msk.f32.mxu1 %vm451_vm2, %v421_v13 }
  0x77   : > { %2105 = vmatmul.mubr.msk.f32.gmra.mrb[4].mxu0 %vm451_vm2, %v390_v14  ;;  %2153 = vmatmul.mubr.msk.f32.gmra.mrb[4].mxu1 %vm451_vm2, %v422_v15 }
  0x78   : > { %2107 = vmatprep.mubr.msk.f32.mxu0 %vm451_vm2, %v391_v16  ;;  %2155 = vmatprep.mubr.msk.f32.mxu1 %vm451_vm2, %v423_v17  ;;  %v324_v16 = vld [vmem:[#allocation2 + $0x18] sm:$0xff] }
  0x79   : > { %v356_v17 = vld [vmem:[#allocation2 + $0x118] sm:$0xff] }
  0x7b   : > { %2108 = vmatmul.mubr.msk.f32.gmra.mrb[6].mxu0 %vm451_vm2, %v392_v18  ;;  %2156 = vmatmul.mubr.msk.f32.gmra.mrb[6].mxu1 %vm451_vm2, %v424_v19  ;;  %v323_v18 = vld [vmem:[#allocation2 + $0x10] sm:$0xff] }
  0x7c   : > { %2110 = vmatprep.mubr.msk.f32.mxu0 %vm451_vm2, %v393_v20  ;;  %2158 = vmatprep.mubr.msk.f32.mxu1 %vm451_vm2, %v425_v21  ;;  %v355_v19 = vld [vmem:[#allocation2 + $0x110] sm:$0xff] }
  0x7f   : > { %2111 = vmatmul.mubr.msk.f32.gmra.mrb[8].mxu0 %vm451_vm2, %v394_v22  ;;  %2159 = vmatmul.mubr.msk.f32.gmra.mrb[8].mxu1 %vm451_vm2, %v426_v23 }
  0x80   : > { %2113 = vmatprep.mubr.msk.f32.mxu0 %vm451_vm2, %v395_v24  ;;  %2161 = vmatprep.mubr.msk.f32.mxu1 %vm451_vm2, %v427_v25 }
  0x83   : > { %2114 = vmatmul.mubr.msk.f32.gmra.mrb[10].mxu0 %vm451_vm2, %v396_v26  ;;  %2162 = vmatmul.mubr.msk.f32.gmra.mrb[10].mxu1 %vm451_vm2, %v428_v27 }
  0x84   : > { %2116 = vmatprep.mubr.msk.f32.mxu0 %vm451_vm2, %v397_v28  ;;  %2164 = vmatprep.mubr.msk.f32.mxu1 %vm451_vm2, %v429_v29  ;;  %v326_v28 = vld [vmem:[#allocation2 + $0x28] sm:$0xff] }
  0x85   : > { %v358_v29 = vld [vmem:[#allocation2 + $0x128] sm:$0xff] }
  0x87   : > { %2117 = vmatmul.mubr.msk.f32.gmra.mrb[12].mxu0 %vm451_vm2, %v398_v30  ;;  %2165 = vmatmul.mubr.msk.f32.gmra.mrb[12].mxu1 %vm451_vm2, %v430_v31  ;;  %v325_v30 = vld [vmem:[#allocation2 + $0x20] sm:$0xff] }
  0x88   : > { %2119 = vmatprep.mubr.msk.f32.mxu0 %vm451_vm2, %v399_v32  ;;  %2167 = vmatprep.mubr.msk.f32.mxu1 %vm451_vm2, %v431_v33  ;;  %v357_v31 = vld [vmem:[#allocation2 + $0x120] sm:$0xff]  ;;  %v2911_v32 = vld [vmem:[#allocation5] ss:$0 sm:$0xff] }
  0x8b   : > { %2120 = vmatmul.mubr.msk.f32.gmra.mrb[14].mxu0 %vm451_vm2, %v400_v34  ;;  %2168 = vmatmul.mubr.msk.f32.gmra.mrb[14].mxu1 %vm451_vm2, %v432_v35 }
  0x8c   : > { %2122 = vmatprep.mubr.msk.f32.mxu0 %vm451_vm2, %v401_v36  ;;  %2170 = vmatprep.mubr.msk.f32.mxu1 %vm451_vm2, %v433_v37 }
  0x8f   : > { %2123 = vmatmul.mubr.msk.f32.gmra.mrb[16].mxu0 %vm451_vm2, %v402_v38  ;;  %2171 = vmatmul.mubr.msk.f32.gmra.mrb[16].mxu1 %vm451_vm2, %v434_v39  ;;  %v328_v39 = vld [vmem:[#allocation2 + $0x38] sm:$0xff] }
  0x90   : > { %2125 = vmatprep.mubr.msk.f32.mxu0 %vm451_vm2, %v403_v40  ;;  %2173 = vmatprep.mubr.msk.f32.mxu1 %vm451_vm2, %v435_v41  ;;  %v360_v40 = vld [vmem:[#allocation2 + $0x138] sm:$0xff] }
  0x93   : > { %2126 = vmatmul.mubr.msk.f32.gmra.mrb[18].mxu0 %vm451_vm2, %v404_v42  ;;  %2174 = vmatmul.mubr.msk.f32.gmra.mrb[18].mxu1 %vm451_vm2, %v436_v43 }
  0x94   : > { %2128 = vmatprep.mubr.msk.f32.mxu0 %vm451_vm2, %v405_v44  ;;  %2176 = vmatprep.mubr.msk.f32.mxu1 %vm451_vm2, %v437_v45  ;;  %v327_v45 = vld [vmem:[#allocation2 + $0x30] sm:$0xff] }
  0x97   : > { %2129 = vmatmul.mubr.msk.f32.gmra.mrb[20].mxu0 %vm451_vm2, %v406_v46  ;;  %2177 = vmatmul.mubr.msk.f32.gmra.mrb[20].mxu1 %vm451_vm2, %v438_v47 }
  0x98   : > { %2131 = vmatprep.mubr.msk.f32.mxu0 %vm451_vm2, %v407_v48  ;;  %2179 = vmatprep.mubr.msk.f32.mxu1 %vm451_vm2, %v439_v49 }
  0x9b   : > { %2132 = vmatmul.mubr.msk.f32.gmra.mrb[22].mxu0 %vm451_vm2, %v408_v50  ;;  %2180 = vmatmul.mubr.msk.f32.gmra.mrb[22].mxu1 %vm451_vm2, %v440_v51  ;;  %v359_v50 = vld [vmem:[#allocation2 + $0x130] sm:$0xff] }
  0x9c   : > { %2134 = vmatprep.mubr.msk.f32.mxu0 %vm451_vm2, %v409_v52  ;;  %2182 = vmatprep.mubr.msk.f32.mxu1 %vm451_vm2, %v441_v53 }
  0x9f   : > { %2135 = vmatmul.mubr.msk.f32.gmra.mrb[24].mxu0 %vm451_vm2, %v410_v54  ;;  %2183 = vmatmul.mubr.msk.f32.gmra.mrb[24].mxu1 %vm451_vm2, %v442_v55 }
  0xa0   : > { %2137 = vmatprep.mubr.msk.f32.mxu0 %vm451_vm2, %v411_v56  ;;  %2185 = vmatprep.mubr.msk.f32.mxu1 %vm451_vm2, %v443_v57 }
  0xa3   : > { %2138 = vmatmul.mubr.msk.f32.gmra.mrb[26].mxu0 %vm451_vm2, %v412_v58  ;;  %2186 = vmatmul.mubr.msk.f32.gmra.mrb[26].mxu1 %vm451_vm2, %v444_v59 }
  0xa4   : > { %2140 = vmatprep.mubr.msk.f32.mxu0 %vm451_vm2, %v413_v60  ;;  %2188 = vmatprep.mubr.msk.f32.mxu1 %vm451_vm2, %v445_v61  ;;  %v330_v61 = vld [vmem:[#allocation2 + $0x48] sm:$0xff] }
  0xa7   : > { %2141 = vmatmul.mubr.msk.f32.gmra.mrb[28].mxu0 %vm451_vm2, %v414_v62  ;;  %2189 = vmatmul.mubr.msk.f32.gmra.mrb[28].mxu1 %vm451_vm2, %v446_v63  ;;  %v362_v62 = vld [vmem:[#allocation2 + $0x148] sm:$0xff] }
  0xa8   : > { %2143 = vmatprep.mubr.msk.f32.mxu0 %vm451_vm2, %v415_v0  ;;  %2191 = vmatprep.mubr.msk.f32.mxu1 %vm451_vm2, %v447_v1 }
  0xab   : > { %2144 = vmatmul.mubr.msk.f32.gmra.mrb[30].mxu0 %vm451_vm2, %v416_v2  ;;  %2192 = vmatmul.mubr.msk.f32.gmra.mrb[30].mxu1 %vm451_vm2, %v448_v3 }
 0x142   : > { %v2100_v8 = vpop.f32.mrb[0].mxu0  ;;  %v2148_v9 = vpop.f32.mrb[0].mxu1 }
 0x143   : > { %v1034_v10 = vadd.f32 %v2100_v8, %v322_v4  ;;  %v1066_v11 = vadd.f32 %v2148_v9, %v354_v5  ;;  %v714_v12 = vpop.f32.mrb[1].mxu0  ;;  %v874_v13 = vpop.f32.mrb[1].mxu1  ;;  %v329_v5 = vld [vmem:[#allocation2 + $0x40] sm:$0xff] }
 0x144   : > { %v1033_v14 = vadd.f32 %v714_v12, %v321_v6  ;;  %v1065_v15 = vadd.f32 %v874_v13, %v353_v7 }
 0x145   : > { %1099 = vst.msk [vmem:[#allocation2 + $0x8] sm:$0xff] %vm256_vm0, %v1034_v10  ;;  %1131 = vst.msk [vmem:[#allocation2 + $0x108] sm:$0xff] %vm256_vm0, %v1066_v11  ;;  %v361_v10 = vld [vmem:[#allocation2 + $0x140] sm:$0xff] }
 0x146   : > { %1098 = vst.msk [vmem:[#allocation2] sm:$0xff] %vm256_vm0, %v1033_v14  ;;  %1130 = vst.msk [vmem:[#allocation2 + $0x100] sm:$0xff] %vm256_vm0, %v1065_v15  ;;  %v2103_v20 = vpop.f32.mrb[2].mxu0  ;;  %v2151_v21 = vpop.f32.mrb[2].mxu1 }
 0x147   : > { %v1036_v22 = vadd.f32 %v2103_v20, %v324_v16  ;;  %v1068_v23 = vadd.f32 %v2151_v21, %v356_v17  ;;  %v724_v24 = vpop.f32.mrb[3].mxu0  ;;  %v884_v25 = vpop.f32.mrb[3].mxu1  ;;  %v332_v21 = vld [vmem:[#allocation2 + $0x58] sm:$0xff] }
 0x148   : > { %v1035_v26 = vadd.f32 %v724_v24, %v323_v18  ;;  %v1067_v27 = vadd.f32 %v884_v25, %v355_v19 }
 0x149   : > { %1101 = vst.msk [vmem:[#allocation2 + $0x18] sm:$0xff] %vm256_vm0, %v1036_v22  ;;  %1133 = vst.msk [vmem:[#allocation2 + $0x118] sm:$0xff] %vm256_vm0, %v1068_v23  ;;  %v364_v22 = vld [vmem:[#allocation2 + $0x158] sm:$0xff] }
 0x14a   : > { %1100 = vst.msk [vmem:[#allocation2 + $0x10] sm:$0xff] %vm256_vm0, %v1035_v26  ;;  %1132 = vst.msk [vmem:[#allocation2 + $0x110] sm:$0xff] %vm256_vm0, %v1067_v27  ;;  %v2106_v33 = vpop.f32.mrb[4].mxu0  ;;  %v2154_v34 = vpop.f32.mrb[4].mxu1 }
 0x14b   : > { %v1038_v35 = vadd.f32 %v2106_v33, %v326_v28  ;;  %v1070_v36 = vadd.f32 %v2154_v34, %v358_v29  ;;  %v734_v37 = vpop.f32.mrb[5].mxu0  ;;  %v894_v38 = vpop.f32.mrb[5].mxu1  ;;  %v331_v29 = vld [vmem:[#allocation2 + $0x50] sm:$0xff] }
 0x14c   : > { %v1166_v41 = vld [vmem:[#allocation2 + $0x8] sm:$0xff]  ;;  %v1037_v43 = vadd.f32 %v734_v37, %v325_v30  ;;  %v1069_v44 = vadd.f32 %v894_v38, %v357_v31 }
 0x14d   : > { %v1198_v42 = vld [vmem:[#allocation2 + $0x108] sm:$0xff]  ;;  %v1237_v46 = vadd.f32 %v2911_v32, %v1166_v41  ;;  %v1165_v48 = vld [vmem:[#allocation2] sm:$0xff]  ;;  %1103 = vst.msk [vmem:[#allocation2 + $0x28] sm:$0xff] %vm256_vm0, %v1038_v35  ;;  %1135 = vst.msk [vmem:[#allocation2 + $0x128] sm:$0xff] %vm256_vm0, %v1070_v36 }
 0x14e   : > { %v1269_v47 = vadd.f32 %v2911_v32, %v1198_v42  ;;  %v1197_v49 = vld [vmem:[#allocation2 + $0x100] sm:$0xff]  ;;  %v1236_v51 = vadd.f32 %v2911_v32, %v1165_v48  ;;  %1102 = vst.msk [vmem:[#allocation2 + $0x20] sm:$0xff] %vm256_vm0, %v1037_v43  ;;  %1134 = vst.msk [vmem:[#allocation2 + $0x120] sm:$0xff] %vm256_vm0, %v1069_v44  ;;  %v2109_v53 = vpop.f32.mrb[6].mxu0  ;;  %v2157_v54 = vpop.f32.mrb[6].mxu1  ;;  %v363_v35 = vld [vmem:[#allocation2 + $0x150] sm:$0xff] }
 0x14f   : > { %v1268_v52 = vadd.f32 %v2911_v32, %v1197_v49  ;;  %v1301_v55 = vmax.f32 %v1237_v46, 0.0  ;;  %v1040_v57 = vadd.f32 %v2109_v53, %v328_v39  ;;  %v1072_v58 = vadd.f32 %v2157_v54, %v360_v40  ;;  %v744_v59 = vpop.f32.mrb[7].mxu0  ;;  %v904_v60 = vpop.f32.mrb[7].mxu1  ;;  %v334_v46 = vld [vmem:[#allocation2 + $0x68] sm:$0xff]  ;;  %v333_v54 = vld [vmem:[#allocation2 + $0x60] sm:$0xff] }
 0x150   : > { %v1333_v56 = vmax.f32 %v1269_v47, 0.0  ;;  %v1300_v63 = vmax.f32 %v1236_v51, 0.0  ;;  %v1168_v1 = vld [vmem:[#allocation2 + $0x18] sm:$0xff]  ;;  %v1039_v3 = vadd.f32 %v744_v59, %v327_v45  ;;  %v1071_v4 = vadd.f32 %v904_v60, %v359_v50  ;;  %v366_v47 = vld [vmem:[#allocation2 + $0x168] sm:$0xff]  ;;  %v365_v59 = vld [vmem:[#allocation2 + $0x160] sm:$0xff] }
 0x151   : > { %v1332_v0 = vmax.f32 %v1268_v52, 0.0  ;;  %v1200_v2 = vld [vmem:[#allocation2 + $0x118] sm:$0xff]  ;;  %1365 = vst.msk [vmem:[%s2926_s12 + $0x8] sm:$0xff] %vm256_vm0, %v1301_v55  ;;  %v1239_v6 = vadd.f32 %v2911_v32, %v1168_v1  ;;  %v1167_v8 = vld [vmem:[#allocation2 + $0x10] sm:$0xff]  ;;  %1105 = vst.msk [vmem:[#allocation2 + $0x38] sm:$0xff] %vm256_vm0, %v1040_v57 }
 0x152   : > { %1397 = vst.msk [vmem:[%s2926_s12 + $0x108] sm:$0xff] %vm256_vm0, %v1333_v56  ;;  %v1271_v7 = vadd.f32 %v2911_v32, %v1200_v2  ;;  %v1199_v9 = vld [vmem:[#allocation2 + $0x110] sm:$0xff]  ;;  %1137 = vst.msk [vmem:[#allocation2 + $0x138] sm:$0xff] %vm256_vm0, %v1072_v58  ;;  %v1238_v11 = vadd.f32 %v2911_v32, %v1167_v8  ;;  %v2112_v13 = vpop.f32.mrb[8].mxu0  ;;  %v2160_v14 = vpop.f32.mrb[8].mxu1 }
 0x153   : > { %1364 = vst.msk [vmem:[%s2926_s12] sm:$0xff] %vm256_vm0, %v1300_v63  ;;  %1396 = vst.msk [vmem:[%s2926_s12 + $0x100] sm:$0xff] %vm256_vm0, %v1332_v0  ;;  %v1270_v12 = vadd.f32 %v2911_v32, %v1199_v9  ;;  %v1303_v15 = vmax.f32 %v1239_v6, 0.0  ;;  %v1042_v17 = vadd.f32 %v2112_v13, %v330_v61  ;;  %v1074_v18 = vadd.f32 %v2160_v14, %v362_v62  ;;  %v754_v19 = vpop.f32.mrb[9].mxu0  ;;  %v914_v20 = vpop.f32.mrb[9].mxu1  ;;  %v336_v6 = vld [vmem:[#allocation2 + $0x78] sm:$0xff] }
 0x154   : > { %1104 = vst.msk [vmem:[#allocation2 + $0x30] sm:$0xff] %vm256_vm0, %v1039_v3  ;;  %1136 = vst.msk [vmem:[#allocation2 + $0x130] sm:$0xff] %vm256_vm0, %v1071_v4  ;;  %v1335_v16 = vmax.f32 %v1271_v7, 0.0  ;;  %v1302_v23 = vmax.f32 %v1238_v11, 0.0  ;;  %v1170_v25 = vld [vmem:[#allocation2 + $0x28] sm:$0xff]  ;;  %v1041_v27 = vadd.f32 %v754_v19, %v329_v5  ;;  %v1073_v28 = vadd.f32 %v914_v20, %v361_v10  ;;  %v368_v7 = vld [vmem:[#allocation2 + $0x178] sm:$0xff] }
 0x155   : > { %v1334_v24 = vmax.f32 %v1270_v12, 0.0  ;;  %v1202_v26 = vld [vmem:[#allocation2 + $0x128] sm:$0xff]  ;;  %1367 = vst.msk [vmem:[%s2926_s12 + $0x18] sm:$0xff] %vm256_vm0, %v1303_v15  ;;  %v1241_v30 = vadd.f32 %v2911_v32, %v1170_v25  ;;  %v1169_v33 = vld [vmem:[#allocation2 + $0x20] sm:$0xff]  ;;  %1107 = vst.msk [vmem:[#allocation2 + $0x48] sm:$0xff] %vm256_vm0, %v1042_v17 }
 0x156   : > { %1399 = vst.msk [vmem:[%s2926_s12 + $0x118] sm:$0xff] %vm256_vm0, %v1335_v16  ;;  %v1273_v31 = vadd.f32 %v2911_v32, %v1202_v26  ;;  %v1201_v34 = vld [vmem:[#allocation2 + $0x120] sm:$0xff]  ;;  %1139 = vst.msk [vmem:[#allocation2 + $0x148] sm:$0xff] %vm256_vm0, %v1074_v18  ;;  %v1240_v36 = vadd.f32 %v2911_v32, %v1169_v33  ;;  %v2115_v38 = vpop.f32.mrb[10].mxu0  ;;  %v2163_v39 = vpop.f32.mrb[10].mxu1  ;;  %v335_v14 = vld [vmem:[#allocation2 + $0x70] sm:$0xff] }
 0x157   : > { %1366 = vst.msk [vmem:[%s2926_s12 + $0x10] sm:$0xff] %vm256_vm0, %v1302_v23  ;;  %1398 = vst.msk [vmem:[%s2926_s12 + $0x110] sm:$0xff] %vm256_vm0, %v1334_v24  ;;  %v1272_v37 = vadd.f32 %v2911_v32, %v1201_v34  ;;  %v1305_v40 = vmax.f32 %v1241_v30, 0.0  ;;  %v1044_v42 = vadd.f32 %v2115_v38, %v332_v21  ;;  %v1076_v43 = vadd.f32 %v2163_v39, %v364_v22  ;;  %v764_v44 = vpop.f32.mrb[11].mxu0  ;;  %v924_v45 = vpop.f32.mrb[11].mxu1  ;;  %v367_v19 = vld [vmem:[#allocation2 + $0x170] sm:$0xff] }
 0x158   : > { %1106 = vst.msk [vmem:[#allocation2 + $0x40] sm:$0xff] %vm256_vm0, %v1041_v27  ;;  %1138 = vst.msk [vmem:[#allocation2 + $0x140] sm:$0xff] %vm256_vm0, %v1073_v28  ;;  %v1337_v41 = vmax.f32 %v1273_v31, 0.0  ;;  %v1304_v48 = vmax.f32 %v1240_v36, 0.0  ;;  %v1172_v50 = vld [vmem:[#allocation2 + $0x38] sm:$0xff]  ;;  %v1043_v52 = vadd.f32 %v764_v44, %v331_v29  ;;  %v1075_v53 = vadd.f32 %v924_v45, %v363_v35  ;;  %v338_v30 = vld [vmem:[#allocation2 + $0x88] sm:$0xff] }
 0x159   : > { %v1336_v49 = vmax.f32 %v1272_v37, 0.0  ;;  %v1204_v51 = vld [vmem:[#allocation2 + $0x138] sm:$0xff]  ;;  %1369 = vst.msk [vmem:[%s2926_s12 + $0x28] sm:$0xff] %vm256_vm0, %v1305_v40  ;;  %v1243_v55 = vadd.f32 %v2911_v32, %v1172_v50  ;;  %1109 = vst.msk [vmem:[#allocation2 + $0x58] sm:$0xff] %vm256_vm0, %v1044_v42  ;;  %v370_v31 = vld [vmem:[#allocation2 + $0x188] sm:$0xff] }
 0x15a   : > { %1401 = vst.msk [vmem:[%s2926_s12 + $0x128] sm:$0xff] %vm256_vm0, %v1337_v41  ;;  %v1275_v56 = vadd.f32 %v2911_v32, %v1204_v51  ;;  %1141 = vst.msk [vmem:[#allocation2 + $0x158] sm:$0xff] %vm256_vm0, %v1076_v43  ;;  %v2118_v62 = vpop.f32.mrb[12].mxu0  ;;  %v2166_v63 = vpop.f32.mrb[12].mxu1  ;;  %v337_v39 = vld [vmem:[#allocation2 + $0x80] sm:$0xff] }
 0x15b   : > { %v1171_v57 = vld [vmem:[#allocation2 + $0x30] sm:$0xff]  ;;  %1368 = vst.msk [vmem:[%s2926_s12 + $0x20] sm:$0xff] %vm256_vm0, %v1304_v48  ;;  %1400 = vst.msk [vmem:[%s2926_s12 + $0x120] sm:$0xff] %vm256_vm0, %v1336_v49  ;;  %v1307_v0 = vmax.f32 %v1243_v55, 0.0  ;;  %v1046_v2 = vadd.f32 %v2118_v62, %v334_v46  ;;  %v1078_v3 = vadd.f32 %v2166_v63, %v366_v47  ;;  %v774_v4 = vpop.f32.mrb[13].mxu0  ;;  %v934_v5 = vpop.f32.mrb[13].mxu1 }
 0x15c   : > { %v1203_v58 = vld [vmem:[#allocation2 + $0x130] sm:$0xff]  ;;  %v1242_v60 = vadd.f32 %v2911_v32, %v1171_v57  ;;  %1108 = vst.msk [vmem:[#allocation2 + $0x50] sm:$0xff] %vm256_vm0, %v1043_v52  ;;  %1140 = vst.msk [vmem:[#allocation2 + $0x150] sm:$0xff] %vm256_vm0, %v1075_v53  ;;  %v1339_v1 = vmax.f32 %v1275_v56, 0.0  ;;  %v1174_v10 = vld [vmem:[#allocation2 + $0x48] sm:$0xff]  ;;  %v1045_v12 = vadd.f32 %v774_v4, %v333_v54  ;;  %v1077_v13 = vadd.f32 %v934_v5, %v365_v59 }
 0x15d   : > { %v1274_v61 = vadd.f32 %v2911_v32, %v1203_v58  ;;  %v1206_v11 = vld [vmem:[#allocation2 + $0x148] sm:$0xff]  ;;  %1371 = vst.msk [vmem:[%s2926_s12 + $0x38] sm:$0xff] %vm256_vm0, %v1307_v0  ;;  %v1245_v15 = vadd.f32 %v2911_v32, %v1174_v10  ;;  %1111 = vst.msk [vmem:[#allocation2 + $0x68] sm:$0xff] %vm256_vm0, %v1046_v2  ;;  %v369_v44 = vld [vmem:[#allocation2 + $0x180] sm:$0xff] }
 0x15e   : > { %v1306_v8 = vmax.f32 %v1242_v60, 0.0  ;;  %1403 = vst.msk [vmem:[%s2926_s12 + $0x138] sm:$0xff] %vm256_vm0, %v1339_v1  ;;  %v1277_v16 = vadd.f32 %v2911_v32, %v1206_v11  ;;  %1143 = vst.msk [vmem:[#allocation2 + $0x168] sm:$0xff] %vm256_vm0, %v1078_v3  ;;  %v2121_v22 = vpop.f32.mrb[14].mxu0  ;;  %v2169_v23 = vpop.f32.mrb[14].mxu1  ;;  %v340_v55 = vld [vmem:[#allocation2 + $0x98] sm:$0xff] }
 0x15f   : > { %v1338_v9 = vmax.f32 %v1274_v61, 0.0  ;;  %v1173_v17 = vld [vmem:[#allocation2 + $0x40] sm:$0xff]  ;;  %1110 = vst.msk [vmem:[#allocation2 + $0x60] sm:$0xff] %vm256_vm0, %v1045_v12  ;;  %1142 = vst.msk [vmem:[#allocation2 + $0x160] sm:$0xff] %vm256_vm0, %v1077_v13  ;;  %v1309_v24 = vmax.f32 %v1245_v15, 0.0  ;;  %v1048_v26 = vadd.f32 %v2121_v22, %v336_v6  ;;  %v1080_v27 = vadd.f32 %v2169_v23, %v368_v7  ;;  %v784_v28 = vpop.f32.mrb[15].mxu0 }
 0x160   : > { %v1205_v18 = vld [vmem:[#allocation2 + $0x140] sm:$0xff]  ;;  %1370 = vst.msk [vmem:[%s2926_s12 + $0x30] sm:$0xff] %vm256_vm0, %v1306_v8  ;;  %v1244_v20 = vadd.f32 %v2911_v32, %v1173_v17  ;;  %v1341_v25 = vmax.f32 %v1277_v16, 0.0  ;;  %v944_v29 = vpop.f32.mrb[15].mxu1  ;;  %v1176_v35 = vld [vmem:[#allocation2 + $0x58] sm:$0xff]  ;;  %v1047_v37 = vadd.f32 %v784_v28, %v335_v14  ;;  %v339_v63 = vld [vmem:[#allocation2 + $0x90] sm:$0xff] }
 0x161   : > { %1402 = vst.msk [vmem:[%s2926_s12 + $0x130] sm:$0xff] %vm256_vm0, %v1338_v9  ;;  %v1276_v21 = vadd.f32 %v2911_v32, %v1205_v18  ;;  %v1208_v36 = vld [vmem:[#allocation2 + $0x158] sm:$0xff]  ;;  %v1079_v38 = vadd.f32 %v944_v29, %v367_v19  ;;  %1373 = vst.msk [vmem:[%s2926_s12 + $0x48] sm:$0xff] %vm256_vm0, %v1309_v24  ;;  %v1247_v40 = vadd.f32 %v2911_v32, %v1176_v35  ;;  %v371_v4 = vld [vmem:[#allocation2 + $0x190] sm:$0xff] }
 0x162   : > { %v1308_v33 = vmax.f32 %v1244_v20, 0.0  ;;  %1405 = vst.msk [vmem:[%s2926_s12 + $0x148] sm:$0xff] %vm256_vm0, %v1341_v25  ;;  %v1279_v41 = vadd.f32 %v2911_v32, %v1208_v36  ;;  %1113 = vst.msk [vmem:[#allocation2 + $0x78] sm:$0xff] %vm256_vm0, %v1048_v26  ;;  %v2124_v47 = vpop.f32.mrb[16].mxu0  ;;  %v2172_v48 = vpop.f32.mrb[16].mxu1  ;;  %v372_v56 = vld [vmem:[#allocation2 + $0x198] sm:$0xff] }
 0x163   : > { %v1340_v34 = vmax.f32 %v1276_v21, 0.0  ;;  %v1175_v42 = vld [vmem:[#allocation2 + $0x50] sm:$0xff]  ;;  %1145 = vst.msk [vmem:[#allocation2 + $0x178] sm:$0xff] %vm256_vm0, %v1080_v27  ;;  %1112 = vst.msk [vmem:[#allocation2 + $0x70] sm:$0xff] %vm256_vm0, %v1047_v37  ;;  %v1311_v49 = vmax.f32 %v1247_v40, 0.0  ;;  %v1050_v51 = vadd.f32 %v2124_v47, %v338_v30  ;;  %v1082_v52 = vadd.f32 %v2172_v48, %v370_v31  ;;  %v794_v53 = vpop.f32.mrb[17].mxu0 }
 0x164   : > { %v1207_v43 = vld [vmem:[#allocation2 + $0x150] sm:$0xff]  ;;  %1372 = vst.msk [vmem:[%s2926_s12 + $0x40] sm:$0xff] %vm256_vm0, %v1308_v33  ;;  %v1246_v45 = vadd.f32 %v2911_v32, %v1175_v42  ;;  %1144 = vst.msk [vmem:[#allocation2 + $0x170] sm:$0xff] %vm256_vm0, %v1079_v38  ;;  %v1343_v50 = vmax.f32 %v1279_v41, 0.0  ;;  %v954_v54 = vpop.f32.mrb[17].mxu1  ;;  %v1178_v59 = vld [vmem:[#allocation2 + $0x68] sm:$0xff]  ;;  %v1049_v61 = vadd.f32 %v794_v53, %v337_v39 }
 0x165   : > { %1404 = vst.msk [vmem:[%s2926_s12 + $0x140] sm:$0xff] %vm256_vm0, %v1340_v34  ;;  %v1278_v46 = vadd.f32 %v2911_v32, %v1207_v43  ;;  %v1210_v60 = vld [vmem:[#allocation2 + $0x168] sm:$0xff]  ;;  %v1081_v62 = vadd.f32 %v954_v54, %v369_v44  ;;  %1375 = vst.msk [vmem:[%s2926_s12 + $0x58] sm:$0xff] %vm256_vm0, %v1311_v49  ;;  %v1249_v0 = vadd.f32 %v2911_v32, %v1178_v59  ;;  %v341_v23 = vld [vmem:[#allocation2 + $0xa0] sm:$0xff] }
 0x166   : > { %v1310_v57 = vmax.f32 %v1246_v45, 0.0  ;;  %1407 = vst.msk [vmem:[%s2926_s12 + $0x158] sm:$0xff] %vm256_vm0, %v1343_v50  ;;  %v1281_v1 = vadd.f32 %v2911_v32, %v1210_v60  ;;  %v1177_v2 = vld [vmem:[#allocation2 + $0x60] sm:$0xff]  ;;  %1115 = vst.msk [vmem:[#allocation2 + $0x88] sm:$0xff] %vm256_vm0, %v1050_v51  ;;  %v2127_v7 = vpop.f32.mrb[18].mxu0  ;;  %v2175_v8 = vpop.f32.mrb[18].mxu1 }
 0x167   : > { %v1342_v58 = vmax.f32 %v1278_v46, 0.0  ;;  %v1209_v3 = vld [vmem:[#allocation2 + $0x160] sm:$0xff]  ;;  %1147 = vst.msk [vmem:[#allocation2 + $0x188] sm:$0xff] %vm256_vm0, %v1082_v52  ;;  %v1248_v5 = vadd.f32 %v2911_v32, %v1177_v2  ;;  %1114 = vst.msk [vmem:[#allocation2 + $0x80] sm:$0xff] %vm256_vm0, %v1049_v61  ;;  %v1313_v9 = vmax.f32 %v1249_v0, 0.0  ;;  %v1052_v11 = vadd.f32 %v2127_v7, %v340_v55  ;;  %v804_v13 = vpop.f32.mrb[19].mxu0 }
 0x168   : > { %1374 = vst.msk [vmem:[%s2926_s12 + $0x50] sm:$0xff] %vm256_vm0, %v1310_v57  ;;  %v1280_v6 = vadd.f32 %v2911_v32, %v1209_v3  ;;  %1146 = vst.msk [vmem:[#allocation2 + $0x180] sm:$0xff] %vm256_vm0, %v1081_v62  ;;  %v1345_v10 = vmax.f32 %v1281_v1, 0.0  ;;  %v1084_v12 = vadd.f32 %v2175_v8, %v372_v56  ;;  %v964_v14 = vpop.f32.mrb[19].mxu1  ;;  %v342_v15 = vld [vmem:[#allocation2 + $0xa8] sm:$0xff]  ;;  %v1051_v21 = vadd.f32 %v804_v13, %v339_v63  ;;  %v373_v28 = vld [vmem:[#allocation2 + $0x1a0] sm:$0xff] }
 0x169   : > { %1406 = vst.msk [vmem:[%s2926_s12 + $0x150] sm:$0xff] %vm256_vm0, %v1342_v58  ;;  %v374_v16 = vld [vmem:[#allocation2 + $0x1a8] sm:$0xff]  ;;  %v1312_v17 = vmax.f32 %v1248_v5, 0.0  ;;  %v1180_v19 = vld [vmem:[#allocation2 + $0x78] sm:$0xff]  ;;  %v1083_v22 = vadd.f32 %v964_v14, %v371_v4  ;;  %1377 = vst.msk [vmem:[%s2926_s12 + $0x68] sm:$0xff] %vm256_vm0, %v1313_v9 }
 0x16a   : > { %v1344_v18 = vmax.f32 %v1280_v6, 0.0  ;;  %v1212_v20 = vld [vmem:[#allocation2 + $0x178] sm:$0xff]  ;;  %1409 = vst.msk [vmem:[%s2926_s12 + $0x168] sm:$0xff] %vm256_vm0, %v1345_v10  ;;  %v1251_v24 = vadd.f32 %v2911_v32, %v1180_v19  ;;  %v1179_v26 = vld [vmem:[#allocation2 + $0x70] sm:$0xff]  ;;  %1117 = vst.msk [vmem:[#allocation2 + $0x98] sm:$0xff] %vm256_vm0, %v1052_v11  ;;  %v2130_v31 = vpop.f32.mrb[20].mxu0 }
 0x16b   : > { %v1283_v25 = vadd.f32 %v2911_v32, %v1212_v20  ;;  %v1211_v27 = vld [vmem:[#allocation2 + $0x170] sm:$0xff]  ;;  %1149 = vst.msk [vmem:[#allocation2 + $0x198] sm:$0xff] %vm256_vm0, %v1084_v12  ;;  %1376 = vst.msk [vmem:[%s2926_s12 + $0x60] sm:$0xff] %vm256_vm0, %v1312_v17  ;;  %v1250_v29 = vadd.f32 %v2911_v32, %v1179_v26  ;;  %v2178_v33 = vpop.f32.mrb[20].mxu1  ;;  %v1054_v36 = vadd.f32 %v2130_v31, %v342_v15  ;;  %v814_v38 = vpop.f32.mrb[21].mxu0  ;;  %v344_v40 = vld [vmem:[#allocation2 + $0xb8] sm:$0xff] }
 0x16c   : > { %1408 = vst.msk [vmem:[%s2926_s12 + $0x160] sm:$0xff] %vm256_vm0, %v1344_v18  ;;  %v1282_v30 = vadd.f32 %v2911_v32, %v1211_v27  ;;  %1116 = vst.msk [vmem:[#allocation2 + $0x90] sm:$0xff] %vm256_vm0, %v1051_v21  ;;  %v1315_v34 = vmax.f32 %v1251_v24, 0.0  ;;  %v1086_v37 = vadd.f32 %v2178_v33, %v374_v16  ;;  %v974_v39 = vpop.f32.mrb[21].mxu1  ;;  %v376_v41 = vld [vmem:[#allocation2 + $0x1b8] sm:$0xff]  ;;  %v1053_v46 = vadd.f32 %v814_v38, %v341_v23  ;;  %v343_v48 = vld [vmem:[#allocation2 + $0xb0] sm:$0xff] }
 0x16d   : > { %1148 = vst.msk [vmem:[#allocation2 + $0x190] sm:$0xff] %vm256_vm0, %v1083_v22  ;;  %v1347_v35 = vmax.f32 %v1283_v25, 0.0  ;;  %v1314_v42 = vmax.f32 %v1250_v29, 0.0  ;;  %v1182_v44 = vld [vmem:[#allocation2 + $0x88] sm:$0xff]  ;;  %v1085_v47 = vadd.f32 %v974_v39, %v373_v28  ;;  %1119 = vst.msk [vmem:[#allocation2 + $0xa8] sm:$0xff] %vm256_vm0, %v1054_v36  ;;  %v375_v53 = vld [vmem:[#allocation2 + $0x1b0] sm:$0xff] }
 0x16e   : > { %v1346_v43 = vmax.f32 %v1282_v30, 0.0  ;;  %v1214_v45 = vld [vmem:[#allocation2 + $0x188] sm:$0xff]  ;;  %1379 = vst.msk [vmem:[%s2926_s12 + $0x78] sm:$0xff] %vm256_vm0, %v1315_v34  ;;  %v1253_v49 = vadd.f32 %v2911_v32, %v1182_v44  ;;  %v1181_v51 = vld [vmem:[#allocation2 + $0x80] sm:$0xff]  ;;  %1151 = vst.msk [vmem:[#allocation2 + $0x1a8] sm:$0xff] %vm256_vm0, %v1086_v37  ;;  %v2133_v56 = vpop.f32.mrb[22].mxu0 }
 0x16f   : > { %1411 = vst.msk [vmem:[%s2926_s12 + $0x178] sm:$0xff] %vm256_vm0, %v1347_v35  ;;  %v1285_v50 = vadd.f32 %v2911_v32, %v1214_v45  ;;  %v1213_v52 = vld [vmem:[#allocation2 + $0x180] sm:$0xff]  ;;  %1378 = vst.msk [vmem:[%s2926_s12 + $0x70] sm:$0xff] %vm256_vm0, %v1314_v42  ;;  %v1252_v54 = vadd.f32 %v2911_v32, %v1181_v51  ;;  %v2181_v57 = vpop.f32.mrb[22].mxu1  ;;  %v1056_v60 = vadd.f32 %v2133_v56, %v344_v40  ;;  %v824_v62 = vpop.f32.mrb[23].mxu0  ;;  %v346_v0 = vld [vmem:[#allocation2 + $0xc8] sm:$0xff] }
 0x170   : > { %1410 = vst.msk [vmem:[%s2926_s12 + $0x170] sm:$0xff] %vm256_vm0, %v1346_v43  ;;  %v1284_v55 = vadd.f32 %v2911_v32, %v1213_v52  ;;  %1118 = vst.msk [vmem:[#allocation2 + $0xa0] sm:$0xff] %vm256_vm0, %v1053_v46  ;;  %v1317_v58 = vmax.f32 %v1253_v49, 0.0  ;;  %v1088_v61 = vadd.f32 %v2181_v57, %v376_v41  ;;  %v984_v63 = vpop.f32.mrb[23].mxu1  ;;  %v378_v1 = vld [vmem:[#allocation2 + $0x1c8] sm:$0xff]  ;;  %v1055_v6 = vadd.f32 %v824_v62, %v343_v48  ;;  %v345_v8 = vld [vmem:[#allocation2 + $0xc0] sm:$0xff] }
 0x171   : > { %1150 = vst.msk [vmem:[#allocation2 + $0x1a0] sm:$0xff] %vm256_vm0, %v1085_v47  ;;  %v1349_v59 = vmax.f32 %v1285_v50, 0.0  ;;  %v1316_v2 = vmax.f32 %v1252_v54, 0.0  ;;  %v1184_v4 = vld [vmem:[#allocation2 + $0x98] sm:$0xff]  ;;  %v1087_v7 = vadd.f32 %v984_v63, %v375_v53  ;;  %1121 = vst.msk [vmem:[#allocation2 + $0xb8] sm:$0xff] %vm256_vm0, %v1056_v60  ;;  %v377_v13 = vld [vmem:[#allocation2 + $0x1c0] sm:$0xff] }
 0x172   : > { %v1348_v3 = vmax.f32 %v1284_v55, 0.0  ;;  %v1216_v5 = vld [vmem:[#allocation2 + $0x198] sm:$0xff]  ;;  %1381 = vst.msk [vmem:[%s2926_s12 + $0x88] sm:$0xff] %vm256_vm0, %v1317_v58  ;;  %v1255_v9 = vadd.f32 %v2911_v32, %v1184_v4  ;;  %1153 = vst.msk [vmem:[#allocation2 + $0x1b8] sm:$0xff] %vm256_vm0, %v1088_v61  ;;  %v2136_v16 = vpop.f32.mrb[24].mxu0  ;;  %v2184_v17 = vpop.f32.mrb[24].mxu1 }
 0x173   : > { %1413 = vst.msk [vmem:[%s2926_s12 + $0x188] sm:$0xff] %vm256_vm0, %v1349_v59  ;;  %v1287_v10 = vadd.f32 %v2911_v32, %v1216_v5  ;;  %v1183_v11 = vld [vmem:[#allocation2 + $0x90] sm:$0xff]  ;;  %1380 = vst.msk [vmem:[%s2926_s12 + $0x80] sm:$0xff] %vm256_vm0, %v1316_v2  ;;  %v1058_v20 = vadd.f32 %v2136_v16, %v346_v0  ;;  %v1090_v21 = vadd.f32 %v2184_v17, %v378_v1  ;;  %v834_v22 = vpop.f32.mrb[25].mxu0  ;;  %v994_v23 = vpop.f32.mrb[25].mxu1  ;;  %v348_v24 = vld [vmem:[#allocation2 + $0xd8] sm:$0xff] }
 0x174   : > { %v1215_v12 = vld [vmem:[#allocation2 + $0x190] sm:$0xff]  ;;  %1412 = vst.msk [vmem:[%s2926_s12 + $0x180] sm:$0xff] %vm256_vm0, %v1348_v3  ;;  %v1254_v14 = vadd.f32 %v2911_v32, %v1183_v11  ;;  %1120 = vst.msk [vmem:[#allocation2 + $0xb0] sm:$0xff] %vm256_vm0, %v1055_v6  ;;  %v1319_v18 = vmax.f32 %v1255_v9, 0.0  ;;  %v380_v25 = vld [vmem:[#allocation2 + $0x1d8] sm:$0xff]  ;;  %v1057_v30 = vadd.f32 %v834_v22, %v345_v8  ;;  %v1089_v31 = vadd.f32 %v994_v23, %v377_v13 }
 0x175   : > { %v1286_v15 = vadd.f32 %v2911_v32, %v1215_v12  ;;  %1152 = vst.msk [vmem:[#allocation2 + $0x1b0] sm:$0xff] %vm256_vm0, %v1087_v7  ;;  %v1351_v19 = vmax.f32 %v1287_v10, 0.0  ;;  %v1186_v28 = vld [vmem:[#allocation2 + $0xa8] sm:$0xff]  ;;  %v347_v33 = vld [vmem:[#allocation2 + $0xd0] sm:$0xff]  ;;  %1123 = vst.msk [vmem:[#allocation2 + $0xc8] sm:$0xff] %vm256_vm0, %v1058_v20 }
 0x176   : > { %v1318_v26 = vmax.f32 %v1254_v14, 0.0  ;;  %v1218_v29 = vld [vmem:[#allocation2 + $0x1a8] sm:$0xff]  ;;  %1383 = vst.msk [vmem:[%s2926_s12 + $0x98] sm:$0xff] %vm256_vm0, %v1319_v18  ;;  %v1257_v34 = vadd.f32 %v2911_v32, %v1186_v28  ;;  %1155 = vst.msk [vmem:[#allocation2 + $0x1c8] sm:$0xff] %vm256_vm0, %v1090_v21  ;;  %v379_v38 = vld [vmem:[#allocation2 + $0x1d0] sm:$0xff]  ;;  %v2139_v41 = vpop.f32.mrb[26].mxu0 }
 0x177   : > { %v1350_v27 = vmax.f32 %v1286_v15, 0.0  ;;  %1415 = vst.msk [vmem:[%s2926_s12 + $0x198] sm:$0xff] %vm256_vm0, %v1351_v19  ;;  %v1289_v35 = vadd.f32 %v2911_v32, %v1218_v29  ;;  %v1185_v36 = vld [vmem:[#allocation2 + $0xa0] sm:$0xff]  ;;  %1122 = vst.msk [vmem:[#allocation2 + $0xc0] sm:$0xff] %vm256_vm0, %v1057_v30  ;;  %v2187_v42 = vpop.f32.mrb[26].mxu1  ;;  %v1060_v45 = vadd.f32 %v2139_v41, %v348_v24  ;;  %v844_v47 = vpop.f32.mrb[27].mxu0 }
 0x178   : > { %v1217_v37 = vld [vmem:[#allocation2 + $0x1a0] sm:$0xff]  ;;  %1382 = vst.msk [vmem:[%s2926_s12 + $0x90] sm:$0xff] %vm256_vm0, %v1318_v26  ;;  %v1256_v39 = vadd.f32 %v2911_v32, %v1185_v36  ;;  %1154 = vst.msk [vmem:[#allocation2 + $0x1c0] sm:$0xff] %vm256_vm0, %v1089_v31  ;;  %v1321_v43 = vmax.f32 %v1257_v34, 0.0  ;;  %v1092_v46 = vadd.f32 %v2187_v42, %v380_v25  ;;  %v1004_v48 = vpop.f32.mrb[27].mxu1  ;;  %v350_v49 = vld [vmem:[#allocation2 + $0xe8] sm:$0xff]  ;;  %v1059_v55 = vadd.f32 %v844_v47, %v347_v33 }
 0x179   : > { %1414 = vst.msk [vmem:[%s2926_s12 + $0x190] sm:$0xff] %vm256_vm0, %v1350_v27  ;;  %v1288_v40 = vadd.f32 %v2911_v32, %v1217_v37  ;;  %v1353_v44 = vmax.f32 %v1289_v35, 0.0  ;;  %v382_v50 = vld [vmem:[#allocation2 + $0x1e8] sm:$0xff]  ;;  %v1188_v53 = vld [vmem:[#allocation2 + $0xb8] sm:$0xff]  ;;  %v1091_v56 = vadd.f32 %v1004_v48, %v379_v38  ;;  %v349_v57 = vld [vmem:[#allocation2 + $0xe0] sm:$0xff] }
 0x17a   : > { %v1320_v51 = vmax.f32 %v1256_v39, 0.0  ;;  %v1220_v54 = vld [vmem:[#allocation2 + $0x1b8] sm:$0xff]  ;;  %1385 = vst.msk [vmem:[%s2926_s12 + $0xa8] sm:$0xff] %vm256_vm0, %v1321_v43  ;;  %v1259_v58 = vadd.f32 %v2911_v32, %v1188_v53  ;;  %1125 = vst.msk [vmem:[#allocation2 + $0xd8] sm:$0xff] %vm256_vm0, %v1060_v45  ;;  %v381_v62 = vld [vmem:[#allocation2 + $0x1e0] sm:$0xff]  ;;  %v2142_v1 = vpop.f32.mrb[28].mxu0 }
 0x17b   : > { %v1352_v52 = vmax.f32 %v1288_v40, 0.0  ;;  %1417 = vst.msk [vmem:[%s2926_s12 + $0x1a8] sm:$0xff] %vm256_vm0, %v1353_v44  ;;  %v1291_v59 = vadd.f32 %v2911_v32, %v1220_v54  ;;  %v1187_v60 = vld [vmem:[#allocation2 + $0xb0] sm:$0xff]  ;;  %1157 = vst.msk [vmem:[#allocation2 + $0x1d8] sm:$0xff] %vm256_vm0, %v1092_v46  ;;  %v2190_v2 = vpop.f32.mrb[28].mxu1  ;;  %v1062_v5 = vadd.f32 %v2142_v1, %v350_v49  ;;  %v854_v7 = vpop.f32.mrb[29].mxu0 }
 0x17c   : > { %v1219_v61 = vld [vmem:[#allocation2 + $0x1b0] sm:$0xff]  ;;  %1384 = vst.msk [vmem:[%s2926_s12 + $0xa0] sm:$0xff] %vm256_vm0, %v1320_v51  ;;  %v1258_v63 = vadd.f32 %v2911_v32, %v1187_v60  ;;  %1124 = vst.msk [vmem:[#allocation2 + $0xd0] sm:$0xff] %vm256_vm0, %v1059_v55  ;;  %v1323_v3 = vmax.f32 %v1259_v58, 0.0  ;;  %v1094_v6 = vadd.f32 %v2190_v2, %v382_v50  ;;  %v1014_v8 = vpop.f32.mrb[29].mxu1  ;;  %v352_v9 = vld [vmem:[#allocation2 + $0xf8] sm:$0xff]  ;;  %v1061_v15 = vadd.f32 %v854_v7, %v349_v57 }
 0x17d   : > { %1416 = vst.msk [vmem:[%s2926_s12 + $0x1a0] sm:$0xff] %vm256_vm0, %v1352_v52  ;;  %v1290_v0 = vadd.f32 %v2911_v32, %v1219_v61  ;;  %1156 = vst.msk [vmem:[#allocation2 + $0x1d0] sm:$0xff] %vm256_vm0, %v1091_v56  ;;  %v1355_v4 = vmax.f32 %v1291_v59, 0.0  ;;  %v384_v10 = vld [vmem:[#allocation2 + $0x1f8] sm:$0xff]  ;;  %v1190_v13 = vld [vmem:[#allocation2 + $0xc8] sm:$0xff]  ;;  %v1093_v16 = vadd.f32 %v1014_v8, %v381_v62 }
 0x17e   : > { %v1322_v11 = vmax.f32 %v1258_v63, 0.0  ;;  %v1222_v14 = vld [vmem:[#allocation2 + $0x1c8] sm:$0xff]  ;;  %v351_v17 = vld [vmem:[#allocation2 + $0xf0] sm:$0xff]  ;;  %1387 = vst.msk [vmem:[%s2926_s12 + $0xb8] sm:$0xff] %vm256_vm0, %v1323_v3  ;;  %v1261_v18 = vadd.f32 %v2911_v32, %v1190_v13  ;;  %v1189_v20 = vld [vmem:[#allocation2 + $0xc0] sm:$0xff]  ;;  %v2145_v25 = vpop.f32.mrb[30].mxu0 }
 0x17f   : > { %v1354_v12 = vmax.f32 %v1290_v0, 0.0  ;;  %1419 = vst.msk [vmem:[%s2926_s12 + $0x1b8] sm:$0xff] %vm256_vm0, %v1355_v4  ;;  %v1293_v19 = vadd.f32 %v2911_v32, %v1222_v14  ;;  %v1221_v21 = vld [vmem:[#allocation2 + $0x1c0] sm:$0xff]  ;;  %1127 = vst.msk [vmem:[#allocation2 + $0xe8] sm:$0xff] %vm256_vm0, %v1062_v5  ;;  %v383_v22 = vld [vmem:[#allocation2 + $0x1f0] sm:$0xff]  ;;  %v1260_v23 = vadd.f32 %v2911_v32, %v1189_v20  ;;  %v2193_v26 = vpop.f32.mrb[30].mxu1  ;;  %v1064_v29 = vadd.f32 %v2145_v25, %v352_v9 }
 0x180   : > { %1159 = vst.msk [vmem:[#allocation2 + $0x1e8] sm:$0xff] %vm256_vm0, %v1094_v6  ;;  %1386 = vst.msk [vmem:[%s2926_s12 + $0xb0] sm:$0xff] %vm256_vm0, %v1322_v11  ;;  %v1292_v24 = vadd.f32 %v2911_v32, %v1221_v21  ;;  %v1325_v27 = vmax.f32 %v1261_v18, 0.0  ;;  %v1096_v30 = vadd.f32 %v2193_v26, %v384_v10  ;;  %v864_v31 = vpop.f32.mrb[31].mxu0  ;;  %v1024_v33 = vpop.f32.mrb[31].mxu1 }
 0x181   : > { %1418 = vst.msk [vmem:[%s2926_s12 + $0x1b0] sm:$0xff] %vm256_vm0, %v1354_v12  ;;  %1126 = vst.msk [vmem:[#allocation2 + $0xe0] sm:$0xff] %vm256_vm0, %v1061_v15  ;;  %v1357_v28 = vmax.f32 %v1293_v19, 0.0  ;;  %v1324_v34 = vmax.f32 %v1260_v23, 0.0  ;;  %v1192_v36 = vld [vmem:[#allocation2 + $0xd8] sm:$0xff]  ;;  %v1063_v38 = vadd.f32 %v864_v31, %v351_v17  ;;  %v1095_v39 = vadd.f32 %v1024_v33, %v383_v22 }
 0x182   : > { %1158 = vst.msk [vmem:[#allocation2 + $0x1e0] sm:$0xff] %vm256_vm0, %v1093_v16  ;;  %v1356_v35 = vmax.f32 %v1292_v24, 0.0  ;;  %v1224_v37 = vld [vmem:[#allocation2 + $0x1d8] sm:$0xff]  ;;  %1389 = vst.msk [vmem:[%s2926_s12 + $0xc8] sm:$0xff] %vm256_vm0, %v1325_v27  ;;  %v1263_v40 = vadd.f32 %v2911_v32, %v1192_v36 }
 0x183   : > { %1421 = vst.msk [vmem:[%s2926_s12 + $0x1c8] sm:$0xff] %vm256_vm0, %v1357_v28  ;;  %v1295_v41 = vadd.f32 %v2911_v32, %v1224_v37  ;;  %v1191_v42 = vld [vmem:[#allocation2 + $0xd0] sm:$0xff]  ;;  %1129 = vst.msk [vmem:[#allocation2 + $0xf8] sm:$0xff] %vm256_vm0, %v1064_v29 }
 0x184   : > { %v1223_v43 = vld [vmem:[#allocation2 + $0x1d0] sm:$0xff]  ;;  %1161 = vst.msk [vmem:[#allocation2 + $0x1f8] sm:$0xff] %vm256_vm0, %v1096_v30  ;;  %1388 = vst.msk [vmem:[%s2926_s12 + $0xc0] sm:$0xff] %vm256_vm0, %v1324_v34  ;;  %v1262_v44 = vadd.f32 %v2911_v32, %v1191_v42  ;;  %v1327_v46 = vmax.f32 %v1263_v40, 0.0 }
 0x185   : > { %1420 = vst.msk [vmem:[%s2926_s12 + $0x1c0] sm:$0xff] %vm256_vm0, %v1356_v35  ;;  %v1294_v45 = vadd.f32 %v2911_v32, %v1223_v43  ;;  %1128 = vst.msk [vmem:[#allocation2 + $0xf0] sm:$0xff] %vm256_vm0, %v1063_v38  ;;  %v1359_v47 = vmax.f32 %v1295_v41, 0.0 }
 0x186   : > { %1160 = vst.msk [vmem:[#allocation2 + $0x1f0] sm:$0xff] %vm256_vm0, %v1095_v39  ;;  %v1326_v48 = vmax.f32 %v1262_v44, 0.0  ;;  %v1194_v50 = vld [vmem:[#allocation2 + $0xe8] sm:$0xff]  ;;  %1391 = vst.msk [vmem:[%s2926_s12 + $0xd8] sm:$0xff] %vm256_vm0, %v1327_v46 }
 0x187   : > { %v1358_v49 = vmax.f32 %v1294_v45, 0.0  ;;  %v1226_v51 = vld [vmem:[#allocation2 + $0x1e8] sm:$0xff]  ;;  %1423 = vst.msk [vmem:[%s2926_s12 + $0x1d8] sm:$0xff] %vm256_vm0, %v1359_v47  ;;  %v1265_v52 = vadd.f32 %v2911_v32, %v1194_v50 }
 0x188   : > { %v1297_v53 = vadd.f32 %v2911_v32, %v1226_v51  ;;  %v1193_v54 = vld [vmem:[#allocation2 + $0xe0] sm:$0xff]  ;;  %1390 = vst.msk [vmem:[%s2926_s12 + $0xd0] sm:$0xff] %vm256_vm0, %v1326_v48 }
 0x189   : > { %v1225_v55 = vld [vmem:[#allocation2 + $0x1e0] sm:$0xff]  ;;  %1422 = vst.msk [vmem:[%s2926_s12 + $0x1d0] sm:$0xff] %vm256_vm0, %v1358_v49  ;;  %v1264_v56 = vadd.f32 %v2911_v32, %v1193_v54  ;;  %v1329_v58 = vmax.f32 %v1265_v52, 0.0 }
 0x18a   : > { %v1296_v57 = vadd.f32 %v2911_v32, %v1225_v55  ;;  %v1361_v59 = vmax.f32 %v1297_v53, 0.0  ;;  %v1196_v62 = vld [vmem:[#allocation2 + $0xf8] sm:$0xff] }
 0x18b   : > { %v1328_v60 = vmax.f32 %v1264_v56, 0.0  ;;  %v1228_v63 = vld [vmem:[#allocation2 + $0x1f8] sm:$0xff]  ;;  %1393 = vst.msk [vmem:[%s2926_s12 + $0xe8] sm:$0xff] %vm256_vm0, %v1329_v58  ;;  %v1267_v0 = vadd.f32 %v2911_v32, %v1196_v62 }
 0x18c   : > { %v1360_v61 = vmax.f32 %v1296_v57, 0.0  ;;  %1425 = vst.msk [vmem:[%s2926_s12 + $0x1e8] sm:$0xff] %vm256_vm0, %v1361_v59  ;;  %v1299_v1 = vadd.f32 %v2911_v32, %v1228_v63  ;;  %v1195_v2 = vld [vmem:[#allocation2 + $0xf0] sm:$0xff]  ;;  %1434 = sbr.rel (!%p3392_p12) target bundleno = 475 (0x1db), region = 52 }
 0x18d   : > { %v1227_v3 = vld [vmem:[#allocation2 + $0x1f0] sm:$0xff]  ;;  %1392 = vst.msk [vmem:[%s2926_s12 + $0xe0] sm:$0xff] %vm256_vm0, %v1328_v60  ;;  %v1266_v4 = vadd.f32 %v2911_v32, %v1195_v2  ;;  %v1331_v6 = vmax.f32 %v1267_v0, 0.0 }
 0x18e   : > { %1424 = vst.msk [vmem:[%s2926_s12 + $0x1e0] sm:$0xff] %vm256_vm0, %v1360_v61  ;;  %v1298_v5 = vadd.f32 %v2911_v32, %v1227_v3  ;;  %v1363_v7 = vmax.f32 %v1299_v1, 0.0 }
 0x18f   : > { %v1330_v8 = vmax.f32 %v1266_v4, 0.0  ;;  %1395 = vst.msk [vmem:[%s2926_s12 + $0xf8] sm:$0xff] %vm256_vm0, %v1331_v6 }
 0x190   : > { %v1362_v9 = vmax.f32 %v1298_v5, 0.0  ;;  %1427 = vst.msk [vmem:[%s2926_s12 + $0x1f8] sm:$0xff] %vm256_vm0, %v1363_v7 }
 0x191   : > { %1394 = vst.msk [vmem:[%s2926_s12 + $0xf0] sm:$0xff] %vm256_vm0, %v1330_v8 }
 0x192   : > { %1426 = vst.msk [vmem:[%s2926_s12 + $0x1f0] sm:$0xff] %vm256_vm0, %v1362_v9 }
 0x193   : > { %s3405_s25 = smov (!%p1437_p8, %s1436_s25), 64 }
 0x194   : > { %s2010_s6 = sshll.u32 %s3405_s25, 7 }
 0x195   : > { %p2013_p11 = scmp.eq.s32.totalorder %s2010_s6, 0 }
 0x196   : > { %s3181_s7 = sshrl.u32 (!%p2013_p11), %s3405_s25, 6 }
 0x197   : > { %1445 = sbr.rel (%p2013_p11) target bundleno = 475 (0x1db), region = 56  ;;  %p2014_p13 = scmp.le.s32.totalorder (!%p2013_p11), %s3181_s7, 0 }
 0x19e   : > { %1860 = sbr.rel (%p2014_p13) target bundleno = 454 (0x1c6), region = 134  ;;  %s3393_s14 = smov (!%p2014_p13), %s3175_s5 }
 0x19f   : > { %s3394_s20 = smov (!%p2014_p13), %s2926_s12  ;;  %s3190_s26 = smov (!%p2014_p13), 0  }
 0x1a0   : > { %s3192_s8 = smov (!%p2014_p13), 0  }
 0x1a5 LB: >> { %v1633_v32 = vld [vmem:[%s2473_s20] sm:$0xff]  ;;  %v1635_v10 = vld [vmem:[%s2473_s20 + $0x8] sm:$0xff]  ;;  %v1637_v11 = vld [vmem:[%s2473_s20 + $0x10] sm:$0xff]  ;;  %s1761_s9 = sadd.s32 1, %s2477_s26  ;;  %s1627_s8 = sadd.s32 1, %s2481_s8   ;;  %s2481_s8 = sphi %s3192_s8, %s1627_s8   ;;  %s2477_s26 = sphi %s3190_s26, %s3397_s26   ;;  %s2473_s20 = sphi %s3394_s20, %s3396_s20   ;;  %s2469_s14 = sphi %s3393_s14, %s3395_s14  }
 0x1a6   : >> { %1634 = vst [vmem:[%s2469_s14] sm:$0xff] %v1633_v32  ;;  %1636 = vst [vmem:[%s2469_s14 + $0x8] sm:$0xff] %v1635_v10  ;;  %v1639_v12 = vld [vmem:[%s2473_s20 + $0x18] sm:$0xff]  ;;  %v1641_v13 = vld [vmem:[%s2473_s20 + $0x20] sm:$0xff]  ;;  %p1762_p0 = scmp.ge.s32.totalorder %s1761_s9, %s3181_s7  ;;  %p1626_p1 = scmp.ge.s32.totalorder %s1627_s8, %s3181_s7 }
 0x1a7   : >> { %1638 = vst [vmem:[%s2469_s14 + $0x10] sm:$0xff] %v1637_v11  ;;  %v1643_v14 = vld [vmem:[%s2473_s20 + $0x28] sm:$0xff]  ;;  %1640 = vst [vmem:[%s2469_s14 + $0x18] sm:$0xff] %v1639_v12  ;;  %v1645_v15 = vld [vmem:[%s2473_s20 + $0x30] sm:$0xff] }
 0x1a8   : >> { %1642 = vst [vmem:[%s2469_s14 + $0x20] sm:$0xff] %v1641_v13  ;;  %1644 = vst [vmem:[%s2469_s14 + $0x28] sm:$0xff] %v1643_v14  ;;  %v1647_v16 = vld [vmem:[%s2473_s20 + $0x38] sm:$0xff]  ;;  %v1649_v17 = vld [vmem:[%s2473_s20 + $0x40] sm:$0xff]  ;;  %s3407_s9 = smov (%p1762_p0, %s1761_s9), 0 }
 0x1a9   : >> { %1646 = vst [vmem:[%s2469_s14 + $0x30] sm:$0xff] %v1645_v15  ;;  %1648 = vst [vmem:[%s2469_s14 + $0x38] sm:$0xff] %v1647_v16  ;;  %v1651_v18 = vld [vmem:[%s2473_s20 + $0x48] sm:$0xff]  ;;  %v1653_v19 = vld [vmem:[%s2473_s20 + $0x50] sm:$0xff]  ;;  %s2015_s10 = sshll.u32 %s3407_s9, 9  ;;  %s3397_s26 = smov %s3407_s9 }
 0x1aa   : >> { %1650 = vst [vmem:[%s2469_s14 + $0x40] sm:$0xff] %v1649_v17  ;;  %v1655_v20 = vld [vmem:[%s2473_s20 + $0x58] sm:$0xff]  ;;  %1652 = vst [vmem:[%s2469_s14 + $0x48] sm:$0xff] %v1651_v18  ;;  %v1657_v21 = vld [vmem:[%s2473_s20 + $0x60] sm:$0xff]  ;;  %s3248_s27 = scalar_lea.vmem %s2926_s12, %s2015_s10 [#allocation7]   ;;  %s3251_s22 = scalar_lea.vmem %s3175_s5, %s2015_s10  }
 0x1ab   : >> { %1654 = vst [vmem:[%s2469_s14 + $0x50] sm:$0xff] %v1653_v19  ;;  %1656 = vst [vmem:[%s2469_s14 + $0x58] sm:$0xff] %v1655_v20  ;;  %v1659_v22 = vld [vmem:[%s2473_s20 + $0x68] sm:$0xff]  ;;  %v1661_v23 = vld [vmem:[%s2473_s20 + $0x70] sm:$0xff] }
 0x1ac   : >> { %1658 = vst [vmem:[%s2469_s14 + $0x60] sm:$0xff] %v1657_v21  ;;  %1660 = vst [vmem:[%s2469_s14 + $0x68] sm:$0xff] %v1659_v22  ;;  %v1663_v24 = vld [vmem:[%s2473_s20 + $0x78] sm:$0xff]  ;;  %v1665_v25 = vld [vmem:[%s2473_s20 + $0x80] sm:$0xff] }
 0x1ad   : >> { %1662 = vst [vmem:[%s2469_s14 + $0x70] sm:$0xff] %v1661_v23  ;;  %v1667_v26 = vld [vmem:[%s2473_s20 + $0x88] sm:$0xff]  ;;  %1664 = vst [vmem:[%s2469_s14 + $0x78] sm:$0xff] %v1663_v24  ;;  %v1669_v27 = vld [vmem:[%s2473_s20 + $0x90] sm:$0xff] }
 0x1ae   : >> { %1666 = vst [vmem:[%s2469_s14 + $0x80] sm:$0xff] %v1665_v25  ;;  %1668 = vst [vmem:[%s2469_s14 + $0x88] sm:$0xff] %v1667_v26  ;;  %v1671_v28 = vld [vmem:[%s2473_s20 + $0x98] sm:$0xff]  ;;  %v1673_v29 = vld [vmem:[%s2473_s20 + $0xa0] sm:$0xff] }
 0x1af   : >> { %1670 = vst [vmem:[%s2469_s14 + $0x90] sm:$0xff] %v1669_v27  ;;  %1672 = vst [vmem:[%s2469_s14 + $0x98] sm:$0xff] %v1671_v28  ;;  %v1675_v30 = vld [vmem:[%s2473_s20 + $0xa8] sm:$0xff]  ;;  %v1677_v31 = vld [vmem:[%s2473_s20 + $0xb0] sm:$0xff] }
 0x1b0   : >> { %1674 = vst [vmem:[%s2469_s14 + $0xa0] sm:$0xff] %v1673_v29  ;;  %v1679_v33 = vld [vmem:[%s2473_s20 + $0xb8] sm:$0xff]  ;;  %1676 = vst [vmem:[%s2469_s14 + $0xa8] sm:$0xff] %v1675_v30  ;;  %v1681_v34 = vld [vmem:[%s2473_s20 + $0xc0] sm:$0xff] }
 0x1b1   : >> { %1678 = vst [vmem:[%s2469_s14 + $0xb0] sm:$0xff] %v1677_v31  ;;  %1680 = vst [vmem:[%s2469_s14 + $0xb8] sm:$0xff] %v1679_v33  ;;  %v1683_v35 = vld [vmem:[%s2473_s20 + $0xc8] sm:$0xff]  ;;  %v1685_v36 = vld [vmem:[%s2473_s20 + $0xd0] sm:$0xff] }
 0x1b2   : >> { %1682 = vst [vmem:[%s2469_s14 + $0xc0] sm:$0xff] %v1681_v34  ;;  %1684 = vst [vmem:[%s2469_s14 + $0xc8] sm:$0xff] %v1683_v35  ;;  %v1687_v37 = vld [vmem:[%s2473_s20 + $0xd8] sm:$0xff]  ;;  %v1689_v38 = vld [vmem:[%s2473_s20 + $0xe0] sm:$0xff] }
 0x1b3   : >> { %1686 = vst [vmem:[%s2469_s14 + $0xd0] sm:$0xff] %v1685_v36  ;;  %v1691_v39 = vld [vmem:[%s2473_s20 + $0xe8] sm:$0xff]  ;;  %1688 = vst [vmem:[%s2469_s14 + $0xd8] sm:$0xff] %v1687_v37  ;;  %v1693_v40 = vld [vmem:[%s2473_s20 + $0xf0] sm:$0xff] }
 0x1b4   : >> { %1690 = vst [vmem:[%s2469_s14 + $0xe0] sm:$0xff] %v1689_v38  ;;  %1692 = vst [vmem:[%s2469_s14 + $0xe8] sm:$0xff] %v1691_v39  ;;  %v1695_v41 = vld [vmem:[%s2473_s20 + $0xf8] sm:$0xff]  ;;  %v1697_v42 = vld [vmem:[%s2473_s20 + $0x100] sm:$0xff] }
 0x1b5   : >> { %1694 = vst [vmem:[%s2469_s14 + $0xf0] sm:$0xff] %v1693_v40  ;;  %1696 = vst [vmem:[%s2469_s14 + $0xf8] sm:$0xff] %v1695_v41  ;;  %v1699_v43 = vld [vmem:[%s2473_s20 + $0x108] sm:$0xff]  ;;  %v1701_v44 = vld [vmem:[%s2473_s20 + $0x110] sm:$0xff] }
 0x1b6   : >> { %1698 = vst [vmem:[%s2469_s14 + $0x100] sm:$0xff] %v1697_v42  ;;  %v1703_v45 = vld [vmem:[%s2473_s20 + $0x118] sm:$0xff]  ;;  %1700 = vst [vmem:[%s2469_s14 + $0x108] sm:$0xff] %v1699_v43  ;;  %v1705_v46 = vld [vmem:[%s2473_s20 + $0x120] sm:$0xff] }
 0x1b7   : >> { %1702 = vst [vmem:[%s2469_s14 + $0x110] sm:$0xff] %v1701_v44  ;;  %1704 = vst [vmem:[%s2469_s14 + $0x118] sm:$0xff] %v1703_v45  ;;  %v1707_v47 = vld [vmem:[%s2473_s20 + $0x128] sm:$0xff]  ;;  %v1709_v48 = vld [vmem:[%s2473_s20 + $0x130] sm:$0xff] }
 0x1b8   : >> { %1706 = vst [vmem:[%s2469_s14 + $0x120] sm:$0xff] %v1705_v46  ;;  %1708 = vst [vmem:[%s2469_s14 + $0x128] sm:$0xff] %v1707_v47  ;;  %v1711_v49 = vld [vmem:[%s2473_s20 + $0x138] sm:$0xff]  ;;  %v1713_v50 = vld [vmem:[%s2473_s20 + $0x140] sm:$0xff] }
 0x1b9   : >> { %1710 = vst [vmem:[%s2469_s14 + $0x130] sm:$0xff] %v1709_v48  ;;  %v1715_v51 = vld [vmem:[%s2473_s20 + $0x148] sm:$0xff]  ;;  %1712 = vst [vmem:[%s2469_s14 + $0x138] sm:$0xff] %v1711_v49  ;;  %v1717_v52 = vld [vmem:[%s2473_s20 + $0x150] sm:$0xff] }
 0x1ba   : >> { %1714 = vst [vmem:[%s2469_s14 + $0x140] sm:$0xff] %v1713_v50  ;;  %1716 = vst [vmem:[%s2469_s14 + $0x148] sm:$0xff] %v1715_v51  ;;  %v1719_v53 = vld [vmem:[%s2473_s20 + $0x158] sm:$0xff]  ;;  %v1721_v54 = vld [vmem:[%s2473_s20 + $0x160] sm:$0xff] }
 0x1bb   : >> { %1718 = vst [vmem:[%s2469_s14 + $0x150] sm:$0xff] %v1717_v52  ;;  %1720 = vst [vmem:[%s2469_s14 + $0x158] sm:$0xff] %v1719_v53  ;;  %v1723_v55 = vld [vmem:[%s2473_s20 + $0x168] sm:$0xff]  ;;  %v1725_v56 = vld [vmem:[%s2473_s20 + $0x170] sm:$0xff] }
 0x1bc   : >> { %1722 = vst [vmem:[%s2469_s14 + $0x160] sm:$0xff] %v1721_v54  ;;  %v1727_v57 = vld [vmem:[%s2473_s20 + $0x178] sm:$0xff]  ;;  %1724 = vst [vmem:[%s2469_s14 + $0x168] sm:$0xff] %v1723_v55  ;;  %v1729_v58 = vld [vmem:[%s2473_s20 + $0x180] sm:$0xff] }
 0x1bd   : >> { %1726 = vst [vmem:[%s2469_s14 + $0x170] sm:$0xff] %v1725_v56  ;;  %1728 = vst [vmem:[%s2469_s14 + $0x178] sm:$0xff] %v1727_v57  ;;  %v1731_v59 = vld [vmem:[%s2473_s20 + $0x188] sm:$0xff]  ;;  %v1733_v60 = vld [vmem:[%s2473_s20 + $0x190] sm:$0xff] }
 0x1be   : >> { %1730 = vst [vmem:[%s2469_s14 + $0x180] sm:$0xff] %v1729_v58  ;;  %1732 = vst [vmem:[%s2469_s14 + $0x188] sm:$0xff] %v1731_v59  ;;  %v1735_v61 = vld [vmem:[%s2473_s20 + $0x198] sm:$0xff]  ;;  %v1737_v62 = vld [vmem:[%s2473_s20 + $0x1a0] sm:$0xff] }
 0x1bf   : >> { %1734 = vst [vmem:[%s2469_s14 + $0x190] sm:$0xff] %v1733_v60  ;;  %v1739_v63 = vld [vmem:[%s2473_s20 + $0x1a8] sm:$0xff]  ;;  %1736 = vst [vmem:[%s2469_s14 + $0x198] sm:$0xff] %v1735_v61  ;;  %v1741_v0 = vld [vmem:[%s2473_s20 + $0x1b0] sm:$0xff]  ;;  %1629 = sbr.rel (!%p1626_p1) target bundleno = 421 (0x1a5), region = 140 }
 0x1c0   : >> { %1738 = vst [vmem:[%s2469_s14 + $0x1a0] sm:$0xff] %v1737_v62  ;;  %1740 = vst [vmem:[%s2469_s14 + $0x1a8] sm:$0xff] %v1739_v63  ;;  %v1743_v1 = vld [vmem:[%s2473_s20 + $0x1b8] sm:$0xff]  ;;  %v1745_v2 = vld [vmem:[%s2473_s20 + $0x1c0] sm:$0xff] }
 0x1c1   : >> { %1742 = vst [vmem:[%s2469_s14 + $0x1b0] sm:$0xff] %v1741_v0  ;;  %1744 = vst [vmem:[%s2469_s14 + $0x1b8] sm:$0xff] %v1743_v1  ;;  %v1747_v3 = vld [vmem:[%s2473_s20 + $0x1c8] sm:$0xff]  ;;  %v1749_v4 = vld [vmem:[%s2473_s20 + $0x1d0] sm:$0xff] }
 0x1c2   : >> { %1746 = vst [vmem:[%s2469_s14 + $0x1c0] sm:$0xff] %v1745_v2  ;;  %v1751_v5 = vld [vmem:[%s2473_s20 + $0x1d8] sm:$0xff]  ;;  %1748 = vst [vmem:[%s2469_s14 + $0x1c8] sm:$0xff] %v1747_v3  ;;  %v1753_v6 = vld [vmem:[%s2473_s20 + $0x1e0] sm:$0xff] }
 0x1c3   : >> { %1750 = vst [vmem:[%s2469_s14 + $0x1d0] sm:$0xff] %v1749_v4  ;;  %1752 = vst [vmem:[%s2469_s14 + $0x1d8] sm:$0xff] %v1751_v5  ;;  %v1755_v7 = vld [vmem:[%s2473_s20 + $0x1e8] sm:$0xff]  ;;  %v1757_v8 = vld [vmem:[%s2473_s20 + $0x1f0] sm:$0xff] }
 0x1c4   : >> { %1754 = vst [vmem:[%s2469_s14 + $0x1e0] sm:$0xff] %v1753_v6  ;;  %1756 = vst [vmem:[%s2469_s14 + $0x1e8] sm:$0xff] %v1755_v7  ;;  %v1759_v9 = vld [vmem:[%s2473_s20 + $0x1f8] sm:$0xff]  ;;  %s3396_s20 = smov %s3248_s27 }
 0x1c5   : >> { %1758 = vst [vmem:[%s2469_s14 + $0x1f0] sm:$0xff] %v1757_v8  ;;  %1760 = vst [vmem:[%s2469_s14 + $0x1f8] sm:$0xff] %v1759_v9  ;;  %s3395_s14 = smov %s3251_s22 }
 0x1c6 PF: > { %s3356_s23 = sand.u32 63, %s3405_s25   ;;  %s2026_s29 = sshll.u32 %s3181_s7, 9 }
 0x1c7   : > { %s1772_s11 = scalar_lea.vmem %s2926_s12, %s2026_s29 [#allocation7]   ;;  %s1774_s17 = scalar_lea.vmem %s3175_s5, %s2026_s29  }
 0x1c8   : > { %p2020_p2 = scmp.le.s32.totalorder %s3356_s23, 0 }
 0x1c9   : > { %s2483_s19 = smov (!%p2020_p2), %s1774_s17   ;;  %s2487_s21 = smov (!%p2020_p2), %s1772_s11  }
 0x1ca   : > { %1874 = sbr.rel (%p2020_p2) target bundleno = 475 (0x1db), region = 145  ;;  %s2491_s28 = smov (!%p2020_p2), 0  }
 0x1cb   : > { %s2495_s30 = smov (!%p2020_p2), 0  }
 0x1d1 LB: >> { %v1784_v32 = vld [vmem:[%s2489_s21] sm:$0xff]  ;;  %s1786_s25 = sadd.s32 1, %s2493_s28  ;;  %s1778_s30 = sadd.s32 1, %s2497_s30   ;;  %s2497_s30 = sphi %s2495_s30, %s1778_s30   ;;  %s2493_s28 = sphi %s2491_s28, %s2492_s28   ;;  %s2489_s21 = sphi %s2487_s21, %s1791_s21   ;;  %s2485_s19 = sphi %s2483_s19, %s1792_s19  }
 0x1d2   : >> { %1785 = vst [vmem:[%s2485_s19] sm:$0xff] %v1784_v32  ;;  %p1787_p4 = scmp.ge.s32.totalorder %s1786_s25, %s3356_s23  ;;  %p1777_p5 = scmp.ge.s32.totalorder %s1778_s30, %s3356_s23 }
 0x1d4   : >> { %s3409_s25 = smov (%p1787_p4, %s1786_s25), 0  ;;  %1780 = sbr.rel (!%p1777_p5) target bundleno = 465 (0x1d1), region = 151 }
 0x1d5   : >> { %s2021_s12 = sshll.u32 %s3409_s25, 3  ;;  %s2492_s28 = smov %s3409_s25  }
 0x1d6   : >> { %s1791_s21 = scalar_lea.vmem %s1772_s11, %s2021_s12 [#allocation7]   ;;  %s1792_s19 = scalar_lea.vmem %s1774_s17, %s2021_s12  }
 0x1db PF: > { %s15_s16 = sadd.s32 1, %s2465_s16   ;;  %s3398_s12 = smov %s2453_s13 }
 0x1dc   : > { %p12_p6 = scmp.ge.s32.totalorder %s15_s16, 5   ;;  %s3399_s13 = smov %s2574_s24 }
 0x1dd   : > { %s3400_s14 = smov %s2461_s15  ;;  %s3401_s15 = smov %s3403_s18 }
 0x1de   :  { %14 = sbr.rel (!%p12_p6) target bundleno = 4 (0x4), region = 162 }
 0x1e5   :  { %1808 = vsyncpa [#allocation4], 1 }
 0x1e6   :  { %1810 = vsyncpa [#allocation4 + $0x1], 1 }
 0x1e7   :  { %1811 = vsyncpa [#allocation6], 1 }

// kernel: net_forward.9
= control target key start
LH: loop header
LB: loop body
LE: loop exit
PB: predicated region body
PF: predicated region fallthrough
CT: control target
= control target key end

     0   :  { %vm19_vm0 = vcmask 74752   ;;  %v260_v3 = vmov 0.0|0.0   ;;  %v261_v6 = vmov 0.0   ;;  %vm262_vm1 = vmmov 0   ;;  %s355_s0 = inlined_call_operand.vmem [shape: f32[2,128], index: 0, kind: input, shape index: {}]   ;;  %s356_s1 = inlined_call_operand.vmem [shape: f32[128,10], index: 1, kind: input, shape index: {}]   ;;  %s357_s2 = inlined_call_operand.vmem [shape: f32[1,10], index: 2, kind: input, shape index: {}]   ;;  %s358_s3 = inlined_call_operand.hbm [shape: f32[2,10], index: 3, kind: output, shape index: {}]  }
   0x1   :  { %v23_v0 = vld [vmem:[%s356_s1] sm:$0xff]  ;;  %v24_v1 = vld [vmem:[%s356_s1 + $0x8] sm:$0xff]  ;;  %v25_v2 = vld [vmem:[%s356_s1 + $0x10] sm:$0xff]  ;;  %204 = vmatprep.subr.bf16.mxu0 %v260_v3  ;;  %20 = vst.msk [vmem:[#allocation2] sm:$0x3] %vm19_vm0, %v261_v6  ;;  %201 = vmatprep.mubr.msk.f32.mxu0 %vm262_vm1, %v261_v6 }
   0x2   :  { %v205_v4 = vpack.c.bf16 %v24_v1, %v23_v0  ;;  %v26_v5 = vld [vmem:[%s356_s1 + $0x18] sm:$0xff]  ;;  %v27_v8 = vld [vmem:[%s356_s1 + $0x20] sm:$0xff]  ;;  %v28_v9 = vld [vmem:[%s356_s1 + $0x28] sm:$0xff] }
   0x3   :  { %v208_v7 = vpack.c.bf16 %v26_v5, %v25_v2 }
   0x4   :  { %206 = vmatpush3.bf16.msra.mxu0 %v205_v4 }
   0x5   :  { %207 = vmatprep.subr.bf16.mxu0 %v260_v3 }
   0x6   :  { %8 = vsyncpa [#allocation4], 0  ;;  %v211_v10 = vpack.c.bf16 %v28_v9, %v27_v8  ;;  %v29_v11 = vld [vmem:[%s356_s1 + $0x30] sm:$0xff]  ;;  %v30_v12 = vld [vmem:[%s356_s1 + $0x38] sm:$0xff] }
   0x7   :  { %v214_v13 = vpack.c.bf16 %v30_v12, %v29_v11  ;;  %v31_v14 = vld [vmem:[%s356_s1 + $0x40] sm:$0xff]  ;;  %v32_v15 = vld [vmem:[%s356_s1 + $0x48] sm:$0xff]  ;;  %v33_v17 = vld [vmem:[%s356_s1 + $0x50] sm:$0xff] }
   0x8   :  { %209 = vmatpush3.bf16.msra.mxu0 %v208_v7  ;;  %v217_v16 = vpack.c.bf16 %v32_v15, %v31_v14  ;;  %v34_v18 = vld [vmem:[%s356_s1 + $0x58] sm:$0xff]  ;;  %v35_v20 = vld [vmem:[%s356_s1 + $0x60] sm:$0xff]  ;;  %v36_v21 = vld [vmem:[%s356_s1 + $0x68] sm:$0xff] }
   0x9   :  { %210 = vmatprep.subr.bf16.mxu0 %v260_v3  ;;  %v220_v19 = vpack.c.bf16 %v34_v18, %v33_v17  ;;  %v223_v22 = vpack.c.bf16 %v36_v21, %v35_v20  ;;  %v37_v23 = vld [vmem:[%s356_s1 + $0x70] sm:$0xff]  ;;  %v38_v24 = vld [vmem:[%s356_s1 + $0x78] sm:$0xff]  ;;  %v22_v26 = vld [vmem:[%s355_s0] sm:$0x3]  ;;  %s263_s0 = smov [#allocation3]  }
   0xa   :  { %v226_v25 = vpack.c.bf16 %v38_v24, %v37_v23  ;;  %v21_v27 = vld [vmem:[#allocation2] sm:$0x3]  ;;  %s143_s1 = sshll.u32 %s263_s0, 4  ;;  %s144_s1 = int_to_ptr.vmem [resolvable:$true] %s143_s1 }
   0xb   :  { %v151_v31 = vld [vmem:[%s357_s2] ss:$0 sm:$0xff]  ;;  %s236_s2 = scalar_lea.vmem %s144_s1, 32  ;;  %p241_p1 = scmp.lt.s32.totalorder %s144_s1, %s144_s1 }
   0xc   :  { %212 = vmatpush3.bf16.msra.mxu0 %v211_v10  ;;  %p237_p0 = scmp.ne.s32.totalorder %s144_s1, %s236_s2  ;;  %p242_p2 = scmp.lt.s32.totalorder %s236_s2, %s236_s2 }
   0xd   :  { %213 = vmatprep.subr.bf16.mxu0 %v260_v3 }
   0xe   :  { %p243_p3 = por %p242_p2, %p241_p1 }
  0x10   :  { %215 = vmatpush3.bf16.msra.mxu0 %v214_v13  ;;  %p244_p4 = pnand %p243_p3, %p237_p0 }
  0x11   :  { %216 = vmatprep.subr.bf16.mxu0 %v260_v3 }
  0x14   :  { %218 = vmatpush3.bf16.msra.mxu0 %v217_v16 }
  0x15   :  { %219 = vmatprep.subr.bf16.mxu0 %v260_v3 }
  0x18   :  { %221 = vmatpush3.bf16.msra.mxu0 %v220_v19 }
  0x19   :  { %222 = vmatprep.subr.bf16.mxu0 %v260_v3 }
  0x1c   :  { %224 = vmatpush3.bf16.msra.mxu0 %v223_v22 }
  0x1d   :  { %225 = vmatprep.subr.bf16.mxu0 %v260_v3 }
  0x20   :  { %227 = vmatpush3.bf16.msra.mxu0 %v226_v25 }
  0x23   :  { %202 = vmatmul.mubr.f32.vlgmr.msra.gmra.mrb[0].mxu0 %v22_v26 }
  0xf6   :  { %v105_v28 = vpop.f32.mrb[0].mxu0 }
  0xf7   :  { %v109_v29 = vadd.f32 %v105_v28, %v21_v27  ;;  %v203_v30 = vpop.f32.mrb[1].mxu0 }
  0xf9   :  { %111 = vst.msk [vmem:[#allocation2] sm:$0x3] %vm19_vm0, %v109_v29 }
 0x100   :  { %v115_v32 = vld [vmem:[#allocation2] sm:$0x3] }
 0x101   :  { %v123_v33 = vadd.f32 %v151_v31, %v115_v32 }
 0x103   :  { %v124_v34 = vsel %vm19_vm0, %v123_v33, -inf }
 0x104   :  { %125 = vmax.xlane.f32.xlu0 %v124_v34 }
 0x191   :  { %v126_v35 = vpop.xlane.xlu0 %125 }
 0x192   :  { %v127_v36 = vsub.f32 %v123_v33, %v126_v35 }
 0x194   :  { %v128_v37 = vmul.f32 1.442695, %v127_v36 }
 0x196   :  { %232 = vpow2.f32 %v128_v37 }
 0x1a0   :  { %v233_v38 = vpop.eup %232 }
 0x1a1   :  { %v130_v39 = vsel %vm19_vm0, %v233_v38, 0.0 }
 0x1a2   :  { %131 = vadd.xlane.f32.xlu0 %v130_v39 }
 0x22f   :  { %v132_v40 = vpop.xlane.xlu0 %131 }
 0x230   :  { %234 = vlog2.f32 %v132_v40 }
 0x23a   :  { %v235_v41 = vpop.eup %234 }
 0x23b   :  { %v134_v42 = vmul.f32 0.6931472, %v235_v41 }
 0x23d   :  { %v135_v43 = vsub.f32 %v127_v36, %v134_v42 }
 0x23f   :  { %136 = vst.msk [vmem:[#allocation3] sm:$0x3] %vm19_vm0, %v135_v43 }
 0x240   :  { %247 = shalt.err (!%p244_p4)
}
 0x241   :  { %s248_s23 = scalar_lea.hbm %s358_s3, 32 }
 0x242   :  { %p249_p5 = scmp.ne.s32.totalorder %s358_s3, %s248_s23  ;;  %p252_p6 = scmp.lt.u32.totalorder %s248_s23, %s358_s3 }
 0x244   :  { %p254_p7 = pnand %p252_p6, %p249_p5 }
 0x246   :  { %257 = shalt.err (!%p254_p7)
}
 0x247   :  { %146 = dma.vmem_to_hbm [thread:$0]  %s144_s1, 32, %s358_s3, [#allocation4]  }
 0x248   :  { %258 = dma.done.wait [#allocation4], 32  }
 0x249   :  { %259 = vsyncadd [#allocation4], 4294967264 }
 0x24a   :  { %150 = vsyncpa [#allocation4], 1 }

// kernel: net_forward.8
= control target key start
LH: loop header
LB: loop body
LE: loop exit
PB: predicated region body
PF: predicated region fallthrough
CT: control target
= control target key end

     0   :  { %s2033_s12 = smov 0   ;;  %s2035_s13 = smov 0   ;;  %s2420_s0 = inlined_call_operand.vmem [shape: f32[2,9216], index: 0, kind: input, shape index: {}]   ;;  %s2421_s1 = inlined_call_operand.vmem [shape: f32[9216,128], index: 1, kind: input, shape index: {}]   ;;  %s2422_s2 = inlined_call_operand.vmem [shape: f32[1,128], index: 2, kind: input, shape index: {}]   ;;  %s2423_s3 = inlined_call_operand.vmem [shape: f32[2,128], index: 3, kind: output, shape index: {}]  }
   0x1   :  { %s2037_s14 = smov 0  }
   0x2 LB: > { %s22_s15 = sadd.s32 1, %s2005_s13  ;;  %p1344_p0 = scmp.ge.s32.totalorder %s2009_s14, 1  ;;  %s2009_s14 = sphi %s2037_s14, %s13_s14   ;;  %s2005_s13 = sphi %s2035_s13, %s2425_s13   ;;  %s2001_s12 = sphi %s2033_s12, %s2424_s12  }
   0x3   : > { %p23_p1 = scmp.ge.s32.totalorder %s22_s15, 4  ;;  %p167_p2 = scmp.lt.s32.totalorder %s2009_s14, 5 }
   0x5   : > { %s2427_s15 = smov (%p23_p1, %s22_s15), 0  ;;  %p168_p3 = pnand %p1344_p0, %p167_p2 }
   0x6   : > { %s199_s16 = smul.u32 (!%p168_p3), 18, %s2001_s12  ;;  %p1347_p6 = scmp.ne.s32.totalorder (!%p168_p3), %s2001_s12, 0 }
   0x7   : > { %171 = sbr.rel (%p168_p3) target bundleno = 420 (0x1a4), region = 32 }
   0x8   : > { %s209_s17 = smul.u32 (!%p168_p3), 288, %s2001_s12  ;;  %p202_p4 = scmp.lt.s32.totalorder (!%p168_p3), %s199_s16, 71 }
   0xa   : > { %p210_p5 = scmp.lt.s32.totalorder (!%p168_p3), %s209_s17, 1151 }
   0xe   : > { %s2429_s16 = smov (!%p202_p4, %s199_s16), 71  ;;  %s2431_s17 = smov (!%p210_p5, %s209_s17), 1151 }
   0xf   : > { %s1345_s18 = sshll.u32 %s2429_s16, 1  ;;  %s1346_s22 = sshll.u32 %s2431_s17, 3  ;;  %v2011_v0 = vmov (!%p1347_p6), 0.0  }
  0x10   : > { %s2058_s21 = scalar_lea.vmem %s2420_s0, %s1345_s18  ;;  %s2063_s25 = scalar_lea.vmem %s2421_s1, %s1346_s22  ;;  %223 = vst [vmem:[#allocation2] sm:$0x3] (!%p1347_p6), %v2011_v0 }
  0x11   : > { %222 = sbr.rel (%p1347_p6) target bundleno = 24 (0x18), region = 36 }
  0x18 PF: > { %v246_v1 = vld [vmem:[%s2063_s25 + $0x80] sm:$0xff]  ;;  %v247_v2 = vld [vmem:[%s2063_s25 + $0x88] sm:$0xff]  ;;  %v248_v12 = vld [vmem:[%s2063_s25 + $0x90] sm:$0xff]  ;;  %v2012_v48 = vmov 1983009808   ;;  %v527_v50 = vlaneseq  ;;  %p1349_p7 = scmp.ne.s32.totalorder %s2001_s12, 3 }
  0x19   : > { %v278_v3 = vld [vmem:[%s2063_s25 + $0x180] sm:$0xff]  ;;  %v1669_v4 = vpack.c.bf16 %v247_v2, %v246_v1  ;;  %v279_v5 = vld [vmem:[%s2063_s25 + $0x188] sm:$0xff]  ;;  %v249_v14 = vld [vmem:[%s2063_s25 + $0x98] sm:$0xff]  ;;  %v525_v49 = vunpack.c.l.s4 %v2012_v48 }
  0x1a   : > { %v230_v6 = vld [vmem:[%s2063_s25] sm:$0xff]  ;;  %v231_v7 = vld [vmem:[%s2063_s25 + $0x8] sm:$0xff]  ;;  %v1701_v8 = vpack.c.bf16 %v279_v5, %v278_v3  ;;  %v280_v15 = vld [vmem:[%s2063_s25 + $0x190] sm:$0xff]  ;;  %v1673_v17 = vpack.c.bf16 %v249_v14, %v248_v12  ;;  %v528_v1 = vshrl.u32 %v527_v50, 7 }
  0x1b   : > { %v1671_v9 = vpack.c.bf16 %v231_v7, %v230_v6  ;;  %v262_v10 = vld [vmem:[%s2063_s25 + $0x100] sm:$0xff]  ;;  %v263_v11 = vld [vmem:[%s2063_s25 + $0x108] sm:$0xff]  ;;  %1670 = vmatprep.subr.bf16.mxu0 %v1669_v4  ;;  %v281_v16 = vld [vmem:[%s2063_s25 + $0x198] sm:$0xff]  ;;  %v526_v0 = vunpack.c.0.s8 %v525_v49 }
  0x1c   : > { %v1703_v13 = vpack.c.bf16 %v263_v11, %v262_v10  ;;  %1702 = vmatprep.subr.bf16.mxu1 %v1701_v8  ;;  %v1705_v18 = vpack.c.bf16 %v281_v16, %v280_v15  ;;  %v232_v19 = vld [vmem:[%s2063_s25 + $0x10] sm:$0xff]  ;;  %v233_v20 = vld [vmem:[%s2063_s25 + $0x18] sm:$0xff]  ;;  %v250_v24 = vld [vmem:[%s2063_s25 + $0xa0] sm:$0xff] }
  0x1d   : > { %1672 = vmatpush3.bf16.msra.mxu0 %v1671_v9  ;;  %v264_v21 = vld [vmem:[%s2063_s25 + $0x110] sm:$0xff]  ;;  %v1675_v22 = vpack.c.bf16 %v233_v20, %v232_v19  ;;  %v265_v23 = vld [vmem:[%s2063_s25 + $0x118] sm:$0xff]  ;;  %v251_v25 = vld [vmem:[%s2063_s25 + $0xa8] sm:$0xff]  ;;  %v2116_v14 = vsub.s32 %v526_v0, %v528_v1 }
  0x1e   : > { %1704 = vmatpush3.bf16.msra.mxu1 %v1703_v13  ;;  %1674 = vmatprep.subr.bf16.mxu0 %v1673_v17  ;;  %v1707_v26 = vpack.c.bf16 %v265_v23, %v264_v21  ;;  %v1677_v27 = vpack.c.bf16 %v251_v25, %v250_v24  ;;  %v282_v28 = vld [vmem:[%s2063_s25 + $0x1a0] sm:$0xff]  ;;  %v283_v29 = vld [vmem:[%s2063_s25 + $0x1a8] sm:$0xff]  ;;  %v252_v36 = vld [vmem:[%s2063_s25 + $0xb0] sm:$0xff] }
  0x1f   : > { %1706 = vmatprep.subr.bf16.mxu1 %v1705_v18  ;;  %v234_v30 = vld [vmem:[%s2063_s25 + $0x20] sm:$0xff]  ;;  %v1709_v31 = vpack.c.bf16 %v283_v29, %v282_v28  ;;  %v235_v32 = vld [vmem:[%s2063_s25 + $0x28] sm:$0xff]  ;;  %v253_v37 = vld [vmem:[%s2063_s25 + $0xb8] sm:$0xff] }
  0x20   : > { %v266_v33 = vld [vmem:[%s2063_s25 + $0x120] sm:$0xff]  ;;  %v267_v34 = vld [vmem:[%s2063_s25 + $0x128] sm:$0xff]  ;;  %v1679_v35 = vpack.c.bf16 %v235_v32, %v234_v30  ;;  %v284_v38 = vld [vmem:[%s2063_s25 + $0x1b0] sm:$0xff]  ;;  %v1681_v40 = vpack.c.bf16 %v253_v37, %v252_v36 }
  0x21   : > { %1676 = vmatpush3.bf16.msra.mxu0 %v1675_v22  ;;  %v1711_v39 = vpack.c.bf16 %v267_v34, %v266_v33  ;;  %v285_v41 = vld [vmem:[%s2063_s25 + $0x1b8] sm:$0xff]  ;;  %v236_v42 = vld [vmem:[%s2063_s25 + $0x30] sm:$0xff]  ;;  %v254_v47 = vld [vmem:[%s2063_s25 + $0xc0] sm:$0xff] }
  0x22   : > { %1708 = vmatpush3.bf16.msra.mxu1 %v1707_v26  ;;  %1678 = vmatprep.subr.bf16.mxu0 %v1677_v27  ;;  %v237_v43 = vld [vmem:[%s2063_s25 + $0x38] sm:$0xff]  ;;  %v1713_v44 = vpack.c.bf16 %v285_v41, %v284_v38  ;;  %v268_v45 = vld [vmem:[%s2063_s25 + $0x130] sm:$0xff]  ;;  %v255_v51 = vld [vmem:[%s2063_s25 + $0xc8] sm:$0xff] }
  0x23   : > { %1710 = vmatprep.subr.bf16.mxu1 %v1709_v31  ;;  %v269_v46 = vld [vmem:[%s2063_s25 + $0x138] sm:$0xff]  ;;  %v286_v52 = vld [vmem:[%s2063_s25 + $0x1c0] sm:$0xff]  ;;  %v287_v53 = vld [vmem:[%s2063_s25 + $0x1c8] sm:$0xff]  ;;  %v1683_v54 = vpack.c.bf16 %v237_v43, %v236_v42  ;;  %v1685_v56 = vpack.c.bf16 %v255_v51, %v254_v47 }
  0x24   : > { %v1715_v55 = vpack.c.bf16 %v269_v46, %v268_v45  ;;  %v238_v57 = vld [vmem:[%s2063_s25 + $0x40] sm:$0xff]  ;;  %v239_v58 = vld [vmem:[%s2063_s25 + $0x48] sm:$0xff]  ;;  %v1717_v60 = vpack.c.bf16 %v287_v53, %v286_v52  ;;  %v256_v62 = vld [vmem:[%s2063_s25 + $0xd0] sm:$0xff] }
  0x25   : > { %1680 = vmatpush3.bf16.msra.mxu0 %v1679_v35  ;;  %v270_v59 = vld [vmem:[%s2063_s25 + $0x140] sm:$0xff]  ;;  %v271_v61 = vld [vmem:[%s2063_s25 + $0x148] sm:$0xff]  ;;  %v257_v63 = vld [vmem:[%s2063_s25 + $0xd8] sm:$0xff]  ;;  %v1687_v4 = vpack.c.bf16 %v239_v58, %v238_v57 }
  0x26   : > { %1712 = vmatpush3.bf16.msra.mxu1 %v1711_v39  ;;  %1682 = vmatprep.subr.bf16.mxu0 %v1681_v40  ;;  %v288_v2 = vld [vmem:[%s2063_s25 + $0x1d0] sm:$0xff]  ;;  %v289_v3 = vld [vmem:[%s2063_s25 + $0x1d8] sm:$0xff]  ;;  %v1719_v5 = vpack.c.bf16 %v271_v61, %v270_v59  ;;  %v1689_v6 = vpack.c.bf16 %v257_v63, %v256_v62  ;;  %v258_v12 = vld [vmem:[%s2063_s25 + $0xe0] sm:$0xff] }
  0x27   : > { %1714 = vmatprep.subr.bf16.mxu1 %v1713_v44  ;;  %v240_v7 = vld [vmem:[%s2063_s25 + $0x50] sm:$0xff]  ;;  %v241_v8 = vld [vmem:[%s2063_s25 + $0x58] sm:$0xff]  ;;  %v1721_v10 = vpack.c.bf16 %v289_v3, %v288_v2  ;;  %v259_v13 = vld [vmem:[%s2063_s25 + $0xe8] sm:$0xff] }
  0x28   : > { %v272_v9 = vld [vmem:[%s2063_s25 + $0x150] sm:$0xff]  ;;  %v273_v11 = vld [vmem:[%s2063_s25 + $0x158] sm:$0xff]  ;;  %v290_v15 = vld [vmem:[%s2063_s25 + $0x1e0] sm:$0xff]  ;;  %v1691_v17 = vpack.c.bf16 %v241_v8, %v240_v7  ;;  %v1693_v20 = vpack.c.bf16 %v259_v13, %v258_v12 }
  0x29   : > { %1684 = vmatpush3.bf16.msra.mxu0 %v1683_v54  ;;  %v291_v16 = vld [vmem:[%s2063_s25 + $0x1e8] sm:$0xff]  ;;  %v242_v18 = vld [vmem:[%s2063_s25 + $0x60] sm:$0xff]  ;;  %v1723_v19 = vpack.c.bf16 %v273_v11, %v272_v9  ;;  %v260_v26 = vld [vmem:[%s2063_s25 + $0xf0] sm:$0xff] }
  0x2a   : > { %1716 = vmatpush3.bf16.msra.mxu1 %v1715_v55  ;;  %1686 = vmatprep.subr.bf16.mxu0 %v1685_v56  ;;  %v243_v21 = vld [vmem:[%s2063_s25 + $0x68] sm:$0xff]  ;;  %v274_v22 = vld [vmem:[%s2063_s25 + $0x160] sm:$0xff]  ;;  %v1725_v24 = vpack.c.bf16 %v291_v16, %v290_v15  ;;  %v261_v27 = vld [vmem:[%s2063_s25 + $0xf8] sm:$0xff] }
  0x2b   : > { %1718 = vmatprep.subr.bf16.mxu1 %v1717_v60  ;;  %v225_v23 = vld [vmem:[%s2058_s21] sm:$0xff]  ;;  %v275_v25 = vld [vmem:[%s2063_s25 + $0x168] sm:$0xff]  ;;  %v292_v30 = vld [vmem:[%s2063_s25 + $0x1f0] sm:$0xff]  ;;  %v1695_v32 = vpack.c.bf16 %v243_v21, %v242_v18  ;;  %v1697_v36 = vpack.c.bf16 %v261_v27, %v260_v26 }
  0x2c   : > { %v530_v28 = vrot.slane %v225_v23, %v2116_v14  ;;  %v523_v29 = vcombine.high %v225_v23, %v225_v23  ;;  %v293_v31 = vld [vmem:[%s2063_s25 + $0x1f8] sm:$0xff]  ;;  %v1727_v35 = vpack.c.bf16 %v275_v25, %v274_v22  ;;  %v244_v37 = vld [vmem:[%s2063_s25 + $0x70] sm:$0xff]  ;;  %v310_v43 = vld [vmem:[%s2063_s25 + $0x280] sm:$0xff] }
  0x2d   : > { %1688 = vmatpush3.bf16.msra.mxu0 %v1687_v4  ;;  %v245_v38 = vld [vmem:[%s2063_s25 + $0x78] sm:$0xff]  ;;  %v276_v39 = vld [vmem:[%s2063_s25 + $0x170] sm:$0xff]  ;;  %v1729_v40 = vpack.c.bf16 %v293_v31, %v292_v30  ;;  %v311_v44 = vld [vmem:[%s2063_s25 + $0x288] sm:$0xff] }
  0x2e   : > { %1720 = vmatpush3.bf16.msra.mxu1 %v1719_v5  ;;  %1690 = vmatprep.subr.bf16.mxu0 %v1689_v6  ;;  %v538_v33 = vcombine.high %v530_v28, %v530_v28  ;;  %v537_v34 = vrot.slane %v523_v29, %v2116_v14  ;;  %v277_v41 = vld [vmem:[%s2063_s25 + $0x178] sm:$0xff]  ;;  %v342_v45 = vld [vmem:[%s2063_s25 + $0x380] sm:$0xff]  ;;  %v343_v46 = vld [vmem:[%s2063_s25 + $0x388] sm:$0xff]  ;;  %v1699_v47 = vpack.c.bf16 %v245_v38, %v244_v37 }
  0x2f   : > { %1722 = vmatprep.subr.bf16.mxu1 %v1721_v10  ;;  %v1731_v48 = vpack.c.bf16 %v277_v41, %v276_v39  ;;  %v1733_v49 = vpack.c.bf16 %v311_v44, %v310_v43  ;;  %v294_v50 = vld [vmem:[%s2063_s25 + $0x200] sm:$0xff]  ;;  %v295_v51 = vld [vmem:[%s2063_s25 + $0x208] sm:$0xff]  ;;  %v1765_v53 = vpack.c.bf16 %v343_v46, %v342_v45  ;;  %v312_v55 = vld [vmem:[%s2063_s25 + $0x290] sm:$0xff] }
  0x30   : > { %681 = vmatprep.mubr.f32.mxu0 %v538_v33  ;;  %v539_v42 = vcombine.high %v537_v34, %v537_v34  ;;  %v326_v52 = vld [vmem:[%s2063_s25 + $0x300] sm:$0xff]  ;;  %v327_v54 = vld [vmem:[%s2063_s25 + $0x308] sm:$0xff]  ;;  %v313_v56 = vld [vmem:[%s2063_s25 + $0x298] sm:$0xff]  ;;  %v1735_v59 = vpack.c.bf16 %v295_v51, %v294_v50 }
  0x31   : > { %1692 = vmatpush3.bf16.msra.mxu0 %v1691_v17  ;;  %v344_v57 = vld [vmem:[%s2063_s25 + $0x390] sm:$0xff]  ;;  %v345_v58 = vld [vmem:[%s2063_s25 + $0x398] sm:$0xff]  ;;  %v1767_v60 = vpack.c.bf16 %v327_v54, %v326_v52  ;;  %v1737_v61 = vpack.c.bf16 %v313_v56, %v312_v55  ;;  %v314_v3 = vld [vmem:[%s2063_s25 + $0x2a0] sm:$0xff] }
  0x32   : > { %1724 = vmatpush3.bf16.msra.mxu1 %v1723_v19  ;;  %1694 = vmatprep.subr.bf16.mxu0 %v1693_v20  ;;  %v296_v62 = vld [vmem:[%s2063_s25 + $0x210] sm:$0xff]  ;;  %v297_v63 = vld [vmem:[%s2063_s25 + $0x218] sm:$0xff]  ;;  %v1769_v1 = vpack.c.bf16 %v345_v58, %v344_v57  ;;  %v315_v4 = vld [vmem:[%s2063_s25 + $0x2a8] sm:$0xff] }
  0x33   : > { %1726 = vmatprep.subr.bf16.mxu1 %v1725_v24  ;;  %751 = vmatprep.mubr.f32.mxu1 %v539_v42  ;;  %v328_v0 = vld [vmem:[%s2063_s25 + $0x310] sm:$0xff]  ;;  %v329_v2 = vld [vmem:[%s2063_s25 + $0x318] sm:$0xff]  ;;  %v346_v5 = vld [vmem:[%s2063_s25 + $0x3a0] sm:$0xff]  ;;  %v1739_v7 = vpack.c.bf16 %v297_v63, %v296_v62  ;;  %v1741_v9 = vpack.c.bf16 %v315_v4, %v314_v3 }
  0x34   : > { %v347_v6 = vld [vmem:[%s2063_s25 + $0x3a8] sm:$0xff]  ;;  %v1771_v8 = vpack.c.bf16 %v329_v2, %v328_v0  ;;  %v298_v10 = vld [vmem:[%s2063_s25 + $0x220] sm:$0xff]  ;;  %v316_v16 = vld [vmem:[%s2063_s25 + $0x2b0] sm:$0xff] }
  0x35   : > { %1696 = vmatpush3.bf16.msra.mxu0 %v1695_v32  ;;  %v299_v11 = vld [vmem:[%s2063_s25 + $0x228] sm:$0xff]  ;;  %v330_v12 = vld [vmem:[%s2063_s25 + $0x320] sm:$0xff]  ;;  %v1773_v13 = vpack.c.bf16 %v347_v6, %v346_v5  ;;  %v317_v17 = vld [vmem:[%s2063_s25 + $0x2b8] sm:$0xff] }
  0x36   : > { %1728 = vmatpush3.bf16.msra.mxu1 %v1727_v35  ;;  %1698 = vmatprep.subr.bf16.mxu0 %v1697_v36  ;;  %v331_v15 = vld [vmem:[%s2063_s25 + $0x328] sm:$0xff]  ;;  %v348_v18 = vld [vmem:[%s2063_s25 + $0x3b0] sm:$0xff]  ;;  %v349_v19 = vld [vmem:[%s2063_s25 + $0x3b8] sm:$0xff]  ;;  %v1743_v20 = vpack.c.bf16 %v299_v11, %v298_v10  ;;  %v1745_v23 = vpack.c.bf16 %v317_v17, %v316_v16 }
  0x37   : > { %1730 = vmatprep.subr.bf16.mxu1 %v1729_v40  ;;  %v300_v21 = vld [vmem:[%s2063_s25 + $0x230] sm:$0xff]  ;;  %v1775_v22 = vpack.c.bf16 %v331_v15, %v330_v12  ;;  %v301_v24 = vld [vmem:[%s2063_s25 + $0x238] sm:$0xff]  ;;  %v1777_v27 = vpack.c.bf16 %v349_v19, %v348_v18  ;;  %v319_v29 = vld [vmem:[%s2063_s25 + $0x2c8] sm:$0xff] }
  0x38   : > { %v332_v25 = vld [vmem:[%s2063_s25 + $0x330] sm:$0xff]  ;;  %v333_v26 = vld [vmem:[%s2063_s25 + $0x338] sm:$0xff]  ;;  %v226_v30 = vld [vmem:[%s2058_s21 + $0x8] sm:$0xff]  ;;  %v1747_v35 = vpack.c.bf16 %v301_v24, %v300_v21 }
  0x39   : > { %1700 = vmatpush3.bf16.msra.mxu0 %v1699_v47  ;;  %v350_v31 = vld [vmem:[%s2063_s25 + $0x3c0] sm:$0xff]  ;;  %v351_v32 = vld [vmem:[%s2063_s25 + $0x3c8] sm:$0xff]  ;;  %v2173_v33 = vrot.slane %v226_v30, %v2116_v14  ;;  %v1779_v36 = vpack.c.bf16 %v333_v26, %v332_v25  ;;  %v320_v45 = vld [vmem:[%s2063_s25 + $0x2d0] sm:$0xff] }
  0x3a   : > { %1732 = vmatpush3.bf16.msra.mxu1 %v1731_v48  ;;  %1734 = vmatprep.subr.bf16.mxu0 %v1733_v49  ;;  %v302_v38 = vld [vmem:[%s2063_s25 + $0x240] sm:$0xff]  ;;  %v303_v39 = vld [vmem:[%s2063_s25 + $0x248] sm:$0xff]  ;;  %v1781_v43 = vpack.c.bf16 %v351_v32, %v350_v31  ;;  %v321_v46 = vld [vmem:[%s2063_s25 + $0x2d8] sm:$0xff] }
  0x3b   : > { %1766 = vmatprep.subr.bf16.mxu1 %v1765_v53  ;;  %v334_v40 = vld [vmem:[%s2063_s25 + $0x340] sm:$0xff]  ;;  %v555_v41 = vcombine.high %v2173_v33, %v2173_v33  ;;  %v335_v44 = vld [vmem:[%s2063_s25 + $0x348] sm:$0xff]  ;;  %v352_v47 = vld [vmem:[%s2063_s25 + $0x3d0] sm:$0xff]  ;;  %v1751_v50 = vpack.c.bf16 %v303_v39, %v302_v38  ;;  %v1753_v52 = vpack.c.bf16 %v321_v46, %v320_v45 }
  0x3c   : > { %682 = vmatmul.mubr.f32.vlgmr.msra.gmra.mrb[0].mxu0 %v530_v28  ;;  %v318_v28 = vld [vmem:[%s2063_s25 + $0x2c0] sm:$0xff]  ;;  %v353_v48 = vld [vmem:[%s2063_s25 + $0x3d8] sm:$0xff]  ;;  %v1783_v51 = vpack.c.bf16 %v335_v44, %v334_v40  ;;  %v304_v53 = vld [vmem:[%s2063_s25 + $0x250] sm:$0xff] }
  0x3d   : > { %752 = vmatmul.mubr.f32.vlgmr.msra.gmra.mrb[0].mxu1 %v537_v34  ;;  %1736 = vmatpush3.bf16.msra.mxu0 %v1735_v59  ;;  %v540_v34 = vcombine.high %v226_v30, %v226_v30  ;;  %v1749_v37 = vpack.c.bf16 %v319_v29, %v318_v28  ;;  %v305_v54 = vld [vmem:[%s2063_s25 + $0x258] sm:$0xff]  ;;  %v336_v55 = vld [vmem:[%s2063_s25 + $0x350] sm:$0xff]  ;;  %v1785_v56 = vpack.c.bf16 %v353_v48, %v352_v47  ;;  %v322_v58 = vld [vmem:[%s2063_s25 + $0x2e0] sm:$0xff] }
  0x3e   : > { %1768 = vmatpush3.bf16.msra.mxu1 %v1767_v60  ;;  %1738 = vmatprep.subr.bf16.mxu0 %v1737_v61  ;;  %v337_v57 = vld [vmem:[%s2063_s25 + $0x358] sm:$0xff]  ;;  %v323_v59 = vld [vmem:[%s2063_s25 + $0x2e8] sm:$0xff]  ;;  %v354_v60 = vld [vmem:[%s2063_s25 + $0x3e0] sm:$0xff]  ;;  %v1755_v62 = vpack.c.bf16 %v305_v54, %v304_v53 }
  0x3f   : > { %1770 = vmatprep.subr.bf16.mxu1 %v1769_v1  ;;  %v2181_v42 = vrot.slane %v540_v34, %v2116_v14  ;;  %821 = vmatprep.mubr.f32.mxu0 %v555_v41  ;;  %v355_v61 = vld [vmem:[%s2063_s25 + $0x3e8] sm:$0xff]  ;;  %v1787_v63 = vpack.c.bf16 %v337_v57, %v336_v55  ;;  %v1757_v0 = vpack.c.bf16 %v323_v59, %v322_v58  ;;  %v306_v1 = vld [vmem:[%s2063_s25 + $0x260] sm:$0xff]  ;;  %v324_v6 = vld [vmem:[%s2063_s25 + $0x2f0] sm:$0xff] }
  0x40   : > { %v307_v2 = vld [vmem:[%s2063_s25 + $0x268] sm:$0xff]  ;;  %v338_v3 = vld [vmem:[%s2063_s25 + $0x360] sm:$0xff]  ;;  %v1789_v4 = vpack.c.bf16 %v355_v61, %v354_v60  ;;  %v309_v15 = vld [vmem:[%s2063_s25 + $0x278] sm:$0xff] }
  0x41   : > { %1740 = vmatpush3.bf16.msra.mxu0 %v1739_v7  ;;  %v556_v49 = vcombine.high %v2181_v42, %v2181_v42  ;;  %v339_v5 = vld [vmem:[%s2063_s25 + $0x368] sm:$0xff]  ;;  %v325_v7 = vld [vmem:[%s2063_s25 + $0x2f8] sm:$0xff]  ;;  %v1759_v10 = vpack.c.bf16 %v307_v2, %v306_v1  ;;  %v340_v16 = vld [vmem:[%s2063_s25 + $0x370] sm:$0xff] }
  0x42   : > { %1772 = vmatpush3.bf16.msra.mxu1 %v1771_v8  ;;  %1742 = vmatprep.subr.bf16.mxu0 %v1741_v9  ;;  %v356_v8 = vld [vmem:[%s2063_s25 + $0x3f0] sm:$0xff]  ;;  %v357_v9 = vld [vmem:[%s2063_s25 + $0x3f8] sm:$0xff]  ;;  %v1791_v11 = vpack.c.bf16 %v339_v5, %v338_v3  ;;  %v1761_v12 = vpack.c.bf16 %v325_v7, %v324_v6  ;;  %v374_v19 = vld [vmem:[%s2063_s25 + $0x480] sm:$0xff] }
  0x43   : > { %1774 = vmatprep.subr.bf16.mxu1 %v1773_v13  ;;  %891 = vmatprep.mubr.f32.mxu1 %v556_v49  ;;  %v308_v13 = vld [vmem:[%s2063_s25 + $0x270] sm:$0xff]  ;;  %v1793_v17 = vpack.c.bf16 %v357_v9, %v356_v8  ;;  %v341_v18 = vld [vmem:[%s2063_s25 + $0x378] sm:$0xff]  ;;  %v406_v21 = vld [vmem:[%s2063_s25 + $0x580] sm:$0xff] }
  0x44   : > { %v358_v24 = vld [vmem:[%s2063_s25 + $0x400] sm:$0xff]  ;;  %v1795_v25 = vpack.c.bf16 %v341_v18, %v340_v16  ;;  %v391_v29 = vld [vmem:[%s2063_s25 + $0x508] sm:$0xff]  ;;  %v376_v31 = vld [vmem:[%s2063_s25 + $0x490] sm:$0xff] }
  0x45   : > { %1744 = vmatpush3.bf16.msra.mxu0 %v1743_v20  ;;  %v375_v20 = vld [vmem:[%s2063_s25 + $0x488] sm:$0xff]  ;;  %v390_v28 = vld [vmem:[%s2063_s25 + $0x500] sm:$0xff]  ;;  %v377_v32 = vld [vmem:[%s2063_s25 + $0x498] sm:$0xff] }
  0x46   : > { %1776 = vmatpush3.bf16.msra.mxu1 %v1775_v22  ;;  %1746 = vmatprep.subr.bf16.mxu0 %v1745_v23  ;;  %v407_v22 = vld [vmem:[%s2063_s25 + $0x588] sm:$0xff]  ;;  %v1763_v23 = vpack.c.bf16 %v309_v15, %v308_v13  ;;  %v1797_v26 = vpack.c.bf16 %v375_v20, %v374_v19  ;;  %v408_v34 = vld [vmem:[%s2063_s25 + $0x590] sm:$0xff]  ;;  %v1801_v39 = vpack.c.bf16 %v377_v32, %v376_v31  ;;  %v361_v41 = vld [vmem:[%s2063_s25 + $0x418] sm:$0xff] }
  0x47   : > { %1778 = vmatprep.subr.bf16.mxu1 %v1777_v27  ;;  %v359_v27 = vld [vmem:[%s2063_s25 + $0x408] sm:$0xff]  ;;  %v1829_v30 = vpack.c.bf16 %v407_v22, %v406_v21  ;;  %v227_v38 = vld [vmem:[%s2058_s21 + $0x10] sm:$0xff]  ;;  %v393_v47 = vld [vmem:[%s2063_s25 + $0x518] sm:$0xff] }
  0x48   : > { %v360_v40 = vld [vmem:[%s2063_s25 + $0x410] sm:$0xff]  ;;  %v2227_v44 = vrot.slane %v227_v38, %v2116_v14  ;;  %v557_v45 = vcombine.high %v227_v38, %v227_v38  ;;  %v378_v48 = vld [vmem:[%s2063_s25 + $0x4a0] sm:$0xff]  ;;  %v379_v49 = vld [vmem:[%s2063_s25 + $0x4a8] sm:$0xff] }
  0x49   : > { %1748 = vmatpush3.bf16.msra.mxu0 %v1747_v35  ;;  %v409_v35 = vld [vmem:[%s2063_s25 + $0x598] sm:$0xff]  ;;  %v1803_v54 = vpack.c.bf16 %v361_v41, %v360_v40  ;;  %v1805_v55 = vpack.c.bf16 %v379_v49, %v378_v48  ;;  %v363_v57 = vld [vmem:[%s2063_s25 + $0x428] sm:$0xff]  ;;  %v394_v58 = vld [vmem:[%s2063_s25 + $0x520] sm:$0xff] }
  0x4a   : > { %1780 = vmatpush3.bf16.msra.mxu1 %v1779_v36  ;;  %1750 = vmatprep.subr.bf16.mxu0 %v1749_v37  ;;  %v1799_v36 = vpack.c.bf16 %v359_v27, %v358_v24  ;;  %v1831_v37 = vpack.c.bf16 %v391_v29, %v390_v28  ;;  %v1833_v46 = vpack.c.bf16 %v409_v35, %v408_v34  ;;  %v395_v61 = vld [vmem:[%s2063_s25 + $0x528] sm:$0xff]  ;;  %v365_v5 = vld [vmem:[%s2063_s25 + $0x438] sm:$0xff]  ;;  %v396_v6 = vld [vmem:[%s2063_s25 + $0x530] sm:$0xff] }
  0x4b   : > { %1782 = vmatprep.subr.bf16.mxu1 %v1781_v43  ;;  %v392_v43 = vld [vmem:[%s2063_s25 + $0x510] sm:$0xff]  ;;  %v2238_v53 = vrot.slane %v557_v45, %v2116_v14  ;;  %v1839_v2 = vpack.c.bf16 %v395_v61, %v394_v58  ;;  %v397_v8 = vld [vmem:[%s2063_s25 + $0x538] sm:$0xff]  ;;  %v382_v9 = vld [vmem:[%s2063_s25 + $0x4c0] sm:$0xff] }
  0x4c   : > { %v1843_v15 = vpack.c.bf16 %v397_v8, %v396_v6  ;;  %v367_v18 = vld [vmem:[%s2063_s25 + $0x448] sm:$0xff]  ;;  %v398_v19 = vld [vmem:[%s2063_s25 + $0x540] sm:$0xff]  ;;  %v384_v22 = vld [vmem:[%s2063_s25 + $0x4d0] sm:$0xff] }
  0x4d   : > { %1752 = vmatpush3.bf16.msra.mxu0 %v1751_v50  ;;  %v410_v50 = vld [vmem:[%s2063_s25 + $0x5a0] sm:$0xff]  ;;  %v573_v59 = vcombine.high %v2238_v53, %v2238_v53  ;;  %v399_v21 = vld [vmem:[%s2063_s25 + $0x548] sm:$0xff]  ;;  %v416_v24 = vld [vmem:[%s2063_s25 + $0x5d0] sm:$0xff] }
  0x4e   : > { %1784 = vmatpush3.bf16.msra.mxu1 %v1783_v51  ;;  %1754 = vmatprep.subr.bf16.mxu0 %v1753_v52  ;;  %v411_v51 = vld [vmem:[%s2063_s25 + $0x5a8] sm:$0xff]  ;;  %v572_v52 = vcombine.high %v2227_v44, %v2227_v44  ;;  %v1847_v27 = vpack.c.bf16 %v399_v21, %v398_v19  ;;  %v368_v29 = vld [vmem:[%s2063_s25 + $0x450] sm:$0xff]  ;;  %v401_v34 = vld [vmem:[%s2063_s25 + $0x558] sm:$0xff] }
  0x4f   : > { %1786 = vmatprep.subr.bf16.mxu1 %v1785_v56  ;;  %v362_v56 = vld [vmem:[%s2063_s25 + $0x420] sm:$0xff]  ;;  %v1837_v60 = vpack.c.bf16 %v411_v51, %v410_v50  ;;  %v400_v31 = vld [vmem:[%s2063_s25 + $0x550] sm:$0xff]  ;;  %v419_v38 = vld [vmem:[%s2063_s25 + $0x5e8] sm:$0xff] }
  0x50   : > { %v1807_v1 = vpack.c.bf16 %v363_v57, %v362_v56  ;;  %v386_v35 = vld [vmem:[%s2063_s25 + $0x4e0] sm:$0xff]  ;;  %v1851_v40 = vpack.c.bf16 %v401_v34, %v400_v31  ;;  %v371_v45 = vld [vmem:[%s2063_s25 + $0x468] sm:$0xff]  ;;  %v388_v49 = vld [vmem:[%s2063_s25 + $0x4f0] sm:$0xff] }
  0x51   : > { %1756 = vmatpush3.bf16.msra.mxu0 %v1755_v62  ;;  %v381_v62 = vld [vmem:[%s2063_s25 + $0x4b8] sm:$0xff]  ;;  %v403_v48 = vld [vmem:[%s2063_s25 + $0x568] sm:$0xff]  ;;  %v420_v51 = vld [vmem:[%s2063_s25 + $0x5f0] sm:$0xff] }
  0x52   : > { %1788 = vmatpush3.bf16.msra.mxu1 %v1787_v63  ;;  %1758 = vmatprep.subr.bf16.mxu0 %v1757_v0  ;;  %v412_v63 = vld [vmem:[%s2063_s25 + $0x5b0] sm:$0xff]  ;;  %v413_v0 = vld [vmem:[%s2063_s25 + $0x5b8] sm:$0xff]  ;;  %v423_v6 = vld [vmem:[%s2063_s25 + $0x608] sm:$0xff] }
  0x53   : > { %1790 = vmatprep.subr.bf16.mxu1 %v1789_v4  ;;  %v364_v4 = vld [vmem:[%s2063_s25 + $0x430] sm:$0xff]  ;;  %v1841_v7 = vpack.c.bf16 %v413_v0, %v412_v63  ;;  %v389_v50 = vld [vmem:[%s2063_s25 + $0x4f8] sm:$0xff]  ;;  %v470_v63 = vld [vmem:[%s2063_s25 + $0x780] sm:$0xff] }
  0x54   : > { %v1811_v13 = vpack.c.bf16 %v365_v5, %v364_v4  ;;  %v1825_v56 = vpack.c.bf16 %v389_v50, %v388_v49  ;;  %v372_v57 = vld [vmem:[%s2063_s25 + $0x470] sm:$0xff]  ;;  %v373_v58 = vld [vmem:[%s2063_s25 + $0x478] sm:$0xff]  ;;  %v471_v0 = vld [vmem:[%s2063_s25 + $0x788] sm:$0xff] }
  0x55   : > { %1760 = vmatpush3.bf16.msra.mxu0 %v1759_v10  ;;  %v383_v10 = vld [vmem:[%s2063_s25 + $0x4c8] sm:$0xff]  ;;  %v405_v61 = vld [vmem:[%s2063_s25 + $0x578] sm:$0xff]  ;;  %v422_v5 = vld [vmem:[%s2063_s25 + $0x600] sm:$0xff]  ;;  %v1893_v8 = vpack.c.bf16 %v471_v0, %v470_v63 }
  0x56   : > { %1792 = vmatpush3.bf16.msra.mxu1 %v1791_v11  ;;  %1762 = vmatprep.subr.bf16.mxu0 %v1761_v12  ;;  %v414_v11 = vld [vmem:[%s2063_s25 + $0x5c0] sm:$0xff]  ;;  %v415_v12 = vld [vmem:[%s2063_s25 + $0x5c8] sm:$0xff]  ;;  %v1813_v16 = vpack.c.bf16 %v383_v10, %v382_v9  ;;  %v440_v10 = vld [vmem:[%s2063_s25 + $0x690] sm:$0xff] }
  0x57   : > { %1794 = vmatprep.subr.bf16.mxu1 %v1793_v17  ;;  %v366_v17 = vld [vmem:[%s2063_s25 + $0x440] sm:$0xff]  ;;  %v1845_v20 = vpack.c.bf16 %v415_v12, %v414_v11  ;;  %v455_v9 = vld [vmem:[%s2063_s25 + $0x708] sm:$0xff]  ;;  %v441_v11 = vld [vmem:[%s2063_s25 + $0x698] sm:$0xff] }
  0x58   : > { %v1865_v19 = vpack.c.bf16 %v441_v11, %v440_v10  ;;  %v425_v21 = vld [vmem:[%s2063_s25 + $0x618] sm:$0xff]  ;;  %v426_v34 = vld [vmem:[%s2063_s25 + $0x620] sm:$0xff]  ;;  %v480_v0 = vld [vmem:[%s2063_s25 + $0x7d0] sm:$0xff] }
  0x59   : > { %1764 = vmatpush3.bf16.msra.mxu0 %v1763_v23  ;;  %v385_v23 = vld [vmem:[%s2063_s25 + $0x4d8] sm:$0xff]  ;;  %v450_v10 = vld [vmem:[%s2063_s25 + $0x6e0] sm:$0xff]  ;;  %v451_v11 = vld [vmem:[%s2063_s25 + $0x6e8] sm:$0xff] }
  0x5a   : > { %1796 = vmatpush3.bf16.msra.mxu1 %v1795_v25  ;;  %1798 = vmatprep.subr.bf16.mxu0 %v1797_v26  ;;  %v417_v25 = vld [vmem:[%s2063_s25 + $0x5d8] sm:$0xff]  ;;  %v1815_v26 = vpack.c.bf16 %v367_v18, %v366_v17  ;;  %v1817_v28 = vpack.c.bf16 %v385_v23, %v384_v22  ;;  %v1863_v17 = vpack.c.bf16 %v423_v6, %v422_v5  ;;  %v456_v22 = vld [vmem:[%s2063_s25 + $0x710] sm:$0xff] }
  0x5b   : > { %1830 = vmatprep.subr.bf16.mxu1 %v1829_v30  ;;  %v369_v30 = vld [vmem:[%s2063_s25 + $0x458] sm:$0xff]  ;;  %v1849_v32 = vpack.c.bf16 %v417_v25, %v416_v24  ;;  %v442_v25 = vld [vmem:[%s2063_s25 + $0x6a0] sm:$0xff]  ;;  %v432_v5 = vld [vmem:[%s2063_s25 + $0x650] sm:$0xff] }
  0x5c   : > { %822 = vmatmul.mubr.f32.vlgmr.msra.gmra.mrb[2].mxu0 %v2173_v33  ;;  %v1835_v33 = vpack.c.bf16 %v393_v47, %v392_v43  ;;  %v370_v43 = vld [vmem:[%s2063_s25 + $0x460] sm:$0xff]  ;;  %v457_v24 = vld [vmem:[%s2063_s25 + $0x718] sm:$0xff] }
  0x5d   : > { %1800 = vmatpush3.bf16.msra.mxu0 %v1799_v36  ;;  %892 = vmatmul.mubr.f32.vlgmr.msra.gmra.mrb[2].mxu1 %v2181_v42  ;;  %v380_v42 = vld [vmem:[%s2063_s25 + $0x4b0] sm:$0xff]  ;;  %v387_v36 = vld [vmem:[%s2063_s25 + $0x4e8] sm:$0xff]  ;;  %v1899_v31 = vpack.c.bf16 %v457_v24, %v456_v22  ;;  %v461_v50 = vld [vmem:[%s2063_s25 + $0x738] sm:$0xff] }
  0x5e   : > { %1832 = vmatpush3.bf16.msra.mxu1 %v1831_v37  ;;  %1802 = vmatprep.subr.bf16.mxu0 %v1801_v39  ;;  %v1809_v3 = vpack.c.bf16 %v381_v62, %v380_v42  ;;  %v418_v37 = vld [vmem:[%s2063_s25 + $0x5e0] sm:$0xff]  ;;  %v1819_v39 = vpack.c.bf16 %v369_v30, %v368_v29  ;;  %v1821_v41 = vpack.c.bf16 %v387_v36, %v386_v35  ;;  %v439_v62 = vld [vmem:[%s2063_s25 + $0x688] sm:$0xff]  ;;  %v449_v63 = vld [vmem:[%s2063_s25 + $0x6d8] sm:$0xff] }
  0x5f   : > { %1834 = vmatprep.subr.bf16.mxu1 %v1833_v46  ;;  %961 = vmatprep.mubr.f32.mxu0 %v572_v52  ;;  %v402_v46 = vld [vmem:[%s2063_s25 + $0x560] sm:$0xff]  ;;  %v1853_v47 = vpack.c.bf16 %v419_v38, %v418_v37  ;;  %v421_v52 = vld [vmem:[%s2063_s25 + $0x5f8] sm:$0xff]  ;;  %v459_v37 = vld [vmem:[%s2063_s25 + $0x728] sm:$0xff] }
  0x60   : > { %1031 = vmatprep.mubr.f32.mxu1 %v573_v59  ;;  %v404_v59 = vld [vmem:[%s2063_s25 + $0x570] sm:$0xff]  ;;  %v438_v42 = vld [vmem:[%s2063_s25 + $0x680] sm:$0xff]  ;;  %v433_v6 = vld [vmem:[%s2063_s25 + $0x658] sm:$0xff] }
  0x61   : > { %1804 = vmatpush3.bf16.msra.mxu0 %v1803_v54  ;;  %v1823_v54 = vpack.c.bf16 %v371_v45, %v370_v43  ;;  %v1861_v4 = vpack.c.bf16 %v439_v62, %v438_v42  ;;  %v458_v35 = vld [vmem:[%s2063_s25 + $0x720] sm:$0xff]  ;;  %v444_v38 = vld [vmem:[%s2063_s25 + $0x6b0] sm:$0xff]  ;;  %v463_v42 = vld [vmem:[%s2063_s25 + $0x748] sm:$0xff] }
  0x62   : > { %1836 = vmatpush3.bf16.msra.mxu1 %v1835_v33  ;;  %1806 = vmatprep.subr.bf16.mxu0 %v1805_v55  ;;  %v228_v33 = vld [vmem:[%s2058_s21 + $0x18] sm:$0xff]  ;;  %v1855_v55 = vpack.c.bf16 %v403_v48, %v402_v46  ;;  %v1903_v43 = vpack.c.bf16 %v459_v37, %v458_v35  ;;  %v428_v46 = vld [vmem:[%s2063_s25 + $0x630] sm:$0xff]  ;;  %v466_v22 = vld [vmem:[%s2063_s25 + $0x760] sm:$0xff] }
  0x63   : > { %1838 = vmatprep.subr.bf16.mxu1 %v1837_v60  ;;  %v1857_v60 = vpack.c.bf16 %v421_v52, %v420_v51  ;;  %v2299_v12 = vrot.slane %v228_v33, %v2116_v14  ;;  %v460_v48 = vld [vmem:[%s2063_s25 + $0x730] sm:$0xff]  ;;  %v446_v51 = vld [vmem:[%s2063_s25 + $0x6c0] sm:$0xff]  ;;  %v447_v52 = vld [vmem:[%s2063_s25 + $0x6c8] sm:$0xff] }
  0x64   : > { %v448_v62 = vld [vmem:[%s2063_s25 + $0x6d0] sm:$0xff]  ;;  %v467_v24 = vld [vmem:[%s2063_s25 + $0x768] sm:$0xff]  ;;  %v469_v35 = vld [vmem:[%s2063_s25 + $0x778] sm:$0xff] }
  0x65   : > { %1808 = vmatpush3.bf16.msra.mxu0 %v1807_v1  ;;  %v574_v1 = vcombine.high %v228_v33, %v228_v33  ;;  %v479_v33 = vld [vmem:[%s2063_s25 + $0x7c8] sm:$0xff] }
  0x66   : > { %1840 = vmatpush3.bf16.msra.mxu1 %v1839_v2  ;;  %1810 = vmatprep.subr.bf16.mxu0 %v1809_v3  ;;  %v1827_v2 = vpack.c.bf16 %v373_v58, %v372_v57  ;;  %v1859_v3 = vpack.c.bf16 %v405_v61, %v404_v59  ;;  %v1877_v57 = vpack.c.bf16 %v447_v52, %v446_v51  ;;  %v430_v58 = vld [vmem:[%s2063_s25 + $0x640] sm:$0xff]  ;;  %v431_v59 = vld [vmem:[%s2063_s25 + $0x648] sm:$0xff] }
  0x67   : > { %1842 = vmatprep.subr.bf16.mxu1 %v1841_v7  ;;  %v454_v7 = vld [vmem:[%s2063_s25 + $0x700] sm:$0xff]  ;;  %v503_v37 = vld [vmem:[%s2063_s25 + $0x888] sm:$0xff] }
  0x68   : > { %v1895_v18 = vpack.c.bf16 %v455_v9, %v454_v7  ;;  %v464_v7 = vld [vmem:[%s2063_s25 + $0x750] sm:$0xff]  ;;  %v465_v9 = vld [vmem:[%s2063_s25 + $0x758] sm:$0xff]  ;;  %v506_v52 = vld [vmem:[%s2063_s25 + $0x8a0] sm:$0xff] }
  0x69   : > { %1812 = vmatpush3.bf16.msra.mxu0 %v1811_v13  ;;  %v472_v13 = vld [vmem:[%s2063_s25 + $0x790] sm:$0xff] }
  0x6a   : > { %1844 = vmatpush3.bf16.msra.mxu1 %v1843_v15  ;;  %1814 = vmatprep.subr.bf16.mxu0 %v1813_v16  ;;  %v473_v15 = vld [vmem:[%s2063_s25 + $0x798] sm:$0xff]  ;;  %v2304_v16 = vrot.slane %v574_v1, %v2116_v14  ;;  %v443_v14 = vld [vmem:[%s2063_s25 + $0x6a8] sm:$0xff] }
  0x6b   : > { %1846 = vmatprep.subr.bf16.mxu1 %v1845_v20  ;;  %v424_v20 = vld [vmem:[%s2063_s25 + $0x610] sm:$0xff]  ;;  %v1897_v23 = vpack.c.bf16 %v473_v15, %v472_v13  ;;  %v481_v1 = vld [vmem:[%s2063_s25 + $0x7d8] sm:$0xff]  ;;  %v482_v13 = vld [vmem:[%s2063_s25 + $0x7e0] sm:$0xff] }
  0x6c   : > { %v590_v29 = vcombine.high %v2304_v16, %v2304_v16  ;;  %v1867_v30 = vpack.c.bf16 %v425_v21, %v424_v20  ;;  %v483_v15 = vld [vmem:[%s2063_s25 + $0x7e8] sm:$0xff]  ;;  %v434_v20 = vld [vmem:[%s2063_s25 + $0x660] sm:$0xff] }
  0x6d   : > { %1816 = vmatpush3.bf16.msra.mxu0 %v1815_v26  ;;  %v589_v26 = vcombine.high %v2299_v12, %v2299_v12  ;;  %v435_v21 = vld [vmem:[%s2063_s25 + $0x668] sm:$0xff] }
  0x6e   : > { %1848 = vmatpush3.bf16.msra.mxu1 %v1847_v27  ;;  %1818 = vmatprep.subr.bf16.mxu0 %v1817_v28  ;;  %v474_v27 = vld [vmem:[%s2063_s25 + $0x7a0] sm:$0xff]  ;;  %v475_v28 = vld [vmem:[%s2063_s25 + $0x7a8] sm:$0xff] }
  0x6f   : > { %1850 = vmatprep.subr.bf16.mxu1 %v1849_v32  ;;  %v1869_v32 = vpack.c.bf16 %v443_v14, %v442_v25  ;;  %v1901_v36 = vpack.c.bf16 %v475_v28, %v474_v27  ;;  %v452_v25 = vld [vmem:[%s2063_s25 + $0x6f0] sm:$0xff]  ;;  %v453_v14 = vld [vmem:[%s2063_s25 + $0x6f8] sm:$0xff]  ;;  %v1887_v28 = vpack.c.bf16 %v435_v21, %v434_v20 }
  0x70   : > { %v485_v27 = vld [vmem:[%s2063_s25 + $0x7f8] sm:$0xff] }
  0x71   : > { %1820 = vmatpush3.bf16.msra.mxu0 %v1819_v39  ;;  %v445_v39 = vld [vmem:[%s2063_s25 + $0x6b8] sm:$0xff] }
  0x72   : > { %1852 = vmatpush3.bf16.msra.mxu1 %v1851_v40  ;;  %1822 = vmatprep.subr.bf16.mxu0 %v1821_v41  ;;  %v477_v40 = vld [vmem:[%s2063_s25 + $0x7b8] sm:$0xff]  ;;  %v1873_v45 = vpack.c.bf16 %v445_v39, %v444_v38 }
  0x73   : > { %1854 = vmatprep.subr.bf16.mxu1 %v1853_v47  ;;  %v429_v47 = vld [vmem:[%s2063_s25 + $0x638] sm:$0xff] }
  0x75   : > { %1824 = vmatpush3.bf16.msra.mxu0 %v1823_v54  ;;  %v478_v54 = vld [vmem:[%s2063_s25 + $0x7c0] sm:$0xff] }
  0x76   : > { %1856 = vmatpush3.bf16.msra.mxu1 %v1855_v55  ;;  %1826 = vmatprep.subr.bf16.mxu0 %v1825_v56  ;;  %v1875_v55 = vpack.c.bf16 %v429_v47, %v428_v46  ;;  %v1907_v56 = vpack.c.bf16 %v461_v50, %v460_v48  ;;  %v1909_v61 = vpack.c.bf16 %v479_v33, %v478_v54  ;;  %v2371_v46 = vld.sshfl [vmem:[%s2058_s21 + $0x20] sm:$0x33 pattern:$0x76325410]  ;;  %v489_v50 = vld [vmem:[%s2063_s25 + $0x818] sm:$0xff]  ;;  %v507_v54 = vld [vmem:[%s2063_s25 + $0x8a8] sm:$0xff] }
  0x77   : > { %1858 = vmatprep.subr.bf16.mxu1 %v1857_v60  ;;  %v462_v60 = vld [vmem:[%s2063_s25 + $0x740] sm:$0xff]  ;;  %v598_v51 = vcombine.high %v2371_v46, %v2371_v46 }
  0x79   : > { %1828 = vmatpush3.bf16.msra.mxu0 %v1827_v2  ;;  %v1879_v2 = vpack.c.bf16 %v431_v59, %v430_v58  ;;  %v508_v58 = vld [vmem:[%s2063_s25 + $0x8b0] sm:$0xff]  ;;  %v509_v59 = vld [vmem:[%s2063_s25 + $0x8b8] sm:$0xff] }
  0x7a   : > { %1860 = vmatpush3.bf16.msra.mxu1 %v1859_v3  ;;  %1862 = vmatprep.subr.bf16.mxu0 %v1861_v4  ;;  %v1911_v3 = vpack.c.bf16 %v463_v42, %v462_v60  ;;  %v1881_v4 = vpack.c.bf16 %v449_v63, %v448_v62  ;;  %v1937_v60 = vpack.c.bf16 %v509_v59, %v508_v58  ;;  %v510_v42 = vld [vmem:[%s2063_s25 + $0x8c0] sm:$0xff]  ;;  %v511_v62 = vld [vmem:[%s2063_s25 + $0x8c8] sm:$0xff] }
  0x7b   : > { %1894 = vmatprep.subr.bf16.mxu1 %v1893_v8  ;;  %v1913_v8 = vpack.c.bf16 %v481_v1, %v480_v0  ;;  %v1941_v0 = vpack.c.bf16 %v511_v62, %v510_v42  ;;  %v494_v1 = vld [vmem:[%s2063_s25 + $0x840] sm:$0xff] }
  0x7c   : > { %962 = vmatmul.mubr.f32.vlgmr.msra.gmra.mrb[4].mxu0 %v2227_v44  ;;  %v427_v44 = vld [vmem:[%s2063_s25 + $0x628] sm:$0xff]  ;;  %v224_v59 = vld [vmem:[#allocation2] sm:$0x3] }
  0x7d   : > { %1864 = vmatpush3.bf16.msra.mxu0 %v1863_v17  ;;  %1032 = vmatmul.mubr.f32.vlgmr.msra.gmra.mrb[4].mxu1 %v2238_v53  ;;  %v476_v53 = vld [vmem:[%s2063_s25 + $0x7b0] sm:$0xff]  ;;  %v1871_v41 = vpack.c.bf16 %v427_v44, %v426_v34  ;;  %v1883_v17 = vpack.c.bf16 %v433_v6, %v432_v5 }
  0x7e   : > { %1896 = vmatpush3.bf16.msra.mxu1 %v1895_v18  ;;  %1866 = vmatprep.subr.bf16.mxu0 %v1865_v19  ;;  %v1905_v49 = vpack.c.bf16 %v477_v40, %v476_v53  ;;  %v1915_v18 = vpack.c.bf16 %v465_v9, %v464_v7  ;;  %v1885_v19 = vpack.c.bf16 %v451_v11, %v450_v10  ;;  %v468_v34 = vld [vmem:[%s2063_s25 + $0x770] sm:$0xff]  ;;  %v486_v40 = vld [vmem:[%s2063_s25 + $0x800] sm:$0xff]  ;;  %v515_v10 = vld [vmem:[%s2063_s25 + $0x8e8] sm:$0xff] }
  0x7f   : > { %1898 = vmatprep.subr.bf16.mxu1 %v1897_v23  ;;  %1101 = vmatprep.mubr.f32.mxu0 %v589_v26  ;;  %v1917_v23 = vpack.c.bf16 %v483_v15, %v482_v13  ;;  %v484_v26 = vld [vmem:[%s2063_s25 + $0x7f0] sm:$0xff]  ;;  %v1923_v39 = vpack.c.bf16 %v469_v35, %v468_v34  ;;  %v514_v9 = vld [vmem:[%s2063_s25 + $0x8e0] sm:$0xff] }
  0x80   : > { %1171 = vmatprep.mubr.f32.mxu1 %v590_v29  ;;  %v1919_v29 = vpack.c.bf16 %v467_v24, %v466_v22  ;;  %v1921_v44 = vpack.c.bf16 %v485_v27, %v484_v26  ;;  %v496_v7 = vld [vmem:[%s2063_s25 + $0x850] sm:$0xff]  ;;  %v1949_v13 = vpack.c.bf16 %v515_v10, %v514_v9  ;;  %v498_v15 = vld [vmem:[%s2063_s25 + $0x860] sm:$0xff] }
  0x81   : > { %1868 = vmatpush3.bf16.msra.mxu0 %v1867_v30  ;;  %v1889_v30 = vpack.c.bf16 %v453_v14, %v452_v25  ;;  %v500_v22 = vld [vmem:[%s2063_s25 + $0x870] sm:$0xff] }
  0x82   : > { %1900 = vmatpush3.bf16.msra.mxu1 %v1899_v31  ;;  %1870 = vmatprep.subr.bf16.mxu0 %v1869_v32  ;;  %v436_v31 = vld [vmem:[%s2063_s25 + $0x670] sm:$0xff]  ;;  %v437_v32 = vld [vmem:[%s2063_s25 + $0x678] sm:$0xff] }
  0x83   : > { %1902 = vmatprep.subr.bf16.mxu1 %v1901_v36  ;;  %v502_v36 = vld [vmem:[%s2063_s25 + $0x880] sm:$0xff]  ;;  %v1891_v38 = vpack.c.bf16 %v437_v32, %v436_v31 }
  0x84   : > { %v1925_v53 = vpack.c.bf16 %v503_v37, %v502_v36 }
  0x85   : > { %1872 = vmatpush3.bf16.msra.mxu0 %v1871_v41  ;;  %v487_v41 = vld [vmem:[%s2063_s25 + $0x808] sm:$0xff] }
  0x86   : > { %1904 = vmatpush3.bf16.msra.mxu1 %v1903_v43  ;;  %1874 = vmatprep.subr.bf16.mxu0 %v1873_v45  ;;  %v504_v43 = vld [vmem:[%s2063_s25 + $0x890] sm:$0xff]  ;;  %v505_v45 = vld [vmem:[%s2063_s25 + $0x898] sm:$0xff]  ;;  %v1927_v47 = vpack.c.bf16 %v487_v41, %v486_v40 }
  0x87   : > { %1906 = vmatprep.subr.bf16.mxu1 %v1905_v49  ;;  %v1929_v48 = vpack.c.bf16 %v505_v45, %v504_v43  ;;  %v488_v49 = vld [vmem:[%s2063_s25 + $0x810] sm:$0xff] }
  0x88   : > { %v1931_v33 = vpack.c.bf16 %v489_v50, %v488_v49 }
  0x89   : > { %1876 = vmatpush3.bf16.msra.mxu0 %v1875_v55  ;;  %v1933_v55 = vpack.c.bf16 %v507_v54, %v506_v52 }
  0x8a   : > { %1908 = vmatpush3.bf16.msra.mxu1 %v1907_v56  ;;  %1878 = vmatprep.subr.bf16.mxu0 %v1877_v57  ;;  %v490_v56 = vld [vmem:[%s2063_s25 + $0x820] sm:$0xff]  ;;  %v491_v57 = vld [vmem:[%s2063_s25 + $0x828] sm:$0xff] }
  0x8b   : > { %1910 = vmatprep.subr.bf16.mxu1 %v1909_v61  ;;  %v492_v61 = vld [vmem:[%s2063_s25 + $0x830] sm:$0xff] }
  0x8d   : > { %1880 = vmatpush3.bf16.msra.mxu0 %v1879_v2  ;;  %v495_v2 = vld [vmem:[%s2063_s25 + $0x848] sm:$0xff] }
  0x8e   : > { %1912 = vmatpush3.bf16.msra.mxu1 %v1911_v3  ;;  %1882 = vmatprep.subr.bf16.mxu0 %v1881_v4  ;;  %v512_v3 = vld [vmem:[%s2063_s25 + $0x8d0] sm:$0xff]  ;;  %v513_v4 = vld [vmem:[%s2063_s25 + $0x8d8] sm:$0xff]  ;;  %v1943_v5 = vpack.c.bf16 %v495_v2, %v494_v1 }
  0x8f   : > { %1914 = vmatprep.subr.bf16.mxu1 %v1913_v8  ;;  %v1945_v6 = vpack.c.bf16 %v513_v4, %v512_v3  ;;  %v497_v8 = vld [vmem:[%s2063_s25 + $0x858] sm:$0xff] }
  0x90   : > { %v1947_v11 = vpack.c.bf16 %v497_v8, %v496_v7 }
  0x91   : > { %1884 = vmatpush3.bf16.msra.mxu0 %v1883_v17  ;;  %v499_v17 = vld [vmem:[%s2063_s25 + $0x868] sm:$0xff] }
  0x92   : > { %1916 = vmatpush3.bf16.msra.mxu1 %v1915_v18  ;;  %1886 = vmatprep.subr.bf16.mxu0 %v1885_v19  ;;  %v516_v18 = vld [vmem:[%s2063_s25 + $0x8f0] sm:$0xff]  ;;  %v517_v19 = vld [vmem:[%s2063_s25 + $0x8f8] sm:$0xff]  ;;  %v1951_v20 = vpack.c.bf16 %v499_v17, %v498_v15 }
  0x93   : > { %1918 = vmatprep.subr.bf16.mxu1 %v1917_v23  ;;  %v1953_v21 = vpack.c.bf16 %v517_v19, %v516_v18  ;;  %v501_v23 = vld [vmem:[%s2063_s25 + $0x878] sm:$0xff] }
  0x94   : > { %v1955_v24 = vpack.c.bf16 %v501_v23, %v500_v22 }
  0x95   : > { %1888 = vmatpush3.bf16.msra.mxu0 %v1887_v28 }
  0x96   : > { %1920 = vmatpush3.bf16.msra.mxu1 %v1919_v29  ;;  %1890 = vmatprep.subr.bf16.mxu0 %v1889_v30 }
  0x97   : > { %1922 = vmatprep.subr.bf16.mxu1 %v1921_v44 }
  0x99   : > { %1892 = vmatpush3.bf16.msra.mxu0 %v1891_v38 }
  0x9a   : > { %1924 = vmatpush3.bf16.msra.mxu1 %v1923_v39  ;;  %1926 = vmatprep.subr.bf16.mxu0 %v1925_v53 }
  0x9c   : > { %1102 = vmatmul.mubr.f32.vlgmr.msra.gmra.mrb[6].mxu0 %v2299_v12  ;;  %v1935_v12 = vpack.c.bf16 %v491_v57, %v490_v56 }
  0x9d   : > { %1928 = vmatpush3.bf16.msra.mxu0 %v1927_v47  ;;  %1172 = vmatmul.mubr.f32.vlgmr.msra.gmra.mrb[6].mxu1 %v2304_v16  ;;  %v493_v16 = vld [vmem:[%s2063_s25 + $0x838] sm:$0xff] }
  0x9e   : > { %1930 = vmatprep.subr.bf16.mxu0 %v1929_v48  ;;  %1241 = vmatprep.mubr.f32.mxu0 %v598_v51  ;;  %v1939_v63 = vpack.c.bf16 %v493_v16, %v492_v61  ;;  %v1350_v16 = vld [vmem:[%s2422_s2] ss:$0 sm:$0xff] (!%p1349_p7) }
  0xa1   : > { %1932 = vmatpush3.bf16.msra.mxu0 %v1931_v33 }
  0xa2   : > { %1934 = vmatprep.subr.bf16.mxu0 %v1933_v55 }
  0xa5   : > { %1936 = vmatpush3.bf16.msra.mxu0 %v1935_v12 }
  0xa6   : > { %1938 = vmatprep.subr.bf16.mxu0 %v1937_v60 }
  0xa9   : > { %1940 = vmatpush3.bf16.msra.mxu0 %v1939_v63 }
  0xaa   : > { %1942 = vmatprep.subr.bf16.mxu0 %v1941_v0 }
  0xad   : > { %1944 = vmatpush3.bf16.msra.mxu0 %v1943_v5 }
  0xae   : > { %1946 = vmatprep.subr.bf16.mxu0 %v1945_v6 }
  0xb1   : > { %1948 = vmatpush3.bf16.msra.mxu0 %v1947_v11 }
  0xb2   : > { %1950 = vmatprep.subr.bf16.mxu0 %v1949_v13 }
  0xb5   : > { %1952 = vmatpush3.bf16.msra.mxu0 %v1951_v20 }
  0xb6   : > { %1954 = vmatprep.subr.bf16.mxu0 %v1953_v21 }
  0xb9   : > { %1956 = vmatpush3.bf16.msra.mxu0 %v1955_v24 }
  0xbc   : > { %1242 = vmatmul.mubr.f32.vlgmr.msra.gmra.mrb[8].mxu0 %v2371_v46 }
 0x10f   : > { %v1386_v25 = vpop.f32.mrb[0].mxu0 }
 0x110   : > { %v1421_v14 = vpop.f32.mrb[0].mxu1  ;;  %v1387_v26 = vpop.f32.mrb[1].mxu0 }
 0x111   : > { %v1388_v27 = vadd.f32 %v1387_v26, %v1386_v25  ;;  %v1422_v28 = vpop.f32.mrb[1].mxu1 }
 0x112   : > { %v1423_v29 = vadd.f32 %v1422_v28, %v1421_v14 }
 0x114   : > { %v754_v30 = vadd.f32 %v1423_v29, %v1388_v27 }
 0x12f   : > { %v1456_v31 = vpop.f32.mrb[2].mxu0 }
 0x130   : > { %v1457_v32 = vpop.f32.mrb[3].mxu0  ;;  %v1491_v34 = vpop.f32.mrb[2].mxu1 }
 0x131   : > { %v1458_v44 = vadd.f32 %v1457_v32, %v1456_v31  ;;  %v1492_v35 = vpop.f32.mrb[3].mxu1 }
 0x132   : > { %v1493_v36 = vadd.f32 %v1492_v35, %v1491_v34 }
 0x133   : > { %v824_v37 = vadd.f32 %v1458_v44, %v754_v30 }
 0x135   : > { %v894_v38 = vadd.f32 %v1493_v36, %v824_v37 }
 0x14f   : > { %v1526_v39 = vpop.f32.mrb[4].mxu0 }
 0x150   : > { %v1527_v53 = vpop.f32.mrb[5].mxu0  ;;  %v1561_v40 = vpop.f32.mrb[4].mxu1 }
 0x151   : > { %v1528_v41 = vadd.f32 %v1527_v53, %v1526_v39  ;;  %v1562_v43 = vpop.f32.mrb[5].mxu1 }
 0x152   : > { %v1563_v45 = vadd.f32 %v1562_v43, %v1561_v40 }
 0x153   : > { %v964_v46 = vadd.f32 %v1528_v41, %v894_v38 }
 0x155   : > { %v1034_v47 = vadd.f32 %v1563_v45, %v964_v46 }
 0x16f   : > { %v1596_v48 = vpop.f32.mrb[6].mxu0 }
 0x170   : > { %v1597_v49 = vpop.f32.mrb[7].mxu0  ;;  %v1631_v50 = vpop.f32.mrb[6].mxu1 }
 0x171   : > { %v1598_v51 = vadd.f32 %v1597_v49, %v1596_v48  ;;  %v1632_v52 = vpop.f32.mrb[7].mxu1 }
 0x172   : > { %v1633_v54 = vadd.f32 %v1632_v52, %v1631_v50 }
 0x173   : > { %v1104_v33 = vadd.f32 %v1598_v51, %v1034_v47 }
 0x175   : > { %v1174_v55 = vadd.f32 %v1633_v54, %v1104_v33 }
 0x18f   : > { %v1666_v56 = vpop.f32.mrb[8].mxu0 }
 0x190   : > { %v1667_v57 = vpop.f32.mrb[9].mxu0 }
 0x191   : > { %v1668_v58 = vadd.f32 %v1667_v57, %v1666_v56  ;;  %1252 = sbr.rel (%p1349_p7) target bundleno = 420 (0x1a4), region = 40 }
 0x193   : > { %v1244_v12 = vadd.f32 %v1668_v58, %v1174_v55 }
 0x195   : > { %v1247_v60 = vadd.f32 %v1244_v12, %v224_v59 }
 0x197   : > { %1248 = vst [vmem:[#allocation2] sm:$0x3] %v1247_v60 }
 0x19e   : > { %v1253_v61 = vld [vmem:[#allocation2] sm:$0x3] }
 0x19f   : > { %v1261_v42 = vadd.f32 %v1350_v16, %v1253_v61 }
 0x1a1   : > { %v1262_v62 = vmax.f32 %v1261_v42, 0.0 }
 0x1a3   : > { %1263 = vst [vmem:[%s2423_s3] sm:$0x3] %v1262_v62 }
 0x1a4 PF: > { %s13_s14 = sadd.s32 1, %s2009_s14   ;;  %s2424_s12 = smov %s2005_s13 }
 0x1a5   : > { %p10_p8 = scmp.ge.s32.totalorder %s13_s14, 6   ;;  %s2425_s13 = smov %s2427_s15 }
 0x1a7   :  { %12 = sbr.rel (!%p10_p8) target bundleno = 2 (0x2), region = 73 }

// kernel: net_forward.6
= control target key start
LH: loop header
LB: loop body
LE: loop exit
PB: predicated region body
PF: predicated region fallthrough
CT: control target
= control target key end

     0   :  { %s12171_s12 = smov 0   ;;  %s14719_s0 = inlined_call_operand.vmem [shape: f32[2,676,32], index: 0, kind: input, shape index: {}]   ;;  %s14720_s1 = inlined_call_operand.vmem [shape: f32[3,3,32,64], index: 1, kind: input, shape index: {}]   ;;  %s14721_s2 = inlined_call_operand.vmem [shape: f32[1,64], index: 2, kind: input, shape index: {}]   ;;  %s14722_s3 = inlined_call_operand.vmem [shape: f32[2,624,64], index: 3, kind: output, shape index: {}]  }
   0x1 LB: > { %s9447_s13 = sadd.s32 4294967295, %s12148_s12   ;;  %p9451_p0 = scmp.ge.s32.totalorder %s12148_s12, 1  ;;  %s12148_s12 = sphi %s12171_s12, %s13_s12  }
   0x2   : > { %p137_p1 = scmp.lt.s32.totalorder %s12148_s12, 3 }
   0x4   : > { %p138_p2 = pnand %p9451_p0, %p137_p1 }
   0x5   : > { %v249_v0 = vld [vmem:[%s14720_s1] sm:$0xff] (!%p138_p2)  ;;  %v250_v1 = vld [vmem:[%s14720_s1 + $0x8] sm:$0xff] (!%p138_p2)  ;;  %v251_v2 = vld [vmem:[%s14720_s1 + $0x10] sm:$0xff] (!%p138_p2)  ;;  %p161_p3 = scmp.lt.s32.totalorder (!%p138_p2), %s9447_s13, 1  ;;  %vm253_vm0 = vcmask (!%p138_p2), 261120   ;;  %vm943_vm1 = vcmask (!%p138_p2), 523264  }
   0x6   : > { %141 = sbr.rel (%p138_p2) target bundleno = 954 (0x3ba), region = 32  ;;  %v12054_v3 = vpack.c.bf16 (!%p138_p2), %v250_v1, %v249_v0  ;;  %v252_v4 = vld [vmem:[%s14720_s1 + $0x18] sm:$0xff] (!%p138_p2)  ;;  %v9532_v6 = vld [vmem:[%s14720_s1 + $0x20] sm:$0xff] (!%p138_p2)  ;;  %v9533_v7 = vld [vmem:[%s14720_s1 + $0x28] sm:$0xff] (!%p138_p2)  ;;  %vm1021_vm2 = vcmask (!%p138_p2), 521216   ;;  %vm9390_vm3 = vcmask (!%p138_p2), 517120  }
   0x7   : > { %v12058_v5 = vpack.c.bf16 (!%p138_p2), %v252_v4, %v251_v2  ;;  %v9614_v8 = vld [vmem:[%s14720_s1 + $0x40] sm:$0xff] (!%p138_p2)  ;;  %v9615_v9 = vld [vmem:[%s14720_s1 + $0x48] sm:$0xff] (!%p138_p2)  ;;  %v12062_v10 = vpack.c.bf16 (!%p138_p2), %v9533_v7, %v9532_v6  ;;  %v9534_v12 = vld [vmem:[%s14720_s1 + $0x30] sm:$0xff] (!%p138_p2) }
   0x8   : > { %12126 = vmatprep.subr.bf16.mxu1 (!%p138_p2), %v12054_v3  ;;  %12055 = vmatprep.subr.bf16.mxu0 (!%p138_p2), %v12054_v3  ;;  %v12070_v11 = vpack.c.bf16 (!%p138_p2), %v9615_v9, %v9614_v8  ;;  %v9535_v13 = vld [vmem:[%s14720_s1 + $0x38] sm:$0xff] (!%p138_p2)  ;;  %v9616_v15 = vld [vmem:[%s14720_s1 + $0x50] sm:$0xff] (!%p138_p2)  ;;  %v9696_v22 = vld [vmem:[%s14720_s1 + $0x60] sm:$0xff] (!%p138_p2) }
   0x9   : > { %12128 = vmatpush3.bf16.msra.mxu1 (!%p138_p2), %v12054_v3  ;;  %12057 = vmatpush3.bf16.msra.mxu0 (!%p138_p2), %v12054_v3  ;;  %v9617_v18 = vld [vmem:[%s14720_s1 + $0x58] sm:$0xff] (!%p138_p2)  ;;  %v12066_v20 = vpack.c.bf16 (!%p138_p2), %v9535_v13, %v9534_v12  ;;  %v9697_v23 = vld [vmem:[%s14720_s1 + $0x68] sm:$0xff] (!%p138_p2)  ;;  %v9778_v27 = vld [vmem:[%s14720_s1 + $0x80] sm:$0xff] (!%p138_p2) }
   0xa   : > { %12127 = vmatprep.subr.bf16.mxu1 (!%p138_p2), %v12058_v5  ;;  %12059 = vmatprep.subr.bf16.mxu0 (!%p138_p2), %v12058_v5  ;;  %v12074_v25 = vpack.c.bf16 (!%p138_p2), %v9617_v18, %v9616_v15  ;;  %v9779_v28 = vld [vmem:[%s14720_s1 + $0x88] sm:$0xff] (!%p138_p2)  ;;  %v12248_v30 = vpack.c.bf16 (!%p138_p2), %v9697_v23, %v9696_v22 }
   0xb   : > { %v12254_v33 = vpack.c.bf16 (!%p138_p2), %v9779_v28, %v9778_v27 }
   0xd   : > { %s14724_s13 = smov (!%p161_p3, %s9447_s13), 1  ;;  %12129 = vmatpush3.bf16.msra.mxu1 %v12058_v5  ;;  %12061 = vmatpush3.bf16.msra.mxu0 %v12058_v5 }
   0xe   : > { %s12130_s30 = smul.u32 680, %s14724_s13  ;;  %12063 = vmatprep.subr.bf16.mxu1 %v12062_v10  ;;  %12071 = vmatprep.subr.bf16.mxu0 %v12070_v11 }
  0x10   : > { %s12209_s6 = scalar_lea.vmem %s14719_s0, %s12130_s30 }
  0x11   : > { %v211_v14 = vld [vmem:[%s12209_s6 + $0x140] sm:$0xff]  ;;  %v212_v16 = vld [vmem:[%s12209_s6 + $0x148] sm:$0xff]  ;;  %v213_v19 = vld [vmem:[%s12209_s6 + $0x150] sm:$0xff] }
  0x12   : > { %10997 = vmatprep.mubr.msk.f32.mxu1 %vm253_vm0, %v211_v14  ;;  %v171_v17 = vld [vmem:[%s12209_s6] sm:$0xff]  ;;  %v172_v21 = vld [vmem:[%s12209_s6 + $0x8] sm:$0xff]  ;;  %v173_v24 = vld [vmem:[%s12209_s6 + $0x10] sm:$0xff] }
  0x13   : > { %10937 = vmatprep.mubr.msk.f32.mxu0 %vm253_vm0, %v171_v17  ;;  %10998 = vmatmul.mubr.msk.f32.vlgmr.msra.gmra.mrb[0].mxu1 %vm253_vm0, %v212_v16  ;;  %v214_v26 = vld [vmem:[%s12209_s6 + $0x158] sm:$0xff]  ;;  %v215_v29 = vld [vmem:[%s12209_s6 + $0x160] sm:$0xff]  ;;  %v216_v34 = vld [vmem:[%s12209_s6 + $0x168] sm:$0xff] }
  0x14   : > { %12065 = vmatpush3.bf16.msra.mxu1 %v12062_v10  ;;  %11000 = vmatprep.mubr.msk.f32.mxu1 %vm253_vm0, %v213_v19  ;;  %v174_v31 = vld [vmem:[%s12209_s6 + $0x18] sm:$0xff]  ;;  %v175_v32 = vld [vmem:[%s12209_s6 + $0x20] sm:$0xff]  ;;  %v217_v35 = vld [vmem:[%s12209_s6 + $0x170] sm:$0xff] }
  0x15   : > { %10938 = vmatmul.mubr.msk.f32.vlgmr.msra.gmra.mrb[0].mxu0 %vm253_vm0, %v172_v21  ;;  %12067 = vmatprep.subr.bf16.mxu1 %v12066_v20  ;;  %v176_v36 = vld [vmem:[%s12209_s6 + $0x28] sm:$0xff]  ;;  %v177_v37 = vld [vmem:[%s12209_s6 + $0x30] sm:$0xff]  ;;  %v218_v38 = vld [vmem:[%s12209_s6 + $0x178] sm:$0xff] }
  0x16   : > { %12073 = vmatpush3.bf16.msra.mxu0 %v12070_v11  ;;  %10940 = vmatprep.mubr.msk.f32.mxu0 %vm253_vm0, %v173_v24  ;;  %v219_v39 = vld [vmem:[%s12209_s6 + $0x180] sm:$0xff]  ;;  %v178_v40 = vld [vmem:[%s12209_s6 + $0x38] sm:$0xff]  ;;  %v220_v42 = vld [vmem:[%s12209_s6 + $0x188] sm:$0xff] }
  0x17   : > { %11001 = vmatmul.mubr.msk.f32.gmra.mrb[2].mxu1 %vm253_vm0, %v214_v26  ;;  %12075 = vmatprep.subr.bf16.mxu0 %v12074_v25  ;;  %v179_v41 = vld [vmem:[%s12209_s6 + $0x40] sm:$0xff]  ;;  %v221_v43 = vld [vmem:[%s12209_s6 + $0x190] sm:$0xff]  ;;  %v180_v44 = vld [vmem:[%s12209_s6 + $0x48] sm:$0xff] }
  0x18   : > { %11003 = vmatprep.mubr.msk.f32.mxu1 %vm253_vm0, %v215_v29  ;;  %12069 = vmatpush3.bf16.msra.mxu1 %v12066_v20  ;;  %v181_v45 = vld [vmem:[%s12209_s6 + $0x50] sm:$0xff]  ;;  %v222_v46 = vld [vmem:[%s12209_s6 + $0x198] sm:$0xff]  ;;  %v223_v47 = vld [vmem:[%s12209_s6 + $0x1a0] sm:$0xff] }
  0x19   : > { %10941 = vmatmul.mubr.msk.f32.gmra.mrb[2].mxu0 %vm253_vm0, %v174_v31  ;;  %12079 = vmatprep.subr.bf16.mxu1 %v12248_v30  ;;  %v182_v48 = vld [vmem:[%s12209_s6 + $0x58] sm:$0xff]  ;;  %v183_v49 = vld [vmem:[%s12209_s6 + $0x60] sm:$0xff]  ;;  %v224_v50 = vld [vmem:[%s12209_s6 + $0x1a8] sm:$0xff] }
  0x1a   : > { %10943 = vmatprep.mubr.msk.f32.mxu0 %vm253_vm0, %v175_v32  ;;  %12077 = vmatpush3.bf16.msra.mxu0 %v12074_v25  ;;  %v225_v51 = vld [vmem:[%s12209_s6 + $0x1b0] sm:$0xff]  ;;  %v184_v52 = vld [vmem:[%s12209_s6 + $0x68] sm:$0xff]  ;;  %v226_v54 = vld [vmem:[%s12209_s6 + $0x1b8] sm:$0xff] }
  0x1b   : > { %11004 = vmatmul.mubr.msk.f32.gmra.mrb[4].mxu1 %vm253_vm0, %v216_v34  ;;  %12087 = vmatprep.subr.bf16.mxu0 %v12254_v33  ;;  %v185_v53 = vld [vmem:[%s12209_s6 + $0x70] sm:$0xff]  ;;  %v227_v55 = vld [vmem:[%s12209_s6 + $0x1c0] sm:$0xff]  ;;  %v186_v56 = vld [vmem:[%s12209_s6 + $0x78] sm:$0xff] }
  0x1c   : > { %11006 = vmatprep.mubr.msk.f32.mxu1 %vm253_vm0, %v217_v35  ;;  %v187_v57 = vld [vmem:[%s12209_s6 + $0x80] sm:$0xff]  ;;  %v228_v58 = vld [vmem:[%s12209_s6 + $0x1c8] sm:$0xff]  ;;  %v229_v59 = vld [vmem:[%s12209_s6 + $0x1d0] sm:$0xff] }
  0x1d   : > { %10944 = vmatmul.mubr.msk.f32.gmra.mrb[4].mxu0 %vm253_vm0, %v176_v36  ;;  %v188_v60 = vld [vmem:[%s12209_s6 + $0x88] sm:$0xff]  ;;  %v189_v61 = vld [vmem:[%s12209_s6 + $0x90] sm:$0xff]  ;;  %v230_v62 = vld [vmem:[%s12209_s6 + $0x1d8] sm:$0xff] }
  0x1e   : > { %10946 = vmatprep.mubr.msk.f32.mxu0 %vm253_vm0, %v177_v37  ;;  %v231_v63 = vld [vmem:[%s12209_s6 + $0x1e0] sm:$0xff]  ;;  %v190_v0 = vld [vmem:[%s12209_s6 + $0x98] sm:$0xff]  ;;  %v232_v2 = vld [vmem:[%s12209_s6 + $0x1e8] sm:$0xff] }
  0x1f   : > { %11007 = vmatmul.mubr.msk.f32.gmra.mrb[6].mxu1 %vm253_vm0, %v218_v38  ;;  %v191_v1 = vld [vmem:[%s12209_s6 + $0xa0] sm:$0xff]  ;;  %v233_v3 = vld [vmem:[%s12209_s6 + $0x1f0] sm:$0xff]  ;;  %v192_v4 = vld [vmem:[%s12209_s6 + $0xa8] sm:$0xff] }
  0x20   : > { %11009 = vmatprep.mubr.msk.f32.mxu1 %vm253_vm0, %v219_v39  ;;  %v193_v5 = vld [vmem:[%s12209_s6 + $0xb0] sm:$0xff]  ;;  %v234_v6 = vld [vmem:[%s12209_s6 + $0x1f8] sm:$0xff]  ;;  %v235_v7 = vld [vmem:[%s12209_s6 + $0x200] sm:$0xff] }
  0x21   : > { %10947 = vmatmul.mubr.msk.f32.gmra.mrb[6].mxu0 %vm253_vm0, %v178_v40  ;;  %v194_v8 = vld [vmem:[%s12209_s6 + $0xb8] sm:$0xff]  ;;  %v195_v9 = vld [vmem:[%s12209_s6 + $0xc0] sm:$0xff]  ;;  %v236_v10 = vld [vmem:[%s12209_s6 + $0x208] sm:$0xff] }
  0x22   : > { %10949 = vmatprep.mubr.msk.f32.mxu0 %vm253_vm0, %v179_v41  ;;  %v237_v11 = vld [vmem:[%s12209_s6 + $0x210] sm:$0xff]  ;;  %v196_v12 = vld [vmem:[%s12209_s6 + $0xc8] sm:$0xff]  ;;  %v238_v14 = vld [vmem:[%s12209_s6 + $0x218] sm:$0xff] }
  0x23   : > { %11010 = vmatmul.mubr.msk.f32.gmra.mrb[8].mxu1 %vm253_vm0, %v220_v42  ;;  %v197_v13 = vld [vmem:[%s12209_s6 + $0xd0] sm:$0xff]  ;;  %v239_v15 = vld [vmem:[%s12209_s6 + $0x220] sm:$0xff]  ;;  %v198_v16 = vld [vmem:[%s12209_s6 + $0xd8] sm:$0xff] }
  0x24   : > { %11012 = vmatprep.mubr.msk.f32.mxu1 %vm253_vm0, %v221_v43  ;;  %v199_v17 = vld [vmem:[%s12209_s6 + $0xe0] sm:$0xff]  ;;  %v240_v18 = vld [vmem:[%s12209_s6 + $0x228] sm:$0xff]  ;;  %v241_v19 = vld [vmem:[%s12209_s6 + $0x230] sm:$0xff] }
  0x25   : > { %10950 = vmatmul.mubr.msk.f32.gmra.mrb[8].mxu0 %vm253_vm0, %v180_v44  ;;  %v200_v20 = vld [vmem:[%s12209_s6 + $0xe8] sm:$0xff]  ;;  %v201_v21 = vld [vmem:[%s12209_s6 + $0xf0] sm:$0xff]  ;;  %v242_v22 = vld [vmem:[%s12209_s6 + $0x238] sm:$0xff] }
  0x26   : > { %10952 = vmatprep.mubr.msk.f32.mxu0 %vm253_vm0, %v181_v45  ;;  %v243_v23 = vld [vmem:[%s12209_s6 + $0x240] sm:$0xff]  ;;  %v202_v24 = vld [vmem:[%s12209_s6 + $0xf8] sm:$0xff]  ;;  %v244_v26 = vld [vmem:[%s12209_s6 + $0x248] sm:$0xff] }
  0x27   : > { %11013 = vmatmul.mubr.msk.f32.gmra.mrb[10].mxu1 %vm253_vm0, %v222_v46  ;;  %v203_v25 = vld [vmem:[%s12209_s6 + $0x100] sm:$0xff]  ;;  %v245_v27 = vld [vmem:[%s12209_s6 + $0x250] sm:$0xff]  ;;  %v204_v28 = vld [vmem:[%s12209_s6 + $0x108] sm:$0xff] }
  0x28   : > { %11015 = vmatprep.mubr.msk.f32.mxu1 %vm253_vm0, %v223_v47  ;;  %v205_v29 = vld [vmem:[%s12209_s6 + $0x110] sm:$0xff]  ;;  %v246_v31 = vld [vmem:[%s12209_s6 + $0x258] sm:$0xff]  ;;  %v247_v32 = vld [vmem:[%s12209_s6 + $0x260] sm:$0xff] }
  0x29   : > { %10953 = vmatmul.mubr.msk.f32.gmra.mrb[10].mxu0 %vm253_vm0, %v182_v48  ;;  %v206_v34 = vld [vmem:[%s12209_s6 + $0x118] sm:$0xff]  ;;  %v207_v35 = vld [vmem:[%s12209_s6 + $0x120] sm:$0xff]  ;;  %v248_v36 = vld [vmem:[%s12209_s6 + $0x268] sm:$0x3f] }
  0x2a   : > { %10955 = vmatprep.mubr.msk.f32.mxu0 %vm253_vm0, %v183_v49  ;;  %v1023_v37 = vld [vmem:[%s12209_s6 + $0x1] sm:$0xff]  ;;  %v9698_v39 = vld [vmem:[%s14720_s1 + $0x70] sm:$0xff]  ;;  %v9699_v40 = vld [vmem:[%s14720_s1 + $0x78] sm:$0xff] }
  0x2b   : > { %11016 = vmatmul.mubr.msk.f32.gmra.mrb[12].mxu1 %vm253_vm0, %v224_v50  ;;  %v208_v38 = vld [vmem:[%s12209_s6 + $0x128] sm:$0xff]  ;;  %v209_v41 = vld [vmem:[%s12209_s6 + $0x130] sm:$0xff]  ;;  %v12082_v44 = vpack.c.bf16 %v9699_v40, %v9698_v39  ;;  %v210_v45 = vld [vmem:[%s12209_s6 + $0x138] sm:$0xff] }
  0x2c   : > { %11018 = vmatprep.mubr.msk.f32.mxu1 %vm253_vm0, %v225_v51  ;;  %v1024_v42 = vld [vmem:[%s12209_s6 + $0x9] sm:$0xff]  ;;  %v1025_v43 = vld [vmem:[%s12209_s6 + $0x11] sm:$0xff]  ;;  %v1026_v47 = vld [vmem:[%s12209_s6 + $0x19] sm:$0xff] }
  0x2d   : > { %10956 = vmatmul.mubr.msk.f32.gmra.mrb[12].mxu0 %vm253_vm0, %v184_v52  ;;  %v2029_v46 = vld [vmem:[%s12209_s6 + $0x2] sm:$0xff]  ;;  %v9780_v48 = vld [vmem:[%s14720_s1 + $0x90] sm:$0xff]  ;;  %v9781_v49 = vld [vmem:[%s14720_s1 + $0x98] sm:$0xff] }
  0x2e   : > { %10958 = vmatprep.mubr.msk.f32.mxu0 %vm253_vm0, %v185_v53  ;;  %v1027_v50 = vld [vmem:[%s12209_s6 + $0x21] sm:$0xff]  ;;  %v2031_v51 = vld [vmem:[%s12209_s6 + $0x12] sm:$0xff]  ;;  %v12090_v52 = vpack.c.bf16 %v9781_v49, %v9780_v48  ;;  %v1028_v53 = vld [vmem:[%s12209_s6 + $0x29] sm:$0xff] }
  0x2f   : > { %11019 = vmatmul.mubr.msk.f32.gmra.mrb[14].mxu1 %vm253_vm0, %v226_v54  ;;  %v1029_v54 = vld [vmem:[%s12209_s6 + $0x31] sm:$0xff]  ;;  %v12592_v39 = vld [vmem:[%s12209_s6 + $0xc2] sm:$0xff]  ;;  %v1050_v40 = vld [vmem:[%s12209_s6 + $0xd9] sm:$0xff] }
  0x30   : > { %11021 = vmatprep.mubr.msk.f32.mxu1 %vm253_vm0, %v227_v55  ;;  %v12430_v55 = vld [vmem:[%s12209_s6 + $0x1a] sm:$0xff] }
  0x31   : > { %10959 = vmatmul.mubr.msk.f32.gmra.mrb[14].mxu0 %vm253_vm0, %v186_v56  ;;  %v12434_v56 = vld [vmem:[%s12209_s6 + $0x22] sm:$0xff]  ;;  %v1054_v48 = vld [vmem:[%s12209_s6 + $0xf9] sm:$0xff] }
  0x32   : > { %10961 = vmatprep.mubr.msk.f32.mxu0 %vm253_vm0, %v187_v57  ;;  %v1030_v57 = vld [vmem:[%s12209_s6 + $0x39] sm:$0xff]  ;;  %v1055_v49 = vld [vmem:[%s12209_s6 + $0x101] sm:$0xff] }
  0x33   : > { %11022 = vmatmul.mubr.msk.f32.gmra.mrb[16].mxu1 %vm253_vm0, %v228_v58  ;;  %v12444_v58 = vld [vmem:[%s12209_s6 + $0x2a] sm:$0xff] }
  0x34   : > { %11024 = vmatprep.mubr.msk.f32.mxu1 %vm253_vm0, %v229_v59  ;;  %v12448_v59 = vld [vmem:[%s12209_s6 + $0x32] sm:$0xff] }
  0x35   : > { %10962 = vmatmul.mubr.msk.f32.gmra.mrb[16].mxu0 %vm253_vm0, %v188_v60  ;;  %v1032_v60 = vld [vmem:[%s12209_s6 + $0x49] sm:$0xff] }
  0x36   : > { %10964 = vmatprep.mubr.msk.f32.mxu0 %vm253_vm0, %v189_v61  ;;  %v1033_v61 = vld [vmem:[%s12209_s6 + $0x51] sm:$0xff] }
  0x37   : > { %11025 = vmatmul.mubr.msk.f32.gmra.mrb[18].mxu1 %vm253_vm0, %v230_v62  ;;  %v12458_v62 = vld [vmem:[%s12209_s6 + $0x3a] sm:$0xff] }
  0x38   : > { %11027 = vmatprep.mubr.msk.f32.mxu1 %vm253_vm0, %v231_v63  ;;  %v12462_v63 = vld [vmem:[%s12209_s6 + $0x42] sm:$0xff] }
  0x39   : > { %10965 = vmatmul.mubr.msk.f32.gmra.mrb[18].mxu0 %vm253_vm0, %v190_v0  ;;  %v1034_v0 = vld [vmem:[%s12209_s6 + $0x59] sm:$0xff] }
  0x3a   : > { %10967 = vmatprep.mubr.msk.f32.mxu0 %vm253_vm0, %v191_v1  ;;  %v1035_v1 = vld [vmem:[%s12209_s6 + $0x61] sm:$0xff] }
  0x3b   : > { %11028 = vmatmul.mubr.msk.f32.gmra.mrb[20].mxu1 %vm253_vm0, %v232_v2  ;;  %v12472_v2 = vld [vmem:[%s12209_s6 + $0x4a] sm:$0xff] }
  0x3c   : > { %11030 = vmatprep.mubr.msk.f32.mxu1 %vm253_vm0, %v233_v3  ;;  %v12476_v3 = vld [vmem:[%s12209_s6 + $0x52] sm:$0xff] }
  0x3d   : > { %10968 = vmatmul.mubr.msk.f32.gmra.mrb[20].mxu0 %vm253_vm0, %v192_v4  ;;  %v1036_v4 = vld [vmem:[%s12209_s6 + $0x69] sm:$0xff] }
  0x3e   : > { %10970 = vmatprep.mubr.msk.f32.mxu0 %vm253_vm0, %v193_v5  ;;  %v1037_v5 = vld [vmem:[%s12209_s6 + $0x71] sm:$0xff] }
  0x3f   : > { %11031 = vmatmul.mubr.msk.f32.gmra.mrb[22].mxu1 %vm253_vm0, %v234_v6  ;;  %v12486_v6 = vld [vmem:[%s12209_s6 + $0x5a] sm:$0xff] }
  0x40   : > { %11033 = vmatprep.mubr.msk.f32.mxu1 %vm253_vm0, %v235_v7  ;;  %v12490_v7 = vld [vmem:[%s12209_s6 + $0x62] sm:$0xff] }
  0x41   : > { %10971 = vmatmul.mubr.msk.f32.gmra.mrb[22].mxu0 %vm253_vm0, %v194_v8  ;;  %v1038_v8 = vld [vmem:[%s12209_s6 + $0x79] sm:$0xff] }
  0x42   : > { %10973 = vmatprep.mubr.msk.f32.mxu0 %vm253_vm0, %v195_v9  ;;  %v1039_v9 = vld [vmem:[%s12209_s6 + $0x81] sm:$0xff] }
  0x43   : > { %11034 = vmatmul.mubr.msk.f32.gmra.mrb[24].mxu1 %vm253_vm0, %v236_v10  ;;  %v12500_v10 = vld [vmem:[%s12209_s6 + $0x6a] sm:$0xff] }
  0x44   : > { %11036 = vmatprep.mubr.msk.f32.mxu1 %vm253_vm0, %v237_v11  ;;  %v12504_v11 = vld [vmem:[%s12209_s6 + $0x72] sm:$0xff] }
  0x45   : > { %10974 = vmatmul.mubr.msk.f32.gmra.mrb[24].mxu0 %vm253_vm0, %v196_v12  ;;  %v1040_v12 = vld [vmem:[%s12209_s6 + $0x89] sm:$0xff] }
  0x46   : > { %10976 = vmatprep.mubr.msk.f32.mxu0 %vm253_vm0, %v197_v13  ;;  %v9860_v13 = vld [vmem:[%s14720_s1 + $0xa0] sm:$0xff] }
  0x47   : > { %11037 = vmatmul.mubr.msk.f32.gmra.mrb[26].mxu1 %vm253_vm0, %v238_v14  ;;  %v9861_v14 = vld [vmem:[%s14720_s1 + $0xa8] sm:$0xff] }
  0x48   : > { %11039 = vmatprep.mubr.msk.f32.mxu1 %vm253_vm0, %v239_v15  ;;  %v1041_v15 = vld [vmem:[%s12209_s6 + $0x91] sm:$0xff] }
  0x49   : > { %10977 = vmatmul.mubr.msk.f32.gmra.mrb[26].mxu0 %vm253_vm0, %v198_v16  ;;  %v12517_v16 = vpack.c.bf16 %v9861_v14, %v9860_v13  ;;  %v12690_v13 = vld [vmem:[%s12209_s6 + $0x132] sm:$0xff]  ;;  %v1064_v14 = vld [vmem:[%s12209_s6 + $0x149] sm:$0xff] }
  0x4a   : > { %10979 = vmatprep.mubr.msk.f32.mxu0 %vm253_vm0, %v199_v17  ;;  %v12522_v17 = vld [vmem:[%s12209_s6 + $0x7a] sm:$0xff] }
  0x4b   : > { %11040 = vmatmul.mubr.msk.f32.gmra.mrb[28].mxu1 %vm253_vm0, %v240_v18  ;;  %v12526_v18 = vld [vmem:[%s12209_s6 + $0x82] sm:$0xff] }
  0x4c   : > { %11042 = vmatprep.mubr.msk.f32.mxu1 %vm253_vm0, %v241_v19  ;;  %v1042_v19 = vld [vmem:[%s12209_s6 + $0x99] sm:$0xff] }
  0x4d   : > { %10980 = vmatmul.mubr.msk.f32.gmra.mrb[28].mxu0 %vm253_vm0, %v200_v20  ;;  %v1043_v20 = vld [vmem:[%s12209_s6 + $0xa1] sm:$0xff] }
  0x4e   : > { %10982 = vmatprep.mubr.msk.f32.mxu0 %vm253_vm0, %v201_v21  ;;  %v12537_v21 = vld [vmem:[%s12209_s6 + $0x8a] sm:$0xff] }
  0x4f   : > { %11043 = vmatmul.mubr.msk.f32.gmra.mrb[30].mxu1 %vm253_vm0, %v242_v22  ;;  %v12541_v22 = vld [vmem:[%s12209_s6 + $0x92] sm:$0xff] }
  0x50   : > { %11045 = vmatprep.mubr.msk.f32.mxu1 %vm253_vm0, %v243_v23  ;;  %v1044_v23 = vld [vmem:[%s12209_s6 + $0xa9] sm:$0xff] }
  0x51   : > { %10983 = vmatmul.mubr.msk.f32.gmra.mrb[30].mxu0 %vm253_vm0, %v202_v24  ;;  %v9942_v24 = vld [vmem:[%s14720_s1 + $0xc0] sm:$0xff] }
  0x52   : > { %10985 = vmatprep.mubr.msk.f32.mxu0 %vm253_vm0, %v203_v25  ;;  %v9943_v25 = vld [vmem:[%s14720_s1 + $0xc8] sm:$0xff] }
  0x53   : > { %11046 = vmatmul.mubr.msk.f32.gmra.mrb[32].mxu1 %vm253_vm0, %v244_v26  ;;  %v1045_v26 = vld [vmem:[%s12209_s6 + $0xb1] sm:$0xff] }
  0x54   : > { %11048 = vmatprep.mubr.msk.f32.mxu1 %vm253_vm0, %v245_v27  ;;  %v12554_v27 = vpack.c.bf16 %v9943_v25, %v9942_v24  ;;  %v1067_v24 = vld [vmem:[%s12209_s6 + $0x161] sm:$0xff]  ;;  %v2070_v25 = vld [vmem:[%s12209_s6 + $0x14a] sm:$0xff] }
  0x55   : > { %10986 = vmatmul.mubr.msk.f32.gmra.mrb[32].mxu0 %vm253_vm0, %v204_v28  ;;  %v12559_v28 = vld [vmem:[%s12209_s6 + $0x9a] sm:$0xff] }
  0x56   : > { %10988 = vmatprep.mubr.msk.f32.mxu0 %vm253_vm0, %v205_v29  ;;  %v12563_v29 = vld [vmem:[%s12209_s6 + $0xa2] sm:$0xff] }
  0x57   : > { %11049 = vmatmul.mubr.msk.f32.gmra.mrb[34].mxu1 %vm253_vm0, %v246_v31  ;;  %v1046_v31 = vld [vmem:[%s12209_s6 + $0xb9] sm:$0xff] }
  0x58   : > { %11051 = vmatprep.mubr.msk.f32.mxu1 %vm253_vm0, %v247_v32  ;;  %v1047_v32 = vld [vmem:[%s12209_s6 + $0xc1] sm:$0xff] }
  0x59   : > { %10989 = vmatmul.mubr.msk.f32.gmra.mrb[34].mxu0 %vm253_vm0, %v206_v34  ;;  %v12574_v34 = vld [vmem:[%s12209_s6 + $0xaa] sm:$0xff] }
  0x5a   : > { %10991 = vmatprep.mubr.msk.f32.mxu0 %vm253_vm0, %v207_v35  ;;  %v12578_v35 = vld [vmem:[%s12209_s6 + $0xb2] sm:$0xff] }
  0x5b   : > { %11052 = vmatmul.mubr.msk.f32.gmra.mrb[36].mxu1 %vm253_vm0, %v248_v36  ;;  %v1048_v36 = vld [vmem:[%s12209_s6 + $0xc9] sm:$0xff] }
  0x5c   : > { %11062 = vmatprep.mubr.msk.f32.mxu1 %vm253_vm0, %v1023_v37  ;;  %v1049_v37 = vld [vmem:[%s12209_s6 + $0xd1] sm:$0xff] }
  0x5d   : > { %10992 = vmatmul.mubr.msk.f32.gmra.mrb[36].mxu0 %vm253_vm0, %v208_v38  ;;  %v12588_v38 = vld [vmem:[%s12209_s6 + $0xba] sm:$0xff] }
  0x5e   : > { %10994 = vmatprep.mubr.msk.f32.mxu0 %vm253_vm0, %v209_v41  ;;  %v1051_v41 = vld [vmem:[%s12209_s6 + $0xe1] sm:$0xff] }
  0x5f   : > { %11063 = vmatmul.mubr.msk.f32.vlgmr.msra.gmra.mrb[38].mxu1 %vm253_vm0, %v1024_v42  ;;  %v12602_v42 = vld [vmem:[%s12209_s6 + $0xca] sm:$0xff] }
  0x60   : > { %12081 = vmatpush3.bf16.msra.mxu1 %v12248_v30  ;;  %11065 = vmatprep.mubr.msk.f32.mxu1 %vm253_vm0, %v1025_v43  ;;  %v2030_v30 = vld [vmem:[%s12209_s6 + $0xa] sm:$0xff]  ;;  %v12606_v43 = vld [vmem:[%s12209_s6 + $0xd2] sm:$0xff] }
  0x61   : > { %10995 = vmatmul.mubr.msk.f32.gmra.mrb[38].mxu0 %vm253_vm0, %v210_v45  ;;  %12083 = vmatprep.subr.bf16.mxu1 %v12082_v44  ;;  %v1053_v45 = vld [vmem:[%s12209_s6 + $0xf1] sm:$0xff] }
  0x62   : > { %11187 = vmatprep.mubr.msk.f32.mxu0 %vm253_vm0, %v2029_v46  ;;  %v12616_v46 = vld [vmem:[%s12209_s6 + $0xda] sm:$0xff] }
  0x63   : > { %11066 = vmatmul.mubr.msk.f32.gmra.mrb[40].mxu1 %vm253_vm0, %v1026_v47  ;;  %v12620_v47 = vld [vmem:[%s12209_s6 + $0xe2] sm:$0xff] }
  0x64   : > { %11068 = vmatprep.mubr.msk.f32.mxu1 %vm253_vm0, %v1027_v50  ;;  %12085 = vmatpush3.bf16.msra.mxu1 %v12082_v44  ;;  %v1052_v44 = vld [vmem:[%s12209_s6 + $0xe9] sm:$0xff] }
  0x65   : > { %11188 = vmatmul.mubr.msk.f32.vlgmr.msra.gmra.mrb[40].mxu0 %vm253_vm0, %v2030_v30  ;;  %12095 = vmatprep.subr.bf16.mxu1 %v12517_v16  ;;  %v12630_v50 = vld [vmem:[%s12209_s6 + $0xea] sm:$0xff]  ;;  %v12634_v30 = vld [vmem:[%s12209_s6 + $0xf2] sm:$0xff] }
  0x66   : > { %12089 = vmatpush3.bf16.msra.mxu0 %v12254_v33  ;;  %11190 = vmatprep.mubr.msk.f32.mxu0 %vm253_vm0, %v2031_v51  ;;  %v1031_v33 = vld [vmem:[%s12209_s6 + $0x41] sm:$0xff]  ;;  %v1056_v51 = vld [vmem:[%s12209_s6 + $0x109] sm:$0xff] }
  0x67   : > { %11069 = vmatmul.mubr.msk.f32.gmra.mrb[42].mxu1 %vm253_vm0, %v1028_v53  ;;  %12091 = vmatprep.subr.bf16.mxu0 %v12090_v52  ;;  %v12644_v53 = vld [vmem:[%s12209_s6 + $0xfa] sm:$0xff] }
  0x68   : > { %11071 = vmatprep.mubr.msk.f32.mxu1 %vm253_vm0, %v1029_v54  ;;  %v12648_v54 = vld [vmem:[%s12209_s6 + $0x102] sm:$0xff] }
  0x69   : > { %11191 = vmatmul.mubr.msk.f32.gmra.mrb[42].mxu0 %vm253_vm0, %v12430_v55 }
  0x6a   : > { %11193 = vmatprep.mubr.msk.f32.mxu0 %vm253_vm0, %v12434_v56  ;;  %12093 = vmatpush3.bf16.msra.mxu0 %v12090_v52  ;;  %v1057_v52 = vld [vmem:[%s12209_s6 + $0x111] sm:$0xff] }
  0x6b   : > { %11072 = vmatmul.mubr.msk.f32.gmra.mrb[44].mxu1 %vm253_vm0, %v1030_v57  ;;  %12103 = vmatprep.subr.bf16.mxu0 %v12554_v27  ;;  %v1058_v57 = vld [vmem:[%s12209_s6 + $0x119] sm:$0xff] }
  0x6c   : > { %11074 = vmatprep.mubr.msk.f32.mxu1 %vm253_vm0, %v1031_v33  ;;  %v1059_v33 = vld [vmem:[%s12209_s6 + $0x121] sm:$0xff] }
  0x6d   : > { %11194 = vmatmul.mubr.msk.f32.gmra.mrb[44].mxu0 %vm253_vm0, %v12444_v58 }
  0x6e   : > { %11196 = vmatprep.mubr.msk.f32.mxu0 %vm253_vm0, %v12448_v59 }
  0x6f   : > { %11075 = vmatmul.mubr.msk.f32.gmra.mrb[46].mxu1 %vm253_vm0, %v1032_v60  ;;  %v12658_v60 = vld [vmem:[%s12209_s6 + $0x10a] sm:$0xff] }
  0x70   : > { %11077 = vmatprep.mubr.msk.f32.mxu1 %vm253_vm0, %v1033_v61  ;;  %v12662_v61 = vld [vmem:[%s12209_s6 + $0x112] sm:$0xff] }
  0x71   : > { %11197 = vmatmul.mubr.msk.f32.gmra.mrb[46].mxu0 %vm253_vm0, %v12458_v62 }
  0x72   : > { %11199 = vmatprep.mubr.msk.f32.mxu0 %vm253_vm0, %v12462_v63 }
  0x73   : > { %11078 = vmatmul.mubr.msk.f32.gmra.mrb[48].mxu1 %vm253_vm0, %v1034_v0  ;;  %v1060_v0 = vld [vmem:[%s12209_s6 + $0x129] sm:$0xff] }
  0x74   : > { %11080 = vmatprep.mubr.msk.f32.mxu1 %vm253_vm0, %v1035_v1  ;;  %v1061_v1 = vld [vmem:[%s12209_s6 + $0x131] sm:$0xff] }
  0x75   : > { %11200 = vmatmul.mubr.msk.f32.gmra.mrb[48].mxu0 %vm253_vm0, %v12472_v2 }
  0x76   : > { %11202 = vmatprep.mubr.msk.f32.mxu0 %vm253_vm0, %v12476_v3 }
  0x77   : > { %11081 = vmatmul.mubr.msk.f32.gmra.mrb[50].mxu1 %vm253_vm0, %v1036_v4  ;;  %v12672_v4 = vld [vmem:[%s12209_s6 + $0x11a] sm:$0xff] }
  0x78   : > { %11083 = vmatprep.mubr.msk.f32.mxu1 %vm253_vm0, %v1037_v5  ;;  %v12676_v5 = vld [vmem:[%s12209_s6 + $0x122] sm:$0xff] }
  0x79   : > { %11203 = vmatmul.mubr.msk.f32.gmra.mrb[50].mxu0 %vm253_vm0, %v12486_v6 }
  0x7a   : > { %11205 = vmatprep.mubr.msk.f32.mxu0 %vm253_vm0, %v12490_v7 }
  0x7b   : > { %11084 = vmatmul.mubr.msk.f32.gmra.mrb[52].mxu1 %vm253_vm0, %v1038_v8  ;;  %v1062_v8 = vld [vmem:[%s12209_s6 + $0x139] sm:$0xff] }
  0x7c   : > { %11086 = vmatprep.mubr.msk.f32.mxu1 %vm253_vm0, %v1039_v9  ;;  %v1063_v9 = vld [vmem:[%s12209_s6 + $0x141] sm:$0xff] }
  0x7d   : > { %11206 = vmatmul.mubr.msk.f32.gmra.mrb[52].mxu0 %vm253_vm0, %v12500_v10 }
  0x7e   : > { %11208 = vmatprep.mubr.msk.f32.mxu0 %vm253_vm0, %v12504_v11 }
  0x7f   : > { %11087 = vmatmul.mubr.msk.f32.gmra.mrb[54].mxu1 %vm253_vm0, %v1040_v12  ;;  %v12686_v12 = vld [vmem:[%s12209_s6 + $0x12a] sm:$0xff] }
  0x80   : > { %11089 = vmatprep.mubr.msk.f32.mxu1 %vm253_vm0, %v1041_v15  ;;  %v1065_v15 = vld [vmem:[%s12209_s6 + $0x151] sm:$0xff] }
  0x81   : > { %11209 = vmatmul.mubr.msk.f32.gmra.mrb[54].mxu0 %vm253_vm0, %v12522_v17 }
  0x82   : > { %11211 = vmatprep.mubr.msk.f32.mxu0 %vm253_vm0, %v12526_v18 }
  0x83   : > { %11090 = vmatmul.mubr.msk.f32.gmra.mrb[56].mxu1 %vm253_vm0, %v1042_v19  ;;  %v12700_v19 = vld [vmem:[%s12209_s6 + $0x13a] sm:$0xff] }
  0x84   : > { %11092 = vmatprep.mubr.msk.f32.mxu1 %vm253_vm0, %v1043_v20  ;;  %v12704_v20 = vld [vmem:[%s12209_s6 + $0x142] sm:$0xff] }
  0x85   : > { %11212 = vmatmul.mubr.msk.f32.gmra.mrb[56].mxu0 %vm253_vm0, %v12537_v21 }
  0x86   : > { %11214 = vmatprep.mubr.msk.f32.mxu0 %vm253_vm0, %v12541_v22 }
  0x87   : > { %11093 = vmatmul.mubr.msk.f32.gmra.mrb[58].mxu1 %vm253_vm0, %v1044_v23  ;;  %v1066_v23 = vld [vmem:[%s12209_s6 + $0x159] sm:$0xff] }
  0x88   : > { %11095 = vmatprep.mubr.msk.f32.mxu1 %vm253_vm0, %v1045_v26  ;;  %v2071_v26 = vld [vmem:[%s12209_s6 + $0x152] sm:$0xff] }
  0x89   : > { %11215 = vmatmul.mubr.msk.f32.gmra.mrb[58].mxu0 %vm253_vm0, %v12559_v28 }
  0x8a   : > { %11217 = vmatprep.mubr.msk.f32.mxu0 %vm253_vm0, %v12563_v29 }
  0x8b   : > { %11096 = vmatmul.mubr.msk.f32.gmra.mrb[60].mxu1 %vm253_vm0, %v1046_v31  ;;  %v1068_v31 = vld [vmem:[%s12209_s6 + $0x169] sm:$0xff] }
  0x8c   : > { %11098 = vmatprep.mubr.msk.f32.mxu1 %vm253_vm0, %v1047_v32  ;;  %v1069_v32 = vld [vmem:[%s12209_s6 + $0x171] sm:$0xff] }
  0x8d   : > { %11218 = vmatmul.mubr.msk.f32.gmra.mrb[60].mxu0 %vm253_vm0, %v12574_v34 }
  0x8e   : > { %11220 = vmatprep.mubr.msk.f32.mxu0 %vm253_vm0, %v12578_v35 }
  0x8f   : > { %11099 = vmatmul.mubr.msk.f32.gmra.mrb[62].mxu1 %vm253_vm0, %v1048_v36  ;;  %v2072_v36 = vld [vmem:[%s12209_s6 + $0x15a] sm:$0xff] }
  0x90   : > { %11101 = vmatprep.mubr.msk.f32.mxu1 %vm253_vm0, %v1049_v37  ;;  %v2073_v37 = vld [vmem:[%s12209_s6 + $0x162] sm:$0xff] }
  0x91   : > { %11221 = vmatmul.mubr.msk.f32.gmra.mrb[62].mxu0 %vm253_vm0, %v12588_v38 }
  0x92   : > { %11223 = vmatprep.mubr.msk.f32.mxu0 %vm253_vm0, %v12592_v39 }
  0x93   : > { %11102 = vmatmul.mubr.msk.f32.gmra.mrb[64].mxu1 %vm253_vm0, %v1050_v40  ;;  %v1070_v40 = vld [vmem:[%s12209_s6 + $0x179] sm:$0xff] }
  0x94   : > { %11104 = vmatprep.mubr.msk.f32.mxu1 %vm253_vm0, %v1051_v41  ;;  %v1071_v41 = vld [vmem:[%s12209_s6 + $0x181] sm:$0xff] }
  0x95   : > { %11224 = vmatmul.mubr.msk.f32.gmra.mrb[64].mxu0 %vm253_vm0, %v12602_v42 }
  0x96   : > { %11226 = vmatprep.mubr.msk.f32.mxu0 %vm253_vm0, %v12606_v43 }
  0x97   : > { %11105 = vmatmul.mubr.msk.f32.gmra.mrb[66].mxu1 %vm253_vm0, %v1052_v44  ;;  %v2074_v44 = vld [vmem:[%s12209_s6 + $0x16a] sm:$0xff] }
  0x98   : > { %11107 = vmatprep.mubr.msk.f32.mxu1 %vm253_vm0, %v1053_v45  ;;  %v2075_v45 = vld [vmem:[%s12209_s6 + $0x172] sm:$0xff] }
  0x99   : > { %11227 = vmatmul.mubr.msk.f32.gmra.mrb[66].mxu0 %vm253_vm0, %v12616_v46 }
  0x9a   : > { %11229 = vmatprep.mubr.msk.f32.mxu0 %vm253_vm0, %v12620_v47 }
  0x9b   : > { %11108 = vmatmul.mubr.msk.f32.gmra.mrb[68].mxu1 %vm253_vm0, %v1054_v48  ;;  %v1072_v48 = vld [vmem:[%s12209_s6 + $0x189] sm:$0xff] }
  0x9c   : > { %11110 = vmatprep.mubr.msk.f32.mxu1 %vm253_vm0, %v1055_v49  ;;  %v1073_v49 = vld [vmem:[%s12209_s6 + $0x191] sm:$0xff] }
  0x9d   : > { %11230 = vmatmul.mubr.msk.f32.gmra.mrb[68].mxu0 %vm253_vm0, %v12630_v50 }
  0x9e   : > { %11232 = vmatprep.mubr.msk.f32.mxu0 %vm253_vm0, %v12634_v30 }
  0x9f   : > { %11111 = vmatmul.mubr.msk.f32.gmra.mrb[70].mxu1 %vm253_vm0, %v1056_v51  ;;  %v2076_v51 = vld [vmem:[%s12209_s6 + $0x17a] sm:$0xff] }
  0xa0   : > { %11113 = vmatprep.mubr.msk.f32.mxu1 %vm253_vm0, %v1057_v52  ;;  %v2077_v52 = vld [vmem:[%s12209_s6 + $0x182] sm:$0xff] }
  0xa1   : > { %11233 = vmatmul.mubr.msk.f32.gmra.mrb[70].mxu0 %vm253_vm0, %v12644_v53 }
  0xa2   : > { %11235 = vmatprep.mubr.msk.f32.mxu0 %vm253_vm0, %v12648_v54 }
  0xa3   : > { %11114 = vmatmul.mubr.msk.f32.gmra.mrb[72].mxu1 %vm253_vm0, %v1058_v57  ;;  %v1074_v57 = vld [vmem:[%s12209_s6 + $0x199] sm:$0xff] }
  0xa4   : > { %11116 = vmatprep.mubr.msk.f32.mxu1 %vm253_vm0, %v1059_v33  ;;  %v1075_v33 = vld [vmem:[%s12209_s6 + $0x1a1] sm:$0xff] }
  0xa5   : > { %11236 = vmatmul.mubr.msk.f32.gmra.mrb[72].mxu0 %vm253_vm0, %v12658_v60 }
  0xa6   : > { %11238 = vmatprep.mubr.msk.f32.mxu0 %vm253_vm0, %v12662_v61 }
  0xa7   : > { %11117 = vmatmul.mubr.msk.f32.gmra.mrb[74].mxu1 %vm253_vm0, %v1060_v0  ;;  %v2078_v0 = vld [vmem:[%s12209_s6 + $0x18a] sm:$0xff] }
  0xa8   : > { %11119 = vmatprep.mubr.msk.f32.mxu1 %vm253_vm0, %v1061_v1  ;;  %v2079_v1 = vld [vmem:[%s12209_s6 + $0x192] sm:$0xff] }
  0xa9   : > { %11239 = vmatmul.mubr.msk.f32.gmra.mrb[74].mxu0 %vm253_vm0, %v12672_v4 }
  0xaa   : > { %11241 = vmatprep.mubr.msk.f32.mxu0 %vm253_vm0, %v12676_v5 }
  0xab   : > { %11120 = vmatmul.mubr.msk.f32.gmra.mrb[76].mxu1 %vm253_vm0, %v1062_v8  ;;  %v1076_v8 = vld [vmem:[%s12209_s6 + $0x1a9] sm:$0xff] }
  0xac   : > { %11122 = vmatprep.mubr.msk.f32.mxu1 %vm253_vm0, %v1063_v9  ;;  %v1077_v9 = vld [vmem:[%s12209_s6 + $0x1b1] sm:$0xff] }
  0xad   : > { %11242 = vmatmul.mubr.msk.f32.gmra.mrb[76].mxu0 %vm253_vm0, %v12686_v12 }
  0xae   : > { %11244 = vmatprep.mubr.msk.f32.mxu0 %vm253_vm0, %v12690_v13 }
  0xaf   : > { %11123 = vmatmul.mubr.msk.f32.gmra.mrb[78].mxu1 %vm253_vm0, %v1064_v14  ;;  %v2080_v14 = vld [vmem:[%s12209_s6 + $0x19a] sm:$0xff] }
  0xb0   : > { %11125 = vmatprep.mubr.msk.f32.mxu1 %vm253_vm0, %v1065_v15  ;;  %v2081_v15 = vld [vmem:[%s12209_s6 + $0x1a2] sm:$0xff] }
  0xb1   : > { %11245 = vmatmul.mubr.msk.f32.gmra.mrb[78].mxu0 %vm253_vm0, %v12700_v19 }
  0xb2   : > { %11247 = vmatprep.mubr.msk.f32.mxu0 %vm253_vm0, %v12704_v20 }
  0xb3   : > { %11126 = vmatmul.mubr.msk.f32.gmra.mrb[80].mxu1 %vm253_vm0, %v1066_v23  ;;  %v1078_v23 = vld [vmem:[%s12209_s6 + $0x1b9] sm:$0xff] }
  0xb4   : > { %11128 = vmatprep.mubr.msk.f32.mxu1 %vm253_vm0, %v1067_v24  ;;  %v1079_v24 = vld [vmem:[%s12209_s6 + $0x1c1] sm:$0xff] }
  0xb5   : > { %11248 = vmatmul.mubr.msk.f32.gmra.mrb[80].mxu0 %vm253_vm0, %v2070_v25  ;;  %v2082_v25 = vld [vmem:[%s12209_s6 + $0x1aa] sm:$0xff] }
  0xb6   : > { %11250 = vmatprep.mubr.msk.f32.mxu0 %vm253_vm0, %v2071_v26  ;;  %v2083_v26 = vld [vmem:[%s12209_s6 + $0x1b2] sm:$0xff] }
  0xb7   : > { %11129 = vmatmul.mubr.msk.f32.gmra.mrb[82].mxu1 %vm253_vm0, %v1068_v31  ;;  %v1080_v31 = vld [vmem:[%s12209_s6 + $0x1c9] sm:$0xff] }
  0xb8   : > { %11131 = vmatprep.mubr.msk.f32.mxu1 %vm253_vm0, %v1069_v32  ;;  %v1081_v32 = vld [vmem:[%s12209_s6 + $0x1d1] sm:$0xff] }
  0xb9   : > { %11251 = vmatmul.mubr.msk.f32.gmra.mrb[82].mxu0 %vm253_vm0, %v2072_v36  ;;  %v2084_v36 = vld [vmem:[%s12209_s6 + $0x1ba] sm:$0xff] }
  0xba   : > { %11253 = vmatprep.mubr.msk.f32.mxu0 %vm253_vm0, %v2073_v37  ;;  %v2085_v37 = vld [vmem:[%s12209_s6 + $0x1c2] sm:$0xff] }
  0xbb   : > { %11132 = vmatmul.mubr.msk.f32.gmra.mrb[84].mxu1 %vm253_vm0, %v1070_v40  ;;  %v1082_v40 = vld [vmem:[%s12209_s6 + $0x1d9] sm:$0xff] }
  0xbc   : > { %11134 = vmatprep.mubr.msk.f32.mxu1 %vm253_vm0, %v1071_v41  ;;  %v1083_v41 = vld [vmem:[%s12209_s6 + $0x1e1] sm:$0xff] }
  0xbd   : > { %11254 = vmatmul.mubr.msk.f32.gmra.mrb[84].mxu0 %vm253_vm0, %v2074_v44  ;;  %v2086_v44 = vld [vmem:[%s12209_s6 + $0x1ca] sm:$0xff] }
  0xbe   : > { %11256 = vmatprep.mubr.msk.f32.mxu0 %vm253_vm0, %v2075_v45  ;;  %v2087_v45 = vld [vmem:[%s12209_s6 + $0x1d2] sm:$0xff] }
  0xbf   : > { %11135 = vmatmul.mubr.msk.f32.gmra.mrb[86].mxu1 %vm253_vm0, %v1072_v48  ;;  %v1084_v48 = vld [vmem:[%s12209_s6 + $0x1e9] sm:$0xff] }
  0xc0   : > { %11137 = vmatprep.mubr.msk.f32.mxu1 %vm253_vm0, %v1073_v49  ;;  %v1085_v49 = vld [vmem:[%s12209_s6 + $0x1f1] sm:$0xff] }
  0xc1   : > { %11257 = vmatmul.mubr.msk.f32.gmra.mrb[86].mxu0 %vm253_vm0, %v2076_v51  ;;  %v2088_v51 = vld [vmem:[%s12209_s6 + $0x1da] sm:$0xff] }
  0xc2   : > { %11259 = vmatprep.mubr.msk.f32.mxu0 %vm253_vm0, %v2077_v52  ;;  %v2089_v52 = vld [vmem:[%s12209_s6 + $0x1e2] sm:$0xff] }
  0xc3   : > { %11138 = vmatmul.mubr.msk.f32.gmra.mrb[88].mxu1 %vm253_vm0, %v1074_v57  ;;  %v1086_v57 = vld [vmem:[%s12209_s6 + $0x1f9] sm:$0xff] }
  0xc4   : > { %11140 = vmatprep.mubr.msk.f32.mxu1 %vm253_vm0, %v1075_v33  ;;  %v1087_v33 = vld [vmem:[%s12209_s6 + $0x201] sm:$0xff] }
  0xc5   : > { %11260 = vmatmul.mubr.msk.f32.gmra.mrb[88].mxu0 %vm253_vm0, %v2078_v0  ;;  %v2090_v0 = vld [vmem:[%s12209_s6 + $0x1ea] sm:$0xff] }
  0xc6   : > { %11262 = vmatprep.mubr.msk.f32.mxu0 %vm253_vm0, %v2079_v1  ;;  %v2091_v1 = vld [vmem:[%s12209_s6 + $0x1f2] sm:$0xff] }
  0xc7   : > { %11141 = vmatmul.mubr.msk.f32.gmra.mrb[90].mxu1 %vm253_vm0, %v1076_v8  ;;  %v1088_v8 = vld [vmem:[%s12209_s6 + $0x209] sm:$0xff] }
  0xc8   : > { %11143 = vmatprep.mubr.msk.f32.mxu1 %vm253_vm0, %v1077_v9  ;;  %v1089_v9 = vld [vmem:[%s12209_s6 + $0x211] sm:$0xff] }
  0xc9   : > { %11263 = vmatmul.mubr.msk.f32.gmra.mrb[90].mxu0 %vm253_vm0, %v2080_v14  ;;  %v2092_v14 = vld [vmem:[%s12209_s6 + $0x1fa] sm:$0xff] }
  0xca   : > { %11265 = vmatprep.mubr.msk.f32.mxu0 %vm253_vm0, %v2081_v15  ;;  %v2093_v15 = vld [vmem:[%s12209_s6 + $0x202] sm:$0xff] }
  0xcb   : > { %11144 = vmatmul.mubr.msk.f32.gmra.mrb[92].mxu1 %vm253_vm0, %v1078_v23  ;;  %v1090_v23 = vld [vmem:[%s12209_s6 + $0x219] sm:$0xff] }
  0xcc   : > { %11146 = vmatprep.mubr.msk.f32.mxu1 %vm253_vm0, %v1079_v24  ;;  %v1091_v24 = vld [vmem:[%s12209_s6 + $0x221] sm:$0xff] }
  0xcd   : > { %11266 = vmatmul.mubr.msk.f32.gmra.mrb[92].mxu0 %vm253_vm0, %v2082_v25  ;;  %v2094_v25 = vld [vmem:[%s12209_s6 + $0x20a] sm:$0xff] }
  0xce   : > { %11268 = vmatprep.mubr.msk.f32.mxu0 %vm253_vm0, %v2083_v26  ;;  %v2095_v26 = vld [vmem:[%s12209_s6 + $0x212] sm:$0xff] }
  0xcf   : > { %11147 = vmatmul.mubr.msk.f32.gmra.mrb[94].mxu1 %vm253_vm0, %v1080_v31  ;;  %v1092_v31 = vld [vmem:[%s12209_s6 + $0x229] sm:$0xff] }
  0xd0   : > { %11149 = vmatprep.mubr.msk.f32.mxu1 %vm253_vm0, %v1081_v32  ;;  %v1093_v32 = vld [vmem:[%s12209_s6 + $0x231] sm:$0xff] }
  0xd1   : > { %11269 = vmatmul.mubr.msk.f32.gmra.mrb[94].mxu0 %vm253_vm0, %v2084_v36 }
  0xd2   : > { %11271 = vmatprep.mubr.msk.f32.mxu0 %vm253_vm0, %v2085_v37  ;;  %v2096_v37 = vld [vmem:[%s12209_s6 + $0x21a] sm:$0xff] }
  0xd3   : > { %11150 = vmatmul.mubr.msk.f32.gmra.mrb[96].mxu1 %vm253_vm0, %v1082_v40 }
  0xd4   : > { %11152 = vmatprep.mubr.msk.f32.mxu1 %vm253_vm0, %v1083_v41  ;;  %v2097_v41 = vld [vmem:[%s12209_s6 + $0x222] sm:$0xff] }
  0xd5   : > { %11272 = vmatmul.mubr.msk.f32.gmra.mrb[96].mxu0 %vm253_vm0, %v2086_v44  ;;  %v1094_v44 = vld [vmem:[%s12209_s6 + $0x239] sm:$0xff] }
  0xd6   : > { %11274 = vmatprep.mubr.msk.f32.mxu0 %vm253_vm0, %v2087_v45 }
  0xd7   : > { %11153 = vmatmul.mubr.msk.f32.gmra.mrb[98].mxu1 %vm253_vm0, %v1084_v48 }
  0xd8   : > { %11155 = vmatprep.mubr.msk.f32.mxu1 %vm253_vm0, %v1085_v49  ;;  %v1095_v49 = vld [vmem:[%s12209_s6 + $0x241] sm:$0xff] }
  0xd9   : > { %11275 = vmatmul.mubr.msk.f32.gmra.mrb[98].mxu0 %vm253_vm0, %v2088_v51 }
  0xda   : > { %11277 = vmatprep.mubr.msk.f32.mxu0 %vm253_vm0, %v2089_v52  ;;  %v2098_v52 = vld [vmem:[%s12209_s6 + $0x22a] sm:$0xff] }
  0xdb   : > { %11156 = vmatmul.mubr.msk.f32.gmra.mrb[100].mxu1 %vm253_vm0, %v1086_v57 }
  0xdc   : > { %11158 = vmatprep.mubr.msk.f32.mxu1 %vm253_vm0, %v1087_v33  ;;  %v2099_v33 = vld [vmem:[%s12209_s6 + $0x232] sm:$0xff] }
  0xdd   : > { %11278 = vmatmul.mubr.msk.f32.gmra.mrb[100].mxu0 %vm253_vm0, %v2090_v0  ;;  %v1096_v0 = vld [vmem:[%s12209_s6 + $0x249] sm:$0xff] }
  0xde   : > { %11280 = vmatprep.mubr.msk.f32.mxu0 %vm253_vm0, %v2091_v1 }
  0xdf   : > { %11159 = vmatmul.mubr.msk.f32.gmra.mrb[102].mxu1 %vm253_vm0, %v1088_v8 }
  0xe0   : > { %11161 = vmatprep.mubr.msk.f32.mxu1 %vm253_vm0, %v1089_v9  ;;  %v1097_v9 = vld [vmem:[%s12209_s6 + $0x251] sm:$0xff] }
  0xe1   : > { %11281 = vmatmul.mubr.msk.f32.gmra.mrb[102].mxu0 %vm253_vm0, %v2092_v14 }
  0xe2   : > { %11283 = vmatprep.mubr.msk.f32.mxu0 %vm253_vm0, %v2093_v15  ;;  %v2100_v15 = vld [vmem:[%s12209_s6 + $0x23a] sm:$0xff] }
  0xe3   : > { %11162 = vmatmul.mubr.msk.f32.gmra.mrb[104].mxu1 %vm253_vm0, %v1090_v23 }
  0xe4   : > { %11164 = vmatprep.mubr.msk.f32.mxu1 %vm253_vm0, %v1091_v24  ;;  %v2101_v24 = vld [vmem:[%s12209_s6 + $0x242] sm:$0xff] }
  0xe5   : > { %11284 = vmatmul.mubr.msk.f32.gmra.mrb[104].mxu0 %vm253_vm0, %v2094_v25  ;;  %v1098_v25 = vld [vmem:[%s12209_s6 + $0x259] sm:$0xff] }
  0xe6   : > { %v10999_v36 = vpop.f32.mrb[0].mxu1  ;;  %11286 = vmatprep.mubr.msk.f32.mxu0 %vm253_vm0, %v2095_v26 }
  0xe7   : > { %985 = vst.msk [vmem:[#allocation2 + $0x148] sm:$0xff] %vm943_vm1, %v10999_v36  ;;  %v754_v40 = vpop.f32.mrb[1].mxu1  ;;  %11165 = vmatmul.mubr.msk.f32.gmra.mrb[106].mxu1 %vm253_vm0, %v1092_v31 }
  0xe8   : > { %984 = vst.msk [vmem:[#allocation2 + $0x140] sm:$0xff] %vm943_vm1, %v754_v40  ;;  %11167 = vmatprep.mubr.msk.f32.mxu1 %vm253_vm0, %v1093_v32  ;;  %v10939_v45 = vpop.f32.mrb[0].mxu0  ;;  %v1099_v32 = vld [vmem:[%s12209_s6 + $0x261] sm:$0xff] }
  0xe9   : > { %945 = vst.msk [vmem:[#allocation2 + $0x8] sm:$0xff] %vm943_vm1, %v10939_v45  ;;  %v554_v48 = vpop.f32.mrb[1].mxu0  ;;  %11287 = vmatmul.mubr.msk.f32.gmra.mrb[106].mxu0 %vm253_vm0, %v2096_v37  ;;  %v2102_v37 = vld [vmem:[%s12209_s6 + $0x24a] sm:$0xff] }
  0xea   : > { %v11002_v51 = vpop.f32.mrb[2].mxu1  ;;  %944 = vst.msk [vmem:[#allocation2] sm:$0xff] %vm943_vm1, %v554_v48  ;;  %11289 = vmatprep.mubr.msk.f32.mxu0 %vm253_vm0, %v2097_v41  ;;  %v2103_v41 = vld [vmem:[%s12209_s6 + $0x252] sm:$0xff] }
  0xeb   : > { %987 = vst.msk [vmem:[#allocation2 + $0x158] sm:$0xff] %vm943_vm1, %v11002_v51  ;;  %v764_v57 = vpop.f32.mrb[3].mxu1  ;;  %11168 = vmatmul.mubr.msk.f32.gmra.mrb[108].mxu1 %vm253_vm0, %v1094_v44  ;;  %v1100_v44 = vld [vmem:[%s12209_s6 + $0x269] sm:$0x3f]  ;;  %v2104_v51 = vld [vmem:[%s12209_s6 + $0x25a] sm:$0xff] }
  0xec   : > { %986 = vst.msk [vmem:[#allocation2 + $0x150] sm:$0xff] %vm943_vm1, %v764_v57  ;;  %11170 = vmatprep.mubr.msk.f32.mxu1 %vm253_vm0, %v1095_v49  ;;  %v10942_v1 = vpop.f32.mrb[2].mxu0  ;;  %v9863_v57 = vld [vmem:[%s14720_s1 + $0xb8] sm:$0xff] }
  0xed   : > { %947 = vst.msk [vmem:[#allocation2 + $0x18] sm:$0xff] %vm943_vm1, %v10942_v1  ;;  %v564_v8 = vpop.f32.mrb[3].mxu0  ;;  %11290 = vmatmul.mubr.msk.f32.gmra.mrb[108].mxu0 %vm253_vm0, %v2098_v52  ;;  %v9862_v52 = vld [vmem:[%s14720_s1 + $0xb0] sm:$0xff] }
  0xee   : > { %v11005_v14 = vpop.f32.mrb[4].mxu1  ;;  %946 = vst.msk [vmem:[#allocation2 + $0x10] sm:$0xff] %vm943_vm1, %v564_v8  ;;  %11292 = vmatprep.mubr.msk.f32.mxu0 %vm253_vm0, %v2099_v33 }
  0xef   : > { %989 = vst.msk [vmem:[#allocation2 + $0x168] sm:$0xff] %vm943_vm1, %v11005_v14  ;;  %v774_v23 = vpop.f32.mrb[5].mxu1  ;;  %11171 = vmatmul.mubr.msk.f32.gmra.mrb[110].mxu1 %vm253_vm0, %v1096_v0  ;;  %v2105_v0 = vld [vmem:[%s12209_s6 + $0x262] sm:$0xff] }
  0xf0   : > { %988 = vst.msk [vmem:[#allocation2 + $0x160] sm:$0xff] %vm943_vm1, %v774_v23  ;;  %11173 = vmatprep.mubr.msk.f32.mxu1 %vm253_vm0, %v1097_v9  ;;  %v10945_v26 = vpop.f32.mrb[4].mxu0  ;;  %v12098_v9 = vpack.c.bf16 %v9863_v57, %v9862_v52 }
  0xf1   : > { %949 = vst.msk [vmem:[#allocation2 + $0x28] sm:$0xff] %vm943_vm1, %v10945_v26  ;;  %v574_v31 = vpop.f32.mrb[5].mxu0  ;;  %11293 = vmatmul.mubr.msk.f32.gmra.mrb[110].mxu0 %vm253_vm0, %v2100_v15  ;;  %v2106_v15 = vld [vmem:[%s12209_s6 + $0x26a] sm:$0x3f]  ;;  %v9945_v26 = vld [vmem:[%s14720_s1 + $0xd8] sm:$0xff] }
  0xf2   : > { %v11008_v36 = vpop.f32.mrb[6].mxu1  ;;  %948 = vst.msk [vmem:[#allocation2 + $0x20] sm:$0xff] %vm943_vm1, %v574_v31  ;;  %11295 = vmatprep.mubr.msk.f32.mxu0 %vm253_vm0, %v2101_v24 }
  0xf3   : > { %991 = vst.msk [vmem:[#allocation2 + $0x178] sm:$0xff] %vm943_vm1, %v11008_v36  ;;  %v784_v40 = vpop.f32.mrb[7].mxu1  ;;  %11174 = vmatmul.mubr.msk.f32.gmra.mrb[112].mxu1 %vm253_vm0, %v1098_v25  ;;  %v9944_v25 = vld [vmem:[%s14720_s1 + $0xd0] sm:$0xff] }
  0xf4   : > { %990 = vst.msk [vmem:[#allocation2 + $0x170] sm:$0xff] %vm943_vm1, %v784_v40  ;;  %11176 = vmatprep.mubr.msk.f32.mxu1 %vm253_vm0, %v1099_v32  ;;  %v10948_v45 = vpop.f32.mrb[6].mxu0  ;;  %v4043_v32 = vld [vmem:[%s12209_s6 + $0x2b] sm:$0xff]  ;;  %v12106_v36 = vpack.c.bf16 %v9945_v26, %v9944_v25 }
  0xf5   : > { %951 = vst.msk [vmem:[#allocation2 + $0x38] sm:$0xff] %vm943_vm1, %v10948_v45  ;;  %v584_v48 = vpop.f32.mrb[7].mxu0  ;;  %11296 = vmatmul.mubr.msk.f32.gmra.mrb[112].mxu0 %vm253_vm0, %v2102_v37 }
  0xf6   : > { %v11011_v49 = vpop.f32.mrb[8].mxu1  ;;  %950 = vst.msk [vmem:[#allocation2 + $0x30] sm:$0xff] %vm943_vm1, %v584_v48  ;;  %11298 = vmatprep.mubr.msk.f32.mxu0 %vm253_vm0, %v2103_v41 }
  0xf7   : > { %993 = vst.msk [vmem:[#allocation2 + $0x188] sm:$0xff] %vm943_vm1, %v11011_v49  ;;  %v794_v33 = vpop.f32.mrb[9].mxu1  ;;  %11177 = vmatmul.mubr.msk.f32.gmra.mrb[114].mxu1 %vm253_vm0, %v1100_v44 }
  0xf8   : > { %992 = vst.msk [vmem:[#allocation2 + $0x180] sm:$0xff] %vm943_vm1, %v794_v33  ;;  %11312 = vmatprep.mubr.msk.f32.mxu1 %vm253_vm0, %v12430_v55  ;;  %v10951_v1 = vpop.f32.mrb[8].mxu0  ;;  %v4041_v55 = vld [vmem:[%s12209_s6 + $0x1b] sm:$0xff]  ;;  %v4048_v33 = vld [vmem:[%s12209_s6 + $0x53] sm:$0xff] }
  0xf9   : > { %953 = vst.msk [vmem:[#allocation2 + $0x48] sm:$0xff] %vm943_vm1, %v10951_v1  ;;  %v594_v8 = vpop.f32.mrb[9].mxu0  ;;  %11299 = vmatmul.mubr.msk.f32.gmra.mrb[114].mxu0 %vm253_vm0, %v2104_v51 }
  0xfa   : > { %v11014_v14 = vpop.f32.mrb[10].mxu1  ;;  %952 = vst.msk [vmem:[#allocation2 + $0x40] sm:$0xff] %vm943_vm1, %v594_v8  ;;  %11301 = vmatprep.mubr.msk.f32.mxu0 %vm253_vm0, %v2105_v0 }
  0xfb   : > { %995 = vst.msk [vmem:[#allocation2 + $0x198] sm:$0xff] %vm943_vm1, %v11014_v14  ;;  %v804_v23 = vpop.f32.mrb[11].mxu1  ;;  %11313 = vmatmul.mubr.msk.f32.vlgmr.msra.gmra.mrb[116].mxu1 %vm253_vm0, %v12434_v56 }
  0xfc   : > { %994 = vst.msk [vmem:[#allocation2 + $0x190] sm:$0xff] %vm943_vm1, %v804_v23  ;;  %12097 = vmatpush3.bf16.msra.mxu1 %v12517_v16  ;;  %11315 = vmatprep.mubr.msk.f32.mxu1 %vm253_vm0, %v12444_v58  ;;  %v10954_v24 = vpop.f32.mrb[10].mxu0  ;;  %v4042_v58 = vld [vmem:[%s12209_s6 + $0x23] sm:$0xff] }
  0xfd   : > { %955 = vst.msk [vmem:[#allocation2 + $0x58] sm:$0xff] %vm943_vm1, %v10954_v24  ;;  %v604_v56 = vpop.f32.mrb[11].mxu0  ;;  %11302 = vmatmul.mubr.msk.f32.gmra.mrb[116].mxu0 %vm253_vm0, %v2106_v15  ;;  %12099 = vmatprep.subr.bf16.mxu1 %v12098_v9 }
  0xfe   : > { %v11017_v16 = vpop.f32.mrb[12].mxu1  ;;  %954 = vst.msk [vmem:[#allocation2 + $0x50] sm:$0xff] %vm943_vm1, %v604_v56  ;;  %11437 = vmatprep.mubr.msk.f32.mxu0 %vm253_vm0, %v4041_v55  ;;  %v4052_v55 = vld [vmem:[%s12209_s6 + $0x73] sm:$0xff]  ;;  %v4054_v56 = vld [vmem:[%s12209_s6 + $0x83] sm:$0xff] }
  0xff   : > { %997 = vst.msk [vmem:[#allocation2 + $0x1a8] sm:$0xff] %vm943_vm1, %v11017_v16  ;;  %v814_v31 = vpop.f32.mrb[13].mxu1  ;;  %11316 = vmatmul.mubr.msk.f32.gmra.mrb[118].mxu1 %vm253_vm0, %v12448_v59  ;;  %v4044_v59 = vld [vmem:[%s12209_s6 + $0x33] sm:$0xff] }
 0x100   : > { %996 = vst.msk [vmem:[#allocation2 + $0x1a0] sm:$0xff] %vm943_vm1, %v814_v31  ;;  %11318 = vmatprep.mubr.msk.f32.mxu1 %vm253_vm0, %v12458_v62  ;;  %v10957_v37 = vpop.f32.mrb[12].mxu0  ;;  %12101 = vmatpush3.bf16.msra.mxu1 %v12098_v9  ;;  %v4045_v62 = vld [vmem:[%s12209_s6 + $0x3b] sm:$0xff]  ;;  %v4050_v9 = vld [vmem:[%s12209_s6 + $0x63] sm:$0xff] }
 0x101   : > { %957 = vst.msk [vmem:[#allocation2 + $0x68] sm:$0xff] %vm943_vm1, %v10957_v37  ;;  %v614_v40 = vpop.f32.mrb[13].mxu0  ;;  %11438 = vmatmul.mubr.msk.f32.vlgmr.msra.gmra.mrb[118].mxu0 %vm253_vm0, %v4042_v58  ;;  %v4057_v37 = vld [vmem:[%s12209_s6 + $0x9b] sm:$0xff] }
 0x102   : > { %v11020_v41 = vpop.f32.mrb[14].mxu1  ;;  %956 = vst.msk [vmem:[#allocation2 + $0x60] sm:$0xff] %vm943_vm1, %v614_v40  ;;  %12105 = vmatpush3.bf16.msra.mxu0 %v12554_v27  ;;  %11440 = vmatprep.mubr.msk.f32.mxu0 %vm253_vm0, %v4043_v32  ;;  %v4056_v32 = vld [vmem:[%s12209_s6 + $0x93] sm:$0xff] }
 0x103   : > { %999 = vst.msk [vmem:[#allocation2 + $0x1b8] sm:$0xff] %vm943_vm1, %v11020_v41  ;;  %v824_v44 = vpop.f32.mrb[15].mxu1  ;;  %11319 = vmatmul.mubr.msk.f32.gmra.mrb[120].mxu1 %vm253_vm0, %v12462_v63  ;;  %12107 = vmatprep.subr.bf16.mxu0 %v12106_v36  ;;  %v4046_v63 = vld [vmem:[%s12209_s6 + $0x43] sm:$0xff] }
 0x104   : > { %998 = vst.msk [vmem:[#allocation2 + $0x1b0] sm:$0xff] %vm943_vm1, %v824_v44  ;;  %11321 = vmatprep.mubr.msk.f32.mxu1 %vm253_vm0, %v12472_v2  ;;  %v10960_v45 = vpop.f32.mrb[14].mxu0  ;;  %v4047_v2 = vld [vmem:[%s12209_s6 + $0x4b] sm:$0xff] }
 0x105   : > { %959 = vst.msk [vmem:[#allocation2 + $0x78] sm:$0xff] %vm943_vm1, %v10960_v45  ;;  %v624_v27 = vpop.f32.mrb[15].mxu0  ;;  %11441 = vmatmul.mubr.msk.f32.gmra.mrb[120].mxu0 %vm253_vm0, %v4044_v59 }
 0x106   : > { %v11023_v48 = vpop.f32.mrb[16].mxu1  ;;  %958 = vst.msk [vmem:[#allocation2 + $0x70] sm:$0xff] %vm943_vm1, %v624_v27  ;;  %11443 = vmatprep.mubr.msk.f32.mxu0 %vm253_vm0, %v4045_v62  ;;  %12109 = vmatpush3.bf16.msra.mxu0 %v12106_v36 }
 0x107   : > { %1001 = vst.msk [vmem:[#allocation2 + $0x1c8] sm:$0xff] %vm943_vm1, %v11023_v48  ;;  %v834_v49 = vpop.f32.mrb[17].mxu1  ;;  %11322 = vmatmul.mubr.msk.f32.gmra.mrb[122].mxu1 %vm253_vm0, %v12476_v3 }
 0x108   : > { %1000 = vst.msk [vmem:[#allocation2 + $0x1c0] sm:$0xff] %vm943_vm1, %v834_v49  ;;  %11324 = vmatprep.mubr.msk.f32.mxu1 %vm253_vm0, %v12486_v6  ;;  %v10963_v51 = vpop.f32.mrb[16].mxu0  ;;  %v4049_v6 = vld [vmem:[%s12209_s6 + $0x5b] sm:$0xff] }
 0x109   : > { %961 = vst.msk [vmem:[#allocation2 + $0x88] sm:$0xff] %vm943_vm1, %v10963_v51  ;;  %v634_v52 = vpop.f32.mrb[17].mxu0  ;;  %11444 = vmatmul.mubr.msk.f32.gmra.mrb[122].mxu0 %vm253_vm0, %v4046_v63  ;;  %v4060_v63 = vld [vmem:[%s12209_s6 + $0xb3] sm:$0xff]  ;;  %v10107_v51 = vld [vmem:[%s14720_s1 + $0x108] sm:$0xff] }
 0x10a   : > { %v11026_v57 = vpop.f32.mrb[18].mxu1  ;;  %960 = vst.msk [vmem:[#allocation2 + $0x80] sm:$0xff] %vm943_vm1, %v634_v52  ;;  %11446 = vmatprep.mubr.msk.f32.mxu0 %vm253_vm0, %v4047_v2  ;;  %v10106_v2 = vld [vmem:[%s14720_s1 + $0x100] sm:$0xff] }
 0x10b   : > { %1003 = vst.msk [vmem:[#allocation2 + $0x1d8] sm:$0xff] %vm943_vm1, %v11026_v57  ;;  %v844_v3 = vpop.f32.mrb[19].mxu1  ;;  %11325 = vmatmul.mubr.msk.f32.gmra.mrb[124].mxu1 %vm253_vm0, %v12490_v7 }
 0x10c   : > { %1002 = vst.msk [vmem:[#allocation2 + $0x1d0] sm:$0xff] %vm943_vm1, %v844_v3  ;;  %11327 = vmatprep.mubr.msk.f32.mxu1 %vm253_vm0, %v12500_v10  ;;  %v10966_v0 = vpop.f32.mrb[18].mxu0  ;;  %v4051_v10 = vld [vmem:[%s12209_s6 + $0x6b] sm:$0xff] }
 0x10d   : > { %963 = vst.msk [vmem:[#allocation2 + $0x98] sm:$0xff] %vm943_vm1, %v10966_v0  ;;  %v644_v1 = vpop.f32.mrb[19].mxu0  ;;  %11447 = vmatmul.mubr.msk.f32.gmra.mrb[124].mxu0 %vm253_vm0, %v4048_v33  ;;  %v4063_v3 = vld [vmem:[%s12209_s6 + $0xcb] sm:$0xff] }
 0x10e   : > { %v11029_v8 = vpop.f32.mrb[20].mxu1  ;;  %962 = vst.msk [vmem:[#allocation2 + $0x90] sm:$0xff] %vm943_vm1, %v644_v1  ;;  %11449 = vmatprep.mubr.msk.f32.mxu0 %vm253_vm0, %v4049_v6 }
 0x10f   : > { %1005 = vst.msk [vmem:[#allocation2 + $0x1e8] sm:$0xff] %vm943_vm1, %v11029_v8  ;;  %v854_v7 = vpop.f32.mrb[21].mxu1  ;;  %11328 = vmatmul.mubr.msk.f32.gmra.mrb[126].mxu1 %vm253_vm0, %v12504_v11 }
 0x110   : > { %1004 = vst.msk [vmem:[#allocation2 + $0x1e0] sm:$0xff] %vm943_vm1, %v854_v7  ;;  %11330 = vmatprep.mubr.msk.f32.mxu1 %vm253_vm0, %v12522_v17  ;;  %v10969_v14 = vpop.f32.mrb[20].mxu0  ;;  %v4053_v17 = vld [vmem:[%s12209_s6 + $0x7b] sm:$0xff] }
 0x111   : > { %965 = vst.msk [vmem:[#allocation2 + $0xa8] sm:$0xff] %vm943_vm1, %v10969_v14  ;;  %v654_v15 = vpop.f32.mrb[21].mxu0  ;;  %11450 = vmatmul.mubr.msk.f32.gmra.mrb[126].mxu0 %vm253_vm0, %v4050_v9 }
 0x112   : > { %v11032_v23 = vpop.f32.mrb[22].mxu1  ;;  %964 = vst.msk [vmem:[#allocation2 + $0xa0] sm:$0xff] %vm943_vm1, %v654_v15  ;;  %11452 = vmatprep.mubr.msk.f32.mxu0 %vm253_vm0, %v4051_v10 }
 0x113   : > { %1007 = vst.msk [vmem:[#allocation2 + $0x1f8] sm:$0xff] %vm943_vm1, %v11032_v23  ;;  %v864_v11 = vpop.f32.mrb[23].mxu1  ;;  %11331 = vmatmul.mubr.msk.f32.gmra.mrb[128].mxu1 %vm253_vm0, %v12526_v18 }
 0x114   : > { %1006 = vst.msk [vmem:[#allocation2 + $0x1f0] sm:$0xff] %vm943_vm1, %v864_v11  ;;  %11333 = vmatprep.mubr.msk.f32.mxu1 %vm253_vm0, %v12537_v21  ;;  %v10972_v24 = vpop.f32.mrb[22].mxu0  ;;  %v4055_v21 = vld [vmem:[%s12209_s6 + $0x8b] sm:$0xff] }
 0x115   : > { %967 = vst.msk [vmem:[#allocation2 + $0xb8] sm:$0xff] %vm943_vm1, %v10972_v24  ;;  %v664_v25 = vpop.f32.mrb[23].mxu0  ;;  %11453 = vmatmul.mubr.msk.f32.gmra.mrb[128].mxu0 %vm253_vm0, %v4052_v55  ;;  %v1796_v11 = vld [vmem:[#allocation2 + $0x8] sm:$0xff] }
 0x116   : > { %v11035_v26 = vpop.f32.mrb[24].mxu1  ;;  %966 = vst.msk [vmem:[#allocation2 + $0xb0] sm:$0xff] %vm943_vm1, %v664_v25  ;;  %11455 = vmatprep.mubr.msk.f32.mxu0 %vm253_vm0, %v4053_v17  ;;  %v1795_v25 = vld [vmem:[#allocation2] sm:$0xff] }
 0x117   : > { %1009 = vst.msk [vmem:[#allocation2 + $0x208] sm:$0xff] %vm943_vm1, %v11035_v26  ;;  %v874_v18 = vpop.f32.mrb[25].mxu1  ;;  %11334 = vmatmul.mubr.msk.f32.gmra.mrb[130].mxu1 %vm253_vm0, %v12541_v22  ;;  %v10024_v22 = vld [vmem:[%s14720_s1 + $0xe0] sm:$0xff] }
 0x118   : > { %1008 = vst.msk [vmem:[#allocation2 + $0x200] sm:$0xff] %vm943_vm1, %v874_v18  ;;  %11336 = vmatprep.mubr.msk.f32.mxu1 %vm253_vm0, %v12559_v28  ;;  %v10975_v16 = vpop.f32.mrb[24].mxu0  ;;  %v10025_v28 = vld [vmem:[%s14720_s1 + $0xe8] sm:$0xff] }
 0x119   : > { %969 = vst.msk [vmem:[#allocation2 + $0xc8] sm:$0xff] %vm943_vm1, %v10975_v16  ;;  %v674_v58 = vpop.f32.mrb[25].mxu0  ;;  %11456 = vmatmul.mubr.msk.f32.gmra.mrb[130].mxu0 %vm253_vm0, %v4054_v56  ;;  %v12996_v40 = vpack.c.bf16 %v10025_v28, %v10024_v22  ;;  %v1798_v16 = vld [vmem:[#allocation2 + $0x18] sm:$0xff] }
 0x11a   : > { %v11038_v31 = vpop.f32.mrb[26].mxu1  ;;  %968 = vst.msk [vmem:[#allocation2 + $0xc0] sm:$0xff] %vm943_vm1, %v674_v58  ;;  %11458 = vmatprep.mubr.msk.f32.mxu0 %vm253_vm0, %v4055_v21 }
 0x11b   : > { %1011 = vst.msk [vmem:[#allocation2 + $0x218] sm:$0xff] %vm943_vm1, %v11038_v31  ;;  %v884_v36 = vpop.f32.mrb[27].mxu1  ;;  %11337 = vmatmul.mubr.msk.f32.gmra.mrb[132].mxu1 %vm253_vm0, %v12563_v29  ;;  %12111 = vmatprep.subr.bf16.mxu1 %v12996_v40  ;;  %v4058_v29 = vld [vmem:[%s12209_s6 + $0xa3] sm:$0xff]  ;;  %v1797_v31 = vld [vmem:[#allocation2 + $0x10] sm:$0xff] }
 0x11c   : > { %1010 = vst.msk [vmem:[#allocation2 + $0x210] sm:$0xff] %vm943_vm1, %v884_v36  ;;  %11339 = vmatprep.mubr.msk.f32.mxu1 %vm253_vm0, %v12574_v34  ;;  %v10978_v41 = vpop.f32.mrb[26].mxu0  ;;  %v4059_v34 = vld [vmem:[%s12209_s6 + $0xab] sm:$0xff] }
 0x11d   : > { %971 = vst.msk [vmem:[#allocation2 + $0xd8] sm:$0xff] %vm943_vm1, %v10978_v41  ;;  %v684_v59 = vpop.f32.mrb[27].mxu0  ;;  %11459 = vmatmul.mubr.msk.f32.gmra.mrb[132].mxu0 %vm253_vm0, %v4056_v32  ;;  %v4071_v32 = vld [vmem:[%s12209_s6 + $0x10b] sm:$0xff] }
 0x11e   : > { %v11041_v44 = vpop.f32.mrb[28].mxu1  ;;  %970 = vst.msk [vmem:[#allocation2 + $0xd0] sm:$0xff] %vm943_vm1, %v684_v59  ;;  %11461 = vmatprep.mubr.msk.f32.mxu0 %vm253_vm0, %v4057_v37  ;;  %v1800_v41 = vld [vmem:[#allocation2 + $0x28] sm:$0xff]  ;;  %v4072_v59 = vld [vmem:[%s12209_s6 + $0x113] sm:$0xff] }
 0x11f   : > { %1013 = vst.msk [vmem:[#allocation2 + $0x228] sm:$0xff] %vm943_vm1, %v11041_v44  ;;  %v894_v62 = vpop.f32.mrb[29].mxu1  ;;  %11340 = vmatmul.mubr.msk.f32.gmra.mrb[134].mxu1 %vm253_vm0, %v12578_v35 }
 0x120   : > { %1012 = vst.msk [vmem:[#allocation2 + $0x220] sm:$0xff] %vm943_vm1, %v894_v62  ;;  %11342 = vmatprep.mubr.msk.f32.mxu1 %vm253_vm0, %v12588_v38  ;;  %v10981_v45 = vpop.f32.mrb[28].mxu0  ;;  %v4061_v38 = vld [vmem:[%s12209_s6 + $0xbb] sm:$0xff] }
 0x121   : > { %973 = vst.msk [vmem:[#allocation2 + $0xe8] sm:$0xff] %vm943_vm1, %v10981_v45  ;;  %v694_v27 = vpop.f32.mrb[29].mxu0  ;;  %11462 = vmatmul.mubr.msk.f32.gmra.mrb[134].mxu0 %vm253_vm0, %v4058_v29  ;;  %v1799_v29 = vld [vmem:[#allocation2 + $0x20] sm:$0xff] }
 0x122   : > { %v11044_v48 = vpop.f32.mrb[30].mxu1  ;;  %972 = vst.msk [vmem:[#allocation2 + $0xe0] sm:$0xff] %vm943_vm1, %v694_v27  ;;  %11464 = vmatprep.mubr.msk.f32.mxu0 %vm253_vm0, %v4059_v34 }
 0x123   : > { %1015 = vst.msk [vmem:[#allocation2 + $0x238] sm:$0xff] %vm943_vm1, %v11044_v48  ;;  %v904_v35 = vpop.f32.mrb[31].mxu1  ;;  %11343 = vmatmul.mubr.msk.f32.gmra.mrb[136].mxu1 %vm253_vm0, %v12592_v39  ;;  %v13034_v39 = vpack.c.bf16 %v10107_v51, %v10106_v2  ;;  %v1801_v51 = vld [vmem:[#allocation2 + $0x30] sm:$0xff] }
 0x124   : > { %1014 = vst.msk [vmem:[#allocation2 + $0x230] sm:$0xff] %vm943_vm1, %v904_v35  ;;  %11345 = vmatprep.mubr.msk.f32.mxu1 %vm253_vm0, %v12602_v42  ;;  %v10984_v49 = vpop.f32.mrb[30].mxu0  ;;  %v4062_v42 = vld [vmem:[%s12209_s6 + $0xc3] sm:$0xff] }
 0x125   : > { %975 = vst.msk [vmem:[#allocation2 + $0xf8] sm:$0xff] %vm943_vm1, %v10984_v49  ;;  %v704_v52 = vpop.f32.mrb[31].mxu0  ;;  %11465 = vmatmul.mubr.msk.f32.gmra.mrb[136].mxu0 %vm253_vm0, %v4060_v63  ;;  %12119 = vmatprep.subr.bf16.mxu0 %v13034_v39  ;;  %v4074_v49 = vld [vmem:[%s12209_s6 + $0x123] sm:$0xff] }
 0x126   : > { %v11047_v57 = vpop.f32.mrb[32].mxu1  ;;  %974 = vst.msk [vmem:[#allocation2 + $0xf0] sm:$0xff] %vm943_vm1, %v704_v52  ;;  %11467 = vmatprep.mubr.msk.f32.mxu0 %vm253_vm0, %v4061_v38  ;;  %v1802_v38 = vld [vmem:[#allocation2 + $0x38] sm:$0xff]  ;;  %v4075_v52 = vld [vmem:[%s12209_s6 + $0x12b] sm:$0xff] }
 0x127   : > { %1017 = vst.msk [vmem:[#allocation2 + $0x248] sm:$0xff] %vm943_vm1, %v11047_v57  ;;  %v914_v33 = vpop.f32.mrb[33].mxu1  ;;  %11346 = vmatmul.mubr.msk.f32.gmra.mrb[138].mxu1 %vm253_vm0, %v12606_v43  ;;  %v4064_v43 = vld [vmem:[%s12209_s6 + $0xd3] sm:$0xff] }
 0x128   : > { %1016 = vst.msk [vmem:[#allocation2 + $0x240] sm:$0xff] %vm943_vm1, %v914_v33  ;;  %11348 = vmatprep.mubr.msk.f32.mxu1 %vm253_vm0, %v12616_v46  ;;  %v10987_v6 = vpop.f32.mrb[32].mxu0  ;;  %v4065_v46 = vld [vmem:[%s12209_s6 + $0xdb] sm:$0xff] }
 0x129   : > { %977 = vst.msk [vmem:[#allocation2 + $0x108] sm:$0xff] %vm943_vm1, %v10987_v6  ;;  %v714_v0 = vpop.f32.mrb[33].mxu0  ;;  %11468 = vmatmul.mubr.msk.f32.gmra.mrb[138].mxu0 %vm253_vm0, %v4062_v42 }
 0x12a   : > { %v11050_v1 = vpop.f32.mrb[34].mxu1  ;;  %976 = vst.msk [vmem:[#allocation2 + $0x100] sm:$0xff] %vm943_vm1, %v714_v0  ;;  %11470 = vmatprep.mubr.msk.f32.mxu0 %vm253_vm0, %v4063_v3 }
 0x12b   : > { %1019 = vst.msk [vmem:[#allocation2 + $0x258] sm:$0xff] %vm943_vm1, %v11050_v1  ;;  %v924_v8 = vpop.f32.mrb[35].mxu1  ;;  %11349 = vmatmul.mubr.msk.f32.gmra.mrb[140].mxu1 %vm253_vm0, %v12620_v47  ;;  %v4066_v47 = vld [vmem:[%s12209_s6 + $0xe3] sm:$0xff] }
 0x12c   : > { %1018 = vst.msk [vmem:[#allocation2 + $0x250] sm:$0xff] %vm943_vm1, %v924_v8  ;;  %11351 = vmatprep.mubr.msk.f32.mxu1 %vm253_vm0, %v12630_v50  ;;  %v10990_v9 = vpop.f32.mrb[34].mxu0  ;;  %v4067_v50 = vld [vmem:[%s12209_s6 + $0xeb] sm:$0xff] }
 0x12d   : > { %979 = vst.msk [vmem:[#allocation2 + $0x118] sm:$0xff] %vm943_vm1, %v10990_v9  ;;  %v724_v7 = vpop.f32.mrb[35].mxu0  ;;  %11471 = vmatmul.mubr.msk.f32.gmra.mrb[140].mxu0 %vm253_vm0, %v4064_v43  ;;  %v3073_v1 = vld [vmem:[%s12209_s6 + $0x14a] sm:$0xff] }
 0x12e   : > { %v11053_v10 = vpop.f32.mrb[36].mxu1  ;;  %978 = vst.msk [vmem:[#allocation2 + $0x110] sm:$0xff] %vm943_vm1, %v724_v7  ;;  %11473 = vmatprep.mubr.msk.f32.mxu0 %vm253_vm0, %v4065_v46  ;;  %v1804_v8 = vld [vmem:[#allocation2 + $0x48] sm:$0xff]  ;;  %v4076_v46 = vld [vmem:[%s12209_s6 + $0x133] sm:$0xff]  ;;  %v1803_v7 = vld [vmem:[#allocation2 + $0x40] sm:$0xff] }
 0x12f   : > { %1022 = vst.msk [vmem:[#allocation2 + $0x268] sm:$0x3f] %vm1021_vm2, %v11053_v10  ;;  %v934_v14 = vpop.f32.mrb[37].mxu1  ;;  %11352 = vmatmul.mubr.msk.f32.gmra.mrb[142].mxu1 %vm253_vm0, %v12634_v30  ;;  %v4068_v30 = vld [vmem:[%s12209_s6 + $0xf3] sm:$0xff]  ;;  %v4077_v10 = vld [vmem:[%s12209_s6 + $0x13b] sm:$0xff] }
 0x130   : > { %1020 = vst.msk [vmem:[#allocation2 + $0x260] sm:$0xff] %vm943_vm1, %v934_v14  ;;  %11354 = vmatprep.mubr.msk.f32.mxu1 %vm253_vm0, %v12644_v53  ;;  %v10993_v15 = vpop.f32.mrb[36].mxu0  ;;  %v4069_v53 = vld [vmem:[%s12209_s6 + $0xfb] sm:$0xff] }
 0x131   : > { %981 = vst.msk [vmem:[#allocation2 + $0x128] sm:$0xff] %vm943_vm1, %v10993_v15  ;;  %v734_v23 = vpop.f32.mrb[37].mxu0  ;;  %11474 = vmatmul.mubr.msk.f32.gmra.mrb[142].mxu0 %vm253_vm0, %v4066_v47 }
 0x132   : > { %v11064_v55 = vpop.f32.mrb[38].mxu1  ;;  %980 = vst.msk [vmem:[#allocation2 + $0x120] sm:$0xff] %vm943_vm1, %v734_v23  ;;  %11476 = vmatprep.mubr.msk.f32.mxu0 %vm253_vm0, %v4067_v50  ;;  %v3074_v50 = vld [vmem:[%s12209_s6 + $0x152] sm:$0xff] }
 0x133   : > { %v1874_v17 = vadd.f32 %v11064_v55, %v1796_v11  ;;  %v1406_v24 = vpop.f32.mrb[39].mxu1  ;;  %11355 = vmatmul.mubr.msk.f32.gmra.mrb[144].mxu1 %vm253_vm0, %v12648_v54  ;;  %v4070_v54 = vld [vmem:[%s12209_s6 + $0x103] sm:$0xff] }
 0x134   : > { %v1873_v26 = vadd.f32 %v1795_v25, %v1406_v24  ;;  %11357 = vmatprep.mubr.msk.f32.mxu1 %vm253_vm0, %v12658_v60  ;;  %v10996_v56 = vpop.f32.mrb[38].mxu0  ;;  %v1806_v24 = vld [vmem:[#allocation2 + $0x58] sm:$0xff]  ;;  %v4078_v25 = vld [vmem:[%s12209_s6 + $0x143] sm:$0xff] }
 0x135   : > { %1952 = vst.msk [vmem:[#allocation2 + $0x8] sm:$0xff] %vm943_vm1, %v1874_v17  ;;  %983 = vst.msk [vmem:[#allocation2 + $0x138] sm:$0xff] %vm943_vm1, %v10996_v56  ;;  %v744_v18 = vpop.f32.mrb[39].mxu0  ;;  %11477 = vmatmul.mubr.msk.f32.gmra.mrb[144].mxu0 %vm253_vm0, %v4068_v30  ;;  %v3075_v30 = vld [vmem:[%s12209_s6 + $0x15a] sm:$0xff]  ;;  %v1805_v56 = vld [vmem:[#allocation2 + $0x50] sm:$0xff] }
 0x136   : > { %1951 = vst.msk [vmem:[#allocation2] sm:$0xff] %vm943_vm1, %v1873_v26  ;;  %v11067_v21 = vpop.f32.mrb[40].mxu1  ;;  %982 = vst.msk [vmem:[#allocation2 + $0x130] sm:$0xff] %vm943_vm1, %v744_v18  ;;  %11479 = vmatprep.mubr.msk.f32.mxu0 %vm253_vm0, %v4069_v53  ;;  %v4079_v18 = vld [vmem:[%s12209_s6 + $0x14b] sm:$0xff] }
 0x137   : > { %v1876_v60 = vadd.f32 %v11067_v21, %v1798_v16  ;;  %v1416_v58 = vpop.f32.mrb[41].mxu1  ;;  %11358 = vmatmul.mubr.msk.f32.gmra.mrb[146].mxu1 %vm253_vm0, %v12662_v61 }
 0x138   : > { %v1875_v22 = vadd.f32 %v1797_v31, %v1416_v58  ;;  %11360 = vmatprep.mubr.msk.f32.mxu1 %vm253_vm0, %v12672_v4  ;;  %v11189_v28 = vpop.f32.mrb[40].mxu0  ;;  %v4073_v4 = vld [vmem:[%s12209_s6 + $0x11b] sm:$0xff] }
 0x139   : > { %1954 = vst.msk [vmem:[#allocation2 + $0x18] sm:$0xff] %vm943_vm1, %v1876_v60  ;;  %v2412_v36 = vpop.f32.mrb[41].mxu0  ;;  %11480 = vmatmul.mubr.msk.f32.gmra.mrb[146].mxu0 %vm253_vm0, %v4070_v54  ;;  %v3076_v54 = vld [vmem:[%s12209_s6 + $0x162] sm:$0xff] }
 0x13a   : > { %1953 = vst.msk [vmem:[#allocation2 + $0x10] sm:$0xff] %vm943_vm1, %v1875_v22  ;;  %v11070_v37 = vpop.f32.mrb[42].mxu1  ;;  %11482 = vmatprep.mubr.msk.f32.mxu0 %vm253_vm0, %v4071_v32  ;;  %v3077_v22 = vld [vmem:[%s12209_s6 + $0x16a] sm:$0xff] }
 0x13b   : > { %v1878_v61 = vadd.f32 %v11070_v37, %v1800_v41  ;;  %v1426_v44 = vpop.f32.mrb[43].mxu1  ;;  %11361 = vmatmul.mubr.msk.f32.gmra.mrb[148].mxu1 %vm253_vm0, %v12676_v5  ;;  %v1808_v37 = vld [vmem:[#allocation2 + $0x68] sm:$0xff]  ;;  %v4080_v41 = vld [vmem:[%s12209_s6 + $0x153] sm:$0xff] }
 0x13c   : > { %v1877_v62 = vadd.f32 %v1799_v29, %v1426_v44  ;;  %v2802_v34 = vld [vmem:[#allocation2 + $0x8] sm:$0xff]  ;;  %11363 = vmatprep.mubr.msk.f32.mxu1 %vm253_vm0, %v12686_v12  ;;  %v11192_v45 = vpop.f32.mrb[42].mxu0  ;;  %v1807_v44 = vld [vmem:[#allocation2 + $0x60] sm:$0xff] }
 0x13d   : > { %1956 = vst.msk [vmem:[#allocation2 + $0x28] sm:$0xff] %vm943_vm1, %v1878_v61  ;;  %v2880_v27 = vadd.f32 %v11189_v28, %v2802_v34  ;;  %v2801_v48 = vld [vmem:[#allocation2] sm:$0xff]  ;;  %v2422_v63 = vpop.f32.mrb[43].mxu0  ;;  %11483 = vmatmul.mubr.msk.f32.gmra.mrb[148].mxu0 %vm253_vm0, %v4072_v59  ;;  %v3078_v34 = vld [vmem:[%s12209_s6 + $0x172] sm:$0xff] }
 0x13e   : > { %1955 = vst.msk [vmem:[#allocation2 + $0x20] sm:$0xff] %vm943_vm1, %v1877_v62  ;;  %v2879_v35 = vadd.f32 %v2801_v48, %v2412_v36  ;;  %v11073_v5 = vpop.f32.mrb[44].mxu1  ;;  %11485 = vmatprep.mubr.msk.f32.mxu0 %vm253_vm0, %v4073_v4  ;;  %v4081_v29 = vld [vmem:[%s12209_s6 + $0x15b] sm:$0xff] }
 0x13f   : > { %2958 = vst.msk [vmem:[#allocation2 + $0x8] sm:$0xff] %vm943_vm1, %v2880_v27  ;;  %v1880_v12 = vadd.f32 %v11073_v5, %v1802_v38  ;;  %v1436_v2 = vpop.f32.mrb[45].mxu1  ;;  %11364 = vmatmul.mubr.msk.f32.gmra.mrb[150].mxu1 %vm253_vm0, %v12690_v13 }
 0x140   : > { %2957 = vst.msk [vmem:[#allocation2] sm:$0xff] %vm943_vm1, %v2879_v35  ;;  %v1879_v57 = vadd.f32 %v1801_v51, %v1436_v2  ;;  %v2804_v42 = vld [vmem:[#allocation2 + $0x18] sm:$0xff]  ;;  %11366 = vmatprep.mubr.msk.f32.mxu1 %vm253_vm0, %v12700_v19  ;;  %v11195_v33 = vpop.f32.mrb[44].mxu0 }
 0x141   : > { %1958 = vst.msk [vmem:[#allocation2 + $0x38] sm:$0xff] %vm943_vm1, %v1880_v12  ;;  %v2882_v3 = vadd.f32 %v11192_v45, %v2804_v42  ;;  %v2803_v6 = vld [vmem:[#allocation2 + $0x10] sm:$0xff]  ;;  %v2432_v0 = vpop.f32.mrb[45].mxu0  ;;  %11486 = vmatmul.mubr.msk.f32.gmra.mrb[150].mxu0 %vm253_vm0, %v4074_v49  ;;  %v3079_v35 = vld [vmem:[%s12209_s6 + $0x17a] sm:$0xff]  ;;  %v4082_v12 = vld [vmem:[%s12209_s6 + $0x163] sm:$0xff] }
 0x142   : > { %1957 = vst.msk [vmem:[#allocation2 + $0x30] sm:$0xff] %vm943_vm1, %v1879_v57  ;;  %v2881_v13 = vadd.f32 %v2803_v6, %v2422_v63  ;;  %v11076_v43 = vpop.f32.mrb[46].mxu1  ;;  %11488 = vmatprep.mubr.msk.f32.mxu0 %vm253_vm0, %v4075_v52  ;;  %v1810_v49 = vld [vmem:[#allocation2 + $0x78] sm:$0xff]  ;;  %v1809_v52 = vld [vmem:[#allocation2 + $0x70] sm:$0xff] }
 0x143   : > { %2960 = vst.msk [vmem:[#allocation2 + $0x18] sm:$0xff] %vm943_vm1, %v2882_v3  ;;  %v1882_v19 = vadd.f32 %v11076_v43, %v1804_v8  ;;  %v1446_v9 = vpop.f32.mrb[47].mxu1  ;;  %11367 = vmatmul.mubr.msk.f32.gmra.mrb[152].mxu1 %vm253_vm0, %v12704_v20  ;;  %v4083_v57 = vld [vmem:[%s12209_s6 + $0x16b] sm:$0xff]  ;;  %v3080_v3 = vld [vmem:[%s12209_s6 + $0x182] sm:$0xff] }
 0x144   : > { %2959 = vst.msk [vmem:[#allocation2 + $0x10] sm:$0xff] %vm943_vm1, %v2881_v13  ;;  %v1881_v47 = vadd.f32 %v1803_v7, %v1446_v9  ;;  %v2806_v14 = vld [vmem:[#allocation2 + $0x28] sm:$0xff]  ;;  %11369 = vmatprep.mubr.msk.f32.mxu1 %vm253_vm0, %v3073_v1  ;;  %v11198_v15 = vpop.f32.mrb[46].mxu0  ;;  %v4084_v9 = vld [vmem:[%s12209_s6 + $0x173] sm:$0xff] }
 0x145   : > { %1960 = vst.msk [vmem:[#allocation2 + $0x48] sm:$0xff] %vm943_vm1, %v1882_v19  ;;  %v2884_v23 = vadd.f32 %v11195_v33, %v2806_v14  ;;  %v2805_v55 = vld [vmem:[#allocation2 + $0x20] sm:$0xff]  ;;  %v2442_v11 = vpop.f32.mrb[47].mxu0  ;;  %11489 = vmatmul.mubr.msk.f32.gmra.mrb[152].mxu0 %vm253_vm0, %v4076_v46  ;;  %v3081_v43 = vld [vmem:[%s12209_s6 + $0x18a] sm:$0xff] }
 0x146   : > { %1959 = vst.msk [vmem:[#allocation2 + $0x40] sm:$0xff] %vm943_vm1, %v1881_v47  ;;  %v2883_v20 = vadd.f32 %v2805_v55, %v2432_v0  ;;  %v11079_v17 = vpop.f32.mrb[48].mxu1  ;;  %11491 = vmatprep.mubr.msk.f32.mxu0 %vm253_vm0, %v4077_v10  ;;  %v1812_v19 = vld [vmem:[#allocation2 + $0x88] sm:$0xff]  ;;  %v1811_v47 = vld [vmem:[#allocation2 + $0x80] sm:$0xff] }
 0x147   : > { %2962 = vst.msk [vmem:[#allocation2 + $0x28] sm:$0xff] %vm943_vm1, %v2884_v23  ;;  %v1884_v53 = vadd.f32 %v11079_v17, %v1806_v24  ;;  %v1456_v26 = vpop.f32.mrb[49].mxu1  ;;  %11370 = vmatmul.mubr.msk.f32.gmra.mrb[154].mxu1 %vm253_vm0, %v3074_v50  ;;  %v4085_v14 = vld [vmem:[%s12209_s6 + $0x17b] sm:$0xff]  ;;  %v3082_v23 = vld [vmem:[%s12209_s6 + $0x192] sm:$0xff] }
 0x148   : > { %2961 = vst.msk [vmem:[#allocation2 + $0x20] sm:$0xff] %vm943_vm1, %v2883_v20  ;;  %v1883_v21 = vadd.f32 %v1805_v56, %v1456_v26  ;;  %v2808_v16 = vld [vmem:[#allocation2 + $0x38] sm:$0xff]  ;;  %11372 = vmatprep.mubr.msk.f32.mxu1 %vm253_vm0, %v3075_v30  ;;  %v11201_v60 = vpop.f32.mrb[48].mxu0  ;;  %v4086_v26 = vld [vmem:[%s12209_s6 + $0x183] sm:$0xff] }
 0x149   : > { %1962 = vst.msk [vmem:[#allocation2 + $0x58] sm:$0xff] %vm943_vm1, %v1884_v53  ;;  %v2886_v58 = vadd.f32 %v11198_v15, %v2808_v16  ;;  %v2807_v31 = vld [vmem:[#allocation2 + $0x30] sm:$0xff]  ;;  %v2452_v32 = vpop.f32.mrb[49].mxu0  ;;  %11492 = vmatmul.mubr.msk.f32.gmra.mrb[154].mxu0 %vm253_vm0, %v4078_v25  ;;  %v3083_v17 = vld [vmem:[%s12209_s6 + $0x19a] sm:$0xff] }
 0x14a   : > { %1961 = vst.msk [vmem:[#allocation2 + $0x50] sm:$0xff] %vm943_vm1, %v1883_v21  ;;  %v2885_v28 = vadd.f32 %v2807_v31, %v2442_v11  ;;  %v11082_v36 = vpop.f32.mrb[50].mxu1  ;;  %11494 = vmatprep.mubr.msk.f32.mxu0 %vm253_vm0, %v4079_v18  ;;  %v1814_v53 = vld [vmem:[#allocation2 + $0x98] sm:$0xff]  ;;  %v1813_v21 = vld [vmem:[#allocation2 + $0x90] sm:$0xff] }
 0x14b   : > { %2964 = vst.msk [vmem:[#allocation2 + $0x38] sm:$0xff] %vm943_vm1, %v2886_v58  ;;  %v1886_v59 = vadd.f32 %v11082_v36, %v1808_v37  ;;  %v1466_v61 = vpop.f32.mrb[51].mxu1  ;;  %11373 = vmatmul.mubr.msk.f32.gmra.mrb[156].mxu1 %vm253_vm0, %v3076_v54  ;;  %v4087_v16 = vld [vmem:[%s12209_s6 + $0x18b] sm:$0xff]  ;;  %v3084_v58 = vld [vmem:[%s12209_s6 + $0x1a2] sm:$0xff] }
 0x14c   : > { %2963 = vst.msk [vmem:[#allocation2 + $0x30] sm:$0xff] %vm943_vm1, %v2885_v28  ;;  %v1885_v4 = vadd.f32 %v1807_v44, %v1466_v61  ;;  %v2810_v62 = vld [vmem:[#allocation2 + $0x48] sm:$0xff]  ;;  %11375 = vmatprep.mubr.msk.f32.mxu1 %vm253_vm0, %v3077_v22  ;;  %v11204_v45 = vpop.f32.mrb[50].mxu0  ;;  %v4088_v61 = vld [vmem:[%s12209_s6 + $0x193] sm:$0xff] }
 0x14d   : > { %1964 = vst.msk [vmem:[#allocation2 + $0x68] sm:$0xff] %vm943_vm1, %v1886_v59  ;;  %v2888_v27 = vadd.f32 %v11201_v60, %v2810_v62  ;;  %v2809_v48 = vld [vmem:[#allocation2 + $0x40] sm:$0xff]  ;;  %v2462_v63 = vpop.f32.mrb[51].mxu0  ;;  %11495 = vmatmul.mubr.msk.f32.gmra.mrb[156].mxu0 %vm253_vm0, %v4080_v41  ;;  %v3085_v36 = vld [vmem:[%s12209_s6 + $0x1aa] sm:$0xff] }
 0x14e   : > { %1963 = vst.msk [vmem:[#allocation2 + $0x60] sm:$0xff] %vm943_vm1, %v1885_v4  ;;  %v2887_v5 = vadd.f32 %v2809_v48, %v2452_v32  ;;  %v11085_v38 = vpop.f32.mrb[52].mxu1  ;;  %11497 = vmatprep.mubr.msk.f32.mxu0 %vm253_vm0, %v4081_v29  ;;  %v1816_v59 = vld [vmem:[#allocation2 + $0xa8] sm:$0xff]  ;;  %v1815_v4 = vld [vmem:[#allocation2 + $0xa0] sm:$0xff] }
 0x14f   : > { %2966 = vst.msk [vmem:[#allocation2 + $0x48] sm:$0xff] %vm943_vm1, %v2888_v27  ;;  %v1888_v2 = vadd.f32 %v11085_v38, %v1810_v49  ;;  %v1476_v51 = vpop.f32.mrb[53].mxu1  ;;  %11376 = vmatmul.mubr.msk.f32.gmra.mrb[158].mxu1 %vm253_vm0, %v3078_v34  ;;  %v4089_v62 = vld [vmem:[%s12209_s6 + $0x19b] sm:$0xff]  ;;  %v3086_v27 = vld [vmem:[%s12209_s6 + $0x1b2] sm:$0xff] }
 0x150   : > { %2965 = vst.msk [vmem:[#allocation2 + $0x40] sm:$0xff] %vm943_vm1, %v2887_v5  ;;  %v1887_v42 = vadd.f32 %v1809_v52, %v1476_v51  ;;  %v2812_v33 = vld [vmem:[#allocation2 + $0x58] sm:$0xff]  ;;  %11378 = vmatprep.mubr.msk.f32.mxu1 %vm253_vm0, %v3079_v35  ;;  %v11207_v6 = vpop.f32.mrb[52].mxu0  ;;  %v4090_v51 = vld [vmem:[%s12209_s6 + $0x1a3] sm:$0xff] }
 0x151   : > { %1966 = vst.msk [vmem:[#allocation2 + $0x78] sm:$0xff] %vm943_vm1, %v1888_v2  ;;  %v2890_v0 = vadd.f32 %v11204_v45, %v2812_v33  ;;  %v2811_v1 = vld [vmem:[#allocation2 + $0x50] sm:$0xff]  ;;  %v2472_v13 = vpop.f32.mrb[53].mxu0  ;;  %11498 = vmatmul.mubr.msk.f32.gmra.mrb[158].mxu0 %vm253_vm0, %v4082_v12  ;;  %v3087_v38 = vld [vmem:[%s12209_s6 + $0x1ba] sm:$0xff] }
 0x152   : > { %1965 = vst.msk [vmem:[#allocation2 + $0x70] sm:$0xff] %vm943_vm1, %v1887_v42  ;;  %v2889_v8 = vadd.f32 %v2811_v1, %v2462_v63  ;;  %v11088_v46 = vpop.f32.mrb[54].mxu1  ;;  %11500 = vmatprep.mubr.msk.f32.mxu0 %vm253_vm0, %v4083_v57  ;;  %v1818_v2 = vld [vmem:[#allocation2 + $0xb8] sm:$0xff]  ;;  %v1817_v42 = vld [vmem:[#allocation2 + $0xb0] sm:$0xff] }
 0x153   : > { %2968 = vst.msk [vmem:[#allocation2 + $0x58] sm:$0xff] %vm943_vm1, %v2890_v0  ;;  %v1890_v7 = vadd.f32 %v11088_v46, %v1812_v19  ;;  %v1486_v10 = vpop.f32.mrb[55].mxu1  ;;  %11379 = vmatmul.mubr.msk.f32.gmra.mrb[160].mxu1 %vm253_vm0, %v3080_v3  ;;  %v4091_v33 = vld [vmem:[%s12209_s6 + $0x1ab] sm:$0xff]  ;;  %v3088_v0 = vld [vmem:[%s12209_s6 + $0x1c2] sm:$0xff] }
 0x154   : > { %2967 = vst.msk [vmem:[#allocation2 + $0x50] sm:$0xff] %vm943_vm1, %v2889_v8  ;;  %v1889_v50 = vadd.f32 %v1811_v47, %v1486_v10  ;;  %v2814_v15 = vld [vmem:[#allocation2 + $0x68] sm:$0xff]  ;;  %11381 = vmatprep.mubr.msk.f32.mxu1 %vm253_vm0, %v3081_v43  ;;  %v11210_v55 = vpop.f32.mrb[54].mxu0  ;;  %v4092_v10 = vld [vmem:[%s12209_s6 + $0x1b3] sm:$0xff] }
 0x155   : > { %1968 = vst.msk [vmem:[#allocation2 + $0x88] sm:$0xff] %vm943_vm1, %v1890_v7  ;;  %v2892_v11 = vadd.f32 %v11207_v6, %v2814_v15  ;;  %v2813_v30 = vld [vmem:[#allocation2 + $0x60] sm:$0xff]  ;;  %v2482_v20 = vpop.f32.mrb[55].mxu0  ;;  %11501 = vmatmul.mubr.msk.f32.gmra.mrb[160].mxu0 %vm253_vm0, %v4084_v9  ;;  %v3089_v46 = vld [vmem:[%s12209_s6 + $0x1ca] sm:$0xff] }
 0x156   : > { %1967 = vst.msk [vmem:[#allocation2 + $0x80] sm:$0xff] %vm943_vm1, %v1889_v50  ;;  %v2891_v24 = vadd.f32 %v2813_v30, %v2472_v13  ;;  %v11091_v25 = vpop.f32.mrb[56].mxu1  ;;  %11503 = vmatprep.mubr.msk.f32.mxu0 %vm253_vm0, %v4085_v14  ;;  %v1820_v7 = vld [vmem:[#allocation2 + $0xc8] sm:$0xff]  ;;  %v1819_v50 = vld [vmem:[#allocation2 + $0xc0] sm:$0xff] }
 0x157   : > { %2970 = vst.msk [vmem:[#allocation2 + $0x68] sm:$0xff] %vm943_vm1, %v2892_v11  ;;  %v1892_v56 = vadd.f32 %v11091_v25, %v1814_v53  ;;  %v1496_v18 = vpop.f32.mrb[57].mxu1  ;;  %11382 = vmatmul.mubr.msk.f32.gmra.mrb[162].mxu1 %vm253_vm0, %v3082_v23  ;;  %v4093_v15 = vld [vmem:[%s12209_s6 + $0x1bb] sm:$0xff]  ;;  %v3090_v11 = vld [vmem:[%s12209_s6 + $0x1d2] sm:$0xff] }
 0x158   : > { %2969 = vst.msk [vmem:[#allocation2 + $0x60] sm:$0xff] %vm943_vm1, %v2891_v24  ;;  %v1891_v54 = vadd.f32 %v1813_v21, %v1496_v18  ;;  %v2816_v60 = vld [vmem:[#allocation2 + $0x78] sm:$0xff]  ;;  %11384 = vmatprep.mubr.msk.f32.mxu1 %vm253_vm0, %v3083_v17  ;;  %v11213_v31 = vpop.f32.mrb[56].mxu0  ;;  %v4094_v18 = vld [vmem:[%s12209_s6 + $0x1c3] sm:$0xff] }
 0x159   : > { %1970 = vst.msk [vmem:[#allocation2 + $0x98] sm:$0xff] %vm943_vm1, %v1892_v56  ;;  %v2894_v32 = vadd.f32 %v11210_v55, %v2816_v60  ;;  %v2815_v22 = vld [vmem:[#allocation2 + $0x70] sm:$0xff]  ;;  %v2492_v28 = vpop.f32.mrb[57].mxu0  ;;  %11504 = vmatmul.mubr.msk.f32.gmra.mrb[162].mxu0 %vm253_vm0, %v4086_v26  ;;  %v3091_v25 = vld [vmem:[%s12209_s6 + $0x1da] sm:$0xff] }
 0x15a   : > { %1969 = vst.msk [vmem:[#allocation2 + $0x90] sm:$0xff] %vm943_vm1, %v1891_v54  ;;  %v2893_v37 = vadd.f32 %v2815_v22, %v2482_v20  ;;  %v11094_v41 = vpop.f32.mrb[58].mxu1  ;;  %11506 = vmatprep.mubr.msk.f32.mxu0 %vm253_vm0, %v4087_v16  ;;  %v1822_v56 = vld [vmem:[#allocation2 + $0xd8] sm:$0xff]  ;;  %v1821_v54 = vld [vmem:[#allocation2 + $0xd0] sm:$0xff] }
 0x15b   : > { %2972 = vst.msk [vmem:[#allocation2 + $0x78] sm:$0xff] %vm943_vm1, %v2894_v32  ;;  %v1894_v44 = vadd.f32 %v11094_v41, %v1816_v59  ;;  %v1506_v29 = vpop.f32.mrb[59].mxu1  ;;  %11385 = vmatmul.mubr.msk.f32.gmra.mrb[164].mxu1 %vm253_vm0, %v3084_v58  ;;  %v4095_v60 = vld [vmem:[%s12209_s6 + $0x1cb] sm:$0xff]  ;;  %v3092_v32 = vld [vmem:[%s12209_s6 + $0x1e2] sm:$0xff] }
 0x15c   : > { %2971 = vst.msk [vmem:[#allocation2 + $0x70] sm:$0xff] %vm943_vm1, %v2893_v37  ;;  %v1893_v34 = vadd.f32 %v1815_v4, %v1506_v29  ;;  %v2818_v45 = vld [vmem:[#allocation2 + $0x88] sm:$0xff]  ;;  %11387 = vmatprep.mubr.msk.f32.mxu1 %vm253_vm0, %v3085_v36  ;;  %v11216_v48 = vpop.f32.mrb[58].mxu0  ;;  %v4096_v29 = vld [vmem:[%s12209_s6 + $0x1d3] sm:$0xff] }
 0x15d   : > { %1972 = vst.msk [vmem:[#allocation2 + $0xa8] sm:$0xff] %vm943_vm1, %v1894_v44  ;;  %v2896_v63 = vadd.f32 %v11213_v31, %v2818_v45  ;;  %v2817_v35 = vld [vmem:[#allocation2 + $0x80] sm:$0xff]  ;;  %v2502_v5 = vpop.f32.mrb[59].mxu0  ;;  %11507 = vmatmul.mubr.msk.f32.gmra.mrb[164].mxu0 %vm253_vm0, %v4088_v61  ;;  %v3093_v41 = vld [vmem:[%s12209_s6 + $0x1ea] sm:$0xff] }
 0x15e   : > { %1971 = vst.msk [vmem:[#allocation2 + $0xa0] sm:$0xff] %vm943_vm1, %v1893_v34  ;;  %v2895_v49 = vadd.f32 %v2817_v35, %v2492_v28  ;;  %v11097_v12 = vpop.f32.mrb[60].mxu1  ;;  %11509 = vmatprep.mubr.msk.f32.mxu0 %vm253_vm0, %v4089_v62  ;;  %v1824_v44 = vld [vmem:[#allocation2 + $0xe8] sm:$0xff]  ;;  %v1823_v34 = vld [vmem:[#allocation2 + $0xe0] sm:$0xff] }
 0x15f   : > { %2974 = vst.msk [vmem:[#allocation2 + $0x88] sm:$0xff] %vm943_vm1, %v2896_v63  ;;  %v1896_v52 = vadd.f32 %v11097_v12, %v1818_v2  ;;  %v1516_v57 = vpop.f32.mrb[61].mxu1  ;;  %11388 = vmatmul.mubr.msk.f32.gmra.mrb[166].mxu1 %vm253_vm0, %v3086_v27  ;;  %v4097_v45 = vld [vmem:[%s12209_s6 + $0x1db] sm:$0xff]  ;;  %v3094_v63 = vld [vmem:[%s12209_s6 + $0x1f2] sm:$0xff] }
 0x160   : > { %2973 = vst.msk [vmem:[#allocation2 + $0x80] sm:$0xff] %vm943_vm1, %v2895_v49  ;;  %v1895_v3 = vadd.f32 %v1817_v42, %v1516_v57  ;;  %v2820_v6 = vld [vmem:[#allocation2 + $0x98] sm:$0xff]  ;;  %11390 = vmatprep.mubr.msk.f32.mxu1 %vm253_vm0, %v3087_v38  ;;  %v11219_v1 = vpop.f32.mrb[60].mxu0  ;;  %v4098_v57 = vld [vmem:[%s12209_s6 + $0x1e3] sm:$0xff] }
 0x161   : > { %1974 = vst.msk [vmem:[#allocation2 + $0xb8] sm:$0xff] %vm943_vm1, %v1896_v52  ;;  %v2898_v13 = vadd.f32 %v11216_v48, %v2820_v6  ;;  %v2819_v43 = vld [vmem:[#allocation2 + $0x90] sm:$0xff]  ;;  %v2512_v8 = vpop.f32.mrb[61].mxu0  ;;  %11510 = vmatmul.mubr.msk.f32.gmra.mrb[166].mxu0 %vm253_vm0, %v4090_v51  ;;  %v3095_v12 = vld [vmem:[%s12209_s6 + $0x1fa] sm:$0xff] }
 0x162   : > { %1973 = vst.msk [vmem:[#allocation2 + $0xb0] sm:$0xff] %vm943_vm1, %v1895_v3  ;;  %v2897_v19 = vadd.f32 %v2819_v43, %v2502_v5  ;;  %v11100_v9 = vpop.f32.mrb[62].mxu1  ;;  %11512 = vmatprep.mubr.msk.f32.mxu0 %vm253_vm0, %v4091_v33  ;;  %v1826_v52 = vld [vmem:[#allocation2 + $0xf8] sm:$0xff]  ;;  %v1825_v3 = vld [vmem:[#allocation2 + $0xf0] sm:$0xff] }
 0x163   : > { %2976 = vst.msk [vmem:[#allocation2 + $0x98] sm:$0xff] %vm943_vm1, %v2898_v13  ;;  %v1898_v47 = vadd.f32 %v11100_v9, %v1820_v7  ;;  %v1526_v14 = vpop.f32.mrb[63].mxu1  ;;  %11391 = vmatmul.mubr.msk.f32.gmra.mrb[168].mxu1 %vm253_vm0, %v3088_v0  ;;  %v4099_v6 = vld [vmem:[%s12209_s6 + $0x1eb] sm:$0xff]  ;;  %v3096_v13 = vld [vmem:[%s12209_s6 + $0x202] sm:$0xff] }
 0x164   : > { %2975 = vst.msk [vmem:[#allocation2 + $0x90] sm:$0xff] %vm943_vm1, %v2897_v19  ;;  %v1897_v23 = vadd.f32 %v1819_v50, %v1526_v14  ;;  %v2822_v55 = vld [vmem:[#allocation2 + $0xa8] sm:$0xff]  ;;  %11393 = vmatprep.mubr.msk.f32.mxu1 %vm253_vm0, %v3089_v46  ;;  %v11222_v30 = vpop.f32.mrb[62].mxu0  ;;  %v4100_v14 = vld [vmem:[%s12209_s6 + $0x1f3] sm:$0xff] }
 0x165   : > { %1976 = vst.msk [vmem:[#allocation2 + $0xc8] sm:$0xff] %vm943_vm1, %v1898_v47  ;;  %v2900_v20 = vadd.f32 %v11219_v1, %v2822_v55  ;;  %v2821_v17 = vld [vmem:[#allocation2 + $0xa0] sm:$0xff]  ;;  %v2522_v24 = vpop.f32.mrb[63].mxu0  ;;  %11513 = vmatmul.mubr.msk.f32.gmra.mrb[168].mxu0 %vm253_vm0, %v4092_v10  ;;  %v3097_v9 = vld [vmem:[%s12209_s6 + $0x20a] sm:$0xff] }
 0x166   : > { %1975 = vst.msk [vmem:[#allocation2 + $0xc0] sm:$0xff] %vm943_vm1, %v1897_v23  ;;  %v2899_v53 = vadd.f32 %v2821_v17, %v2512_v8  ;;  %v11103_v26 = vpop.f32.mrb[64].mxu1  ;;  %11515 = vmatprep.mubr.msk.f32.mxu0 %vm253_vm0, %v4093_v15  ;;  %v1828_v47 = vld [vmem:[#allocation2 + $0x108] sm:$0xff]  ;;  %v1827_v23 = vld [vmem:[#allocation2 + $0x100] sm:$0xff] }
 0x167   : > { %2978 = vst.msk [vmem:[#allocation2 + $0xa8] sm:$0xff] %vm943_vm1, %v2900_v20  ;;  %v1900_v21 = vadd.f32 %v11103_v26, %v1822_v56  ;;  %v1536_v16 = vpop.f32.mrb[65].mxu1  ;;  %11394 = vmatmul.mubr.msk.f32.gmra.mrb[170].mxu1 %vm253_vm0, %v3090_v11  ;;  %v4101_v55 = vld [vmem:[%s12209_s6 + $0x1fb] sm:$0xff]  ;;  %v3098_v20 = vld [vmem:[%s12209_s6 + $0x212] sm:$0xff] }
 0x168   : > { %2977 = vst.msk [vmem:[#allocation2 + $0xa0] sm:$0xff] %vm943_vm1, %v2899_v53  ;;  %v1899_v58 = vadd.f32 %v1821_v54, %v1536_v16  ;;  %v2824_v31 = vld [vmem:[#allocation2 + $0xb8] sm:$0xff]  ;;  %11396 = vmatprep.mubr.msk.f32.mxu1 %vm253_vm0, %v3091_v25  ;;  %v11225_v22 = vpop.f32.mrb[64].mxu0  ;;  %v4102_v16 = vld [vmem:[%s12209_s6 + $0x203] sm:$0xff] }
 0x169   : > { %1978 = vst.msk [vmem:[#allocation2 + $0xd8] sm:$0xff] %vm943_vm1, %v1900_v21  ;;  %v2902_v28 = vadd.f32 %v11222_v30, %v2824_v31  ;;  %v2823_v36 = vld [vmem:[#allocation2 + $0xb0] sm:$0xff]  ;;  %v2532_v37 = vpop.f32.mrb[65].mxu0  ;;  %11516 = vmatmul.mubr.msk.f32.gmra.mrb[170].mxu0 %vm253_vm0, %v4094_v18  ;;  %v3099_v26 = vld [vmem:[%s12209_s6 + $0x21a] sm:$0xff] }
 0x16a   : > { %1977 = vst.msk [vmem:[#allocation2 + $0xd0] sm:$0xff] %vm943_vm1, %v1899_v58  ;;  %v2901_v59 = vadd.f32 %v2823_v36, %v2522_v24  ;;  %v11106_v61 = vpop.f32.mrb[66].mxu1  ;;  %11518 = vmatprep.mubr.msk.f32.mxu0 %vm253_vm0, %v4095_v60  ;;  %v1830_v21 = vld [vmem:[#allocation2 + $0x118] sm:$0xff]  ;;  %v1829_v58 = vld [vmem:[#allocation2 + $0x110] sm:$0xff] }
 0x16b   : > { %2980 = vst.msk [vmem:[#allocation2 + $0xb8] sm:$0xff] %vm943_vm1, %v2902_v28  ;;  %v1902_v4 = vadd.f32 %v11106_v61, %v1824_v44  ;;  %v1546_v62 = vpop.f32.mrb[67].mxu1  ;;  %11397 = vmatmul.mubr.msk.f32.gmra.mrb[172].mxu1 %vm253_vm0, %v3092_v32  ;;  %v4103_v31 = vld [vmem:[%s12209_s6 + $0x20b] sm:$0xff]  ;;  %v3100_v28 = vld [vmem:[%s12209_s6 + $0x222] sm:$0xff] }
 0x16c   : > { %2979 = vst.msk [vmem:[#allocation2 + $0xb0] sm:$0xff] %vm943_vm1, %v2901_v59  ;;  %v1901_v27 = vadd.f32 %v1823_v34, %v1546_v62  ;;  %v2826_v48 = vld [vmem:[#allocation2 + $0xc8] sm:$0xff]  ;;  %11399 = vmatprep.mubr.msk.f32.mxu1 %vm253_vm0, %v3093_v41  ;;  %v11228_v35 = vpop.f32.mrb[66].mxu0  ;;  %v4104_v62 = vld [vmem:[%s12209_s6 + $0x213] sm:$0xff] }
 0x16d   : > { %1980 = vst.msk [vmem:[#allocation2 + $0xe8] sm:$0xff] %vm943_vm1, %v1902_v4  ;;  %v2904_v5 = vadd.f32 %v11225_v22, %v2826_v48  ;;  %v2825_v38 = vld [vmem:[#allocation2 + $0xc0] sm:$0xff]  ;;  %v2542_v49 = vpop.f32.mrb[67].mxu0  ;;  %11519 = vmatmul.mubr.msk.f32.gmra.mrb[172].mxu0 %vm253_vm0, %v4096_v29  ;;  %v3101_v61 = vld [vmem:[%s12209_s6 + $0x22a] sm:$0xff] }
 0x16e   : > { %1979 = vst.msk [vmem:[#allocation2 + $0xe0] sm:$0xff] %vm943_vm1, %v1901_v27  ;;  %v2903_v2 = vadd.f32 %v2825_v38, %v2532_v37  ;;  %v11109_v51 = vpop.f32.mrb[68].mxu1  ;;  %11521 = vmatprep.mubr.msk.f32.mxu0 %vm253_vm0, %v4097_v45  ;;  %v1832_v4 = vld [vmem:[#allocation2 + $0x128] sm:$0xff]  ;;  %v1831_v27 = vld [vmem:[#allocation2 + $0x120] sm:$0xff] }
 0x16f   : > { %2982 = vst.msk [vmem:[#allocation2 + $0xc8] sm:$0xff] %vm943_vm1, %v2904_v5  ;;  %v1904_v42 = vadd.f32 %v11109_v51, %v1826_v52  ;;  %v1556_v33 = vpop.f32.mrb[69].mxu1  ;;  %11400 = vmatmul.mubr.msk.f32.gmra.mrb[174].mxu1 %vm253_vm0, %v3094_v63  ;;  %v4105_v48 = vld [vmem:[%s12209_s6 + $0x21b] sm:$0xff]  ;;  %v3102_v5 = vld [vmem:[%s12209_s6 + $0x232] sm:$0xff] }
 0x170   : > { %2981 = vst.msk [vmem:[#allocation2 + $0xc0] sm:$0xff] %vm943_vm1, %v2903_v2  ;;  %v1903_v0 = vadd.f32 %v1825_v3, %v1556_v33  ;;  %v2828_v1 = vld [vmem:[#allocation2 + $0xd8] sm:$0xff]  ;;  %11402 = vmatprep.mubr.msk.f32.mxu1 %vm253_vm0, %v3095_v12  ;;  %v11231_v43 = vpop.f32.mrb[68].mxu0  ;;  %v4106_v33 = vld [vmem:[%s12209_s6 + $0x223] sm:$0xff] }
 0x171   : > { %1982 = vst.msk [vmem:[#allocation2 + $0xf8] sm:$0xff] %vm943_vm1, %v1904_v42  ;;  %v2906_v8 = vadd.f32 %v11228_v35, %v2828_v1  ;;  %v2827_v46 = vld [vmem:[#allocation2 + $0xd0] sm:$0xff]  ;;  %v2552_v19 = vpop.f32.mrb[69].mxu0  ;;  %11522 = vmatmul.mubr.msk.f32.gmra.mrb[174].mxu0 %vm253_vm0, %v4098_v57  ;;  %v3103_v51 = vld [vmem:[%s12209_s6 + $0x23a] sm:$0xff] }
 0x172   : > { %1981 = vst.msk [vmem:[#allocation2 + $0xf0] sm:$0xff] %vm943_vm1, %v1903_v0  ;;  %v2905_v7 = vadd.f32 %v2827_v46, %v2542_v49  ;;  %v11112_v10 = vpop.f32.mrb[70].mxu1  ;;  %11524 = vmatprep.mubr.msk.f32.mxu0 %vm253_vm0, %v4099_v6  ;;  %v1834_v42 = vld [vmem:[#allocation2 + $0x138] sm:$0xff]  ;;  %v1833_v0 = vld [vmem:[#allocation2 + $0x130] sm:$0xff] }
 0x173   : > { %2984 = vst.msk [vmem:[#allocation2 + $0xd8] sm:$0xff] %vm943_vm1, %v2906_v8  ;;  %v1906_v50 = vadd.f32 %v11112_v10, %v1828_v47  ;;  %v1566_v15 = vpop.f32.mrb[71].mxu1  ;;  %11403 = vmatmul.mubr.msk.f32.gmra.mrb[176].mxu1 %vm253_vm0, %v3096_v13  ;;  %v4107_v1 = vld [vmem:[%s12209_s6 + $0x22b] sm:$0xff]  ;;  %v3104_v8 = vld [vmem:[%s12209_s6 + $0x242] sm:$0xff] }
 0x174   : > { %2983 = vst.msk [vmem:[#allocation2 + $0xd0] sm:$0xff] %vm943_vm1, %v2905_v7  ;;  %v1905_v11 = vadd.f32 %v1827_v23, %v1566_v15  ;;  %v2830_v30 = vld [vmem:[#allocation2 + $0xe8] sm:$0xff]  ;;  %11405 = vmatprep.mubr.msk.f32.mxu1 %vm253_vm0, %v3097_v9  ;;  %v11234_v17 = vpop.f32.mrb[70].mxu0  ;;  %v4108_v15 = vld [vmem:[%s12209_s6 + $0x233] sm:$0xff] }
 0x175   : > { %1984 = vst.msk [vmem:[#allocation2 + $0x108] sm:$0xff] %vm943_vm1, %v1906_v50  ;;  %v2908_v24 = vadd.f32 %v11231_v43, %v2830_v30  ;;  %v2829_v25 = vld [vmem:[#allocation2 + $0xe0] sm:$0xff]  ;;  %v2562_v53 = vpop.f32.mrb[71].mxu0  ;;  %11525 = vmatmul.mubr.msk.f32.gmra.mrb[176].mxu0 %vm253_vm0, %v4100_v14  ;;  %v3105_v10 = vld [vmem:[%s12209_s6 + $0x24a] sm:$0xff] }
 0x176   : > { %1983 = vst.msk [vmem:[#allocation2 + $0x100] sm:$0xff] %vm943_vm1, %v1905_v11  ;;  %v2907_v56 = vadd.f32 %v2829_v25, %v2552_v19  ;;  %v11115_v18 = vpop.f32.mrb[72].mxu1  ;;  %11527 = vmatprep.mubr.msk.f32.mxu0 %vm253_vm0, %v4101_v55  ;;  %v1836_v50 = vld [vmem:[#allocation2 + $0x148] sm:$0xff]  ;;  %v1835_v11 = vld [vmem:[#allocation2 + $0x140] sm:$0xff] }
 0x177   : > { %2986 = vst.msk [vmem:[#allocation2 + $0xe8] sm:$0xff] %vm943_vm1, %v2908_v24  ;;  %v1908_v54 = vadd.f32 %v11115_v18, %v1830_v21  ;;  %v1576_v60 = vpop.f32.mrb[73].mxu1  ;;  %11406 = vmatmul.mubr.msk.f32.gmra.mrb[178].mxu1 %vm253_vm0, %v3098_v20  ;;  %v4109_v30 = vld [vmem:[%s12209_s6 + $0x23b] sm:$0xff]  ;;  %v3106_v24 = vld [vmem:[%s12209_s6 + $0x252] sm:$0xff] }
 0x178   : > { %2985 = vst.msk [vmem:[#allocation2 + $0xe0] sm:$0xff] %vm943_vm1, %v2907_v56  ;;  %v1907_v32 = vadd.f32 %v1829_v58, %v1576_v60  ;;  %v2832_v22 = vld [vmem:[#allocation2 + $0xf8] sm:$0xff]  ;;  %11408 = vmatprep.mubr.msk.f32.mxu1 %vm253_vm0, %v3099_v26  ;;  %v11237_v36 = vpop.f32.mrb[72].mxu0  ;;  %v4110_v60 = vld [vmem:[%s12209_s6 + $0x243] sm:$0xff] }
 0x179   : > { %1986 = vst.msk [vmem:[#allocation2 + $0x118] sm:$0xff] %vm943_vm1, %v1908_v54  ;;  %v2910_v37 = vadd.f32 %v11234_v17, %v2832_v22  ;;  %v2831_v41 = vld [vmem:[#allocation2 + $0xf0] sm:$0xff]  ;;  %v2572_v59 = vpop.f32.mrb[73].mxu0  ;;  %11528 = vmatmul.mubr.msk.f32.gmra.mrb[178].mxu0 %vm253_vm0, %v4102_v16  ;;  %v3107_v18 = vld [vmem:[%s12209_s6 + $0x25a] sm:$0xff] }
 0x17a   : > { %1985 = vst.msk [vmem:[#allocation2 + $0x110] sm:$0xff] %vm943_vm1, %v1907_v32  ;;  %v2909_v44 = vadd.f32 %v2831_v41, %v2562_v53  ;;  %v11118_v29 = vpop.f32.mrb[74].mxu1  ;;  %11530 = vmatprep.mubr.msk.f32.mxu0 %vm253_vm0, %v4103_v31  ;;  %v1838_v54 = vld [vmem:[#allocation2 + $0x158] sm:$0xff]  ;;  %v1837_v32 = vld [vmem:[#allocation2 + $0x150] sm:$0xff] }
 0x17b   : > { %2988 = vst.msk [vmem:[#allocation2 + $0xf8] sm:$0xff] %vm943_vm1, %v2910_v37  ;;  %v1910_v34 = vadd.f32 %v11118_v29, %v1832_v4  ;;  %v1586_v45 = vpop.f32.mrb[75].mxu1  ;;  %11409 = vmatmul.mubr.msk.f32.gmra.mrb[180].mxu1 %vm253_vm0, %v3100_v28  ;;  %v4111_v22 = vld [vmem:[%s12209_s6 + $0x24b] sm:$0xff]  ;;  %v3108_v37 = vld [vmem:[%s12209_s6 + $0x262] sm:$0xff] }
 0x17c   : > { %2987 = vst.msk [vmem:[#allocation2 + $0xf0] sm:$0xff] %vm943_vm1, %v2909_v44  ;;  %v1909_v63 = vadd.f32 %v1831_v27, %v1586_v45  ;;  %v2834_v35 = vld [vmem:[#allocation2 + $0x108] sm:$0xff]  ;;  %11411 = vmatprep.mubr.msk.f32.mxu1 %vm253_vm0, %v3101_v61  ;;  %v11240_v38 = vpop.f32.mrb[74].mxu0  ;;  %v4112_v45 = vld [vmem:[%s12209_s6 + $0x253] sm:$0xff] }
 0x17d   : > { %1988 = vst.msk [vmem:[#allocation2 + $0x128] sm:$0xff] %vm943_vm1, %v1910_v34  ;;  %v2912_v49 = vadd.f32 %v11237_v36, %v2834_v35  ;;  %v2833_v12 = vld [vmem:[#allocation2 + $0x100] sm:$0xff]  ;;  %v2582_v2 = vpop.f32.mrb[75].mxu0  ;;  %11531 = vmatmul.mubr.msk.f32.gmra.mrb[180].mxu0 %vm253_vm0, %v4104_v62  ;;  %v3109_v29 = vld [vmem:[%s12209_s6 + $0x26a] sm:$0xff] }
 0x17e   : > { %1987 = vst.msk [vmem:[#allocation2 + $0x120] sm:$0xff] %vm943_vm1, %v1909_v63  ;;  %v2911_v52 = vadd.f32 %v2833_v12, %v2572_v59  ;;  %v11121_v57 = vpop.f32.mrb[76].mxu1  ;;  %11533 = vmatprep.mubr.msk.f32.mxu0 %vm253_vm0, %v4105_v48  ;;  %v1840_v34 = vld [vmem:[#allocation2 + $0x168] sm:$0xff]  ;;  %v1839_v63 = vld [vmem:[#allocation2 + $0x160] sm:$0xff] }
 0x17f   : > { %2990 = vst.msk [vmem:[#allocation2 + $0x108] sm:$0xff] %vm943_vm1, %v2912_v49  ;;  %v1912_v3 = vadd.f32 %v11121_v57, %v1834_v42  ;;  %v1596_v6 = vpop.f32.mrb[77].mxu1  ;;  %11412 = vmatmul.mubr.msk.f32.gmra.mrb[182].mxu1 %vm253_vm0, %v3102_v5  ;;  %v4113_v35 = vld [vmem:[%s12209_s6 + $0x25b] sm:$0xff]  ;;  %v3110_v49 = vld [vmem:[%s12209_s6 + $0x272] sm:$0xff] }
 0x180   : > { %2989 = vst.msk [vmem:[#allocation2 + $0x100] sm:$0xff] %vm943_vm1, %v2911_v52  ;;  %v1911_v13 = vadd.f32 %v1833_v0, %v1596_v6  ;;  %v2836_v43 = vld [vmem:[#allocation2 + $0x118] sm:$0xff]  ;;  %11414 = vmatprep.mubr.msk.f32.mxu1 %vm253_vm0, %v3103_v51  ;;  %v11243_v46 = vpop.f32.mrb[76].mxu0  ;;  %v4114_v6 = vld [vmem:[%s12209_s6 + $0x263] sm:$0xff] }
 0x181   : > { %1990 = vst.msk [vmem:[#allocation2 + $0x138] sm:$0xff] %vm943_vm1, %v1912_v3  ;;  %v2914_v19 = vadd.f32 %v11240_v38, %v2836_v43  ;;  %v2835_v9 = vld [vmem:[#allocation2 + $0x110] sm:$0xff]  ;;  %v2592_v7 = vpop.f32.mrb[77].mxu0  ;;  %11534 = vmatmul.mubr.msk.f32.gmra.mrb[182].mxu0 %vm253_vm0, %v4106_v33  ;;  %v3111_v57 = vld [vmem:[%s12209_s6 + $0x27a] sm:$0xff] }
 0x182   : > { %1989 = vst.msk [vmem:[#allocation2 + $0x130] sm:$0xff] %vm943_vm1, %v1911_v13  ;;  %v2913_v47 = vadd.f32 %v2835_v9, %v2582_v2  ;;  %v11124_v14 = vpop.f32.mrb[78].mxu1  ;;  %11536 = vmatprep.mubr.msk.f32.mxu0 %vm253_vm0, %v4107_v1  ;;  %v1842_v3 = vld [vmem:[#allocation2 + $0x178] sm:$0xff]  ;;  %v1841_v13 = vld [vmem:[#allocation2 + $0x170] sm:$0xff] }
 0x183   : > { %2992 = vst.msk [vmem:[#allocation2 + $0x118] sm:$0xff] %vm943_vm1, %v2914_v19  ;;  %v1914_v23 = vadd.f32 %v11124_v14, %v1836_v50  ;;  %v1606_v55 = vpop.f32.mrb[79].mxu1  ;;  %11415 = vmatmul.mubr.msk.f32.gmra.mrb[184].mxu1 %vm253_vm0, %v3104_v8  ;;  %v4115_v43 = vld [vmem:[%s12209_s6 + $0x26b] sm:$0xff]  ;;  %v3112_v19 = vld [vmem:[%s12209_s6 + $0x282] sm:$0x3f] }
 0x184   : > { %2991 = vst.msk [vmem:[#allocation2 + $0x110] sm:$0xff] %vm943_vm1, %v2913_v47  ;;  %v1913_v20 = vadd.f32 %v1835_v11, %v1606_v55  ;;  %v2838_v17 = vld [vmem:[#allocation2 + $0x128] sm:$0xff]  ;;  %11417 = vmatprep.mubr.msk.f32.mxu1 %vm253_vm0, %v3105_v10  ;;  %v11246_v25 = vpop.f32.mrb[78].mxu0  ;;  %v5047_v50 = vld [vmem:[%s12209_s6 + $0x1c] sm:$0xff]  ;;  %v4116_v55 = vld [vmem:[%s12209_s6 + $0x273] sm:$0xff] }
 0x185   : > { %1992 = vst.msk [vmem:[#allocation2 + $0x148] sm:$0xff] %vm943_vm1, %v1914_v23  ;;  %v2916_v53 = vadd.f32 %v11243_v46, %v2838_v17  ;;  %v2837_v26 = vld [vmem:[#allocation2 + $0x120] sm:$0xff]  ;;  %v2602_v56 = vpop.f32.mrb[79].mxu0  ;;  %11537 = vmatmul.mubr.msk.f32.gmra.mrb[184].mxu0 %vm253_vm0, %v4108_v15  ;;  %v1844_v47 = vld [vmem:[#allocation2 + $0x188] sm:$0xff]  ;;  %v10026_v11 = vld [vmem:[%s14720_s1 + $0xf0] sm:$0xff] }
 0x186   : > { %1991 = vst.msk [vmem:[#allocation2 + $0x140] sm:$0xff] %vm943_vm1, %v1913_v20  ;;  %v2915_v21 = vadd.f32 %v2837_v26, %v2592_v7  ;;  %v11127_v16 = vpop.f32.mrb[80].mxu1  ;;  %11539 = vmatprep.mubr.msk.f32.mxu0 %vm253_vm0, %v4109_v30  ;;  %v10027_v30 = vld [vmem:[%s14720_s1 + $0xf8] sm:$0xff] }
 0x187   : > { %2994 = vst.msk [vmem:[#allocation2 + $0x128] sm:$0xff] %vm943_vm1, %v2916_v53  ;;  %v1916_v58 = vadd.f32 %v11127_v16, %v1838_v54  ;;  %v1616_v31 = vpop.f32.mrb[81].mxu1  ;;  %11418 = vmatmul.mubr.msk.f32.gmra.mrb[186].mxu1 %vm253_vm0, %v3106_v24  ;;  %v1843_v24 = vld [vmem:[#allocation2 + $0x180] sm:$0xff] }
 0x188   : > { %2993 = vst.msk [vmem:[#allocation2 + $0x120] sm:$0xff] %vm943_vm1, %v2915_v21  ;;  %v1915_v28 = vadd.f32 %v1837_v32, %v1616_v31  ;;  %v2840_v36 = vld [vmem:[#allocation2 + $0x138] sm:$0xff]  ;;  %11420 = vmatprep.mubr.msk.f32.mxu1 %vm253_vm0, %v3107_v18  ;;  %v11249_v41 = vpop.f32.mrb[80].mxu0 }
 0x189   : > { %1994 = vst.msk [vmem:[#allocation2 + $0x158] sm:$0xff] %vm943_vm1, %v1916_v58  ;;  %v2918_v59 = vadd.f32 %v11246_v25, %v2840_v36  ;;  %v2839_v61 = vld [vmem:[#allocation2 + $0x130] sm:$0xff]  ;;  %v2612_v44 = vpop.f32.mrb[81].mxu0  ;;  %11540 = vmatmul.mubr.msk.f32.gmra.mrb[186].mxu0 %vm253_vm0, %v4110_v60  ;;  %v4117_v25 = vld [vmem:[%s12209_s6 + $0x27b] sm:$0xff]  ;;  %v12114_v58 = vpack.c.bf16 %v10027_v30, %v10026_v11 }
 0x18a   : > { %1993 = vst.msk [vmem:[#allocation2 + $0x150] sm:$0xff] %vm943_vm1, %v1915_v28  ;;  %v2917_v4 = vadd.f32 %v2839_v61, %v2602_v56  ;;  %v11130_v62 = vpop.f32.mrb[82].mxu1  ;;  %11542 = vmatprep.mubr.msk.f32.mxu0 %vm253_vm0, %v4111_v22  ;;  %v5048_v56 = vld [vmem:[%s12209_s6 + $0x24] sm:$0xff]  ;;  %v5049_v60 = vld [vmem:[%s12209_s6 + $0x2c] sm:$0xff]  ;;  %v1846_v22 = vld [vmem:[#allocation2 + $0x198] sm:$0xff] }
 0x18b   : > { %2996 = vst.msk [vmem:[#allocation2 + $0x138] sm:$0xff] %vm943_vm1, %v2918_v59  ;;  %v1918_v27 = vadd.f32 %v11130_v62, %v1840_v34  ;;  %v1626_v48 = vpop.f32.mrb[83].mxu1  ;;  %11421 = vmatmul.mubr.msk.f32.gmra.mrb[188].mxu1 %vm253_vm0, %v3108_v37  ;;  %v4118_v28 = vld [vmem:[%s12209_s6 + $0x283] sm:$0x3f]  ;;  %v5050_v59 = vld [vmem:[%s12209_s6 + $0x34] sm:$0xff] }
 0x18c   : > { %2995 = vst.msk [vmem:[#allocation2 + $0x130] sm:$0xff] %vm943_vm1, %v2917_v4  ;;  %v1917_v5 = vadd.f32 %v1839_v63, %v1626_v48  ;;  %v2842_v38 = vld [vmem:[#allocation2 + $0x148] sm:$0xff]  ;;  %11423 = vmatprep.mubr.msk.f32.mxu1 %vm253_vm0, %v3109_v29  ;;  %v11252_v12 = vpop.f32.mrb[82].mxu0  ;;  %v10108_v4 = vld [vmem:[%s14720_s1 + $0x110] sm:$0xff]  ;;  %v10109_v62 = vld [vmem:[%s14720_s1 + $0x118] sm:$0xff] }
 0x18d   : > { %1996 = vst.msk [vmem:[#allocation2 + $0x168] sm:$0xff] %vm943_vm1, %v1918_v27  ;;  %v2920_v2 = vadd.f32 %v11249_v41, %v2842_v38  ;;  %v2841_v51 = vld [vmem:[#allocation2 + $0x140] sm:$0xff]  ;;  %v2622_v52 = vpop.f32.mrb[83].mxu0  ;;  %11543 = vmatmul.mubr.msk.f32.gmra.mrb[188].mxu0 %vm253_vm0, %v4112_v45  ;;  %v1845_v41 = vld [vmem:[#allocation2 + $0x190] sm:$0xff] }
 0x18e   : > { %1995 = vst.msk [vmem:[#allocation2 + $0x160] sm:$0xff] %vm943_vm1, %v1917_v5  ;;  %v2919_v42 = vadd.f32 %v2841_v51, %v2612_v44  ;;  %v11133_v33 = vpop.f32.mrb[84].mxu1  ;;  %11545 = vmatprep.mubr.msk.f32.mxu0 %vm253_vm0, %v4113_v35  ;;  %v5051_v48 = vld [vmem:[%s12209_s6 + $0x3c] sm:$0xff]  ;;  %v1848_v35 = vld [vmem:[#allocation2 + $0x1a8] sm:$0xff] }
 0x18f   : > { %2998 = vst.msk [vmem:[#allocation2 + $0x148] sm:$0xff] %vm943_vm1, %v2920_v2  ;;  %v1920_v0 = vadd.f32 %v11133_v33, %v1842_v3  ;;  %v1636_v1 = vpop.f32.mrb[85].mxu1  ;;  %11424 = vmatmul.mubr.msk.f32.gmra.mrb[190].mxu1 %vm253_vm0, %v3110_v49  ;;  %v1847_v49 = vld [vmem:[#allocation2 + $0x1a0] sm:$0xff] }
 0x190   : > { %2997 = vst.msk [vmem:[#allocation2 + $0x140] sm:$0xff] %vm943_vm1, %v2919_v42  ;;  %v1919_v8 = vadd.f32 %v1841_v13, %v1636_v1  ;;  %v2844_v46 = vld [vmem:[#allocation2 + $0x158] sm:$0xff]  ;;  %11426 = vmatprep.mubr.msk.f32.mxu1 %vm253_vm0, %v3111_v57  ;;  %v11255_v9 = vpop.f32.mrb[84].mxu0 }
 0x191   : > { %1998 = vst.msk [vmem:[#allocation2 + $0x178] sm:$0xff] %vm943_vm1, %v1920_v0  ;;  %v2922_v7 = vadd.f32 %v11252_v12, %v2844_v46  ;;  %v2843_v10 = vld [vmem:[#allocation2 + $0x150] sm:$0xff]  ;;  %v2632_v14 = vpop.f32.mrb[85].mxu0  ;;  %11546 = vmatmul.mubr.msk.f32.gmra.mrb[190].mxu0 %vm253_vm0, %v4114_v6  ;;  %v12122_v12 = vpack.c.bf16 %v10109_v62, %v10108_v4  ;;  %v1850_v13 = vld [vmem:[#allocation2 + $0x1b8] sm:$0xff]  ;;  %v1856_v62 = vld [vmem:[#allocation2 + $0x1e8] sm:$0xff] }
 0x192   : > { %1997 = vst.msk [vmem:[#allocation2 + $0x170] sm:$0xff] %vm943_vm1, %v1919_v8  ;;  %v2921_v15 = vadd.f32 %v2843_v10, %v2622_v52  ;;  %v11136_v23 = vpop.f32.mrb[86].mxu1  ;;  %11548 = vmatprep.mubr.msk.f32.mxu0 %vm253_vm0, %v4115_v43  ;;  %v5052_v52 = vld [vmem:[%s12209_s6 + $0x44] sm:$0xff]  ;;  %v5053_v6 = vld [vmem:[%s12209_s6 + $0x4c] sm:$0xff] }
 0x193   : > { %3000 = vst.msk [vmem:[#allocation2 + $0x158] sm:$0xff] %vm943_vm1, %v2922_v7  ;;  %v1922_v20 = vadd.f32 %v11136_v23, %v1844_v47  ;;  %v1646_v17 = vpop.f32.mrb[87].mxu1  ;;  %11427 = vmatmul.mubr.msk.f32.gmra.mrb[192].mxu1 %vm253_vm0, %v3112_v19  ;;  %v1849_v46 = vld [vmem:[#allocation2 + $0x1b0] sm:$0xff] }
 0x194   : > { %2999 = vst.msk [vmem:[#allocation2 + $0x150] sm:$0xff] %vm943_vm1, %v2921_v15  ;;  %v1921_v53 = vadd.f32 %v1843_v24, %v1646_v17  ;;  %v2846_v26 = vld [vmem:[#allocation2 + $0x168] sm:$0xff]  ;;  %11562 = vmatprep.mubr.msk.f32.mxu1 %vm253_vm0, %v5047_v50  ;;  %v11258_v18 = vpop.f32.mrb[86].mxu0  ;;  %v5054_v7 = vld [vmem:[%s12209_s6 + $0x54] sm:$0xff]  ;;  %v5055_v50 = vld [vmem:[%s12209_s6 + $0x5c] sm:$0xff] }
 0x195   : > { %2000 = vst.msk [vmem:[#allocation2 + $0x188] sm:$0xff] %vm943_vm1, %v1922_v20  ;;  %v2924_v21 = vadd.f32 %v11255_v9, %v2846_v26  ;;  %v2845_v16 = vld [vmem:[#allocation2 + $0x160] sm:$0xff]  ;;  %v2642_v54 = vpop.f32.mrb[87].mxu0  ;;  %11549 = vmatmul.mubr.msk.f32.gmra.mrb[192].mxu0 %vm253_vm0, %v4116_v55  ;;  %v1852_v55 = vld [vmem:[#allocation2 + $0x1c8] sm:$0xff] }
 0x196   : > { %1999 = vst.msk [vmem:[#allocation2 + $0x180] sm:$0xff] %vm943_vm1, %v1921_v53  ;;  %v2923_v31 = vadd.f32 %v2845_v16, %v2632_v14  ;;  %v11139_v32 = vpop.f32.mrb[88].mxu1  ;;  %11551 = vmatprep.mubr.msk.f32.mxu0 %vm253_vm0, %v4117_v25  ;;  %v1851_v20 = vld [vmem:[#allocation2 + $0x1c0] sm:$0xff] }
 0x197   : > { %3002 = vst.msk [vmem:[#allocation2 + $0x168] sm:$0xff] %vm943_vm1, %v2924_v21  ;;  %v1924_v36 = vadd.f32 %v11139_v32, %v1846_v22  ;;  %v1656_v37 = vpop.f32.mrb[89].mxu1  ;;  %11563 = vmatmul.mubr.msk.f32.vlgmr.msra.gmra.mrb[194].mxu1 %vm253_vm0, %v5048_v56  ;;  %v5056_v25 = vld [vmem:[%s12209_s6 + $0x64] sm:$0xff]  ;;  %v5057_v21 = vld [vmem:[%s12209_s6 + $0x6c] sm:$0xff] }
 0x198   : > { %3001 = vst.msk [vmem:[#allocation2 + $0x160] sm:$0xff] %vm943_vm1, %v2923_v31  ;;  %v1923_v61 = vadd.f32 %v1845_v41, %v1656_v37  ;;  %v2848_v44 = vld [vmem:[#allocation2 + $0x178] sm:$0xff]  ;;  %12113 = vmatpush3.bf16.msra.mxu1 %v12996_v40  ;;  %11565 = vmatprep.mubr.msk.f32.mxu1 %vm253_vm0, %v5049_v60  ;;  %v11261_v29 = vpop.f32.mrb[88].mxu0  ;;  %v1853_v32 = vld [vmem:[#allocation2 + $0x1d0] sm:$0xff] }
 0x199   : > { %2002 = vst.msk [vmem:[#allocation2 + $0x198] sm:$0xff] %vm943_vm1, %v1924_v36  ;;  %v2926_v34 = vadd.f32 %v11258_v18, %v2848_v44  ;;  %v2847_v45 = vld [vmem:[#allocation2 + $0x170] sm:$0xff]  ;;  %v2652_v27 = vpop.f32.mrb[89].mxu0  ;;  %11552 = vmatmul.mubr.msk.f32.gmra.mrb[194].mxu0 %vm253_vm0, %v4118_v28  ;;  %12115 = vmatprep.subr.bf16.mxu1 %v12114_v58  ;;  %v1854_v60 = vld [vmem:[#allocation2 + $0x1d8] sm:$0xff] }
 0x19a   : > { %2001 = vst.msk [vmem:[#allocation2 + $0x190] sm:$0xff] %vm943_vm1, %v1923_v61  ;;  %v2925_v40 = vadd.f32 %v2847_v45, %v2642_v54  ;;  %v11142_v63 = vpop.f32.mrb[90].mxu1  ;;  %11687 = vmatprep.mubr.msk.f32.mxu0 %vm253_vm0, %v5050_v59  ;;  %v5058_v36 = vld [vmem:[%s12209_s6 + $0x74] sm:$0xff]  ;;  %v5059_v44 = vld [vmem:[%s12209_s6 + $0x7c] sm:$0xff] }
 0x19b   : > { %3004 = vst.msk [vmem:[#allocation2 + $0x178] sm:$0xff] %vm943_vm1, %v2926_v34  ;;  %v1926_v5 = vadd.f32 %v11142_v63, %v1848_v35  ;;  %v1666_v38 = vpop.f32.mrb[91].mxu1  ;;  %11566 = vmatmul.mubr.msk.f32.gmra.mrb[196].mxu1 %vm253_vm0, %v5050_v59  ;;  %v5060_v63 = vld [vmem:[%s12209_s6 + $0x84] sm:$0xff] }
 0x19c   : > { %3003 = vst.msk [vmem:[#allocation2 + $0x170] sm:$0xff] %vm943_vm1, %v2925_v40  ;;  %v1925_v2 = vadd.f32 %v1847_v49, %v1666_v38  ;;  %v2850_v51 = vld [vmem:[#allocation2 + $0x188] sm:$0xff]  ;;  %11568 = vmatprep.mubr.msk.f32.mxu1 %vm253_vm0, %v5051_v48  ;;  %v11264_v57 = vpop.f32.mrb[90].mxu0  ;;  %12117 = vmatpush3.bf16.msra.mxu1 %v12114_v58 }
 0x19d   : > { %2004 = vst.msk [vmem:[#allocation2 + $0x1a8] sm:$0xff] %vm943_vm1, %v1926_v5  ;;  %v2928_v42 = vadd.f32 %v11261_v29, %v2850_v51  ;;  %v2849_v33 = vld [vmem:[#allocation2 + $0x180] sm:$0xff]  ;;  %v2662_v3 = vpop.f32.mrb[91].mxu0  ;;  %11688 = vmatmul.mubr.msk.f32.vlgmr.msra.gmra.mrb[196].mxu0 %vm253_vm0, %v5051_v48 }
 0x19e   : > { %2003 = vst.msk [vmem:[#allocation2 + $0x1a0] sm:$0xff] %vm943_vm1, %v1925_v2  ;;  %v2927_v0 = vadd.f32 %v2849_v33, %v2652_v27  ;;  %v11145_v1 = vpop.f32.mrb[92].mxu1  ;;  %12121 = vmatpush3.bf16.msra.mxu0 %v13034_v39  ;;  %11690 = vmatprep.mubr.msk.f32.mxu0 %vm253_vm0, %v5052_v52  ;;  %v1855_v27 = vld [vmem:[#allocation2 + $0x1e0] sm:$0xff]  ;;  %v1857_v33 = vld [vmem:[#allocation2 + $0x1f0] sm:$0xff] }
 0x19f   : > { %3006 = vst.msk [vmem:[#allocation2 + $0x188] sm:$0xff] %vm943_vm1, %v2928_v42  ;;  %v1928_v43 = vadd.f32 %v11145_v1, %v1850_v13  ;;  %v1676_v8 = vpop.f32.mrb[93].mxu1  ;;  %11569 = vmatmul.mubr.msk.f32.gmra.mrb[198].mxu1 %vm253_vm0, %v5052_v52  ;;  %12123 = vmatprep.subr.bf16.mxu0 %v12122_v12  ;;  %v1858_v52 = vld [vmem:[#allocation2 + $0x1f8] sm:$0xff] }
 0x1a0   : > { %3005 = vst.msk [vmem:[#allocation2 + $0x180] sm:$0xff] %vm943_vm1, %v2927_v0  ;;  %v1927_v19 = vadd.f32 %v1849_v46, %v1676_v8  ;;  %v2852_v9 = vld [vmem:[#allocation2 + $0x198] sm:$0xff]  ;;  %11571 = vmatprep.mubr.msk.f32.mxu1 %vm253_vm0, %v5053_v6  ;;  %v11267_v10 = vpop.f32.mrb[92].mxu0 }
 0x1a1   : > { %2006 = vst.msk [vmem:[#allocation2 + $0x1b8] sm:$0xff] %vm943_vm1, %v1928_v43  ;;  %v2930_v39 = vadd.f32 %v11264_v57, %v2852_v9  ;;  %v2851_v47 = vld [vmem:[#allocation2 + $0x190] sm:$0xff]  ;;  %v2672_v14 = vpop.f32.mrb[93].mxu0  ;;  %11691 = vmatmul.mubr.msk.f32.gmra.mrb[198].mxu0 %vm253_vm0, %v5053_v6  ;;  %v5063_v46 = vld [vmem:[%s12209_s6 + $0x9c] sm:$0xff] }
 0x1a2   : > { %2005 = vst.msk [vmem:[#allocation2 + $0x1b0] sm:$0xff] %vm943_vm1, %v1927_v19  ;;  %v2929_v15 = vadd.f32 %v2851_v47, %v2662_v3  ;;  %v11148_v23 = vpop.f32.mrb[94].mxu1  ;;  %11693 = vmatprep.mubr.msk.f32.mxu0 %vm253_vm0, %v5054_v7  ;;  %12125 = vmatpush3.bf16.msra.mxu0 %v12122_v12  ;;  %v5061_v12 = vld [vmem:[%s12209_s6 + $0x8c] sm:$0xff]  ;;  %v5062_v0 = vld [vmem:[%s12209_s6 + $0x94] sm:$0xff]  ;;  %v1859_v47 = vld [vmem:[#allocation2 + $0x200] sm:$0xff] }
 0x1a3   : > { %3008 = vst.msk [vmem:[#allocation2 + $0x198] sm:$0xff] %vm943_vm1, %v2930_v39  ;;  %v1930_v11 = vadd.f32 %v11148_v23, %v1852_v55  ;;  %v1686_v30 = vpop.f32.mrb[95].mxu1  ;;  %11572 = vmatmul.mubr.msk.f32.gmra.mrb[200].mxu1 %vm253_vm0, %v5054_v7  ;;  %v1860_v7 = vld [vmem:[#allocation2 + $0x208] sm:$0xff] }
 0x1a4   : > { %3007 = vst.msk [vmem:[#allocation2 + $0x190] sm:$0xff] %vm943_vm1, %v2929_v15  ;;  %v1929_v17 = vadd.f32 %v1851_v20, %v1686_v30  ;;  %v2854_v24 = vld [vmem:[#allocation2 + $0x1a8] sm:$0xff]  ;;  %11574 = vmatprep.mubr.msk.f32.mxu1 %vm253_vm0, %v5055_v50  ;;  %v11270_v53 = vpop.f32.mrb[94].mxu0 }
 0x1a5   : > { %2008 = vst.msk [vmem:[#allocation2 + $0x1c8] sm:$0xff] %vm943_vm1, %v1930_v11  ;;  %v2932_v26 = vadd.f32 %v11267_v10, %v2854_v24  ;;  %v2853_v56 = vld [vmem:[#allocation2 + $0x1a0] sm:$0xff]  ;;  %v2682_v18 = vpop.f32.mrb[95].mxu0  ;;  %11694 = vmatmul.mubr.msk.f32.gmra.mrb[200].mxu0 %vm253_vm0, %v5055_v50  ;;  %v5065_v20 = vld [vmem:[%s12209_s6 + $0xac] sm:$0xff] }
 0x1a6   : > { %2007 = vst.msk [vmem:[#allocation2 + $0x1c0] sm:$0xff] %vm943_vm1, %v1929_v17  ;;  %v2931_v16 = vadd.f32 %v2853_v56, %v2672_v14  ;;  %v11151_v54 = vpop.f32.mrb[96].mxu1  ;;  %11696 = vmatprep.mubr.msk.f32.mxu0 %vm253_vm0, %v5056_v25  ;;  %v5064_v15 = vld [vmem:[%s12209_s6 + $0xa4] sm:$0xff]  ;;  %v1861_v56 = vld [vmem:[#allocation2 + $0x210] sm:$0xff] }
 0x1a7   : > { %3010 = vst.msk [vmem:[#allocation2 + $0x1a8] sm:$0xff] %vm943_vm1, %v2932_v26  ;;  %v1932_v58 = vadd.f32 %v11151_v54, %v1854_v60  ;;  %v1696_v31 = vpop.f32.mrb[97].mxu1  ;;  %11575 = vmatmul.mubr.msk.f32.gmra.mrb[202].mxu1 %vm253_vm0, %v5056_v25  ;;  %v1862_v25 = vld [vmem:[#allocation2 + $0x218] sm:$0xff] }
 0x1a8   : > { %3009 = vst.msk [vmem:[#allocation2 + $0x1a0] sm:$0xff] %vm943_vm1, %v2931_v16  ;;  %v1931_v22 = vadd.f32 %v1853_v32, %v1696_v31  ;;  %v2856_v28 = vld [vmem:[#allocation2 + $0x1b8] sm:$0xff]  ;;  %11577 = vmatprep.mubr.msk.f32.mxu1 %vm253_vm0, %v5057_v21  ;;  %v11273_v37 = vpop.f32.mrb[96].mxu0 }
 0x1a9   : > { %2010 = vst.msk [vmem:[#allocation2 + $0x1d8] sm:$0xff] %vm943_vm1, %v1932_v58  ;;  %v2934_v41 = vadd.f32 %v11270_v53, %v2856_v28  ;;  %v2855_v59 = vld [vmem:[#allocation2 + $0x1b0] sm:$0xff]  ;;  %v2692_v61 = vpop.f32.mrb[97].mxu0  ;;  %11697 = vmatmul.mubr.msk.f32.gmra.mrb[202].mxu0 %vm253_vm0, %v5057_v21  ;;  %v5067_v32 = vld [vmem:[%s12209_s6 + $0xbc] sm:$0xff] }
 0x1aa   : > { %2009 = vst.msk [vmem:[#allocation2 + $0x1d0] sm:$0xff] %vm943_vm1, %v1931_v22  ;;  %v2933_v29 = vadd.f32 %v2855_v59, %v2682_v18  ;;  %v11154_v4 = vpop.f32.mrb[98].mxu1  ;;  %11699 = vmatprep.mubr.msk.f32.mxu0 %vm253_vm0, %v5058_v36  ;;  %v5066_v16 = vld [vmem:[%s12209_s6 + $0xb4] sm:$0xff]  ;;  %v1863_v59 = vld [vmem:[#allocation2 + $0x220] sm:$0xff] }
 0x1ab   : > { %3012 = vst.msk [vmem:[#allocation2 + $0x1b8] sm:$0xff] %vm943_vm1, %v2934_v41  ;;  %v1934_v34 = vadd.f32 %v11154_v4, %v1856_v62  ;;  %v1706_v45 = vpop.f32.mrb[99].mxu1  ;;  %11578 = vmatmul.mubr.msk.f32.gmra.mrb[204].mxu1 %vm253_vm0, %v5058_v36  ;;  %v1864_v36 = vld [vmem:[#allocation2 + $0x228] sm:$0xff] }
 0x1ac   : > { %3011 = vst.msk [vmem:[#allocation2 + $0x1b0] sm:$0xff] %vm943_vm1, %v2933_v29  ;;  %v1933_v48 = vadd.f32 %v1855_v27, %v1706_v45  ;;  %v2858_v40 = vld [vmem:[#allocation2 + $0x1c8] sm:$0xff]  ;;  %11580 = vmatprep.mubr.msk.f32.mxu1 %vm253_vm0, %v5059_v44  ;;  %v11276_v35 = vpop.f32.mrb[98].mxu0 }
 0x1ad   : > { %2012 = vst.msk [vmem:[#allocation2 + $0x1e8] sm:$0xff] %vm943_vm1, %v1934_v34  ;;  %v2936_v5 = vadd.f32 %v11273_v37, %v2858_v40  ;;  %v2857_v38 = vld [vmem:[#allocation2 + $0x1c0] sm:$0xff]  ;;  %v2702_v49 = vpop.f32.mrb[99].mxu0  ;;  %11700 = vmatmul.mubr.msk.f32.gmra.mrb[204].mxu0 %vm253_vm0, %v5059_v44  ;;  %v5069_v27 = vld [vmem:[%s12209_s6 + $0xcc] sm:$0xff] }
 0x1ae   : > { %2011 = vst.msk [vmem:[#allocation2 + $0x1e0] sm:$0xff] %vm943_vm1, %v1933_v48  ;;  %v2935_v2 = vadd.f32 %v2857_v38, %v2692_v61  ;;  %v11157_v51 = vpop.f32.mrb[100].mxu1  ;;  %11702 = vmatprep.mubr.msk.f32.mxu0 %vm253_vm0, %v5060_v63  ;;  %v5068_v29 = vld [vmem:[%s12209_s6 + $0xc4] sm:$0xff]  ;;  %v1865_v38 = vld [vmem:[#allocation2 + $0x230] sm:$0xff] }
 0x1af   : > { %3014 = vst.msk [vmem:[#allocation2 + $0x1c8] sm:$0xff] %vm943_vm1, %v2936_v5  ;;  %v1936_v57 = vadd.f32 %v11157_v51, %v1858_v52  ;;  %v1716_v42 = vpop.f32.mrb[101].mxu1  ;;  %11581 = vmatmul.mubr.msk.f32.gmra.mrb[206].mxu1 %vm253_vm0, %v5060_v63  ;;  %v1866_v63 = vld [vmem:[#allocation2 + $0x238] sm:$0xff] }
 0x1b0   : > { %3013 = vst.msk [vmem:[#allocation2 + $0x1c0] sm:$0xff] %vm943_vm1, %v2935_v2  ;;  %v1935_v3 = vadd.f32 %v1857_v33, %v1716_v42  ;;  %v2860_v6 = vld [vmem:[#allocation2 + $0x1d8] sm:$0xff]  ;;  %11583 = vmatprep.mubr.msk.f32.mxu1 %vm253_vm0, %v5061_v12  ;;  %v11279_v1 = vpop.f32.mrb[100].mxu0 }
 0x1b1   : > { %2014 = vst.msk [vmem:[#allocation2 + $0x1f8] sm:$0xff] %vm943_vm1, %v1936_v57  ;;  %v2938_v13 = vadd.f32 %v11276_v35, %v2860_v6  ;;  %v2859_v43 = vld [vmem:[#allocation2 + $0x1d0] sm:$0xff]  ;;  %v2712_v8 = vpop.f32.mrb[101].mxu0  ;;  %11703 = vmatmul.mubr.msk.f32.gmra.mrb[206].mxu0 %vm253_vm0, %v5061_v12  ;;  %v5071_v33 = vld [vmem:[%s12209_s6 + $0xdc] sm:$0xff] }
 0x1b2   : > { %2013 = vst.msk [vmem:[#allocation2 + $0x1f0] sm:$0xff] %vm943_vm1, %v1935_v3  ;;  %v2937_v19 = vadd.f32 %v2859_v43, %v2702_v49  ;;  %v11160_v9 = vpop.f32.mrb[102].mxu1  ;;  %11705 = vmatprep.mubr.msk.f32.mxu0 %vm253_vm0, %v5062_v0  ;;  %v5070_v2 = vld [vmem:[%s12209_s6 + $0xd4] sm:$0xff]  ;;  %v1867_v43 = vld [vmem:[#allocation2 + $0x240] sm:$0xff] }
 0x1b3   : > { %3016 = vst.msk [vmem:[#allocation2 + $0x1d8] sm:$0xff] %vm943_vm1, %v2938_v13  ;;  %v1938_v10 = vadd.f32 %v11160_v9, %v1860_v7  ;;  %v1726_v39 = vpop.f32.mrb[103].mxu1  ;;  %11584 = vmatmul.mubr.msk.f32.gmra.mrb[208].mxu1 %vm253_vm0, %v5062_v0  ;;  %v1868_v0 = vld [vmem:[#allocation2 + $0x248] sm:$0xff] }
 0x1b4   : > { %3015 = vst.msk [vmem:[#allocation2 + $0x1d0] sm:$0xff] %vm943_vm1, %v2937_v19  ;;  %v1937_v14 = vadd.f32 %v1859_v47, %v1726_v39  ;;  %v2862_v50 = vld [vmem:[#allocation2 + $0x1e8] sm:$0xff]  ;;  %11586 = vmatprep.mubr.msk.f32.mxu1 %vm253_vm0, %v5063_v46  ;;  %v11282_v23 = vpop.f32.mrb[102].mxu0 }
 0x1b5   : > { %2016 = vst.msk [vmem:[#allocation2 + $0x208] sm:$0xff] %vm943_vm1, %v1938_v10  ;;  %v2940_v55 = vadd.f32 %v11279_v1, %v2862_v50  ;;  %v2861_v11 = vld [vmem:[#allocation2 + $0x1e0] sm:$0xff]  ;;  %v2722_v30 = vpop.f32.mrb[103].mxu0  ;;  %11706 = vmatmul.mubr.msk.f32.gmra.mrb[208].mxu0 %vm253_vm0, %v5063_v46  ;;  %v5073_v47 = vld [vmem:[%s12209_s6 + $0xec] sm:$0xff] }
 0x1b6   : > { %2015 = vst.msk [vmem:[#allocation2 + $0x200] sm:$0xff] %vm943_vm1, %v1937_v14  ;;  %v2939_v17 = vadd.f32 %v2861_v11, %v2712_v8  ;;  %v11163_v24 = vpop.f32.mrb[104].mxu1  ;;  %11708 = vmatprep.mubr.msk.f32.mxu0 %vm253_vm0, %v5064_v15  ;;  %v5072_v19 = vld [vmem:[%s12209_s6 + $0xe4] sm:$0xff]  ;;  %v1869_v11 = vld [vmem:[#allocation2 + $0x250] sm:$0xff] }
 0x1b7   : > { %3018 = vst.msk [vmem:[#allocation2 + $0x1e8] sm:$0xff] %vm943_vm1, %v2940_v55  ;;  %v1940_v53 = vadd.f32 %v11163_v24, %v1862_v25  ;;  %v1736_v26 = vpop.f32.mrb[105].mxu1  ;;  %11587 = vmatmul.mubr.msk.f32.gmra.mrb[210].mxu1 %vm253_vm0, %v5064_v15  ;;  %v1870_v15 = vld [vmem:[#allocation2 + $0x258] sm:$0xff] }
 0x1b8   : > { %3017 = vst.msk [vmem:[#allocation2 + $0x1e0] sm:$0xff] %vm943_vm1, %v2939_v17  ;;  %v1939_v18 = vadd.f32 %v1861_v56, %v1736_v26  ;;  %v2864_v21 = vld [vmem:[#allocation2 + $0x1f8] sm:$0xff]  ;;  %11589 = vmatprep.mubr.msk.f32.mxu1 %vm253_vm0, %v5065_v20  ;;  %v11285_v54 = vpop.f32.mrb[104].mxu0 }
 0x1b9   : > { %2018 = vst.msk [vmem:[#allocation2 + $0x218] sm:$0xff] %vm943_vm1, %v1940_v53  ;;  %v2942_v60 = vadd.f32 %v11282_v23, %v2864_v21  ;;  %v2863_v58 = vld [vmem:[#allocation2 + $0x1f0] sm:$0xff]  ;;  %v2732_v31 = vpop.f32.mrb[105].mxu0  ;;  %11709 = vmatmul.mubr.msk.f32.gmra.mrb[210].mxu0 %vm253_vm0, %v5065_v20  ;;  %v5075_v56 = vld [vmem:[%s12209_s6 + $0xfc] sm:$0xff] }
 0x1ba   : > { %2017 = vst.msk [vmem:[#allocation2 + $0x210] sm:$0xff] %vm943_vm1, %v1939_v18  ;;  %v2941_v22 = vadd.f32 %v2863_v58, %v2722_v30  ;;  %v11166_v28 = vpop.f32.mrb[106].mxu1  ;;  %11711 = vmatprep.mubr.msk.f32.mxu0 %vm253_vm0, %v5066_v16  ;;  %v5074_v17 = vld [vmem:[%s12209_s6 + $0xf4] sm:$0xff]  ;;  %v1871_v58 = vld [vmem:[#allocation2 + $0x260] sm:$0xff] }
 0x1bb   : > { %3020 = vst.msk [vmem:[#allocation2 + $0x1f8] sm:$0xff] %vm943_vm1, %v2942_v60  ;;  %v1942_v37 = vadd.f32 %v11166_v28, %v1864_v36  ;;  %v1746_v41 = vpop.f32.mrb[107].mxu1  ;;  %11590 = vmatmul.mubr.msk.f32.gmra.mrb[212].mxu1 %vm253_vm0, %v5066_v16  ;;  %v1872_v16 = vld [vmem:[#allocation2 + $0x268] sm:$0x3f] }
 0x1bc   : > { %3019 = vst.msk [vmem:[#allocation2 + $0x1f0] sm:$0xff] %vm943_vm1, %v2941_v22  ;;  %v1941_v61 = vadd.f32 %v1863_v59, %v1746_v41  ;;  %v2866_v44 = vld [vmem:[#allocation2 + $0x208] sm:$0xff]  ;;  %11592 = vmatprep.mubr.msk.f32.mxu1 %vm253_vm0, %v5067_v32  ;;  %v11288_v4 = vpop.f32.mrb[106].mxu0 }
 0x1bd   : > { %2020 = vst.msk [vmem:[#allocation2 + $0x228] sm:$0xff] %vm943_vm1, %v1942_v37  ;;  %v2944_v62 = vadd.f32 %v11285_v54, %v2866_v44  ;;  %v2865_v34 = vld [vmem:[#allocation2 + $0x200] sm:$0xff]  ;;  %v2742_v45 = vpop.f32.mrb[107].mxu0  ;;  %11712 = vmatmul.mubr.msk.f32.gmra.mrb[212].mxu0 %vm253_vm0, %v5067_v32  ;;  %v5077_v59 = vld [vmem:[%s12209_s6 + $0x10c] sm:$0xff] }
 0x1be   : > { %2019 = vst.msk [vmem:[#allocation2 + $0x220] sm:$0xff] %vm943_vm1, %v1941_v61  ;;  %v2943_v48 = vadd.f32 %v2865_v34, %v2732_v31  ;;  %v11169_v40 = vpop.f32.mrb[108].mxu1  ;;  %11714 = vmatprep.mubr.msk.f32.mxu0 %vm253_vm0, %v5068_v29  ;;  %v5076_v22 = vld [vmem:[%s12209_s6 + $0x104] sm:$0xff] }
 0x1bf   : > { %3022 = vst.msk [vmem:[#allocation2 + $0x208] sm:$0xff] %vm943_vm1, %v2944_v62  ;;  %v1944_v35 = vadd.f32 %v11169_v40, %v1866_v63  ;;  %v1756_v5 = vpop.f32.mrb[109].mxu1  ;;  %11593 = vmatmul.mubr.msk.f32.gmra.mrb[214].mxu1 %vm253_vm0, %v5068_v29  ;;  %v3808_v29 = vld [vmem:[#allocation2 + $0x8] sm:$0xff]  ;;  %v3807_v34 = vld [vmem:[#allocation2] sm:$0xff] }
 0x1c0   : > { %3021 = vst.msk [vmem:[#allocation2 + $0x200] sm:$0xff] %vm943_vm1, %v2943_v48  ;;  %v1943_v49 = vadd.f32 %v1865_v38, %v1756_v5  ;;  %v2868_v12 = vld [vmem:[#allocation2 + $0x218] sm:$0xff]  ;;  %11595 = vmatprep.mubr.msk.f32.mxu1 %vm253_vm0, %v5069_v27  ;;  %v11291_v51 = vpop.f32.mrb[108].mxu0 }
 0x1c1   : > { %2022 = vst.msk [vmem:[#allocation2 + $0x238] sm:$0xff] %vm943_vm1, %v1944_v35  ;;  %v2946_v52 = vadd.f32 %v11288_v4, %v2868_v12  ;;  %v2867_v57 = vld [vmem:[#allocation2 + $0x210] sm:$0xff]  ;;  %v2752_v42 = vpop.f32.mrb[109].mxu0  ;;  %11715 = vmatmul.mubr.msk.f32.gmra.mrb[214].mxu0 %vm253_vm0, %v5069_v27  ;;  %v5079_v38 = vld [vmem:[%s12209_s6 + $0x11c] sm:$0xff] }
 0x1c2   : > { %2021 = vst.msk [vmem:[#allocation2 + $0x230] sm:$0xff] %vm943_vm1, %v1943_v49  ;;  %v2945_v3 = vadd.f32 %v2867_v57, %v2742_v45  ;;  %v11172_v6 = vpop.f32.mrb[110].mxu1  ;;  %11717 = vmatprep.mubr.msk.f32.mxu0 %vm253_vm0, %v5070_v2  ;;  %v5078_v48 = vld [vmem:[%s12209_s6 + $0x114] sm:$0xff] }
 0x1c3   : > { %3024 = vst.msk [vmem:[#allocation2 + $0x218] sm:$0xff] %vm943_vm1, %v2946_v52  ;;  %v1946_v1 = vadd.f32 %v11172_v6, %v1868_v0  ;;  %v1766_v13 = vpop.f32.mrb[111].mxu1  ;;  %11596 = vmatmul.mubr.msk.f32.gmra.mrb[216].mxu1 %vm253_vm0, %v5070_v2  ;;  %v3810_v2 = vld [vmem:[#allocation2 + $0x18] sm:$0xff]  ;;  %v3809_v57 = vld [vmem:[#allocation2 + $0x10] sm:$0xff] }
 0x1c4   : > { %3023 = vst.msk [vmem:[#allocation2 + $0x210] sm:$0xff] %vm943_vm1, %v2945_v3  ;;  %v1945_v8 = vadd.f32 %v1867_v43, %v1766_v13  ;;  %v2870_v46 = vld [vmem:[#allocation2 + $0x228] sm:$0xff]  ;;  %11598 = vmatprep.mubr.msk.f32.mxu1 %vm253_vm0, %v5071_v33  ;;  %v11294_v9 = vpop.f32.mrb[110].mxu0 }
 0x1c5   : > { %2024 = vst.msk [vmem:[#allocation2 + $0x248] sm:$0xff] %vm943_vm1, %v1946_v1  ;;  %v2948_v7 = vadd.f32 %v11291_v51, %v2870_v46  ;;  %v2869_v10 = vld [vmem:[#allocation2 + $0x220] sm:$0xff]  ;;  %v2762_v39 = vpop.f32.mrb[111].mxu0  ;;  %11718 = vmatmul.mubr.msk.f32.gmra.mrb[216].mxu0 %vm253_vm0, %v5071_v33  ;;  %v5081_v43 = vld [vmem:[%s12209_s6 + $0x12c] sm:$0xff] }
 0x1c6   : > { %2023 = vst.msk [vmem:[#allocation2 + $0x240] sm:$0xff] %vm943_vm1, %v1945_v8  ;;  %v2947_v14 = vadd.f32 %v2869_v10, %v2752_v42  ;;  %v11175_v50 = vpop.f32.mrb[112].mxu1  ;;  %11720 = vmatprep.mubr.msk.f32.mxu0 %vm253_vm0, %v5072_v19  ;;  %v5080_v3 = vld [vmem:[%s12209_s6 + $0x124] sm:$0xff] }
 0x1c7   : > { %3026 = vst.msk [vmem:[#allocation2 + $0x228] sm:$0xff] %vm943_vm1, %v2948_v7  ;;  %v1948_v23 = vadd.f32 %v11175_v50, %v1870_v15  ;;  %v1776_v55 = vpop.f32.mrb[113].mxu1  ;;  %11599 = vmatmul.mubr.msk.f32.gmra.mrb[218].mxu1 %vm253_vm0, %v5072_v19  ;;  %v3812_v19 = vld [vmem:[#allocation2 + $0x28] sm:$0xff]  ;;  %v3811_v10 = vld [vmem:[#allocation2 + $0x20] sm:$0xff] }
 0x1c8   : > { %3025 = vst.msk [vmem:[#allocation2 + $0x220] sm:$0xff] %vm943_vm1, %v2947_v14  ;;  %v1947_v30 = vadd.f32 %v1869_v11, %v1776_v55  ;;  %v2872_v20 = vld [vmem:[#allocation2 + $0x238] sm:$0xff]  ;;  %11601 = vmatprep.mubr.msk.f32.mxu1 %vm253_vm0, %v5073_v47  ;;  %v11297_v24 = vpop.f32.mrb[112].mxu0 }
 0x1c9   : > { %2026 = vst.msk [vmem:[#allocation2 + $0x258] sm:$0xff] %vm943_vm1, %v1948_v23  ;;  %v2950_v25 = vadd.f32 %v11294_v9, %v2872_v20  ;;  %v2871_v53 = vld [vmem:[#allocation2 + $0x230] sm:$0xff]  ;;  %v2772_v26 = vpop.f32.mrb[113].mxu0  ;;  %11721 = vmatmul.mubr.msk.f32.gmra.mrb[218].mxu0 %vm253_vm0, %v5073_v47  ;;  %v5083_v11 = vld [vmem:[%s12209_s6 + $0x13c] sm:$0xff] }
 0x1ca   : > { %2025 = vst.msk [vmem:[#allocation2 + $0x250] sm:$0xff] %vm943_vm1, %v1947_v30  ;;  %v2949_v18 = vadd.f32 %v2871_v53, %v2762_v39  ;;  %v11178_v21 = vpop.f32.mrb[114].mxu1  ;;  %11723 = vmatprep.mubr.msk.f32.mxu0 %vm253_vm0, %v5074_v17  ;;  %v5082_v14 = vld [vmem:[%s12209_s6 + $0x134] sm:$0xff] }
 0x1cb   : > { %3028 = vst.msk [vmem:[#allocation2 + $0x238] sm:$0xff] %vm943_vm1, %v2950_v25  ;;  %v1950_v54 = vadd.f32 %v11178_v21, %v1872_v16  ;;  %v1786_v60 = vpop.f32.mrb[115].mxu1  ;;  %11602 = vmatmul.mubr.msk.f32.gmra.mrb[220].mxu1 %vm253_vm0, %v5074_v17  ;;  %v3814_v17 = vld [vmem:[#allocation2 + $0x38] sm:$0xff]  ;;  %v3813_v53 = vld [vmem:[#allocation2 + $0x30] sm:$0xff] }
 0x1cc   : > { %3027 = vst.msk [vmem:[#allocation2 + $0x230] sm:$0xff] %vm943_vm1, %v2949_v18  ;;  %v1949_v31 = vadd.f32 %v1871_v58, %v1786_v60  ;;  %v2874_v32 = vld [vmem:[#allocation2 + $0x248] sm:$0xff]  ;;  %11604 = vmatprep.mubr.msk.f32.mxu1 %vm253_vm0, %v5075_v56  ;;  %v11300_v28 = vpop.f32.mrb[114].mxu0 }
 0x1cd   : > { %2028 = vst.msk [vmem:[#allocation2 + $0x268] sm:$0x3f] %vm1021_vm2, %v1950_v54  ;;  %v2952_v36 = vadd.f32 %v11297_v24, %v2874_v32  ;;  %v2873_v37 = vld [vmem:[#allocation2 + $0x240] sm:$0xff]  ;;  %v2782_v41 = vpop.f32.mrb[115].mxu0  ;;  %11724 = vmatmul.mubr.msk.f32.gmra.mrb[220].mxu0 %vm253_vm0, %v5075_v56  ;;  %v5085_v58 = vld [vmem:[%s12209_s6 + $0x14c] sm:$0xff] }
 0x1ce   : > { %2027 = vst.msk [vmem:[#allocation2 + $0x260] sm:$0xff] %vm943_vm1, %v1949_v31  ;;  %v2951_v61 = vadd.f32 %v2873_v37, %v2772_v26  ;;  %v11314_v44 = vpop.f32.mrb[116].mxu1  ;;  %11726 = vmatprep.mubr.msk.f32.mxu0 %vm253_vm0, %v5076_v22  ;;  %v5084_v18 = vld [vmem:[%s12209_s6 + $0x144] sm:$0xff] }
 0x1cf   : > { %3030 = vst.msk [vmem:[#allocation2 + $0x248] sm:$0xff] %vm943_vm1, %v2952_v36  ;;  %v3886_v4 = vadd.f32 %v11314_v44, %v3808_v29  ;;  %v3418_v62 = vpop.f32.mrb[117].mxu1  ;;  %11605 = vmatmul.mubr.msk.f32.gmra.mrb[222].mxu1 %vm253_vm0, %v5076_v22  ;;  %v3816_v22 = vld [vmem:[#allocation2 + $0x48] sm:$0xff]  ;;  %v3815_v37 = vld [vmem:[#allocation2 + $0x40] sm:$0xff] }
 0x1d0   : > { %3029 = vst.msk [vmem:[#allocation2 + $0x240] sm:$0xff] %vm943_vm1, %v2951_v61  ;;  %v3885_v45 = vadd.f32 %v3807_v34, %v3418_v62  ;;  %v2876_v27 = vld [vmem:[#allocation2 + $0x258] sm:$0xff]  ;;  %11607 = vmatprep.mubr.msk.f32.mxu1 %vm253_vm0, %v5077_v59  ;;  %v11303_v40 = vpop.f32.mrb[116].mxu0 }
 0x1d1   : > { %3964 = vst.msk [vmem:[#allocation2 + $0x8] sm:$0xff] %vm943_vm1, %v3886_v4  ;;  %v2954_v63 = vadd.f32 %v11300_v28, %v2876_v27  ;;  %v2875_v35 = vld [vmem:[#allocation2 + $0x250] sm:$0xff]  ;;  %v2792_v5 = vpop.f32.mrb[117].mxu0  ;;  %11727 = vmatmul.mubr.msk.f32.gmra.mrb[222].mxu0 %vm253_vm0, %v5077_v59  ;;  %v5087_v34 = vld [vmem:[%s12209_s6 + $0x15c] sm:$0xff] }
 0x1d2   : > { %3963 = vst.msk [vmem:[#allocation2] sm:$0xff] %vm943_vm1, %v3885_v45  ;;  %v2953_v49 = vadd.f32 %v2875_v35, %v2782_v41  ;;  %v11317_v12 = vpop.f32.mrb[118].mxu1  ;;  %11729 = vmatprep.mubr.msk.f32.mxu0 %vm253_vm0, %v5078_v48  ;;  %v5086_v61 = vld [vmem:[%s12209_s6 + $0x154] sm:$0xff] }
 0x1d3   : > { %3032 = vst.msk [vmem:[#allocation2 + $0x258] sm:$0xff] %vm943_vm1, %v2954_v63  ;;  %v3888_v51 = vadd.f32 %v11317_v12, %v3810_v2  ;;  %v3428_v52 = vpop.f32.mrb[119].mxu1  ;;  %11608 = vmatmul.mubr.msk.f32.gmra.mrb[224].mxu1 %vm253_vm0, %v5078_v48  ;;  %v3818_v48 = vld [vmem:[#allocation2 + $0x58] sm:$0xff]  ;;  %v3817_v35 = vld [vmem:[#allocation2 + $0x50] sm:$0xff] }
 0x1d4   : > { %3031 = vst.msk [vmem:[#allocation2 + $0x250] sm:$0xff] %vm943_vm1, %v2953_v49  ;;  %v3887_v42 = vadd.f32 %v3809_v57, %v3428_v52  ;;  %v2878_v33 = vld [vmem:[#allocation2 + $0x268] sm:$0x3f]  ;;  %11610 = vmatprep.mubr.msk.f32.mxu1 %vm253_vm0, %v5079_v38  ;;  %v11439_v6 = vpop.f32.mrb[118].mxu0 }
 0x1d5   : > { %3966 = vst.msk [vmem:[#allocation2 + $0x18] sm:$0xff] %vm943_vm1, %v3888_v51  ;;  %v2956_v0 = vadd.f32 %v11303_v40, %v2878_v33  ;;  %v2877_v1 = vld [vmem:[#allocation2 + $0x260] sm:$0xff]  ;;  %v4424_v13 = vpop.f32.mrb[119].mxu0  ;;  %11730 = vmatmul.mubr.msk.f32.gmra.mrb[224].mxu0 %vm253_vm0, %v5079_v38  ;;  %v5089_v57 = vld [vmem:[%s12209_s6 + $0x16c] sm:$0xff] }
 0x1d6   : > { %3965 = vst.msk [vmem:[#allocation2 + $0x10] sm:$0xff] %vm943_vm1, %v3887_v42  ;;  %v2955_v8 = vadd.f32 %v2877_v1, %v2792_v5  ;;  %v11320_v46 = vpop.f32.mrb[120].mxu1  ;;  %11732 = vmatprep.mubr.msk.f32.mxu0 %vm253_vm0, %v5080_v3  ;;  %v5088_v49 = vld [vmem:[%s12209_s6 + $0x164] sm:$0xff] }
 0x1d7   : > { %3034 = vst.msk [vmem:[#allocation2 + $0x268] sm:$0x3f] %vm1021_vm2, %v2956_v0  ;;  %v3890_v9 = vadd.f32 %v11320_v46, %v3812_v19  ;;  %v3438_v7 = vpop.f32.mrb[121].mxu1  ;;  %11611 = vmatmul.mubr.msk.f32.gmra.mrb[226].mxu1 %vm253_vm0, %v5080_v3  ;;  %v3820_v3 = vld [vmem:[#allocation2 + $0x68] sm:$0xff]  ;;  %v3819_v1 = vld [vmem:[#allocation2 + $0x60] sm:$0xff] }
 0x1d8   : > { %3033 = vst.msk [vmem:[#allocation2 + $0x260] sm:$0xff] %vm943_vm1, %v2955_v8  ;;  %v3889_v39 = vadd.f32 %v3811_v10, %v3438_v7  ;;  %v4814_v47 = vld [vmem:[#allocation2 + $0x8] sm:$0xff]  ;;  %11613 = vmatprep.mubr.msk.f32.mxu1 %vm253_vm0, %v5081_v43  ;;  %v11442_v50 = vpop.f32.mrb[120].mxu0  ;;  %v5090_v8 = vld [vmem:[%s12209_s6 + $0x174] sm:$0xff]  ;;  %v5091_v10 = vld [vmem:[%s12209_s6 + $0x17c] sm:$0xff] }
 0x1d9   : > { %3968 = vst.msk [vmem:[#allocation2 + $0x28] sm:$0xff] %vm943_vm1, %v3890_v9  ;;  %v4892_v15 = vadd.f32 %v11439_v6, %v4814_v47  ;;  %v4813_v23 = vld [vmem:[#allocation2] sm:$0xff]  ;;  %v4434_v55 = vpop.f32.mrb[121].mxu0  ;;  %11733 = vmatmul.mubr.msk.f32.gmra.mrb[226].mxu0 %vm253_vm0, %v5081_v43 }
 0x1da   : > { %3967 = vst.msk [vmem:[#allocation2 + $0x20] sm:$0xff] %vm943_vm1, %v3889_v39  ;;  %v4891_v30 = vadd.f32 %v4813_v23, %v4424_v13  ;;  %v11323_v20 = vpop.f32.mrb[122].mxu1  ;;  %11735 = vmatprep.mubr.msk.f32.mxu0 %vm253_vm0, %v5082_v14  ;;  %v3821_v23 = vld [vmem:[#allocation2 + $0x70] sm:$0xff] }
 0x1db   : > { %4970 = vst.msk [vmem:[#allocation2 + $0x8] sm:$0xff] %vm943_vm1, %v4892_v15  ;;  %v3892_v24 = vadd.f32 %v11323_v20, %v3814_v17  ;;  %v3448_v25 = vpop.f32.mrb[123].mxu1  ;;  %11614 = vmatmul.mubr.msk.f32.gmra.mrb[228].mxu1 %vm253_vm0, %v5082_v14  ;;  %v3822_v14 = vld [vmem:[#allocation2 + $0x78] sm:$0xff] }
 0x1dc   : > { %4969 = vst.msk [vmem:[#allocation2] sm:$0xff] %vm943_vm1, %v4891_v30  ;;  %v3891_v26 = vadd.f32 %v3813_v53, %v3448_v25  ;;  %v4816_v56 = vld [vmem:[#allocation2 + $0x18] sm:$0xff]  ;;  %11616 = vmatprep.mubr.msk.f32.mxu1 %vm253_vm0, %v5083_v11  ;;  %v11445_v21 = vpop.f32.mrb[122].mxu0  ;;  %v5092_v30 = vld [vmem:[%s12209_s6 + $0x184] sm:$0xff]  ;;  %v5093_v53 = vld [vmem:[%s12209_s6 + $0x18c] sm:$0xff] }
 0x1dd   : > { %3970 = vst.msk [vmem:[#allocation2 + $0x38] sm:$0xff] %vm943_vm1, %v3892_v24  ;;  %v4894_v16 = vadd.f32 %v11442_v50, %v4816_v56  ;;  %v4815_v54 = vld [vmem:[#allocation2 + $0x10] sm:$0xff]  ;;  %v4444_v60 = vpop.f32.mrb[123].mxu0  ;;  %11736 = vmatmul.mubr.msk.f32.gmra.mrb[228].mxu0 %vm253_vm0, %v5083_v11 }
 0x1de   : > { %3969 = vst.msk [vmem:[#allocation2 + $0x30] sm:$0xff] %vm943_vm1, %v3891_v26  ;;  %v4893_v31 = vadd.f32 %v4815_v54, %v4434_v55  ;;  %v11326_v32 = vpop.f32.mrb[124].mxu1  ;;  %11738 = vmatprep.mubr.msk.f32.mxu0 %vm253_vm0, %v5084_v18  ;;  %v3823_v54 = vld [vmem:[#allocation2 + $0x80] sm:$0xff] }
 0x1df   : > { %4972 = vst.msk [vmem:[#allocation2 + $0x18] sm:$0xff] %vm943_vm1, %v4894_v16  ;;  %v3894_v28 = vadd.f32 %v11326_v32, %v3816_v22  ;;  %v3458_v36 = vpop.f32.mrb[125].mxu1  ;;  %11617 = vmatmul.mubr.msk.f32.gmra.mrb[230].mxu1 %vm253_vm0, %v5084_v18  ;;  %v3824_v18 = vld [vmem:[#allocation2 + $0x88] sm:$0xff] }
 0x1e0   : > { %4971 = vst.msk [vmem:[#allocation2 + $0x10] sm:$0xff] %vm943_vm1, %v4893_v31  ;;  %v3893_v41 = vadd.f32 %v3815_v37, %v3458_v36  ;;  %v4818_v59 = vld [vmem:[#allocation2 + $0x28] sm:$0xff]  ;;  %11619 = vmatprep.mubr.msk.f32.mxu1 %vm253_vm0, %v5085_v58  ;;  %v11448_v44 = vpop.f32.mrb[124].mxu0  ;;  %v5094_v31 = vld [vmem:[%s12209_s6 + $0x194] sm:$0xff]  ;;  %v5095_v37 = vld [vmem:[%s12209_s6 + $0x19c] sm:$0xff] }
 0x1e1   : > { %3972 = vst.msk [vmem:[#allocation2 + $0x48] sm:$0xff] %vm943_vm1, %v3894_v28  ;;  %v4896_v29 = vadd.f32 %v11445_v21, %v4818_v59  ;;  %v4817_v4 = vld [vmem:[#allocation2 + $0x20] sm:$0xff]  ;;  %v4454_v62 = vpop.f32.mrb[125].mxu0  ;;  %11739 = vmatmul.mubr.msk.f32.gmra.mrb[230].mxu0 %vm253_vm0, %v5085_v58 }
 0x1e2   : > { %3971 = vst.msk [vmem:[#allocation2 + $0x40] sm:$0xff] %vm943_vm1, %v3893_v41  ;;  %v4895_v45 = vadd.f32 %v4817_v4, %v4444_v60  ;;  %v11329_v27 = vpop.f32.mrb[126].mxu1  ;;  %11741 = vmatprep.mubr.msk.f32.mxu0 %vm253_vm0, %v5086_v61  ;;  %v3825_v4 = vld [vmem:[#allocation2 + $0x90] sm:$0xff] }
 0x1e3   : > { %4974 = vst.msk [vmem:[#allocation2 + $0x28] sm:$0xff] %vm943_vm1, %v4896_v29  ;;  %v3896_v40 = vadd.f32 %v11329_v27, %v3818_v48  ;;  %v3468_v63 = vpop.f32.mrb[127].mxu1  ;;  %11620 = vmatmul.mubr.msk.f32.gmra.mrb[232].mxu1 %vm253_vm0, %v5086_v61  ;;  %v3826_v61 = vld [vmem:[#allocation2 + $0x98] sm:$0xff] }
 0x1e4   : > { %4973 = vst.msk [vmem:[#allocation2 + $0x20] sm:$0xff] %vm943_vm1, %v4895_v45  ;;  %v3895_v5 = vadd.f32 %v3817_v35, %v3468_v63  ;;  %v4820_v38 = vld [vmem:[#allocation2 + $0x38] sm:$0xff]  ;;  %11622 = vmatprep.mubr.msk.f32.mxu1 %vm253_vm0, %v5087_v34  ;;  %v11451_v12 = vpop.f32.mrb[126].mxu0  ;;  %v5096_v45 = vld [vmem:[%s12209_s6 + $0x1a4] sm:$0xff]  ;;  %v5097_v35 = vld [vmem:[%s12209_s6 + $0x1ac] sm:$0xff] }
 0x1e5   : > { %3974 = vst.msk [vmem:[#allocation2 + $0x58] sm:$0xff] %vm943_vm1, %v3896_v40  ;;  %v4898_v2 = vadd.f32 %v11448_v44, %v4820_v38  ;;  %v4819_v51 = vld [vmem:[#allocation2 + $0x30] sm:$0xff]  ;;  %v4464_v52 = vpop.f32.mrb[127].mxu0  ;;  %11742 = vmatmul.mubr.msk.f32.gmra.mrb[232].mxu0 %vm253_vm0, %v5087_v34 }
 0x1e6   : > { %3973 = vst.msk [vmem:[#allocation2 + $0x50] sm:$0xff] %vm943_vm1, %v3895_v5  ;;  %v4897_v42 = vadd.f32 %v4819_v51, %v4454_v62  ;;  %v11332_v33 = vpop.f32.mrb[128].mxu1  ;;  %11744 = vmatprep.mubr.msk.f32.mxu0 %vm253_vm0, %v5088_v49  ;;  %v3827_v51 = vld [vmem:[#allocation2 + $0xa0] sm:$0xff] }
 0x1e7   : > { %4976 = vst.msk [vmem:[#allocation2 + $0x38] sm:$0xff] %vm943_vm1, %v4898_v2  ;;  %v3898_v6 = vadd.f32 %v11332_v33, %v3820_v3  ;;  %v3478_v0 = vpop.f32.mrb[129].mxu1  ;;  %11623 = vmatmul.mubr.msk.f32.gmra.mrb[234].mxu1 %vm253_vm0, %v5088_v49  ;;  %v3828_v49 = vld [vmem:[#allocation2 + $0xa8] sm:$0xff] }
 0x1e8   : > { %4975 = vst.msk [vmem:[#allocation2 + $0x30] sm:$0xff] %vm943_vm1, %v4897_v42  ;;  %v3897_v13 = vadd.f32 %v3819_v1, %v3478_v0  ;;  %v4822_v43 = vld [vmem:[#allocation2 + $0x48] sm:$0xff]  ;;  %11625 = vmatprep.mubr.msk.f32.mxu1 %vm253_vm0, %v5089_v57  ;;  %v11454_v46 = vpop.f32.mrb[128].mxu0  ;;  %v5098_v42 = vld [vmem:[%s12209_s6 + $0x1b4] sm:$0xff]  ;;  %v5099_v1 = vld [vmem:[%s12209_s6 + $0x1bc] sm:$0xff] }
 0x1e9   : > { %3976 = vst.msk [vmem:[#allocation2 + $0x68] sm:$0xff] %vm943_vm1, %v3898_v6  ;;  %v4900_v19 = vadd.f32 %v11451_v12, %v4822_v43  ;;  %v4821_v9 = vld [vmem:[#allocation2 + $0x40] sm:$0xff]  ;;  %v4474_v7 = vpop.f32.mrb[129].mxu0  ;;  %11745 = vmatmul.mubr.msk.f32.gmra.mrb[234].mxu0 %vm253_vm0, %v5089_v57 }
 0x1ea   : > { %3975 = vst.msk [vmem:[#allocation2 + $0x60] sm:$0xff] %vm943_vm1, %v3897_v13  ;;  %v4899_v39 = vadd.f32 %v4821_v9, %v4464_v52  ;;  %v11335_v47 = vpop.f32.mrb[130].mxu1  ;;  %11747 = vmatprep.mubr.msk.f32.mxu0 %vm253_vm0, %v5090_v8  ;;  %v3829_v9 = vld [vmem:[#allocation2 + $0xb0] sm:$0xff] }
 0x1eb   : > { %4978 = vst.msk [vmem:[#allocation2 + $0x48] sm:$0xff] %vm943_vm1, %v4900_v19  ;;  %v3900_v50 = vadd.f32 %v11335_v47, %v3822_v14  ;;  %v3488_v15 = vpop.f32.mrb[131].mxu1  ;;  %11626 = vmatmul.mubr.msk.f32.gmra.mrb[236].mxu1 %vm253_vm0, %v5090_v8  ;;  %v3830_v8 = vld [vmem:[#allocation2 + $0xb8] sm:$0xff] }
 0x1ec   : > { %4977 = vst.msk [vmem:[#allocation2 + $0x40] sm:$0xff] %vm943_vm1, %v4899_v39  ;;  %v3899_v55 = vadd.f32 %v3821_v23, %v3488_v15  ;;  %v4824_v11 = vld [vmem:[#allocation2 + $0x58] sm:$0xff]  ;;  %11628 = vmatprep.mubr.msk.f32.mxu1 %vm253_vm0, %v5091_v10  ;;  %v11457_v20 = vpop.f32.mrb[130].mxu0  ;;  %v5100_v39 = vld [vmem:[%s12209_s6 + $0x1c4] sm:$0xff]  ;;  %v5101_v23 = vld [vmem:[%s12209_s6 + $0x1cc] sm:$0xff] }
 0x1ed   : > { %3978 = vst.msk [vmem:[#allocation2 + $0x78] sm:$0xff] %vm943_vm1, %v3900_v50  ;;  %v4902_v17 = vadd.f32 %v11454_v46, %v4824_v11  ;;  %v4823_v24 = vld [vmem:[#allocation2 + $0x50] sm:$0xff]  ;;  %v4484_v25 = vpop.f32.mrb[131].mxu0  ;;  %11748 = vmatmul.mubr.msk.f32.gmra.mrb[236].mxu0 %vm253_vm0, %v5091_v10 }
 0x1ee   : > { %3977 = vst.msk [vmem:[#allocation2 + $0x70] sm:$0xff] %vm943_vm1, %v3899_v55  ;;  %v4901_v26 = vadd.f32 %v4823_v24, %v4474_v7  ;;  %v11338_v56 = vpop.f32.mrb[132].mxu1  ;;  %11750 = vmatprep.mubr.msk.f32.mxu0 %vm253_vm0, %v5092_v30  ;;  %v3831_v24 = vld [vmem:[#allocation2 + $0xc0] sm:$0xff] }
 0x1ef   : > { %4980 = vst.msk [vmem:[#allocation2 + $0x58] sm:$0xff] %vm943_vm1, %v4902_v17  ;;  %v3902_v21 = vadd.f32 %v11338_v56, %v3824_v18  ;;  %v3498_v16 = vpop.f32.mrb[133].mxu1  ;;  %11629 = vmatmul.mubr.msk.f32.gmra.mrb[238].mxu1 %vm253_vm0, %v5092_v30  ;;  %v3832_v30 = vld [vmem:[#allocation2 + $0xc8] sm:$0xff] }
 0x1f0   : > { %4979 = vst.msk [vmem:[#allocation2 + $0x50] sm:$0xff] %vm943_vm1, %v4901_v26  ;;  %v3901_v60 = vadd.f32 %v3823_v54, %v3498_v16  ;;  %v4826_v58 = vld [vmem:[#allocation2 + $0x68] sm:$0xff]  ;;  %11631 = vmatprep.mubr.msk.f32.mxu1 %vm253_vm0, %v5093_v53  ;;  %v11460_v32 = vpop.f32.mrb[132].mxu0  ;;  %v5102_v26 = vld [vmem:[%s12209_s6 + $0x1d4] sm:$0xff]  ;;  %v5103_v54 = vld [vmem:[%s12209_s6 + $0x1dc] sm:$0xff] }
 0x1f1   : > { %3980 = vst.msk [vmem:[#allocation2 + $0x88] sm:$0xff] %vm943_vm1, %v3902_v21  ;;  %v4904_v22 = vadd.f32 %v11457_v20, %v4826_v58  ;;  %v4825_v28 = vld [vmem:[#allocation2 + $0x60] sm:$0xff]  ;;  %v4494_v36 = vpop.f32.mrb[133].mxu0  ;;  %11751 = vmatmul.mubr.msk.f32.gmra.mrb[238].mxu0 %vm253_vm0, %v5093_v53 }
 0x1f2   : > { %3979 = vst.msk [vmem:[#allocation2 + $0x80] sm:$0xff] %vm943_vm1, %v3901_v60  ;;  %v4903_v41 = vadd.f32 %v4825_v28, %v4484_v25  ;;  %v11341_v59 = vpop.f32.mrb[134].mxu1  ;;  %11753 = vmatprep.mubr.msk.f32.mxu0 %vm253_vm0, %v5094_v31  ;;  %v3833_v28 = vld [vmem:[#allocation2 + $0xd0] sm:$0xff] }
 0x1f3   : > { %4982 = vst.msk [vmem:[#allocation2 + $0x68] sm:$0xff] %vm943_vm1, %v4904_v22  ;;  %v3904_v44 = vadd.f32 %v11341_v59, %v3826_v61  ;;  %v3508_v29 = vpop.f32.mrb[135].mxu1  ;;  %11632 = vmatmul.mubr.msk.f32.gmra.mrb[240].mxu1 %vm253_vm0, %v5094_v31  ;;  %v3834_v31 = vld [vmem:[#allocation2 + $0xd8] sm:$0xff] }
 0x1f4   : > { %4981 = vst.msk [vmem:[#allocation2 + $0x60] sm:$0xff] %vm943_vm1, %v4903_v41  ;;  %v3903_v62 = vadd.f32 %v3825_v4, %v3508_v29  ;;  %v4828_v34 = vld [vmem:[#allocation2 + $0x78] sm:$0xff]  ;;  %11634 = vmatprep.mubr.msk.f32.mxu1 %vm253_vm0, %v5095_v37  ;;  %v11463_v27 = vpop.f32.mrb[134].mxu0  ;;  %v5104_v41 = vld [vmem:[%s12209_s6 + $0x1e4] sm:$0xff]  ;;  %v5105_v4 = vld [vmem:[%s12209_s6 + $0x1ec] sm:$0xff] }
 0x1f5   : > { %3982 = vst.msk [vmem:[#allocation2 + $0x98] sm:$0xff] %vm943_vm1, %v3904_v44  ;;  %v4906_v48 = vadd.f32 %v11460_v32, %v4828_v34  ;;  %v4827_v40 = vld [vmem:[#allocation2 + $0x70] sm:$0xff]  ;;  %v4504_v63 = vpop.f32.mrb[135].mxu0  ;;  %11754 = vmatmul.mubr.msk.f32.gmra.mrb[240].mxu0 %vm253_vm0, %v5095_v37 }
 0x1f6   : > { %3981 = vst.msk [vmem:[#allocation2 + $0x90] sm:$0xff] %vm943_vm1, %v3903_v62  ;;  %v4905_v5 = vadd.f32 %v4827_v40, %v4494_v36  ;;  %v11344_v38 = vpop.f32.mrb[136].mxu1  ;;  %11756 = vmatprep.mubr.msk.f32.mxu0 %vm253_vm0, %v5096_v45  ;;  %v3835_v40 = vld [vmem:[#allocation2 + $0xe0] sm:$0xff] }
 0x1f7   : > { %4984 = vst.msk [vmem:[#allocation2 + $0x78] sm:$0xff] %vm943_vm1, %v4906_v48  ;;  %v3906_v12 = vadd.f32 %v11344_v38, %v3828_v49  ;;  %v3518_v2 = vpop.f32.mrb[137].mxu1  ;;  %11635 = vmatmul.mubr.msk.f32.gmra.mrb[242].mxu1 %vm253_vm0, %v5096_v45  ;;  %v3836_v45 = vld [vmem:[#allocation2 + $0xe8] sm:$0xff] }
 0x1f8   : > { %4983 = vst.msk [vmem:[#allocation2 + $0x70] sm:$0xff] %vm943_vm1, %v4905_v5  ;;  %v3905_v52 = vadd.f32 %v3827_v51, %v3518_v2  ;;  %v4830_v57 = vld [vmem:[#allocation2 + $0x88] sm:$0xff]  ;;  %11637 = vmatprep.mubr.msk.f32.mxu1 %vm253_vm0, %v5097_v35  ;;  %v11466_v33 = vpop.f32.mrb[136].mxu0  ;;  %v5106_v5 = vld [vmem:[%s12209_s6 + $0x1f4] sm:$0xff]  ;;  %v5107_v51 = vld [vmem:[%s12209_s6 + $0x1fc] sm:$0xff] }
 0x1f9   : > { %3984 = vst.msk [vmem:[#allocation2 + $0xa8] sm:$0xff] %vm943_vm1, %v3906_v12  ;;  %v4908_v3 = vadd.f32 %v11463_v27, %v4830_v57  ;;  %v4829_v6 = vld [vmem:[#allocation2 + $0x80] sm:$0xff]  ;;  %v4514_v0 = vpop.f32.mrb[137].mxu0  ;;  %11757 = vmatmul.mubr.msk.f32.gmra.mrb[242].mxu0 %vm253_vm0, %v5097_v35 }
 0x1fa   : > { %3983 = vst.msk [vmem:[#allocation2 + $0xa0] sm:$0xff] %vm943_vm1, %v3905_v52  ;;  %v4907_v13 = vadd.f32 %v4829_v6, %v4504_v63  ;;  %v11347_v43 = vpop.f32.mrb[138].mxu1  ;;  %11759 = vmatprep.mubr.msk.f32.mxu0 %vm253_vm0, %v5098_v42  ;;  %v3837_v6 = vld [vmem:[#allocation2 + $0xf0] sm:$0xff] }
 0x1fb   : > { %4986 = vst.msk [vmem:[#allocation2 + $0x88] sm:$0xff] %vm943_vm1, %v4908_v3  ;;  %v3908_v46 = vadd.f32 %v11347_v43, %v3830_v8  ;;  %v3528_v19 = vpop.f32.mrb[139].mxu1  ;;  %11638 = vmatmul.mubr.msk.f32.gmra.mrb[244].mxu1 %vm253_vm0, %v5098_v42  ;;  %v3838_v42 = vld [vmem:[#allocation2 + $0xf8] sm:$0xff] }
 0x1fc   : > { %4985 = vst.msk [vmem:[#allocation2 + $0x80] sm:$0xff] %vm943_vm1, %v4907_v13  ;;  %v3907_v7 = vadd.f32 %v3829_v9, %v3528_v19  ;;  %v4832_v10 = vld [vmem:[#allocation2 + $0x98] sm:$0xff]  ;;  %11640 = vmatprep.mubr.msk.f32.mxu1 %vm253_vm0, %v5099_v1  ;;  %v11469_v47 = vpop.f32.mrb[138].mxu0  ;;  %v5108_v13 = vld [vmem:[%s12209_s6 + $0x204] sm:$0xff]  ;;  %v5109_v9 = vld [vmem:[%s12209_s6 + $0x20c] sm:$0xff] }
 0x1fd   : > { %3986 = vst.msk [vmem:[#allocation2 + $0xb8] sm:$0xff] %vm943_vm1, %v3908_v46  ;;  %v4910_v14 = vadd.f32 %v11466_v33, %v4832_v10  ;;  %v4831_v50 = vld [vmem:[#allocation2 + $0x90] sm:$0xff]  ;;  %v4524_v15 = vpop.f32.mrb[139].mxu0  ;;  %11760 = vmatmul.mubr.msk.f32.gmra.mrb[244].mxu0 %vm253_vm0, %v5099_v1 }
 0x1fe   : > { %3985 = vst.msk [vmem:[#allocation2 + $0xb0] sm:$0xff] %vm943_vm1, %v3907_v7  ;;  %v4909_v55 = vadd.f32 %v4831_v50, %v4514_v0  ;;  %v11350_v11 = vpop.f32.mrb[140].mxu1  ;;  %11762 = vmatprep.mubr.msk.f32.mxu0 %vm253_vm0, %v5100_v39  ;;  %v3839_v50 = vld [vmem:[#allocation2 + $0x100] sm:$0xff] }
 0x1ff   : > { %4988 = vst.msk [vmem:[#allocation2 + $0x98] sm:$0xff] %vm943_vm1, %v4910_v14  ;;  %v3910_v20 = vadd.f32 %v11350_v11, %v3832_v30  ;;  %v3538_v17 = vpop.f32.mrb[141].mxu1  ;;  %11641 = vmatmul.mubr.msk.f32.gmra.mrb[246].mxu1 %vm253_vm0, %v5100_v39  ;;  %v3840_v39 = vld [vmem:[#allocation2 + $0x108] sm:$0xff] }
 0x200   : > { %4987 = vst.msk [vmem:[#allocation2 + $0x90] sm:$0xff] %vm943_vm1, %v4909_v55  ;;  %v3909_v25 = vadd.f32 %v3831_v24, %v3538_v17  ;;  %v4834_v53 = vld [vmem:[#allocation2 + $0xa8] sm:$0xff]  ;;  %11643 = vmatprep.mubr.msk.f32.mxu1 %vm253_vm0, %v5101_v23  ;;  %v11472_v56 = vpop.f32.mrb[140].mxu0  ;;  %v5110_v55 = vld [vmem:[%s12209_s6 + $0x214] sm:$0xff]  ;;  %v5111_v24 = vld [vmem:[%s12209_s6 + $0x21c] sm:$0xff] }
 0x201   : > { %3988 = vst.msk [vmem:[#allocation2 + $0xc8] sm:$0xff] %vm943_vm1, %v3910_v20  ;;  %v4912_v18 = vadd.f32 %v11469_v47, %v4834_v53  ;;  %v4833_v21 = vld [vmem:[#allocation2 + $0xa0] sm:$0xff]  ;;  %v4534_v16 = vpop.f32.mrb[141].mxu0  ;;  %11763 = vmatmul.mubr.msk.f32.gmra.mrb[246].mxu0 %vm253_vm0, %v5101_v23 }
 0x202   : > { %3987 = vst.msk [vmem:[#allocation2 + $0xc0] sm:$0xff] %vm943_vm1, %v3909_v25  ;;  %v4911_v60 = vadd.f32 %v4833_v21, %v4524_v15  ;;  %v11353_v58 = vpop.f32.mrb[142].mxu1  ;;  %11765 = vmatprep.mubr.msk.f32.mxu0 %vm253_vm0, %v5102_v26  ;;  %v3841_v21 = vld [vmem:[#allocation2 + $0x110] sm:$0xff] }
 0x203   : > { %4990 = vst.msk [vmem:[#allocation2 + $0xa8] sm:$0xff] %vm943_vm1, %v4912_v18  ;;  %v3912_v32 = vadd.f32 %v11353_v58, %v3834_v31  ;;  %v3548_v22 = vpop.f32.mrb[143].mxu1  ;;  %11644 = vmatmul.mubr.msk.f32.gmra.mrb[248].mxu1 %vm253_vm0, %v5102_v26  ;;  %v3842_v26 = vld [vmem:[#allocation2 + $0x118] sm:$0xff] }
 0x204   : > { %4989 = vst.msk [vmem:[#allocation2 + $0xa0] sm:$0xff] %vm943_vm1, %v4911_v60  ;;  %v3911_v36 = vadd.f32 %v3833_v28, %v3548_v22  ;;  %v4836_v37 = vld [vmem:[#allocation2 + $0xb8] sm:$0xff]  ;;  %11646 = vmatprep.mubr.msk.f32.mxu1 %vm253_vm0, %v5103_v54  ;;  %v11475_v59 = vpop.f32.mrb[142].mxu0  ;;  %v5112_v60 = vld [vmem:[%s12209_s6 + $0x224] sm:$0xff]  ;;  %v5113_v28 = vld [vmem:[%s12209_s6 + $0x22c] sm:$0xff] }
 0x205   : > { %3990 = vst.msk [vmem:[#allocation2 + $0xd8] sm:$0xff] %vm943_vm1, %v3912_v32  ;;  %v4914_v61 = vadd.f32 %v11472_v56, %v4836_v37  ;;  %v4835_v44 = vld [vmem:[#allocation2 + $0xb0] sm:$0xff]  ;;  %v4544_v29 = vpop.f32.mrb[143].mxu0  ;;  %11766 = vmatmul.mubr.msk.f32.gmra.mrb[248].mxu0 %vm253_vm0, %v5103_v54 }
 0x206   : > { %3989 = vst.msk [vmem:[#allocation2 + $0xd0] sm:$0xff] %vm943_vm1, %v3911_v36  ;;  %v4913_v62 = vadd.f32 %v4835_v44, %v4534_v16  ;;  %v11356_v34 = vpop.f32.mrb[144].mxu1  ;;  %11768 = vmatprep.mubr.msk.f32.mxu0 %vm253_vm0, %v5104_v41  ;;  %v3843_v44 = vld [vmem:[#allocation2 + $0x120] sm:$0xff] }
 0x207   : > { %4992 = vst.msk [vmem:[#allocation2 + $0xb8] sm:$0xff] %vm943_vm1, %v4914_v61  ;;  %v3914_v27 = vadd.f32 %v11356_v34, %v3836_v45  ;;  %v3558_v48 = vpop.f32.mrb[145].mxu1  ;;  %11647 = vmatmul.mubr.msk.f32.gmra.mrb[250].mxu1 %vm253_vm0, %v5104_v41  ;;  %v3844_v41 = vld [vmem:[#allocation2 + $0x128] sm:$0xff] }
 0x208   : > { %4991 = vst.msk [vmem:[#allocation2 + $0xb0] sm:$0xff] %vm943_vm1, %v4913_v62  ;;  %v3913_v63 = vadd.f32 %v3835_v40, %v3558_v48  ;;  %v4838_v35 = vld [vmem:[#allocation2 + $0xc8] sm:$0xff]  ;;  %11649 = vmatprep.mubr.msk.f32.mxu1 %vm253_vm0, %v5105_v4  ;;  %v11478_v38 = vpop.f32.mrb[144].mxu0  ;;  %v5114_v62 = vld [vmem:[%s12209_s6 + $0x234] sm:$0xff]  ;;  %v5115_v40 = vld [vmem:[%s12209_s6 + $0x23c] sm:$0xff] }
 0x209   : > { %3992 = vst.msk [vmem:[#allocation2 + $0xe8] sm:$0xff] %vm943_vm1, %v3914_v27  ;;  %v4916_v49 = vadd.f32 %v11475_v59, %v4838_v35  ;;  %v4837_v12 = vld [vmem:[#allocation2 + $0xc0] sm:$0xff]  ;;  %v4554_v2 = vpop.f32.mrb[145].mxu0  ;;  %11769 = vmatmul.mubr.msk.f32.gmra.mrb[250].mxu0 %vm253_vm0, %v5105_v4 }
 0x20a   : > { %3991 = vst.msk [vmem:[#allocation2 + $0xe0] sm:$0xff] %vm943_vm1, %v3913_v63  ;;  %v4915_v52 = vadd.f32 %v4837_v12, %v4544_v29  ;;  %v11359_v57 = vpop.f32.mrb[146].mxu1  ;;  %11771 = vmatprep.mubr.msk.f32.mxu0 %vm253_vm0, %v5106_v5  ;;  %v3845_v12 = vld [vmem:[#allocation2 + $0x130] sm:$0xff] }
 0x20b   : > { %4994 = vst.msk [vmem:[#allocation2 + $0xc8] sm:$0xff] %vm943_vm1, %v4916_v49  ;;  %v3916_v33 = vadd.f32 %v11359_v57, %v3838_v42  ;;  %v3568_v3 = vpop.f32.mrb[147].mxu1  ;;  %11650 = vmatmul.mubr.msk.f32.gmra.mrb[252].mxu1 %vm253_vm0, %v5106_v5  ;;  %v3846_v5 = vld [vmem:[#allocation2 + $0x138] sm:$0xff] }
 0x20c   : > { %4993 = vst.msk [vmem:[#allocation2 + $0xc0] sm:$0xff] %vm943_vm1, %v4915_v52  ;;  %v3915_v0 = vadd.f32 %v3837_v6, %v3568_v3  ;;  %v4840_v1 = vld [vmem:[#allocation2 + $0xd8] sm:$0xff]  ;;  %11652 = vmatprep.mubr.msk.f32.mxu1 %vm253_vm0, %v5107_v51  ;;  %v11481_v43 = vpop.f32.mrb[146].mxu0  ;;  %v5116_v52 = vld [vmem:[%s12209_s6 + $0x244] sm:$0xff]  ;;  %v5117_v6 = vld [vmem:[%s12209_s6 + $0x24c] sm:$0xff] }
 0x20d   : > { %3994 = vst.msk [vmem:[#allocation2 + $0xf8] sm:$0xff] %vm943_vm1, %v3916_v33  ;;  %v4918_v8 = vadd.f32 %v11478_v38, %v4840_v1  ;;  %v4839_v46 = vld [vmem:[#allocation2 + $0xd0] sm:$0xff]  ;;  %v4564_v19 = vpop.f32.mrb[147].mxu0  ;;  %11772 = vmatmul.mubr.msk.f32.gmra.mrb[252].mxu0 %vm253_vm0, %v5107_v51 }
 0x20e   : > { %3993 = vst.msk [vmem:[#allocation2 + $0xf0] sm:$0xff] %vm943_vm1, %v3915_v0  ;;  %v4917_v7 = vadd.f32 %v4839_v46, %v4554_v2  ;;  %v11362_v10 = vpop.f32.mrb[148].mxu1  ;;  %11774 = vmatprep.mubr.msk.f32.mxu0 %vm253_vm0, %v5108_v13  ;;  %v3847_v46 = vld [vmem:[#allocation2 + $0x140] sm:$0xff] }
 0x20f   : > { %4996 = vst.msk [vmem:[#allocation2 + $0xd8] sm:$0xff] %vm943_vm1, %v4918_v8  ;;  %v3918_v47 = vadd.f32 %v11362_v10, %v3840_v39  ;;  %v3578_v14 = vpop.f32.mrb[149].mxu1  ;;  %11653 = vmatmul.mubr.msk.f32.gmra.mrb[254].mxu1 %vm253_vm0, %v5108_v13  ;;  %v3848_v13 = vld [vmem:[#allocation2 + $0x148] sm:$0xff] }
 0x210   : > { %4995 = vst.msk [vmem:[#allocation2 + $0xd0] sm:$0xff] %vm943_vm1, %v4917_v7  ;;  %v3917_v15 = vadd.f32 %v3839_v50, %v3578_v14  ;;  %v4842_v23 = vld [vmem:[#allocation2 + $0xe8] sm:$0xff]  ;;  %11655 = vmatprep.mubr.msk.f32.mxu1 %vm253_vm0, %v5109_v9  ;;  %v11484_v11 = vpop.f32.mrb[148].mxu0  ;;  %v5118_v7 = vld [vmem:[%s12209_s6 + $0x254] sm:$0xff]  ;;  %v5119_v50 = vld [vmem:[%s12209_s6 + $0x25c] sm:$0xff] }
 0x211   : > { %3996 = vst.msk [vmem:[#allocation2 + $0x108] sm:$0xff] %vm943_vm1, %v3918_v47  ;;  %v4920_v30 = vadd.f32 %v11481_v43, %v4842_v23  ;;  %v4841_v20 = vld [vmem:[#allocation2 + $0xe0] sm:$0xff]  ;;  %v4574_v17 = vpop.f32.mrb[149].mxu0  ;;  %11775 = vmatmul.mubr.msk.f32.gmra.mrb[254].mxu0 %vm253_vm0, %v5109_v9 }
 0x212   : > { %3995 = vst.msk [vmem:[#allocation2 + $0x100] sm:$0xff] %vm943_vm1, %v3917_v15  ;;  %v4919_v25 = vadd.f32 %v4841_v20, %v4564_v19  ;;  %v11365_v53 = vpop.f32.mrb[150].mxu1  ;;  %11777 = vmatprep.mubr.msk.f32.mxu0 %vm253_vm0, %v5110_v55  ;;  %v3849_v20 = vld [vmem:[#allocation2 + $0x150] sm:$0xff] }
 0x213   : > { %4998 = vst.msk [vmem:[#allocation2 + $0xe8] sm:$0xff] %vm943_vm1, %v4920_v30  ;;  %v3920_v56 = vadd.f32 %v11365_v53, %v3842_v26  ;;  %v3588_v18 = vpop.f32.mrb[151].mxu1  ;;  %11656 = vmatmul.mubr.msk.f32.gmra.mrb[0].mxu1 %vm253_vm0, %v5110_v55  ;;  %v3850_v55 = vld [vmem:[#allocation2 + $0x158] sm:$0xff] }
 0x214   : > { %4997 = vst.msk [vmem:[#allocation2 + $0xe0] sm:$0xff] %vm943_vm1, %v4919_v25  ;;  %v3919_v16 = vadd.f32 %v3841_v21, %v3588_v18  ;;  %v4844_v54 = vld [vmem:[#allocation2 + $0xf8] sm:$0xff]  ;;  %11658 = vmatprep.mubr.msk.f32.mxu1 %vm253_vm0, %v5111_v24  ;;  %v11487_v58 = vpop.f32.mrb[150].mxu0  ;;  %v5120_v25 = vld [vmem:[%s12209_s6 + $0x264] sm:$0xff]  ;;  %v5121_v21 = vld [vmem:[%s12209_s6 + $0x26c] sm:$0xff] }
 0x215   : > { %3998 = vst.msk [vmem:[#allocation2 + $0x118] sm:$0xff] %vm943_vm1, %v3920_v56  ;;  %v4922_v31 = vadd.f32 %v11484_v11, %v4844_v54  ;;  %v4843_v32 = vld [vmem:[#allocation2 + $0xf0] sm:$0xff]  ;;  %v4584_v22 = vpop.f32.mrb[151].mxu0  ;;  %11778 = vmatmul.mubr.msk.f32.gmra.mrb[0].mxu0 %vm253_vm0, %v5111_v24 }
 0x216   : > { %3997 = vst.msk [vmem:[#allocation2 + $0x110] sm:$0xff] %vm943_vm1, %v3919_v16  ;;  %v4921_v36 = vadd.f32 %v4843_v32, %v4574_v17  ;;  %v11368_v37 = vpop.f32.mrb[152].mxu1  ;;  %11780 = vmatprep.mubr.msk.f32.mxu0 %vm253_vm0, %v5112_v60  ;;  %v3851_v32 = vld [vmem:[#allocation2 + $0x160] sm:$0xff] }
 0x217   : > { %5000 = vst.msk [vmem:[#allocation2 + $0xf8] sm:$0xff] %vm943_vm1, %v4922_v31  ;;  %v3922_v59 = vadd.f32 %v11368_v37, %v3844_v41  ;;  %v3598_v61 = vpop.f32.mrb[153].mxu1  ;;  %11659 = vmatmul.mubr.msk.f32.gmra.mrb[2].mxu1 %vm253_vm0, %v5112_v60  ;;  %v3852_v60 = vld [vmem:[#allocation2 + $0x168] sm:$0xff] }
 0x218   : > { %4999 = vst.msk [vmem:[#allocation2 + $0xf0] sm:$0xff] %vm943_vm1, %v4921_v36  ;;  %v3921_v29 = vadd.f32 %v3843_v44, %v3598_v61  ;;  %v4846_v4 = vld [vmem:[#allocation2 + $0x108] sm:$0xff]  ;;  %11661 = vmatprep.mubr.msk.f32.mxu1 %vm253_vm0, %v5113_v28  ;;  %v11490_v34 = vpop.f32.mrb[152].mxu0  ;;  %v5122_v36 = vld [vmem:[%s12209_s6 + $0x274] sm:$0xff]  ;;  %v5123_v44 = vld [vmem:[%s12209_s6 + $0x27c] sm:$0xff] }
 0x219   : > { %4000 = vst.msk [vmem:[#allocation2 + $0x128] sm:$0xff] %vm943_vm1, %v3922_v59  ;;  %v4924_v45 = vadd.f32 %v11487_v58, %v4846_v4  ;;  %v4845_v27 = vld [vmem:[#allocation2 + $0x100] sm:$0xff]  ;;  %v4594_v48 = vpop.f32.mrb[153].mxu0  ;;  %11781 = vmatmul.mubr.msk.f32.gmra.mrb[2].mxu0 %vm253_vm0, %v5113_v28 }
 0x21a   : > { %3999 = vst.msk [vmem:[#allocation2 + $0x120] sm:$0xff] %vm943_vm1, %v3921_v29  ;;  %v4923_v63 = vadd.f32 %v4845_v27, %v4584_v22  ;;  %v11371_v35 = vpop.f32.mrb[154].mxu1  ;;  %11783 = vmatprep.mubr.msk.f32.mxu0 %vm253_vm0, %v5114_v62  ;;  %v3853_v27 = vld [vmem:[#allocation2 + $0x170] sm:$0xff] }
 0x21b   : > { %5002 = vst.msk [vmem:[#allocation2 + $0x108] sm:$0xff] %vm943_vm1, %v4924_v45  ;;  %v3924_v38 = vadd.f32 %v11371_v35, %v3846_v5  ;;  %v3608_v49 = vpop.f32.mrb[155].mxu1  ;;  %11662 = vmatmul.mubr.msk.f32.gmra.mrb[4].mxu1 %vm253_vm0, %v5114_v62  ;;  %v3854_v62 = vld [vmem:[#allocation2 + $0x178] sm:$0xff]  ;;  %v5124_v35 = vld [vmem:[%s12209_s6 + $0x284] sm:$0x3f] }
 0x21c   : > { %5001 = vst.msk [vmem:[#allocation2 + $0x100] sm:$0xff] %vm943_vm1, %v4923_v63  ;;  %v3923_v2 = vadd.f32 %v3845_v12, %v3608_v49  ;;  %v4848_v51 = vld [vmem:[#allocation2 + $0x118] sm:$0xff]  ;;  %11664 = vmatprep.mubr.msk.f32.mxu1 %vm253_vm0, %v5115_v40  ;;  %v11493_v57 = vpop.f32.mrb[154].mxu0 }
 0x21d   : > { %4002 = vst.msk [vmem:[#allocation2 + $0x138] sm:$0xff] %vm943_vm1, %v3924_v38  ;;  %v4926_v42 = vadd.f32 %v11490_v34, %v4848_v51  ;;  %v4847_v33 = vld [vmem:[#allocation2 + $0x110] sm:$0xff]  ;;  %v4604_v3 = vpop.f32.mrb[155].mxu0  ;;  %11784 = vmatmul.mubr.msk.f32.gmra.mrb[4].mxu0 %vm253_vm0, %v5115_v40 }
 0x21e   : > { %4001 = vst.msk [vmem:[#allocation2 + $0x130] sm:$0xff] %vm943_vm1, %v3923_v2  ;;  %v4925_v0 = vadd.f32 %v4847_v33, %v4594_v48  ;;  %v11374_v1 = vpop.f32.mrb[156].mxu1  ;;  %11786 = vmatprep.mubr.msk.f32.mxu0 %vm253_vm0, %v5116_v52  ;;  %v6127_v48 = vld [vmem:[%s12209_s6 + $0x284] sm:$0xff]  ;;  %v7059_v2 = vld [vmem:[%s12209_s6 + $0x35] sm:$0xff] }
 0x21f   : > { %5004 = vst.msk [vmem:[#allocation2 + $0x118] sm:$0xff] %vm943_vm1, %v4926_v42  ;;  %v3926_v43 = vadd.f32 %v11374_v1, %v3848_v13  ;;  %v3618_v8 = vpop.f32.mrb[157].mxu1  ;;  %11665 = vmatmul.mubr.msk.f32.gmra.mrb[6].mxu1 %vm253_vm0, %v5116_v52  ;;  %v6128_v42 = vld [vmem:[%s12209_s6 + $0x28c] sm:$0xff] }
 0x220   : > { %5003 = vst.msk [vmem:[#allocation2 + $0x110] sm:$0xff] %vm943_vm1, %v4925_v0  ;;  %v3925_v19 = vadd.f32 %v3847_v46, %v3618_v8  ;;  %v4850_v9 = vld [vmem:[#allocation2 + $0x128] sm:$0xff]  ;;  %11667 = vmatprep.mubr.msk.f32.mxu1 %vm253_vm0, %v5117_v6  ;;  %v11496_v10 = vpop.f32.mrb[156].mxu0  ;;  %v6129_v0 = vld [vmem:[%s12209_s6 + $0x294] sm:$0xff] }
 0x221   : > { %4004 = vst.msk [vmem:[#allocation2 + $0x148] sm:$0xff] %vm943_vm1, %v3926_v43  ;;  %v4928_v39 = vadd.f32 %v11493_v57, %v4850_v9  ;;  %v4849_v47 = vld [vmem:[#allocation2 + $0x120] sm:$0xff]  ;;  %v4614_v14 = vpop.f32.mrb[157].mxu0  ;;  %11787 = vmatmul.mubr.msk.f32.gmra.mrb[6].mxu0 %vm253_vm0, %v5117_v6  ;;  %v3856_v57 = vld [vmem:[#allocation2 + $0x188] sm:$0xff] }
 0x222   : > { %4003 = vst.msk [vmem:[#allocation2 + $0x140] sm:$0xff] %vm943_vm1, %v3925_v19  ;;  %v4927_v15 = vadd.f32 %v4849_v47, %v4604_v3  ;;  %v11377_v23 = vpop.f32.mrb[158].mxu1  ;;  %11789 = vmatprep.mubr.msk.f32.mxu0 %vm253_vm0, %v5118_v7  ;;  %v3855_v6 = vld [vmem:[#allocation2 + $0x180] sm:$0xff]  ;;  %v3858_v47 = vld [vmem:[#allocation2 + $0x198] sm:$0xff] }
 0x223   : > { %5006 = vst.msk [vmem:[#allocation2 + $0x128] sm:$0xff] %vm943_vm1, %v4928_v39  ;;  %v3928_v11 = vadd.f32 %v11377_v23, %v3850_v55  ;;  %v3628_v30 = vpop.f32.mrb[159].mxu1  ;;  %11668 = vmatmul.mubr.msk.f32.gmra.mrb[8].mxu1 %vm253_vm0, %v5118_v7  ;;  %v7060_v43 = vld [vmem:[%s12209_s6 + $0x3d] sm:$0xff]  ;;  %v7061_v7 = vld [vmem:[%s12209_s6 + $0x45] sm:$0xff]  ;;  %v3857_v23 = vld [vmem:[#allocation2 + $0x190] sm:$0xff] }
 0x224   : > { %5005 = vst.msk [vmem:[#allocation2 + $0x120] sm:$0xff] %vm943_vm1, %v4927_v15  ;;  %v3927_v17 = vadd.f32 %v3849_v20, %v3628_v30  ;;  %v4852_v24 = vld [vmem:[#allocation2 + $0x138] sm:$0xff]  ;;  %11670 = vmatprep.mubr.msk.f32.mxu1 %vm253_vm0, %v5119_v50  ;;  %v11499_v53 = vpop.f32.mrb[158].mxu0  ;;  %v7062_v20 = vld [vmem:[%s12209_s6 + $0x4d] sm:$0xff] }
 0x225   : > { %4006 = vst.msk [vmem:[#allocation2 + $0x158] sm:$0xff] %vm943_vm1, %v3928_v11  ;;  %v4930_v26 = vadd.f32 %v11496_v10, %v4852_v24  ;;  %v4851_v56 = vld [vmem:[#allocation2 + $0x130] sm:$0xff]  ;;  %v4624_v18 = vpop.f32.mrb[159].mxu0  ;;  %11790 = vmatmul.mubr.msk.f32.gmra.mrb[8].mxu0 %vm253_vm0, %v5119_v50 }
 0x226   : > { %4005 = vst.msk [vmem:[#allocation2 + $0x150] sm:$0xff] %vm943_vm1, %v3927_v17  ;;  %v4929_v16 = vadd.f32 %v4851_v56, %v4614_v14  ;;  %v11380_v54 = vpop.f32.mrb[160].mxu1  ;;  %11792 = vmatprep.mubr.msk.f32.mxu0 %vm253_vm0, %v5120_v25  ;;  %v6130_v14 = vld [vmem:[%s12209_s6 + $0x29c] sm:$0x3f] }
 0x227   : > { %5008 = vst.msk [vmem:[#allocation2 + $0x138] sm:$0xff] %vm943_vm1, %v4930_v26  ;;  %v3930_v58 = vadd.f32 %v11380_v54, %v3852_v60  ;;  %v3638_v31 = vpop.f32.mrb[161].mxu1  ;;  %11671 = vmatmul.mubr.msk.f32.gmra.mrb[10].mxu1 %vm253_vm0, %v5120_v25  ;;  %v8065_v55 = vld [vmem:[%s12209_s6 + $0x36] sm:$0xff] }
 0x228   : > { %5007 = vst.msk [vmem:[#allocation2 + $0x130] sm:$0xff] %vm943_vm1, %v4929_v16  ;;  %v3929_v22 = vadd.f32 %v3851_v32, %v3638_v31  ;;  %v4854_v28 = vld [vmem:[#allocation2 + $0x148] sm:$0xff]  ;;  %11673 = vmatprep.mubr.msk.f32.mxu1 %vm253_vm0, %v5121_v21  ;;  %v11502_v37 = vpop.f32.mrb[160].mxu0  ;;  %v7063_v26 = vld [vmem:[%s12209_s6 + $0x55] sm:$0xff]  ;;  %v8066_v16 = vld [vmem:[%s12209_s6 + $0x3e] sm:$0xff] }
 0x229   : > { %4008 = vst.msk [vmem:[#allocation2 + $0x168] sm:$0xff] %vm943_vm1, %v3930_v58  ;;  %v4932_v41 = vadd.f32 %v11499_v53, %v4854_v28  ;;  %v4853_v59 = vld [vmem:[#allocation2 + $0x140] sm:$0xff]  ;;  %v4634_v61 = vpop.f32.mrb[161].mxu0  ;;  %11793 = vmatmul.mubr.msk.f32.gmra.mrb[10].mxu0 %vm253_vm0, %v5121_v21  ;;  %v3860_v21 = vld [vmem:[#allocation2 + $0x1a8] sm:$0xff] }
 0x22a   : > { %4007 = vst.msk [vmem:[#allocation2 + $0x160] sm:$0xff] %vm943_vm1, %v3929_v22  ;;  %v4931_v29 = vadd.f32 %v4853_v59, %v4624_v18  ;;  %v11383_v4 = vpop.f32.mrb[162].mxu1  ;;  %11795 = vmatprep.mubr.msk.f32.mxu0 %vm253_vm0, %v5122_v36  ;;  %v3859_v58 = vld [vmem:[#allocation2 + $0x1a0] sm:$0xff] }
 0x22b   : > { %5010 = vst.msk [vmem:[#allocation2 + $0x148] sm:$0xff] %vm943_vm1, %v4932_v41  ;;  %v3932_v34 = vadd.f32 %v11383_v4, %v3854_v62  ;;  %v3648_v45 = vpop.f32.mrb[163].mxu1  ;;  %11674 = vmatmul.mubr.msk.f32.gmra.mrb[12].mxu1 %vm253_vm0, %v5122_v36  ;;  %v8067_v31 = vld [vmem:[%s12209_s6 + $0x46] sm:$0xff]  ;;  %v7064_v28 = vld [vmem:[%s12209_s6 + $0x5d] sm:$0xff]  ;;  %v8068_v62 = vld [vmem:[%s12209_s6 + $0x4e] sm:$0xff] }
 0x22c   : > { %5009 = vst.msk [vmem:[#allocation2 + $0x140] sm:$0xff] %vm943_vm1, %v4931_v29  ;;  %v3931_v40 = vadd.f32 %v3853_v27, %v3648_v45  ;;  %v4856_v63 = vld [vmem:[#allocation2 + $0x158] sm:$0xff]  ;;  %11676 = vmatprep.mubr.msk.f32.mxu1 %vm253_vm0, %v5123_v44  ;;  %v11505_v5 = vpop.f32.mrb[162].mxu0  ;;  %v3861_v27 = vld [vmem:[#allocation2 + $0x1b0] sm:$0xff] }
 0x22d   : > { %4010 = vst.msk [vmem:[#allocation2 + $0x178] sm:$0xff] %vm943_vm1, %v3932_v34  ;;  %v4934_v38 = vadd.f32 %v11502_v37, %v4856_v63  ;;  %v4855_v49 = vld [vmem:[#allocation2 + $0x150] sm:$0xff]  ;;  %v4644_v12 = vpop.f32.mrb[163].mxu0  ;;  %11796 = vmatmul.mubr.msk.f32.gmra.mrb[12].mxu0 %vm253_vm0, %v5123_v44  ;;  %v3862_v4 = vld [vmem:[#allocation2 + $0x1b8] sm:$0xff] }
 0x22e   : > { %4009 = vst.msk [vmem:[#allocation2 + $0x170] sm:$0xff] %vm943_vm1, %v3931_v40  ;;  %v4933_v51 = vadd.f32 %v4855_v49, %v4634_v61  ;;  %v11386_v52 = vpop.f32.mrb[164].mxu1  ;;  %11798 = vmatprep.mubr.msk.f32.mxu0 %vm253_vm0, %v6127_v48  ;;  %v7065_v61 = vld [vmem:[%s12209_s6 + $0x65] sm:$0xff]  ;;  %v8069_v48 = vld [vmem:[%s12209_s6 + $0x56] sm:$0xff] }
 0x22f   : > { %5012 = vst.msk [vmem:[#allocation2 + $0x158] sm:$0xff] %vm943_vm1, %v4934_v38  ;;  %v3934_v33 = vadd.f32 %v11386_v52, %v3856_v57  ;;  %v3658_v3 = vpop.f32.mrb[165].mxu1  ;;  %11677 = vmatmul.mubr.msk.f32.gmra.mrb[14].mxu1 %vm253_vm0, %v5124_v35  ;;  %v7066_v35 = vld [vmem:[%s12209_s6 + $0x6d] sm:$0xff] }
 0x230   : > { %5011 = vst.msk [vmem:[#allocation2 + $0x150] sm:$0xff] %vm943_vm1, %v4933_v51  ;;  %v3933_v1 = vadd.f32 %v3855_v6, %v3658_v3  ;;  %v4858_v13 = vld [vmem:[#allocation2 + $0x168] sm:$0xff]  ;;  %11812 = vmatprep.mubr.msk.f32.mxu1 %vm253_vm0, %v7059_v2  ;;  %v11508_v8 = vpop.f32.mrb[164].mxu0  ;;  %v7067_v2 = vld [vmem:[%s12209_s6 + $0x75] sm:$0xff]  ;;  %v3863_v6 = vld [vmem:[#allocation2 + $0x1c0] sm:$0xff] }
 0x231   : > { %4012 = vst.msk [vmem:[#allocation2 + $0x188] sm:$0xff] %vm943_vm1, %v3934_v33  ;;  %v4936_v46 = vadd.f32 %v11505_v5, %v4858_v13  ;;  %v4857_v19 = vld [vmem:[#allocation2 + $0x160] sm:$0xff]  ;;  %v4654_v9 = vpop.f32.mrb[165].mxu0  ;;  %11799 = vmatmul.mubr.msk.f32.gmra.mrb[14].mxu0 %vm253_vm0, %v6128_v42  ;;  %v3864_v57 = vld [vmem:[#allocation2 + $0x1c8] sm:$0xff] }
 0x232   : > { %4011 = vst.msk [vmem:[#allocation2 + $0x180] sm:$0xff] %vm943_vm1, %v3933_v1  ;;  %v4935_v10 = vadd.f32 %v4857_v19, %v4644_v12  ;;  %v11389_v39 = vpop.f32.mrb[166].mxu1  ;;  %11801 = vmatprep.mubr.msk.f32.mxu0 %vm253_vm0, %v6129_v0  ;;  %v8070_v42 = vld [vmem:[%s12209_s6 + $0x5e] sm:$0xff]  ;;  %v8071_v0 = vld [vmem:[%s12209_s6 + $0x66] sm:$0xff] }
 0x233   : > { %5014 = vst.msk [vmem:[#allocation2 + $0x168] sm:$0xff] %vm943_vm1, %v4936_v46  ;;  %v3936_v50 = vadd.f32 %v11389_v39, %v3858_v47  ;;  %v3668_v15 = vpop.f32.mrb[167].mxu1  ;;  %11813 = vmatmul.mubr.msk.f32.vlgmr.msra.gmra.mrb[16].mxu1 %vm253_vm0, %v7060_v43  ;;  %v7068_v43 = vld [vmem:[%s12209_s6 + $0x7d] sm:$0xff] }
 0x234   : > { %5013 = vst.msk [vmem:[#allocation2 + $0x160] sm:$0xff] %vm943_vm1, %v4935_v10  ;;  %v3935_v11 = vadd.f32 %v3857_v23, %v3668_v15  ;;  %v4860_v30 = vld [vmem:[#allocation2 + $0x178] sm:$0xff]  ;;  %11815 = vmatprep.mubr.msk.f32.mxu1 %vm253_vm0, %v7061_v7  ;;  %v11511_v17 = vpop.f32.mrb[166].mxu0  ;;  %v7069_v7 = vld [vmem:[%s12209_s6 + $0x85] sm:$0xff]  ;;  %v3865_v23 = vld [vmem:[#allocation2 + $0x1d0] sm:$0xff] }
 0x235   : > { %4014 = vst.msk [vmem:[#allocation2 + $0x198] sm:$0xff] %vm943_vm1, %v3936_v50  ;;  %v4938_v24 = vadd.f32 %v11508_v8, %v4860_v30  ;;  %v4859_v25 = vld [vmem:[#allocation2 + $0x170] sm:$0xff]  ;;  %v4664_v53 = vpop.f32.mrb[167].mxu0  ;;  %11802 = vmatmul.mubr.msk.f32.gmra.mrb[16].mxu0 %vm253_vm0, %v6130_v14  ;;  %v3866_v47 = vld [vmem:[#allocation2 + $0x1d8] sm:$0xff] }
 0x236   : > { %4013 = vst.msk [vmem:[#allocation2 + $0x190] sm:$0xff] %vm943_vm1, %v3935_v11  ;;  %v4937_v56 = vadd.f32 %v4859_v25, %v4654_v9  ;;  %v11392_v18 = vpop.f32.mrb[168].mxu1  ;;  %11937 = vmatprep.mubr.msk.f32.mxu0 %vm253_vm0, %v8065_v55  ;;  %v8072_v14 = vld [vmem:[%s12209_s6 + $0x6e] sm:$0xff]  ;;  %v8073_v55 = vld [vmem:[%s12209_s6 + $0x76] sm:$0xff] }
 0x237   : > { %5016 = vst.msk [vmem:[#allocation2 + $0x178] sm:$0xff] %vm943_vm1, %v4938_v24  ;;  %v3938_v54 = vadd.f32 %v11392_v18, %v3860_v21  ;;  %v3678_v60 = vpop.f32.mrb[169].mxu1  ;;  %11816 = vmatmul.mubr.msk.f32.gmra.mrb[18].mxu1 %vm253_vm0, %v7062_v20  ;;  %v7070_v20 = vld [vmem:[%s12209_s6 + $0x8d] sm:$0xff] }
 0x238   : > { %5015 = vst.msk [vmem:[#allocation2 + $0x170] sm:$0xff] %vm943_vm1, %v4937_v56  ;;  %v3937_v32 = vadd.f32 %v3859_v58, %v3678_v60  ;;  %v4862_v22 = vld [vmem:[#allocation2 + $0x188] sm:$0xff]  ;;  %11818 = vmatprep.mubr.msk.f32.mxu1 %vm253_vm0, %v7063_v26  ;;  %v11514_v36 = vpop.f32.mrb[168].mxu0  ;;  %v7071_v26 = vld [vmem:[%s12209_s6 + $0x95] sm:$0xff]  ;;  %v3867_v58 = vld [vmem:[#allocation2 + $0x1e0] sm:$0xff] }
 0x239   : > { %4016 = vst.msk [vmem:[#allocation2 + $0x1a8] sm:$0xff] %vm943_vm1, %v3938_v54  ;;  %v4940_v37 = vadd.f32 %v11511_v17, %v4862_v22  ;;  %v4861_v41 = vld [vmem:[#allocation2 + $0x180] sm:$0xff]  ;;  %v4674_v59 = vpop.f32.mrb[169].mxu0  ;;  %11938 = vmatmul.mubr.msk.f32.vlgmr.msra.gmra.mrb[18].mxu0 %vm253_vm0, %v8066_v16  ;;  %v3868_v21 = vld [vmem:[#allocation2 + $0x1e8] sm:$0xff] }
 0x23a   : > { %4015 = vst.msk [vmem:[#allocation2 + $0x1a0] sm:$0xff] %vm943_vm1, %v3937_v32  ;;  %v4939_v44 = vadd.f32 %v4861_v41, %v4664_v53  ;;  %v11395_v29 = vpop.f32.mrb[170].mxu1  ;;  %11940 = vmatprep.mubr.msk.f32.mxu0 %vm253_vm0, %v8067_v31  ;;  %v8074_v16 = vld [vmem:[%s12209_s6 + $0x7e] sm:$0xff]  ;;  %v8075_v31 = vld [vmem:[%s12209_s6 + $0x86] sm:$0xff] }
 0x23b   : > { %5018 = vst.msk [vmem:[#allocation2 + $0x188] sm:$0xff] %vm943_vm1, %v4940_v37  ;;  %v3940_v34 = vadd.f32 %v11395_v29, %v3862_v4  ;;  %v3688_v45 = vpop.f32.mrb[171].mxu1  ;;  %11819 = vmatmul.mubr.msk.f32.gmra.mrb[20].mxu1 %vm253_vm0, %v7064_v28  ;;  %v7072_v28 = vld [vmem:[%s12209_s6 + $0x9d] sm:$0xff] }
 0x23c   : > { %5017 = vst.msk [vmem:[#allocation2 + $0x180] sm:$0xff] %vm943_vm1, %v4939_v44  ;;  %v3939_v40 = vadd.f32 %v3861_v27, %v3688_v45  ;;  %v4864_v63 = vld [vmem:[#allocation2 + $0x198] sm:$0xff]  ;;  %11821 = vmatprep.mubr.msk.f32.mxu1 %vm253_vm0, %v7065_v61  ;;  %v11517_v5 = vpop.f32.mrb[170].mxu0  ;;  %v7073_v61 = vld [vmem:[%s12209_s6 + $0xa5] sm:$0xff]  ;;  %v3869_v27 = vld [vmem:[#allocation2 + $0x1f0] sm:$0xff] }
 0x23d   : > { %4018 = vst.msk [vmem:[#allocation2 + $0x1b8] sm:$0xff] %vm943_vm1, %v3940_v34  ;;  %v4942_v38 = vadd.f32 %v11514_v36, %v4864_v63  ;;  %v4863_v49 = vld [vmem:[#allocation2 + $0x190] sm:$0xff]  ;;  %v4684_v12 = vpop.f32.mrb[171].mxu0  ;;  %11941 = vmatmul.mubr.msk.f32.gmra.mrb[20].mxu0 %vm253_vm0, %v8068_v62  ;;  %v3870_v4 = vld [vmem:[#allocation2 + $0x1f8] sm:$0xff] }
 0x23e   : > { %4017 = vst.msk [vmem:[#allocation2 + $0x1b0] sm:$0xff] %vm943_vm1, %v3939_v40  ;;  %v4941_v51 = vadd.f32 %v4863_v49, %v4674_v59  ;;  %v11398_v52 = vpop.f32.mrb[172].mxu1  ;;  %11943 = vmatprep.mubr.msk.f32.mxu0 %vm253_vm0, %v8069_v48  ;;  %v8076_v62 = vld [vmem:[%s12209_s6 + $0x8e] sm:$0xff]  ;;  %v8077_v48 = vld [vmem:[%s12209_s6 + $0x96] sm:$0xff] }
 0x23f   : > { %5020 = vst.msk [vmem:[#allocation2 + $0x198] sm:$0xff] %vm943_vm1, %v4942_v38  ;;  %v3942_v33 = vadd.f32 %v11398_v52, %v3864_v57  ;;  %v3698_v3 = vpop.f32.mrb[173].mxu1  ;;  %11822 = vmatmul.mubr.msk.f32.gmra.mrb[22].mxu1 %vm253_vm0, %v7066_v35  ;;  %v7074_v35 = vld [vmem:[%s12209_s6 + $0xad] sm:$0xff] }
 0x240   : > { %5019 = vst.msk [vmem:[#allocation2 + $0x190] sm:$0xff] %vm943_vm1, %v4941_v51  ;;  %v3941_v1 = vadd.f32 %v3863_v6, %v3698_v3  ;;  %v4866_v13 = vld [vmem:[#allocation2 + $0x1a8] sm:$0xff]  ;;  %11824 = vmatprep.mubr.msk.f32.mxu1 %vm253_vm0, %v7067_v2  ;;  %v11520_v8 = vpop.f32.mrb[172].mxu0  ;;  %v7075_v2 = vld [vmem:[%s12209_s6 + $0xb5] sm:$0xff]  ;;  %v3871_v6 = vld [vmem:[#allocation2 + $0x200] sm:$0xff] }
 0x241   : > { %4020 = vst.msk [vmem:[#allocation2 + $0x1c8] sm:$0xff] %vm943_vm1, %v3942_v33  ;;  %v4944_v46 = vadd.f32 %v11517_v5, %v4866_v13  ;;  %v4865_v19 = vld [vmem:[#allocation2 + $0x1a0] sm:$0xff]  ;;  %v4694_v9 = vpop.f32.mrb[173].mxu0  ;;  %11944 = vmatmul.mubr.msk.f32.gmra.mrb[22].mxu0 %vm253_vm0, %v8070_v42  ;;  %v3872_v57 = vld [vmem:[#allocation2 + $0x208] sm:$0xff] }
 0x242   : > { %4019 = vst.msk [vmem:[#allocation2 + $0x1c0] sm:$0xff] %vm943_vm1, %v3941_v1  ;;  %v4943_v10 = vadd.f32 %v4865_v19, %v4684_v12  ;;  %v11401_v39 = vpop.f32.mrb[174].mxu1  ;;  %11946 = vmatprep.mubr.msk.f32.mxu0 %vm253_vm0, %v8071_v0  ;;  %v8078_v42 = vld [vmem:[%s12209_s6 + $0x9e] sm:$0xff]  ;;  %v8079_v0 = vld [vmem:[%s12209_s6 + $0xa6] sm:$0xff] }
 0x243   : > { %5022 = vst.msk [vmem:[#allocation2 + $0x1a8] sm:$0xff] %vm943_vm1, %v4944_v46  ;;  %v3944_v50 = vadd.f32 %v11401_v39, %v3866_v47  ;;  %v3708_v15 = vpop.f32.mrb[175].mxu1  ;;  %11825 = vmatmul.mubr.msk.f32.gmra.mrb[24].mxu1 %vm253_vm0, %v7068_v43  ;;  %v7076_v43 = vld [vmem:[%s12209_s6 + $0xbd] sm:$0xff] }
 0x244   : > { %5021 = vst.msk [vmem:[#allocation2 + $0x1a0] sm:$0xff] %vm943_vm1, %v4943_v10  ;;  %v3943_v11 = vadd.f32 %v3865_v23, %v3708_v15  ;;  %v4868_v30 = vld [vmem:[#allocation2 + $0x1b8] sm:$0xff]  ;;  %11827 = vmatprep.mubr.msk.f32.mxu1 %vm253_vm0, %v7069_v7  ;;  %v11523_v17 = vpop.f32.mrb[174].mxu0  ;;  %v7077_v7 = vld [vmem:[%s12209_s6 + $0xc5] sm:$0xff]  ;;  %v3873_v23 = vld [vmem:[#allocation2 + $0x210] sm:$0xff] }
 0x245   : > { %4022 = vst.msk [vmem:[#allocation2 + $0x1d8] sm:$0xff] %vm943_vm1, %v3944_v50  ;;  %v4946_v24 = vadd.f32 %v11520_v8, %v4868_v30  ;;  %v4867_v25 = vld [vmem:[#allocation2 + $0x1b0] sm:$0xff]  ;;  %v4704_v53 = vpop.f32.mrb[175].mxu0  ;;  %11947 = vmatmul.mubr.msk.f32.gmra.mrb[24].mxu0 %vm253_vm0, %v8072_v14  ;;  %v3874_v47 = vld [vmem:[#allocation2 + $0x218] sm:$0xff] }
 0x246   : > { %4021 = vst.msk [vmem:[#allocation2 + $0x1d0] sm:$0xff] %vm943_vm1, %v3943_v11  ;;  %v4945_v56 = vadd.f32 %v4867_v25, %v4694_v9  ;;  %v11404_v18 = vpop.f32.mrb[176].mxu1  ;;  %11949 = vmatprep.mubr.msk.f32.mxu0 %vm253_vm0, %v8073_v55  ;;  %v8080_v14 = vld [vmem:[%s12209_s6 + $0xae] sm:$0xff]  ;;  %v8081_v55 = vld [vmem:[%s12209_s6 + $0xb6] sm:$0xff] }
 0x247   : > { %5024 = vst.msk [vmem:[#allocation2 + $0x1b8] sm:$0xff] %vm943_vm1, %v4946_v24  ;;  %v3946_v54 = vadd.f32 %v11404_v18, %v3868_v21  ;;  %v3718_v60 = vpop.f32.mrb[177].mxu1  ;;  %11828 = vmatmul.mubr.msk.f32.gmra.mrb[26].mxu1 %vm253_vm0, %v7070_v20  ;;  %v7078_v20 = vld [vmem:[%s12209_s6 + $0xcd] sm:$0xff] }
 0x248   : > { %5023 = vst.msk [vmem:[#allocation2 + $0x1b0] sm:$0xff] %vm943_vm1, %v4945_v56  ;;  %v3945_v32 = vadd.f32 %v3867_v58, %v3718_v60  ;;  %v4870_v22 = vld [vmem:[#allocation2 + $0x1c8] sm:$0xff]  ;;  %11830 = vmatprep.mubr.msk.f32.mxu1 %vm253_vm0, %v7071_v26  ;;  %v11526_v36 = vpop.f32.mrb[176].mxu0  ;;  %v7079_v26 = vld [vmem:[%s12209_s6 + $0xd5] sm:$0xff]  ;;  %v3875_v58 = vld [vmem:[#allocation2 + $0x220] sm:$0xff] }
 0x249   : > { %4024 = vst.msk [vmem:[#allocation2 + $0x1e8] sm:$0xff] %vm943_vm1, %v3946_v54  ;;  %v4948_v37 = vadd.f32 %v11523_v17, %v4870_v22  ;;  %v4869_v41 = vld [vmem:[#allocation2 + $0x1c0] sm:$0xff]  ;;  %v4714_v59 = vpop.f32.mrb[177].mxu0  ;;  %11950 = vmatmul.mubr.msk.f32.gmra.mrb[26].mxu0 %vm253_vm0, %v8074_v16  ;;  %v3876_v21 = vld [vmem:[#allocation2 + $0x228] sm:$0xff] }
 0x24a   : > { %4023 = vst.msk [vmem:[#allocation2 + $0x1e0] sm:$0xff] %vm943_vm1, %v3945_v32  ;;  %v4947_v44 = vadd.f32 %v4869_v41, %v4704_v53  ;;  %v11407_v29 = vpop.f32.mrb[178].mxu1  ;;  %11952 = vmatprep.mubr.msk.f32.mxu0 %vm253_vm0, %v8075_v31  ;;  %v8082_v16 = vld [vmem:[%s12209_s6 + $0xbe] sm:$0xff]  ;;  %v8083_v31 = vld [vmem:[%s12209_s6 + $0xc6] sm:$0xff] }
 0x24b   : > { %5026 = vst.msk [vmem:[#allocation2 + $0x1c8] sm:$0xff] %vm943_vm1, %v4948_v37  ;;  %v3948_v34 = vadd.f32 %v11407_v29, %v3870_v4  ;;  %v3728_v45 = vpop.f32.mrb[179].mxu1  ;;  %11831 = vmatmul.mubr.msk.f32.gmra.mrb[28].mxu1 %vm253_vm0, %v7072_v28  ;;  %v7080_v28 = vld [vmem:[%s12209_s6 + $0xdd] sm:$0xff] }
 0x24c   : > { %5025 = vst.msk [vmem:[#allocation2 + $0x1c0] sm:$0xff] %vm943_vm1, %v4947_v44  ;;  %v3947_v40 = vadd.f32 %v3869_v27, %v3728_v45  ;;  %v4872_v63 = vld [vmem:[#allocation2 + $0x1d8] sm:$0xff]  ;;  %11833 = vmatprep.mubr.msk.f32.mxu1 %vm253_vm0, %v7073_v61  ;;  %v11529_v5 = vpop.f32.mrb[178].mxu0  ;;  %v7081_v61 = vld [vmem:[%s12209_s6 + $0xe5] sm:$0xff]  ;;  %v3877_v27 = vld [vmem:[#allocation2 + $0x230] sm:$0xff] }
 0x24d   : > { %4026 = vst.msk [vmem:[#allocation2 + $0x1f8] sm:$0xff] %vm943_vm1, %v3948_v34  ;;  %v4950_v38 = vadd.f32 %v11526_v36, %v4872_v63  ;;  %v4871_v49 = vld [vmem:[#allocation2 + $0x1d0] sm:$0xff]  ;;  %v4724_v12 = vpop.f32.mrb[179].mxu0  ;;  %11953 = vmatmul.mubr.msk.f32.gmra.mrb[28].mxu0 %vm253_vm0, %v8076_v62  ;;  %v3878_v4 = vld [vmem:[#allocation2 + $0x238] sm:$0xff] }
 0x24e   : > { %4025 = vst.msk [vmem:[#allocation2 + $0x1f0] sm:$0xff] %vm943_vm1, %v3947_v40  ;;  %v4949_v51 = vadd.f32 %v4871_v49, %v4714_v59  ;;  %v11410_v52 = vpop.f32.mrb[180].mxu1  ;;  %11955 = vmatprep.mubr.msk.f32.mxu0 %vm253_vm0, %v8077_v48  ;;  %v8084_v62 = vld [vmem:[%s12209_s6 + $0xce] sm:$0xff]  ;;  %v8085_v48 = vld [vmem:[%s12209_s6 + $0xd6] sm:$0xff] }
 0x24f   : > { %5028 = vst.msk [vmem:[#allocation2 + $0x1d8] sm:$0xff] %vm943_vm1, %v4950_v38  ;;  %v3950_v33 = vadd.f32 %v11410_v52, %v3872_v57  ;;  %v3738_v3 = vpop.f32.mrb[181].mxu1  ;;  %11834 = vmatmul.mubr.msk.f32.gmra.mrb[30].mxu1 %vm253_vm0, %v7074_v35  ;;  %v7082_v35 = vld [vmem:[%s12209_s6 + $0xed] sm:$0xff] }
 0x250   : > { %5027 = vst.msk [vmem:[#allocation2 + $0x1d0] sm:$0xff] %vm943_vm1, %v4949_v51  ;;  %v3949_v1 = vadd.f32 %v3871_v6, %v3738_v3  ;;  %v4874_v13 = vld [vmem:[#allocation2 + $0x1e8] sm:$0xff]  ;;  %11836 = vmatprep.mubr.msk.f32.mxu1 %vm253_vm0, %v7075_v2  ;;  %v11532_v8 = vpop.f32.mrb[180].mxu0  ;;  %v7083_v2 = vld [vmem:[%s12209_s6 + $0xf5] sm:$0xff]  ;;  %v3879_v6 = vld [vmem:[#allocation2 + $0x240] sm:$0xff] }
 0x251   : > { %4028 = vst.msk [vmem:[#allocation2 + $0x208] sm:$0xff] %vm943_vm1, %v3950_v33  ;;  %v4952_v46 = vadd.f32 %v11529_v5, %v4874_v13  ;;  %v4873_v19 = vld [vmem:[#allocation2 + $0x1e0] sm:$0xff]  ;;  %v4734_v9 = vpop.f32.mrb[181].mxu0  ;;  %11956 = vmatmul.mubr.msk.f32.gmra.mrb[30].mxu0 %vm253_vm0, %v8078_v42  ;;  %v3880_v57 = vld [vmem:[#allocation2 + $0x248] sm:$0xff] }
 0x252   : > { %4027 = vst.msk [vmem:[#allocation2 + $0x200] sm:$0xff] %vm943_vm1, %v3949_v1  ;;  %v4951_v10 = vadd.f32 %v4873_v19, %v4724_v12  ;;  %v11413_v39 = vpop.f32.mrb[182].mxu1  ;;  %11958 = vmatprep.mubr.msk.f32.mxu0 %vm253_vm0, %v8079_v0  ;;  %v8086_v42 = vld [vmem:[%s12209_s6 + $0xde] sm:$0xff]  ;;  %v8087_v0 = vld [vmem:[%s12209_s6 + $0xe6] sm:$0xff] }
 0x253   : > { %5030 = vst.msk [vmem:[#allocation2 + $0x1e8] sm:$0xff] %vm943_vm1, %v4952_v46  ;;  %v3952_v50 = vadd.f32 %v11413_v39, %v3874_v47  ;;  %v3748_v15 = vpop.f32.mrb[183].mxu1  ;;  %11837 = vmatmul.mubr.msk.f32.gmra.mrb[32].mxu1 %vm253_vm0, %v7076_v43  ;;  %v7084_v43 = vld [vmem:[%s12209_s6 + $0xfd] sm:$0xff] }
 0x254   : > { %5029 = vst.msk [vmem:[#allocation2 + $0x1e0] sm:$0xff] %vm943_vm1, %v4951_v10  ;;  %v3951_v11 = vadd.f32 %v3873_v23, %v3748_v15  ;;  %v4876_v30 = vld [vmem:[#allocation2 + $0x1f8] sm:$0xff]  ;;  %11839 = vmatprep.mubr.msk.f32.mxu1 %vm253_vm0, %v7077_v7  ;;  %v11535_v17 = vpop.f32.mrb[182].mxu0  ;;  %v7085_v7 = vld [vmem:[%s12209_s6 + $0x105] sm:$0xff]  ;;  %v3881_v23 = vld [vmem:[#allocation2 + $0x250] sm:$0xff] }
 0x255   : > { %4030 = vst.msk [vmem:[#allocation2 + $0x218] sm:$0xff] %vm943_vm1, %v3952_v50  ;;  %v4954_v24 = vadd.f32 %v11532_v8, %v4876_v30  ;;  %v4875_v25 = vld [vmem:[#allocation2 + $0x1f0] sm:$0xff]  ;;  %v4744_v53 = vpop.f32.mrb[183].mxu0  ;;  %11959 = vmatmul.mubr.msk.f32.gmra.mrb[32].mxu0 %vm253_vm0, %v8080_v14  ;;  %v3882_v47 = vld [vmem:[#allocation2 + $0x258] sm:$0xff] }
 0x256   : > { %4029 = vst.msk [vmem:[#allocation2 + $0x210] sm:$0xff] %vm943_vm1, %v3951_v11  ;;  %v4953_v56 = vadd.f32 %v4875_v25, %v4734_v9  ;;  %v11416_v18 = vpop.f32.mrb[184].mxu1  ;;  %11961 = vmatprep.mubr.msk.f32.mxu0 %vm253_vm0, %v8081_v55  ;;  %v8088_v14 = vld [vmem:[%s12209_s6 + $0xee] sm:$0xff]  ;;  %v8089_v55 = vld [vmem:[%s12209_s6 + $0xf6] sm:$0xff] }
 0x257   : > { %5032 = vst.msk [vmem:[#allocation2 + $0x1f8] sm:$0xff] %vm943_vm1, %v4954_v24  ;;  %v3954_v54 = vadd.f32 %v11416_v18, %v3876_v21  ;;  %v3758_v60 = vpop.f32.mrb[185].mxu1  ;;  %11840 = vmatmul.mubr.msk.f32.gmra.mrb[34].mxu1 %vm253_vm0, %v7078_v20  ;;  %v7086_v20 = vld [vmem:[%s12209_s6 + $0x10d] sm:$0xff] }
 0x258   : > { %5031 = vst.msk [vmem:[#allocation2 + $0x1f0] sm:$0xff] %vm943_vm1, %v4953_v56  ;;  %v3953_v32 = vadd.f32 %v3875_v58, %v3758_v60  ;;  %v4878_v22 = vld [vmem:[#allocation2 + $0x208] sm:$0xff]  ;;  %11842 = vmatprep.mubr.msk.f32.mxu1 %vm253_vm0, %v7079_v26  ;;  %v11538_v36 = vpop.f32.mrb[184].mxu0  ;;  %v7087_v26 = vld [vmem:[%s12209_s6 + $0x115] sm:$0xff]  ;;  %v3883_v58 = vld [vmem:[#allocation2 + $0x260] sm:$0xff] }
 0x259   : > { %4032 = vst.msk [vmem:[#allocation2 + $0x228] sm:$0xff] %vm943_vm1, %v3954_v54  ;;  %v4956_v37 = vadd.f32 %v11535_v17, %v4878_v22  ;;  %v4877_v41 = vld [vmem:[#allocation2 + $0x200] sm:$0xff]  ;;  %v4754_v59 = vpop.f32.mrb[185].mxu0  ;;  %11962 = vmatmul.mubr.msk.f32.gmra.mrb[34].mxu0 %vm253_vm0, %v8082_v16  ;;  %v3884_v21 = vld [vmem:[#allocation2 + $0x268] sm:$0x3f] }
 0x25a   : > { %4031 = vst.msk [vmem:[#allocation2 + $0x220] sm:$0xff] %vm943_vm1, %v3953_v32  ;;  %v4955_v44 = vadd.f32 %v4877_v41, %v4744_v53  ;;  %v11419_v29 = vpop.f32.mrb[186].mxu1  ;;  %11964 = vmatprep.mubr.msk.f32.mxu0 %vm253_vm0, %v8083_v31  ;;  %v8090_v16 = vld [vmem:[%s12209_s6 + $0xfe] sm:$0xff]  ;;  %v8091_v31 = vld [vmem:[%s12209_s6 + $0x106] sm:$0xff] }
 0x25b   : > { %5034 = vst.msk [vmem:[#allocation2 + $0x208] sm:$0xff] %vm943_vm1, %v4956_v37  ;;  %v3956_v34 = vadd.f32 %v11419_v29, %v3878_v4  ;;  %v3768_v45 = vpop.f32.mrb[187].mxu1  ;;  %11843 = vmatmul.mubr.msk.f32.gmra.mrb[36].mxu1 %vm253_vm0, %v7080_v28  ;;  %v7088_v28 = vld [vmem:[%s12209_s6 + $0x11d] sm:$0xff]  ;;  %v5820_v4 = vld [vmem:[#allocation2 + $0x8] sm:$0xff] }
 0x25c   : > { %5033 = vst.msk [vmem:[#allocation2 + $0x200] sm:$0xff] %vm943_vm1, %v4955_v44  ;;  %v3955_v40 = vadd.f32 %v3877_v27, %v3768_v45  ;;  %v4880_v63 = vld [vmem:[#allocation2 + $0x218] sm:$0xff]  ;;  %11845 = vmatprep.mubr.msk.f32.mxu1 %vm253_vm0, %v7081_v61  ;;  %v11541_v5 = vpop.f32.mrb[186].mxu0  ;;  %v7089_v61 = vld [vmem:[%s12209_s6 + $0x125] sm:$0xff] }
 0x25d   : > { %4034 = vst.msk [vmem:[#allocation2 + $0x238] sm:$0xff] %vm943_vm1, %v3956_v34  ;;  %v4958_v38 = vadd.f32 %v11538_v36, %v4880_v63  ;;  %v4879_v49 = vld [vmem:[#allocation2 + $0x210] sm:$0xff]  ;;  %v4764_v12 = vpop.f32.mrb[187].mxu0  ;;  %11965 = vmatmul.mubr.msk.f32.gmra.mrb[36].mxu0 %vm253_vm0, %v8084_v62  ;;  %v5819_v27 = vld [vmem:[#allocation2] sm:$0xff] }
 0x25e   : > { %4033 = vst.msk [vmem:[#allocation2 + $0x230] sm:$0xff] %vm943_vm1, %v3955_v40  ;;  %v4957_v51 = vadd.f32 %v4879_v49, %v4754_v59  ;;  %v11422_v52 = vpop.f32.mrb[188].mxu1  ;;  %11967 = vmatprep.mubr.msk.f32.mxu0 %vm253_vm0, %v8085_v48  ;;  %v8092_v62 = vld [vmem:[%s12209_s6 + $0x10e] sm:$0xff]  ;;  %v8093_v48 = vld [vmem:[%s12209_s6 + $0x116] sm:$0xff] }
 0x25f   : > { %5036 = vst.msk [vmem:[#allocation2 + $0x218] sm:$0xff] %vm943_vm1, %v4958_v38  ;;  %v3958_v33 = vadd.f32 %v11422_v52, %v3880_v57  ;;  %v3778_v3 = vpop.f32.mrb[189].mxu1  ;;  %11846 = vmatmul.mubr.msk.f32.gmra.mrb[38].mxu1 %vm253_vm0, %v7082_v35  ;;  %v7090_v35 = vld [vmem:[%s12209_s6 + $0x12d] sm:$0xff]  ;;  %v5822_v57 = vld [vmem:[#allocation2 + $0x18] sm:$0xff] }
 0x260   : > { %5035 = vst.msk [vmem:[#allocation2 + $0x210] sm:$0xff] %vm943_vm1, %v4957_v51  ;;  %v3957_v1 = vadd.f32 %v3879_v6, %v3778_v3  ;;  %v4882_v13 = vld [vmem:[#allocation2 + $0x228] sm:$0xff]  ;;  %11848 = vmatprep.mubr.msk.f32.mxu1 %vm253_vm0, %v7083_v2  ;;  %v11544_v8 = vpop.f32.mrb[188].mxu0  ;;  %v7091_v2 = vld [vmem:[%s12209_s6 + $0x135] sm:$0xff] }
 0x261   : > { %4036 = vst.msk [vmem:[#allocation2 + $0x248] sm:$0xff] %vm943_vm1, %v3958_v33  ;;  %v4960_v46 = vadd.f32 %v11541_v5, %v4882_v13  ;;  %v4881_v19 = vld [vmem:[#allocation2 + $0x220] sm:$0xff]  ;;  %v4774_v9 = vpop.f32.mrb[189].mxu0  ;;  %11968 = vmatmul.mubr.msk.f32.gmra.mrb[38].mxu0 %vm253_vm0, %v8086_v42  ;;  %v5821_v6 = vld [vmem:[#allocation2 + $0x10] sm:$0xff] }
 0x262   : > { %4035 = vst.msk [vmem:[#allocation2 + $0x240] sm:$0xff] %vm943_vm1, %v3957_v1  ;;  %v4959_v10 = vadd.f32 %v4881_v19, %v4764_v12  ;;  %v11425_v39 = vpop.f32.mrb[190].mxu1  ;;  %11970 = vmatprep.mubr.msk.f32.mxu0 %vm253_vm0, %v8087_v0  ;;  %v8094_v42 = vld [vmem:[%s12209_s6 + $0x11e] sm:$0xff]  ;;  %v8095_v0 = vld [vmem:[%s12209_s6 + $0x126] sm:$0xff] }
 0x263   : > { %5038 = vst.msk [vmem:[#allocation2 + $0x228] sm:$0xff] %vm943_vm1, %v4960_v46  ;;  %v3960_v50 = vadd.f32 %v11425_v39, %v3882_v47  ;;  %v3788_v15 = vpop.f32.mrb[191].mxu1  ;;  %11849 = vmatmul.mubr.msk.f32.gmra.mrb[40].mxu1 %vm253_vm0, %v7084_v43  ;;  %v7092_v43 = vld [vmem:[%s12209_s6 + $0x13d] sm:$0xff]  ;;  %v5824_v47 = vld [vmem:[#allocation2 + $0x28] sm:$0xff] }
 0x264   : > { %5037 = vst.msk [vmem:[#allocation2 + $0x220] sm:$0xff] %vm943_vm1, %v4959_v10  ;;  %v3959_v11 = vadd.f32 %v3881_v23, %v3788_v15  ;;  %v4884_v30 = vld [vmem:[#allocation2 + $0x238] sm:$0xff]  ;;  %11851 = vmatprep.mubr.msk.f32.mxu1 %vm253_vm0, %v7085_v7  ;;  %v11547_v17 = vpop.f32.mrb[190].mxu0  ;;  %v7093_v7 = vld [vmem:[%s12209_s6 + $0x145] sm:$0xff] }
 0x265   : > { %4038 = vst.msk [vmem:[#allocation2 + $0x258] sm:$0xff] %vm943_vm1, %v3960_v50  ;;  %v4962_v24 = vadd.f32 %v11544_v8, %v4884_v30  ;;  %v4883_v25 = vld [vmem:[#allocation2 + $0x230] sm:$0xff]  ;;  %v4784_v53 = vpop.f32.mrb[191].mxu0  ;;  %11971 = vmatmul.mubr.msk.f32.gmra.mrb[40].mxu0 %vm253_vm0, %v8088_v14  ;;  %v5823_v23 = vld [vmem:[#allocation2 + $0x20] sm:$0xff] }
 0x266   : > { %4037 = vst.msk [vmem:[#allocation2 + $0x250] sm:$0xff] %vm943_vm1, %v3959_v11  ;;  %v4961_v56 = vadd.f32 %v4883_v25, %v4774_v9  ;;  %v11428_v18 = vpop.f32.mrb[192].mxu1  ;;  %11973 = vmatprep.mubr.msk.f32.mxu0 %vm253_vm0, %v8089_v55  ;;  %v8096_v14 = vld [vmem:[%s12209_s6 + $0x12e] sm:$0xff]  ;;  %v8097_v55 = vld [vmem:[%s12209_s6 + $0x136] sm:$0xff] }
 0x267   : > { %5040 = vst.msk [vmem:[#allocation2 + $0x238] sm:$0xff] %vm943_vm1, %v4962_v24  ;;  %v3962_v54 = vadd.f32 %v11428_v18, %v3884_v21  ;;  %v3798_v60 = vpop.f32.mrb[193].mxu1  ;;  %11852 = vmatmul.mubr.msk.f32.gmra.mrb[42].mxu1 %vm253_vm0, %v7086_v20  ;;  %v7094_v20 = vld [vmem:[%s12209_s6 + $0x14d] sm:$0xff]  ;;  %v5826_v21 = vld [vmem:[#allocation2 + $0x38] sm:$0xff] }
 0x268   : > { %5039 = vst.msk [vmem:[#allocation2 + $0x230] sm:$0xff] %vm943_vm1, %v4961_v56  ;;  %v3961_v32 = vadd.f32 %v3883_v58, %v3798_v60  ;;  %v4886_v22 = vld [vmem:[#allocation2 + $0x248] sm:$0xff]  ;;  %11854 = vmatprep.mubr.msk.f32.mxu1 %vm253_vm0, %v7087_v26  ;;  %v11550_v36 = vpop.f32.mrb[192].mxu0  ;;  %v7095_v26 = vld [vmem:[%s12209_s6 + $0x155] sm:$0xff] }
 0x269   : > { %4040 = vst.msk [vmem:[#allocation2 + $0x268] sm:$0x3f] %vm1021_vm2, %v3962_v54  ;;  %v4964_v37 = vadd.f32 %v11547_v17, %v4886_v22  ;;  %v4885_v41 = vld [vmem:[#allocation2 + $0x240] sm:$0xff]  ;;  %v4794_v59 = vpop.f32.mrb[193].mxu0  ;;  %11974 = vmatmul.mubr.msk.f32.gmra.mrb[42].mxu0 %vm253_vm0, %v8090_v16  ;;  %v5825_v58 = vld [vmem:[#allocation2 + $0x30] sm:$0xff] }
 0x26a   : > { %4039 = vst.msk [vmem:[#allocation2 + $0x260] sm:$0xff] %vm943_vm1, %v3961_v32  ;;  %v4963_v44 = vadd.f32 %v4885_v41, %v4784_v53  ;;  %v11564_v29 = vpop.f32.mrb[194].mxu1  ;;  %11976 = vmatprep.mubr.msk.f32.mxu0 %vm253_vm0, %v8091_v31  ;;  %v8098_v16 = vld [vmem:[%s12209_s6 + $0x13e] sm:$0xff]  ;;  %v8099_v31 = vld [vmem:[%s12209_s6 + $0x146] sm:$0xff] }
 0x26b   : > { %5042 = vst.msk [vmem:[#allocation2 + $0x248] sm:$0xff] %vm943_vm1, %v4964_v37  ;;  %v5898_v34 = vadd.f32 %v11564_v29, %v5820_v4  ;;  %v5430_v45 = vpop.f32.mrb[195].mxu1  ;;  %11855 = vmatmul.mubr.msk.f32.gmra.mrb[44].mxu1 %vm253_vm0, %v7088_v28  ;;  %v7096_v28 = vld [vmem:[%s12209_s6 + $0x15d] sm:$0xff]  ;;  %v5828_v4 = vld [vmem:[#allocation2 + $0x48] sm:$0xff] }
 0x26c   : > { %5041 = vst.msk [vmem:[#allocation2 + $0x240] sm:$0xff] %vm943_vm1, %v4963_v44  ;;  %v5897_v40 = vadd.f32 %v5819_v27, %v5430_v45  ;;  %v4888_v63 = vld [vmem:[#allocation2 + $0x258] sm:$0xff]  ;;  %11857 = vmatprep.mubr.msk.f32.mxu1 %vm253_vm0, %v7089_v61  ;;  %v11553_v5 = vpop.f32.mrb[194].mxu0  ;;  %v7097_v61 = vld [vmem:[%s12209_s6 + $0x165] sm:$0xff] }
 0x26d   : > { %5976 = vst.msk [vmem:[#allocation2 + $0x8] sm:$0xff] %vm943_vm1, %v5898_v34  ;;  %v4966_v38 = vadd.f32 %v11550_v36, %v4888_v63  ;;  %v4887_v49 = vld [vmem:[#allocation2 + $0x250] sm:$0xff]  ;;  %v4804_v12 = vpop.f32.mrb[195].mxu0  ;;  %11977 = vmatmul.mubr.msk.f32.gmra.mrb[44].mxu0 %vm253_vm0, %v8092_v62  ;;  %v5827_v27 = vld [vmem:[#allocation2 + $0x40] sm:$0xff] }
 0x26e   : > { %5975 = vst.msk [vmem:[#allocation2] sm:$0xff] %vm943_vm1, %v5897_v40  ;;  %v4965_v51 = vadd.f32 %v4887_v49, %v4794_v59  ;;  %v11567_v52 = vpop.f32.mrb[196].mxu1  ;;  %11979 = vmatprep.mubr.msk.f32.mxu0 %vm253_vm0, %v8093_v48  ;;  %v8100_v62 = vld [vmem:[%s12209_s6 + $0x14e] sm:$0xff]  ;;  %v8101_v48 = vld [vmem:[%s12209_s6 + $0x156] sm:$0xff] }
 0x26f   : > { %5044 = vst.msk [vmem:[#allocation2 + $0x258] sm:$0xff] %vm943_vm1, %v4966_v38  ;;  %v5900_v33 = vadd.f32 %v11567_v52, %v5822_v57  ;;  %v5440_v3 = vpop.f32.mrb[197].mxu1  ;;  %11858 = vmatmul.mubr.msk.f32.gmra.mrb[46].mxu1 %vm253_vm0, %v7090_v35  ;;  %v7098_v35 = vld [vmem:[%s12209_s6 + $0x16d] sm:$0xff]  ;;  %v5830_v57 = vld [vmem:[#allocation2 + $0x58] sm:$0xff] }
 0x270   : > { %5043 = vst.msk [vmem:[#allocation2 + $0x250] sm:$0xff] %vm943_vm1, %v4965_v51  ;;  %v5899_v1 = vadd.f32 %v5821_v6, %v5440_v3  ;;  %v4890_v13 = vld [vmem:[#allocation2 + $0x268] sm:$0x3f]  ;;  %11860 = vmatprep.mubr.msk.f32.mxu1 %vm253_vm0, %v7091_v2  ;;  %v11689_v8 = vpop.f32.mrb[196].mxu0  ;;  %v7099_v2 = vld [vmem:[%s12209_s6 + $0x175] sm:$0xff] }
 0x271   : > { %5978 = vst.msk [vmem:[#allocation2 + $0x18] sm:$0xff] %vm943_vm1, %v5900_v33  ;;  %v4968_v46 = vadd.f32 %v11553_v5, %v4890_v13  ;;  %v4889_v19 = vld [vmem:[#allocation2 + $0x260] sm:$0xff]  ;;  %v6436_v9 = vpop.f32.mrb[197].mxu0  ;;  %11980 = vmatmul.mubr.msk.f32.gmra.mrb[46].mxu0 %vm253_vm0, %v8094_v42  ;;  %v5829_v6 = vld [vmem:[#allocation2 + $0x50] sm:$0xff] }
 0x272   : > { %5977 = vst.msk [vmem:[#allocation2 + $0x10] sm:$0xff] %vm943_vm1, %v5899_v1  ;;  %v4967_v10 = vadd.f32 %v4889_v19, %v4804_v12  ;;  %v11570_v39 = vpop.f32.mrb[198].mxu1  ;;  %11982 = vmatprep.mubr.msk.f32.mxu0 %vm253_vm0, %v8095_v0  ;;  %v8102_v42 = vld [vmem:[%s12209_s6 + $0x15e] sm:$0xff]  ;;  %v8103_v0 = vld [vmem:[%s12209_s6 + $0x166] sm:$0xff] }
 0x273   : > { %5046 = vst.msk [vmem:[#allocation2 + $0x268] sm:$0x3f] %vm1021_vm2, %v4968_v46  ;;  %v5902_v50 = vadd.f32 %v11570_v39, %v5824_v47  ;;  %v5450_v15 = vpop.f32.mrb[199].mxu1  ;;  %11861 = vmatmul.mubr.msk.f32.gmra.mrb[48].mxu1 %vm253_vm0, %v7092_v43  ;;  %v7100_v43 = vld [vmem:[%s12209_s6 + $0x17d] sm:$0xff]  ;;  %v5832_v47 = vld [vmem:[#allocation2 + $0x68] sm:$0xff] }
 0x274   : > { %5045 = vst.msk [vmem:[#allocation2 + $0x260] sm:$0xff] %vm943_vm1, %v4967_v10  ;;  %v5901_v11 = vadd.f32 %v5823_v23, %v5450_v15  ;;  %v6826_v30 = vld [vmem:[#allocation2 + $0x8] sm:$0xff]  ;;  %11863 = vmatprep.mubr.msk.f32.mxu1 %vm253_vm0, %v7093_v7  ;;  %v11692_v17 = vpop.f32.mrb[198].mxu0  ;;  %v5831_v23 = vld [vmem:[#allocation2 + $0x60] sm:$0xff] }
 0x275   : > { %5980 = vst.msk [vmem:[#allocation2 + $0x28] sm:$0xff] %vm943_vm1, %v5902_v50  ;;  %v6904_v24 = vadd.f32 %v11689_v8, %v6826_v30  ;;  %v6825_v25 = vld [vmem:[#allocation2] sm:$0xff]  ;;  %v6446_v53 = vpop.f32.mrb[199].mxu0  ;;  %11983 = vmatmul.mubr.msk.f32.gmra.mrb[48].mxu0 %vm253_vm0, %v8096_v14  ;;  %v8104_v14 = vld [vmem:[%s12209_s6 + $0x16e] sm:$0xff] }
 0x276   : > { %5979 = vst.msk [vmem:[#allocation2 + $0x20] sm:$0xff] %vm943_vm1, %v5901_v11  ;;  %v6903_v56 = vadd.f32 %v6825_v25, %v6436_v9  ;;  %v11573_v18 = vpop.f32.mrb[200].mxu1  ;;  %11985 = vmatprep.mubr.msk.f32.mxu0 %vm253_vm0, %v8097_v55  ;;  %v7101_v7 = vld [vmem:[%s12209_s6 + $0x185] sm:$0xff]  ;;  %v8105_v55 = vld [vmem:[%s12209_s6 + $0x176] sm:$0xff] }
 0x277   : > { %6982 = vst.msk [vmem:[#allocation2 + $0x8] sm:$0xff] %vm943_vm1, %v6904_v24  ;;  %v5904_v54 = vadd.f32 %v11573_v18, %v5826_v21  ;;  %v5460_v60 = vpop.f32.mrb[201].mxu1  ;;  %11864 = vmatmul.mubr.msk.f32.gmra.mrb[50].mxu1 %vm253_vm0, %v7094_v20  ;;  %v7102_v20 = vld [vmem:[%s12209_s6 + $0x18d] sm:$0xff]  ;;  %v5834_v21 = vld [vmem:[#allocation2 + $0x78] sm:$0xff] }
 0x278   : > { %6981 = vst.msk [vmem:[#allocation2] sm:$0xff] %vm943_vm1, %v6903_v56  ;;  %v5903_v32 = vadd.f32 %v5825_v58, %v5460_v60  ;;  %v6828_v22 = vld [vmem:[#allocation2 + $0x18] sm:$0xff]  ;;  %11866 = vmatprep.mubr.msk.f32.mxu1 %vm253_vm0, %v7095_v26  ;;  %v11695_v36 = vpop.f32.mrb[200].mxu0  ;;  %v5833_v58 = vld [vmem:[#allocation2 + $0x70] sm:$0xff] }
 0x279   : > { %5982 = vst.msk [vmem:[#allocation2 + $0x38] sm:$0xff] %vm943_vm1, %v5904_v54  ;;  %v6906_v37 = vadd.f32 %v11692_v17, %v6828_v22  ;;  %v6827_v41 = vld [vmem:[#allocation2 + $0x10] sm:$0xff]  ;;  %v6456_v59 = vpop.f32.mrb[201].mxu0  ;;  %11986 = vmatmul.mubr.msk.f32.gmra.mrb[50].mxu0 %vm253_vm0, %v8098_v16  ;;  %v8106_v16 = vld [vmem:[%s12209_s6 + $0x17e] sm:$0xff] }
 0x27a   : > { %5981 = vst.msk [vmem:[#allocation2 + $0x30] sm:$0xff] %vm943_vm1, %v5903_v32  ;;  %v6905_v44 = vadd.f32 %v6827_v41, %v6446_v53  ;;  %v11576_v29 = vpop.f32.mrb[202].mxu1  ;;  %11988 = vmatprep.mubr.msk.f32.mxu0 %vm253_vm0, %v8099_v31  ;;  %v7103_v26 = vld [vmem:[%s12209_s6 + $0x195] sm:$0xff]  ;;  %v8107_v31 = vld [vmem:[%s12209_s6 + $0x186] sm:$0xff] }
 0x27b   : > { %6984 = vst.msk [vmem:[#allocation2 + $0x18] sm:$0xff] %vm943_vm1, %v6906_v37  ;;  %v5906_v34 = vadd.f32 %v11576_v29, %v5828_v4  ;;  %v5470_v45 = vpop.f32.mrb[203].mxu1  ;;  %11867 = vmatmul.mubr.msk.f32.gmra.mrb[52].mxu1 %vm253_vm0, %v7096_v28  ;;  %v7104_v28 = vld [vmem:[%s12209_s6 + $0x19d] sm:$0xff]  ;;  %v5836_v4 = vld [vmem:[#allocation2 + $0x88] sm:$0xff] }
 0x27c   : > { %6983 = vst.msk [vmem:[#allocation2 + $0x10] sm:$0xff] %vm943_vm1, %v6905_v44  ;;  %v5905_v40 = vadd.f32 %v5827_v27, %v5470_v45  ;;  %v6830_v63 = vld [vmem:[#allocation2 + $0x28] sm:$0xff]  ;;  %11869 = vmatprep.mubr.msk.f32.mxu1 %vm253_vm0, %v7097_v61  ;;  %v11698_v5 = vpop.f32.mrb[202].mxu0  ;;  %v5835_v27 = vld [vmem:[#allocation2 + $0x80] sm:$0xff] }
 0x27d   : > { %5984 = vst.msk [vmem:[#allocation2 + $0x48] sm:$0xff] %vm943_vm1, %v5906_v34  ;;  %v6908_v38 = vadd.f32 %v11695_v36, %v6830_v63  ;;  %v6829_v49 = vld [vmem:[#allocation2 + $0x20] sm:$0xff]  ;;  %v6466_v12 = vpop.f32.mrb[203].mxu0  ;;  %11989 = vmatmul.mubr.msk.f32.gmra.mrb[52].mxu0 %vm253_vm0, %v8100_v62  ;;  %v8108_v62 = vld [vmem:[%s12209_s6 + $0x18e] sm:$0xff] }
 0x27e   : > { %5983 = vst.msk [vmem:[#allocation2 + $0x40] sm:$0xff] %vm943_vm1, %v5905_v40  ;;  %v6907_v51 = vadd.f32 %v6829_v49, %v6456_v59  ;;  %v11579_v52 = vpop.f32.mrb[204].mxu1  ;;  %11991 = vmatprep.mubr.msk.f32.mxu0 %vm253_vm0, %v8101_v48  ;;  %v7105_v61 = vld [vmem:[%s12209_s6 + $0x1a5] sm:$0xff]  ;;  %v8109_v48 = vld [vmem:[%s12209_s6 + $0x196] sm:$0xff] }
 0x27f   : > { %6986 = vst.msk [vmem:[#allocation2 + $0x28] sm:$0xff] %vm943_vm1, %v6908_v38  ;;  %v5908_v33 = vadd.f32 %v11579_v52, %v5830_v57  ;;  %v5480_v3 = vpop.f32.mrb[205].mxu1  ;;  %11870 = vmatmul.mubr.msk.f32.gmra.mrb[54].mxu1 %vm253_vm0, %v7098_v35  ;;  %v7106_v35 = vld [vmem:[%s12209_s6 + $0x1ad] sm:$0xff]  ;;  %v5838_v57 = vld [vmem:[#allocation2 + $0x98] sm:$0xff] }
 0x280   : > { %6985 = vst.msk [vmem:[#allocation2 + $0x20] sm:$0xff] %vm943_vm1, %v6907_v51  ;;  %v5907_v1 = vadd.f32 %v5829_v6, %v5480_v3  ;;  %v6832_v13 = vld [vmem:[#allocation2 + $0x38] sm:$0xff]  ;;  %11872 = vmatprep.mubr.msk.f32.mxu1 %vm253_vm0, %v7099_v2  ;;  %v11701_v8 = vpop.f32.mrb[204].mxu0  ;;  %v5837_v6 = vld [vmem:[#allocation2 + $0x90] sm:$0xff] }
 0x281   : > { %5986 = vst.msk [vmem:[#allocation2 + $0x58] sm:$0xff] %vm943_vm1, %v5908_v33  ;;  %v6910_v46 = vadd.f32 %v11698_v5, %v6832_v13  ;;  %v6831_v19 = vld [vmem:[#allocation2 + $0x30] sm:$0xff]  ;;  %v6476_v9 = vpop.f32.mrb[205].mxu0  ;;  %11992 = vmatmul.mubr.msk.f32.gmra.mrb[54].mxu0 %vm253_vm0, %v8102_v42  ;;  %v8110_v42 = vld [vmem:[%s12209_s6 + $0x19e] sm:$0xff] }
 0x282   : > { %5985 = vst.msk [vmem:[#allocation2 + $0x50] sm:$0xff] %vm943_vm1, %v5907_v1  ;;  %v6909_v10 = vadd.f32 %v6831_v19, %v6466_v12  ;;  %v11582_v39 = vpop.f32.mrb[206].mxu1  ;;  %11994 = vmatprep.mubr.msk.f32.mxu0 %vm253_vm0, %v8103_v0  ;;  %v7107_v2 = vld [vmem:[%s12209_s6 + $0x1b5] sm:$0xff]  ;;  %v8111_v0 = vld [vmem:[%s12209_s6 + $0x1a6] sm:$0xff] }
 0x283   : > { %6988 = vst.msk [vmem:[#allocation2 + $0x38] sm:$0xff] %vm943_vm1, %v6910_v46  ;;  %v5910_v50 = vadd.f32 %v11582_v39, %v5832_v47  ;;  %v5490_v15 = vpop.f32.mrb[207].mxu1  ;;  %11873 = vmatmul.mubr.msk.f32.gmra.mrb[56].mxu1 %vm253_vm0, %v7100_v43  ;;  %v7108_v43 = vld [vmem:[%s12209_s6 + $0x1bd] sm:$0xff]  ;;  %v5840_v47 = vld [vmem:[#allocation2 + $0xa8] sm:$0xff] }
 0x284   : > { %6987 = vst.msk [vmem:[#allocation2 + $0x30] sm:$0xff] %vm943_vm1, %v6909_v10  ;;  %v5909_v11 = vadd.f32 %v5831_v23, %v5490_v15  ;;  %v6834_v30 = vld [vmem:[#allocation2 + $0x48] sm:$0xff]  ;;  %11875 = vmatprep.mubr.msk.f32.mxu1 %vm253_vm0, %v7101_v7  ;;  %v11704_v17 = vpop.f32.mrb[206].mxu0  ;;  %v5839_v23 = vld [vmem:[#allocation2 + $0xa0] sm:$0xff] }
 0x285   : > { %5988 = vst.msk [vmem:[#allocation2 + $0x68] sm:$0xff] %vm943_vm1, %v5910_v50  ;;  %v6912_v24 = vadd.f32 %v11701_v8, %v6834_v30  ;;  %v6833_v25 = vld [vmem:[#allocation2 + $0x40] sm:$0xff]  ;;  %v6486_v53 = vpop.f32.mrb[207].mxu0  ;;  %11995 = vmatmul.mubr.msk.f32.gmra.mrb[56].mxu0 %vm253_vm0, %v8104_v14  ;;  %v8112_v14 = vld [vmem:[%s12209_s6 + $0x1ae] sm:$0xff] }
 0x286   : > { %5987 = vst.msk [vmem:[#allocation2 + $0x60] sm:$0xff] %vm943_vm1, %v5909_v11  ;;  %v6911_v56 = vadd.f32 %v6833_v25, %v6476_v9  ;;  %v11585_v18 = vpop.f32.mrb[208].mxu1  ;;  %11997 = vmatprep.mubr.msk.f32.mxu0 %vm253_vm0, %v8105_v55  ;;  %v7109_v7 = vld [vmem:[%s12209_s6 + $0x1c5] sm:$0xff]  ;;  %v8113_v55 = vld [vmem:[%s12209_s6 + $0x1b6] sm:$0xff] }
 0x287   : > { %6990 = vst.msk [vmem:[#allocation2 + $0x48] sm:$0xff] %vm943_vm1, %v6912_v24  ;;  %v5912_v54 = vadd.f32 %v11585_v18, %v5834_v21  ;;  %v5500_v60 = vpop.f32.mrb[209].mxu1  ;;  %11876 = vmatmul.mubr.msk.f32.gmra.mrb[58].mxu1 %vm253_vm0, %v7102_v20  ;;  %v7110_v20 = vld [vmem:[%s12209_s6 + $0x1cd] sm:$0xff]  ;;  %v5842_v21 = vld [vmem:[#allocation2 + $0xb8] sm:$0xff] }
 0x288   : > { %6989 = vst.msk [vmem:[#allocation2 + $0x40] sm:$0xff] %vm943_vm1, %v6911_v56  ;;  %v5911_v32 = vadd.f32 %v5833_v58, %v5500_v60  ;;  %v6836_v22 = vld [vmem:[#allocation2 + $0x58] sm:$0xff]  ;;  %11878 = vmatprep.mubr.msk.f32.mxu1 %vm253_vm0, %v7103_v26  ;;  %v11707_v36 = vpop.f32.mrb[208].mxu0  ;;  %v5841_v58 = vld [vmem:[#allocation2 + $0xb0] sm:$0xff] }
 0x289   : > { %5990 = vst.msk [vmem:[#allocation2 + $0x78] sm:$0xff] %vm943_vm1, %v5912_v54  ;;  %v6914_v37 = vadd.f32 %v11704_v17, %v6836_v22  ;;  %v6835_v41 = vld [vmem:[#allocation2 + $0x50] sm:$0xff]  ;;  %v6496_v59 = vpop.f32.mrb[209].mxu0  ;;  %11998 = vmatmul.mubr.msk.f32.gmra.mrb[58].mxu0 %vm253_vm0, %v8106_v16  ;;  %v8114_v16 = vld [vmem:[%s12209_s6 + $0x1be] sm:$0xff] }
 0x28a   : > { %5989 = vst.msk [vmem:[#allocation2 + $0x70] sm:$0xff] %vm943_vm1, %v5911_v32  ;;  %v6913_v44 = vadd.f32 %v6835_v41, %v6486_v53  ;;  %v11588_v29 = vpop.f32.mrb[210].mxu1  ;;  %12000 = vmatprep.mubr.msk.f32.mxu0 %vm253_vm0, %v8107_v31  ;;  %v7111_v26 = vld [vmem:[%s12209_s6 + $0x1d5] sm:$0xff]  ;;  %v8115_v31 = vld [vmem:[%s12209_s6 + $0x1c6] sm:$0xff] }
 0x28b   : > { %6992 = vst.msk [vmem:[#allocation2 + $0x58] sm:$0xff] %vm943_vm1, %v6914_v37  ;;  %v5914_v34 = vadd.f32 %v11588_v29, %v5836_v4  ;;  %v5510_v45 = vpop.f32.mrb[211].mxu1  ;;  %11879 = vmatmul.mubr.msk.f32.gmra.mrb[60].mxu1 %vm253_vm0, %v7104_v28  ;;  %v7112_v28 = vld [vmem:[%s12209_s6 + $0x1dd] sm:$0xff]  ;;  %v5844_v4 = vld [vmem:[#allocation2 + $0xc8] sm:$0xff] }
 0x28c   : > { %6991 = vst.msk [vmem:[#allocation2 + $0x50] sm:$0xff] %vm943_vm1, %v6913_v44  ;;  %v5913_v40 = vadd.f32 %v5835_v27, %v5510_v45  ;;  %v6838_v63 = vld [vmem:[#allocation2 + $0x68] sm:$0xff]  ;;  %11881 = vmatprep.mubr.msk.f32.mxu1 %vm253_vm0, %v7105_v61  ;;  %v11710_v5 = vpop.f32.mrb[210].mxu0  ;;  %v5843_v27 = vld [vmem:[#allocation2 + $0xc0] sm:$0xff] }
 0x28d   : > { %5992 = vst.msk [vmem:[#allocation2 + $0x88] sm:$0xff] %vm943_vm1, %v5914_v34  ;;  %v6916_v38 = vadd.f32 %v11707_v36, %v6838_v63  ;;  %v6837_v49 = vld [vmem:[#allocation2 + $0x60] sm:$0xff]  ;;  %v6506_v12 = vpop.f32.mrb[211].mxu0  ;;  %12001 = vmatmul.mubr.msk.f32.gmra.mrb[60].mxu0 %vm253_vm0, %v8108_v62  ;;  %v8116_v62 = vld [vmem:[%s12209_s6 + $0x1ce] sm:$0xff] }
 0x28e   : > { %5991 = vst.msk [vmem:[#allocation2 + $0x80] sm:$0xff] %vm943_vm1, %v5913_v40  ;;  %v6915_v51 = vadd.f32 %v6837_v49, %v6496_v59  ;;  %v11591_v52 = vpop.f32.mrb[212].mxu1  ;;  %12003 = vmatprep.mubr.msk.f32.mxu0 %vm253_vm0, %v8109_v48  ;;  %v7113_v61 = vld [vmem:[%s12209_s6 + $0x1e5] sm:$0xff]  ;;  %v8117_v48 = vld [vmem:[%s12209_s6 + $0x1d6] sm:$0xff] }
 0x28f   : > { %6994 = vst.msk [vmem:[#allocation2 + $0x68] sm:$0xff] %vm943_vm1, %v6916_v38  ;;  %v5916_v33 = vadd.f32 %v11591_v52, %v5838_v57  ;;  %v5520_v3 = vpop.f32.mrb[213].mxu1  ;;  %11882 = vmatmul.mubr.msk.f32.gmra.mrb[62].mxu1 %vm253_vm0, %v7106_v35  ;;  %v7114_v35 = vld [vmem:[%s12209_s6 + $0x1ed] sm:$0xff]  ;;  %v5846_v57 = vld [vmem:[#allocation2 + $0xd8] sm:$0xff] }
 0x290   : > { %6993 = vst.msk [vmem:[#allocation2 + $0x60] sm:$0xff] %vm943_vm1, %v6915_v51  ;;  %v5915_v1 = vadd.f32 %v5837_v6, %v5520_v3  ;;  %v6840_v13 = vld [vmem:[#allocation2 + $0x78] sm:$0xff]  ;;  %11884 = vmatprep.mubr.msk.f32.mxu1 %vm253_vm0, %v7107_v2  ;;  %v11713_v8 = vpop.f32.mrb[212].mxu0  ;;  %v5845_v6 = vld [vmem:[#allocation2 + $0xd0] sm:$0xff] }
 0x291   : > { %5994 = vst.msk [vmem:[#allocation2 + $0x98] sm:$0xff] %vm943_vm1, %v5916_v33  ;;  %v6918_v46 = vadd.f32 %v11710_v5, %v6840_v13  ;;  %v6839_v19 = vld [vmem:[#allocation2 + $0x70] sm:$0xff]  ;;  %v6516_v9 = vpop.f32.mrb[213].mxu0  ;;  %12004 = vmatmul.mubr.msk.f32.gmra.mrb[62].mxu0 %vm253_vm0, %v8110_v42  ;;  %v8118_v42 = vld [vmem:[%s12209_s6 + $0x1de] sm:$0xff] }
 0x292   : > { %5993 = vst.msk [vmem:[#allocation2 + $0x90] sm:$0xff] %vm943_vm1, %v5915_v1  ;;  %v6917_v10 = vadd.f32 %v6839_v19, %v6506_v12  ;;  %v11594_v39 = vpop.f32.mrb[214].mxu1  ;;  %12006 = vmatprep.mubr.msk.f32.mxu0 %vm253_vm0, %v8111_v0  ;;  %v7115_v2 = vld [vmem:[%s12209_s6 + $0x1f5] sm:$0xff]  ;;  %v8119_v0 = vld [vmem:[%s12209_s6 + $0x1e6] sm:$0xff] }
 0x293   : > { %6996 = vst.msk [vmem:[#allocation2 + $0x78] sm:$0xff] %vm943_vm1, %v6918_v46  ;;  %v5918_v50 = vadd.f32 %v11594_v39, %v5840_v47  ;;  %v5530_v15 = vpop.f32.mrb[215].mxu1  ;;  %11885 = vmatmul.mubr.msk.f32.gmra.mrb[64].mxu1 %vm253_vm0, %v7108_v43  ;;  %v7116_v43 = vld [vmem:[%s12209_s6 + $0x1fd] sm:$0xff]  ;;  %v5848_v47 = vld [vmem:[#allocation2 + $0xe8] sm:$0xff] }
 0x294   : > { %6995 = vst.msk [vmem:[#allocation2 + $0x70] sm:$0xff] %vm943_vm1, %v6917_v10  ;;  %v5917_v11 = vadd.f32 %v5839_v23, %v5530_v15  ;;  %v6842_v30 = vld [vmem:[#allocation2 + $0x88] sm:$0xff]  ;;  %11887 = vmatprep.mubr.msk.f32.mxu1 %vm253_vm0, %v7109_v7  ;;  %v11716_v17 = vpop.f32.mrb[214].mxu0  ;;  %v5847_v23 = vld [vmem:[#allocation2 + $0xe0] sm:$0xff] }
 0x295   : > { %5996 = vst.msk [vmem:[#allocation2 + $0xa8] sm:$0xff] %vm943_vm1, %v5918_v50  ;;  %v6920_v24 = vadd.f32 %v11713_v8, %v6842_v30  ;;  %v6841_v25 = vld [vmem:[#allocation2 + $0x80] sm:$0xff]  ;;  %v6526_v53 = vpop.f32.mrb[215].mxu0  ;;  %12007 = vmatmul.mubr.msk.f32.gmra.mrb[64].mxu0 %vm253_vm0, %v8112_v14  ;;  %v8120_v14 = vld [vmem:[%s12209_s6 + $0x1ee] sm:$0xff] }
 0x296   : > { %5995 = vst.msk [vmem:[#allocation2 + $0xa0] sm:$0xff] %vm943_vm1, %v5917_v11  ;;  %v6919_v56 = vadd.f32 %v6841_v25, %v6516_v9  ;;  %v11597_v18 = vpop.f32.mrb[216].mxu1  ;;  %12009 = vmatprep.mubr.msk.f32.mxu0 %vm253_vm0, %v8113_v55  ;;  %v7117_v7 = vld [vmem:[%s12209_s6 + $0x205] sm:$0xff]  ;;  %v8121_v55 = vld [vmem:[%s12209_s6 + $0x1f6] sm:$0xff] }
 0x297   : > { %6998 = vst.msk [vmem:[#allocation2 + $0x88] sm:$0xff] %vm943_vm1, %v6920_v24  ;;  %v5920_v54 = vadd.f32 %v11597_v18, %v5842_v21  ;;  %v5540_v60 = vpop.f32.mrb[217].mxu1  ;;  %11888 = vmatmul.mubr.msk.f32.gmra.mrb[66].mxu1 %vm253_vm0, %v7110_v20  ;;  %v7118_v20 = vld [vmem:[%s12209_s6 + $0x20d] sm:$0xff]  ;;  %v5850_v21 = vld [vmem:[#allocation2 + $0xf8] sm:$0xff] }
 0x298   : > { %6997 = vst.msk [vmem:[#allocation2 + $0x80] sm:$0xff] %vm943_vm1, %v6919_v56  ;;  %v5919_v32 = vadd.f32 %v5841_v58, %v5540_v60  ;;  %v6844_v22 = vld [vmem:[#allocation2 + $0x98] sm:$0xff]  ;;  %11890 = vmatprep.mubr.msk.f32.mxu1 %vm253_vm0, %v7111_v26  ;;  %v11719_v36 = vpop.f32.mrb[216].mxu0  ;;  %v5849_v58 = vld [vmem:[#allocation2 + $0xf0] sm:$0xff] }
 0x299   : > { %5998 = vst.msk [vmem:[#allocation2 + $0xb8] sm:$0xff] %vm943_vm1, %v5920_v54  ;;  %v6922_v37 = vadd.f32 %v11716_v17, %v6844_v22  ;;  %v6843_v41 = vld [vmem:[#allocation2 + $0x90] sm:$0xff]  ;;  %v6536_v59 = vpop.f32.mrb[217].mxu0  ;;  %12010 = vmatmul.mubr.msk.f32.gmra.mrb[66].mxu0 %vm253_vm0, %v8114_v16  ;;  %v8122_v16 = vld [vmem:[%s12209_s6 + $0x1fe] sm:$0xff] }
 0x29a   : > { %5997 = vst.msk [vmem:[#allocation2 + $0xb0] sm:$0xff] %vm943_vm1, %v5919_v32  ;;  %v6921_v44 = vadd.f32 %v6843_v41, %v6526_v53  ;;  %v11600_v29 = vpop.f32.mrb[218].mxu1  ;;  %12012 = vmatprep.mubr.msk.f32.mxu0 %vm253_vm0, %v8115_v31  ;;  %v7119_v26 = vld [vmem:[%s12209_s6 + $0x215] sm:$0xff]  ;;  %v8123_v31 = vld [vmem:[%s12209_s6 + $0x206] sm:$0xff] }
 0x29b   : > { %7000 = vst.msk [vmem:[#allocation2 + $0x98] sm:$0xff] %vm943_vm1, %v6922_v37  ;;  %v5922_v34 = vadd.f32 %v11600_v29, %v5844_v4  ;;  %v5550_v45 = vpop.f32.mrb[219].mxu1  ;;  %11891 = vmatmul.mubr.msk.f32.gmra.mrb[68].mxu1 %vm253_vm0, %v7112_v28  ;;  %v7120_v28 = vld [vmem:[%s12209_s6 + $0x21d] sm:$0xff]  ;;  %v5852_v4 = vld [vmem:[#allocation2 + $0x108] sm:$0xff] }
 0x29c   : > { %6999 = vst.msk [vmem:[#allocation2 + $0x90] sm:$0xff] %vm943_vm1, %v6921_v44  ;;  %v5921_v40 = vadd.f32 %v5843_v27, %v5550_v45  ;;  %v6846_v63 = vld [vmem:[#allocation2 + $0xa8] sm:$0xff]  ;;  %11893 = vmatprep.mubr.msk.f32.mxu1 %vm253_vm0, %v7113_v61  ;;  %v11722_v5 = vpop.f32.mrb[218].mxu0  ;;  %v5851_v27 = vld [vmem:[#allocation2 + $0x100] sm:$0xff] }
 0x29d   : > { %6000 = vst.msk [vmem:[#allocation2 + $0xc8] sm:$0xff] %vm943_vm1, %v5922_v34  ;;  %v6924_v38 = vadd.f32 %v11719_v36, %v6846_v63  ;;  %v6845_v49 = vld [vmem:[#allocation2 + $0xa0] sm:$0xff]  ;;  %v6546_v12 = vpop.f32.mrb[219].mxu0  ;;  %12013 = vmatmul.mubr.msk.f32.gmra.mrb[68].mxu0 %vm253_vm0, %v8116_v62  ;;  %v8124_v62 = vld [vmem:[%s12209_s6 + $0x20e] sm:$0xff] }
 0x29e   : > { %5999 = vst.msk [vmem:[#allocation2 + $0xc0] sm:$0xff] %vm943_vm1, %v5921_v40  ;;  %v6923_v51 = vadd.f32 %v6845_v49, %v6536_v59  ;;  %v11603_v52 = vpop.f32.mrb[220].mxu1  ;;  %12015 = vmatprep.mubr.msk.f32.mxu0 %vm253_vm0, %v8117_v48  ;;  %v7121_v61 = vld [vmem:[%s12209_s6 + $0x225] sm:$0xff]  ;;  %v8125_v48 = vld [vmem:[%s12209_s6 + $0x216] sm:$0xff] }
 0x29f   : > { %7002 = vst.msk [vmem:[#allocation2 + $0xa8] sm:$0xff] %vm943_vm1, %v6924_v38  ;;  %v5924_v33 = vadd.f32 %v11603_v52, %v5846_v57  ;;  %v5560_v3 = vpop.f32.mrb[221].mxu1  ;;  %11894 = vmatmul.mubr.msk.f32.gmra.mrb[70].mxu1 %vm253_vm0, %v7114_v35  ;;  %v7122_v35 = vld [vmem:[%s12209_s6 + $0x22d] sm:$0xff]  ;;  %v5854_v57 = vld [vmem:[#allocation2 + $0x118] sm:$0xff] }
 0x2a0   : > { %7001 = vst.msk [vmem:[#allocation2 + $0xa0] sm:$0xff] %vm943_vm1, %v6923_v51  ;;  %v5923_v1 = vadd.f32 %v5845_v6, %v5560_v3  ;;  %v6848_v13 = vld [vmem:[#allocation2 + $0xb8] sm:$0xff]  ;;  %11896 = vmatprep.mubr.msk.f32.mxu1 %vm253_vm0, %v7115_v2  ;;  %v11725_v8 = vpop.f32.mrb[220].mxu0  ;;  %v5853_v6 = vld [vmem:[#allocation2 + $0x110] sm:$0xff] }
 0x2a1   : > { %6002 = vst.msk [vmem:[#allocation2 + $0xd8] sm:$0xff] %vm943_vm1, %v5924_v33  ;;  %v6926_v46 = vadd.f32 %v11722_v5, %v6848_v13  ;;  %v6847_v19 = vld [vmem:[#allocation2 + $0xb0] sm:$0xff]  ;;  %v6556_v9 = vpop.f32.mrb[221].mxu0  ;;  %12016 = vmatmul.mubr.msk.f32.gmra.mrb[70].mxu0 %vm253_vm0, %v8118_v42  ;;  %v8126_v42 = vld [vmem:[%s12209_s6 + $0x21e] sm:$0xff] }
 0x2a2   : > { %6001 = vst.msk [vmem:[#allocation2 + $0xd0] sm:$0xff] %vm943_vm1, %v5923_v1  ;;  %v6925_v10 = vadd.f32 %v6847_v19, %v6546_v12  ;;  %v11606_v39 = vpop.f32.mrb[222].mxu1  ;;  %12018 = vmatprep.mubr.msk.f32.mxu0 %vm253_vm0, %v8119_v0  ;;  %v7123_v2 = vld [vmem:[%s12209_s6 + $0x235] sm:$0xff]  ;;  %v8127_v0 = vld [vmem:[%s12209_s6 + $0x226] sm:$0xff] }
 0x2a3   : > { %7004 = vst.msk [vmem:[#allocation2 + $0xb8] sm:$0xff] %vm943_vm1, %v6926_v46  ;;  %v5926_v50 = vadd.f32 %v11606_v39, %v5848_v47  ;;  %v5570_v15 = vpop.f32.mrb[223].mxu1  ;;  %11897 = vmatmul.mubr.msk.f32.gmra.mrb[72].mxu1 %vm253_vm0, %v7116_v43  ;;  %v7124_v43 = vld [vmem:[%s12209_s6 + $0x23d] sm:$0xff]  ;;  %v5856_v47 = vld [vmem:[#allocation2 + $0x128] sm:$0xff] }
 0x2a4   : > { %7003 = vst.msk [vmem:[#allocation2 + $0xb0] sm:$0xff] %vm943_vm1, %v6925_v10  ;;  %v5925_v11 = vadd.f32 %v5847_v23, %v5570_v15  ;;  %v6850_v30 = vld [vmem:[#allocation2 + $0xc8] sm:$0xff]  ;;  %11899 = vmatprep.mubr.msk.f32.mxu1 %vm253_vm0, %v7117_v7  ;;  %v11728_v17 = vpop.f32.mrb[222].mxu0  ;;  %v5855_v23 = vld [vmem:[#allocation2 + $0x120] sm:$0xff] }
 0x2a5   : > { %6004 = vst.msk [vmem:[#allocation2 + $0xe8] sm:$0xff] %vm943_vm1, %v5926_v50  ;;  %v6928_v24 = vadd.f32 %v11725_v8, %v6850_v30  ;;  %v6849_v25 = vld [vmem:[#allocation2 + $0xc0] sm:$0xff]  ;;  %v6566_v53 = vpop.f32.mrb[223].mxu0  ;;  %12019 = vmatmul.mubr.msk.f32.gmra.mrb[72].mxu0 %vm253_vm0, %v8120_v14  ;;  %v8128_v14 = vld [vmem:[%s12209_s6 + $0x22e] sm:$0xff] }
 0x2a6   : > { %6003 = vst.msk [vmem:[#allocation2 + $0xe0] sm:$0xff] %vm943_vm1, %v5925_v11  ;;  %v6927_v56 = vadd.f32 %v6849_v25, %v6556_v9  ;;  %v11609_v18 = vpop.f32.mrb[224].mxu1  ;;  %12021 = vmatprep.mubr.msk.f32.mxu0 %vm253_vm0, %v8121_v55  ;;  %v7125_v7 = vld [vmem:[%s12209_s6 + $0x245] sm:$0xff]  ;;  %v8129_v55 = vld [vmem:[%s12209_s6 + $0x236] sm:$0xff] }
 0x2a7   : > { %7006 = vst.msk [vmem:[#allocation2 + $0xc8] sm:$0xff] %vm943_vm1, %v6928_v24  ;;  %v5928_v54 = vadd.f32 %v11609_v18, %v5850_v21  ;;  %v5580_v60 = vpop.f32.mrb[225].mxu1  ;;  %11900 = vmatmul.mubr.msk.f32.gmra.mrb[74].mxu1 %vm253_vm0, %v7118_v20  ;;  %v7126_v20 = vld [vmem:[%s12209_s6 + $0x24d] sm:$0xff]  ;;  %v5858_v21 = vld [vmem:[#allocation2 + $0x138] sm:$0xff] }
 0x2a8   : > { %7005 = vst.msk [vmem:[#allocation2 + $0xc0] sm:$0xff] %vm943_vm1, %v6927_v56  ;;  %v5927_v32 = vadd.f32 %v5849_v58, %v5580_v60  ;;  %v6852_v22 = vld [vmem:[#allocation2 + $0xd8] sm:$0xff]  ;;  %11902 = vmatprep.mubr.msk.f32.mxu1 %vm253_vm0, %v7119_v26  ;;  %v11731_v36 = vpop.f32.mrb[224].mxu0  ;;  %v5857_v58 = vld [vmem:[#allocation2 + $0x130] sm:$0xff] }
 0x2a9   : > { %6006 = vst.msk [vmem:[#allocation2 + $0xf8] sm:$0xff] %vm943_vm1, %v5928_v54  ;;  %v6930_v37 = vadd.f32 %v11728_v17, %v6852_v22  ;;  %v6851_v41 = vld [vmem:[#allocation2 + $0xd0] sm:$0xff]  ;;  %v6576_v59 = vpop.f32.mrb[225].mxu0  ;;  %12022 = vmatmul.mubr.msk.f32.gmra.mrb[74].mxu0 %vm253_vm0, %v8122_v16  ;;  %v8130_v16 = vld [vmem:[%s12209_s6 + $0x23e] sm:$0xff] }
 0x2aa   : > { %6005 = vst.msk [vmem:[#allocation2 + $0xf0] sm:$0xff] %vm943_vm1, %v5927_v32  ;;  %v6929_v44 = vadd.f32 %v6851_v41, %v6566_v53  ;;  %v11612_v29 = vpop.f32.mrb[226].mxu1  ;;  %12024 = vmatprep.mubr.msk.f32.mxu0 %vm253_vm0, %v8123_v31  ;;  %v7127_v26 = vld [vmem:[%s12209_s6 + $0x255] sm:$0xff]  ;;  %v8131_v31 = vld [vmem:[%s12209_s6 + $0x246] sm:$0xff] }
 0x2ab   : > { %7008 = vst.msk [vmem:[#allocation2 + $0xd8] sm:$0xff] %vm943_vm1, %v6930_v37  ;;  %v5930_v34 = vadd.f32 %v11612_v29, %v5852_v4  ;;  %v5590_v45 = vpop.f32.mrb[227].mxu1  ;;  %11903 = vmatmul.mubr.msk.f32.gmra.mrb[76].mxu1 %vm253_vm0, %v7120_v28  ;;  %v7128_v28 = vld [vmem:[%s12209_s6 + $0x25d] sm:$0xff]  ;;  %v5860_v4 = vld [vmem:[#allocation2 + $0x148] sm:$0xff] }
 0x2ac   : > { %7007 = vst.msk [vmem:[#allocation2 + $0xd0] sm:$0xff] %vm943_vm1, %v6929_v44  ;;  %v5929_v40 = vadd.f32 %v5851_v27, %v5590_v45  ;;  %v6854_v63 = vld [vmem:[#allocation2 + $0xe8] sm:$0xff]  ;;  %11905 = vmatprep.mubr.msk.f32.mxu1 %vm253_vm0, %v7121_v61  ;;  %v11734_v5 = vpop.f32.mrb[226].mxu0  ;;  %v5859_v27 = vld [vmem:[#allocation2 + $0x140] sm:$0xff] }
 0x2ad   : > { %6008 = vst.msk [vmem:[#allocation2 + $0x108] sm:$0xff] %vm943_vm1, %v5930_v34  ;;  %v6932_v38 = vadd.f32 %v11731_v36, %v6854_v63  ;;  %v6853_v49 = vld [vmem:[#allocation2 + $0xe0] sm:$0xff]  ;;  %v6586_v12 = vpop.f32.mrb[227].mxu0  ;;  %12025 = vmatmul.mubr.msk.f32.gmra.mrb[76].mxu0 %vm253_vm0, %v8124_v62  ;;  %v8132_v62 = vld [vmem:[%s12209_s6 + $0x24e] sm:$0xff] }
 0x2ae   : > { %6007 = vst.msk [vmem:[#allocation2 + $0x100] sm:$0xff] %vm943_vm1, %v5929_v40  ;;  %v6931_v51 = vadd.f32 %v6853_v49, %v6576_v59  ;;  %v11615_v52 = vpop.f32.mrb[228].mxu1  ;;  %12027 = vmatprep.mubr.msk.f32.mxu0 %vm253_vm0, %v8125_v48  ;;  %v7129_v61 = vld [vmem:[%s12209_s6 + $0x265] sm:$0xff]  ;;  %v8133_v48 = vld [vmem:[%s12209_s6 + $0x256] sm:$0xff] }
 0x2af   : > { %7010 = vst.msk [vmem:[#allocation2 + $0xe8] sm:$0xff] %vm943_vm1, %v6932_v38  ;;  %v5932_v33 = vadd.f32 %v11615_v52, %v5854_v57  ;;  %v5600_v3 = vpop.f32.mrb[229].mxu1  ;;  %11906 = vmatmul.mubr.msk.f32.gmra.mrb[78].mxu1 %vm253_vm0, %v7122_v35  ;;  %v7130_v35 = vld [vmem:[%s12209_s6 + $0x26d] sm:$0xff]  ;;  %v5862_v57 = vld [vmem:[#allocation2 + $0x158] sm:$0xff] }
 0x2b0   : > { %7009 = vst.msk [vmem:[#allocation2 + $0xe0] sm:$0xff] %vm943_vm1, %v6931_v51  ;;  %v5931_v1 = vadd.f32 %v5853_v6, %v5600_v3  ;;  %v6856_v13 = vld [vmem:[#allocation2 + $0xf8] sm:$0xff]  ;;  %11908 = vmatprep.mubr.msk.f32.mxu1 %vm253_vm0, %v7123_v2  ;;  %v11737_v8 = vpop.f32.mrb[228].mxu0  ;;  %v5861_v6 = vld [vmem:[#allocation2 + $0x150] sm:$0xff] }
 0x2b1   : > { %6010 = vst.msk [vmem:[#allocation2 + $0x118] sm:$0xff] %vm943_vm1, %v5932_v33  ;;  %v6934_v46 = vadd.f32 %v11734_v5, %v6856_v13  ;;  %v6855_v19 = vld [vmem:[#allocation2 + $0xf0] sm:$0xff]  ;;  %v6596_v9 = vpop.f32.mrb[229].mxu0  ;;  %12028 = vmatmul.mubr.msk.f32.gmra.mrb[78].mxu0 %vm253_vm0, %v8126_v42  ;;  %v8134_v42 = vld [vmem:[%s12209_s6 + $0x25e] sm:$0xff] }
 0x2b2   : > { %6009 = vst.msk [vmem:[#allocation2 + $0x110] sm:$0xff] %vm943_vm1, %v5931_v1  ;;  %v6933_v10 = vadd.f32 %v6855_v19, %v6586_v12  ;;  %v11618_v39 = vpop.f32.mrb[230].mxu1  ;;  %12030 = vmatprep.mubr.msk.f32.mxu0 %vm253_vm0, %v8127_v0  ;;  %v7131_v2 = vld [vmem:[%s12209_s6 + $0x275] sm:$0xff]  ;;  %v8135_v0 = vld [vmem:[%s12209_s6 + $0x266] sm:$0xff] }
 0x2b3   : > { %7012 = vst.msk [vmem:[#allocation2 + $0xf8] sm:$0xff] %vm943_vm1, %v6934_v46  ;;  %v5934_v50 = vadd.f32 %v11618_v39, %v5856_v47  ;;  %v5610_v15 = vpop.f32.mrb[231].mxu1  ;;  %11909 = vmatmul.mubr.msk.f32.gmra.mrb[80].mxu1 %vm253_vm0, %v7124_v43  ;;  %v7132_v43 = vld [vmem:[%s12209_s6 + $0x27d] sm:$0xff]  ;;  %v5864_v47 = vld [vmem:[#allocation2 + $0x168] sm:$0xff] }
 0x2b4   : > { %7011 = vst.msk [vmem:[#allocation2 + $0xf0] sm:$0xff] %vm943_vm1, %v6933_v10  ;;  %v5933_v11 = vadd.f32 %v5855_v23, %v5610_v15  ;;  %v6858_v30 = vld [vmem:[#allocation2 + $0x108] sm:$0xff]  ;;  %11911 = vmatprep.mubr.msk.f32.mxu1 %vm253_vm0, %v7125_v7  ;;  %v11740_v17 = vpop.f32.mrb[230].mxu0  ;;  %v5863_v23 = vld [vmem:[#allocation2 + $0x160] sm:$0xff] }
 0x2b5   : > { %6012 = vst.msk [vmem:[#allocation2 + $0x128] sm:$0xff] %vm943_vm1, %v5934_v50  ;;  %v6936_v24 = vadd.f32 %v11737_v8, %v6858_v30  ;;  %v6857_v25 = vld [vmem:[#allocation2 + $0x100] sm:$0xff]  ;;  %v6606_v53 = vpop.f32.mrb[231].mxu0  ;;  %12031 = vmatmul.mubr.msk.f32.gmra.mrb[80].mxu0 %vm253_vm0, %v8128_v14  ;;  %v8136_v14 = vld [vmem:[%s12209_s6 + $0x26e] sm:$0xff] }
 0x2b6   : > { %6011 = vst.msk [vmem:[#allocation2 + $0x120] sm:$0xff] %vm943_vm1, %v5933_v11  ;;  %v6935_v56 = vadd.f32 %v6857_v25, %v6596_v9  ;;  %v11621_v18 = vpop.f32.mrb[232].mxu1  ;;  %12033 = vmatprep.mubr.msk.f32.mxu0 %vm253_vm0, %v8129_v55  ;;  %v7133_v7 = vld [vmem:[%s12209_s6 + $0x285] sm:$0xff]  ;;  %v8137_v55 = vld [vmem:[%s12209_s6 + $0x276] sm:$0xff] }
 0x2b7   : > { %7014 = vst.msk [vmem:[#allocation2 + $0x108] sm:$0xff] %vm943_vm1, %v6936_v24  ;;  %v5936_v54 = vadd.f32 %v11621_v18, %v5858_v21  ;;  %v5620_v60 = vpop.f32.mrb[233].mxu1  ;;  %11912 = vmatmul.mubr.msk.f32.gmra.mrb[82].mxu1 %vm253_vm0, %v7126_v20  ;;  %v7134_v20 = vld [vmem:[%s12209_s6 + $0x28d] sm:$0xff]  ;;  %v5866_v21 = vld [vmem:[#allocation2 + $0x178] sm:$0xff] }
 0x2b8   : > { %7013 = vst.msk [vmem:[#allocation2 + $0x100] sm:$0xff] %vm943_vm1, %v6935_v56  ;;  %v5935_v32 = vadd.f32 %v5857_v58, %v5620_v60  ;;  %v6860_v22 = vld [vmem:[#allocation2 + $0x118] sm:$0xff]  ;;  %11914 = vmatprep.mubr.msk.f32.mxu1 %vm253_vm0, %v7127_v26  ;;  %v11743_v36 = vpop.f32.mrb[232].mxu0  ;;  %v5865_v58 = vld [vmem:[#allocation2 + $0x170] sm:$0xff] }
 0x2b9   : > { %6014 = vst.msk [vmem:[#allocation2 + $0x138] sm:$0xff] %vm943_vm1, %v5936_v54  ;;  %v6938_v37 = vadd.f32 %v11740_v17, %v6860_v22  ;;  %v6859_v41 = vld [vmem:[#allocation2 + $0x110] sm:$0xff]  ;;  %v6616_v59 = vpop.f32.mrb[233].mxu0  ;;  %12034 = vmatmul.mubr.msk.f32.gmra.mrb[82].mxu0 %vm253_vm0, %v8130_v16  ;;  %v8138_v16 = vld [vmem:[%s12209_s6 + $0x27e] sm:$0xff] }
 0x2ba   : > { %6013 = vst.msk [vmem:[#allocation2 + $0x130] sm:$0xff] %vm943_vm1, %v5935_v32  ;;  %v6937_v44 = vadd.f32 %v6859_v41, %v6606_v53  ;;  %v11624_v29 = vpop.f32.mrb[234].mxu1  ;;  %12036 = vmatprep.mubr.msk.f32.mxu0 %vm253_vm0, %v8131_v31  ;;  %v7135_v26 = vld [vmem:[%s12209_s6 + $0x295] sm:$0xff]  ;;  %v8139_v31 = vld [vmem:[%s12209_s6 + $0x286] sm:$0xff] }
 0x2bb   : > { %7016 = vst.msk [vmem:[#allocation2 + $0x118] sm:$0xff] %vm943_vm1, %v6938_v37  ;;  %v5938_v34 = vadd.f32 %v11624_v29, %v5860_v4  ;;  %v5630_v45 = vpop.f32.mrb[235].mxu1  ;;  %11915 = vmatmul.mubr.msk.f32.gmra.mrb[84].mxu1 %vm253_vm0, %v7128_v28  ;;  %v7136_v28 = vld [vmem:[%s12209_s6 + $0x29d] sm:$0x3f]  ;;  %v5868_v29 = vld [vmem:[#allocation2 + $0x188] sm:$0xff] }
 0x2bc   : > { %7015 = vst.msk [vmem:[#allocation2 + $0x110] sm:$0xff] %vm943_vm1, %v6937_v44  ;;  %v5937_v40 = vadd.f32 %v5859_v27, %v5630_v45  ;;  %v6862_v63 = vld [vmem:[#allocation2 + $0x128] sm:$0xff]  ;;  %11917 = vmatprep.mubr.msk.f32.mxu1 %vm253_vm0, %v7129_v61  ;;  %v11746_v5 = vpop.f32.mrb[234].mxu0  ;;  %v5867_v45 = vld [vmem:[#allocation2 + $0x180] sm:$0xff]  ;;  %v8141_v27 = vld [vmem:[%s12209_s6 + $0x296] sm:$0xff] }
 0x2bd   : > { %6016 = vst.msk [vmem:[#allocation2 + $0x148] sm:$0xff] %vm943_vm1, %v5938_v34  ;;  %v6940_v38 = vadd.f32 %v11743_v36, %v6862_v63  ;;  %v6861_v49 = vld [vmem:[#allocation2 + $0x120] sm:$0xff]  ;;  %v6626_v12 = vpop.f32.mrb[235].mxu0  ;;  %12037 = vmatmul.mubr.msk.f32.gmra.mrb[84].mxu0 %vm253_vm0, %v8132_v62  ;;  %v8140_v4 = vld [vmem:[%s12209_s6 + $0x28e] sm:$0xff] }
 0x2be   : > { %6015 = vst.msk [vmem:[#allocation2 + $0x140] sm:$0xff] %vm943_vm1, %v5937_v40  ;;  %v6939_v51 = vadd.f32 %v6861_v49, %v6616_v59  ;;  %v11627_v52 = vpop.f32.mrb[236].mxu1  ;;  %12039 = vmatprep.mubr.msk.f32.mxu0 %vm253_vm0, %v8133_v48 }
 0x2bf   : > { %7018 = vst.msk [vmem:[#allocation2 + $0x128] sm:$0xff] %vm943_vm1, %v6940_v38  ;;  %v5940_v33 = vadd.f32 %v11627_v52, %v5862_v57  ;;  %v5640_v3 = vpop.f32.mrb[237].mxu1  ;;  %11918 = vmatmul.mubr.msk.f32.gmra.mrb[86].mxu1 %vm253_vm0, %v7130_v35 }
 0x2c0   : > { %7017 = vst.msk [vmem:[#allocation2 + $0x120] sm:$0xff] %vm943_vm1, %v6939_v51  ;;  %v5939_v1 = vadd.f32 %v5861_v6, %v5640_v3  ;;  %v6864_v13 = vld [vmem:[#allocation2 + $0x138] sm:$0xff]  ;;  %11920 = vmatprep.mubr.msk.f32.mxu1 %vm253_vm0, %v7131_v2  ;;  %v11749_v8 = vpop.f32.mrb[236].mxu0 }
 0x2c1   : > { %6018 = vst.msk [vmem:[#allocation2 + $0x158] sm:$0xff] %vm943_vm1, %v5940_v33  ;;  %v6942_v46 = vadd.f32 %v11746_v5, %v6864_v13  ;;  %v6863_v19 = vld [vmem:[#allocation2 + $0x130] sm:$0xff]  ;;  %v6636_v9 = vpop.f32.mrb[237].mxu0  ;;  %12040 = vmatmul.mubr.msk.f32.gmra.mrb[86].mxu0 %vm253_vm0, %v8134_v42  ;;  %v5870_v2 = vld [vmem:[#allocation2 + $0x198] sm:$0xff] }
 0x2c2   : > { %6017 = vst.msk [vmem:[#allocation2 + $0x150] sm:$0xff] %vm943_vm1, %v5939_v1  ;;  %v6941_v10 = vadd.f32 %v6863_v19, %v6626_v12  ;;  %v11630_v39 = vpop.f32.mrb[238].mxu1  ;;  %12042 = vmatprep.mubr.msk.f32.mxu0 %vm253_vm0, %v8135_v0  ;;  %v8142_v51 = vld [vmem:[%s12209_s6 + $0x29e] sm:$0x3f]  ;;  %v5869_v42 = vld [vmem:[#allocation2 + $0x190] sm:$0xff]  ;;  %s12131_s6 = smul.u32 624, %s14724_s13 }
 0x2c3   : > { %7020 = vst.msk [vmem:[#allocation2 + $0x138] sm:$0xff] %vm943_vm1, %v6942_v46  ;;  %v5942_v50 = vadd.f32 %v11630_v39, %v5864_v47  ;;  %v5650_v15 = vpop.f32.mrb[239].mxu1  ;;  %11921 = vmatmul.mubr.msk.f32.gmra.mrb[88].mxu1 %vm253_vm0, %v7132_v43  ;;  %v5872_v46 = vld [vmem:[#allocation2 + $0x1a8] sm:$0xff] }
 0x2c4   : > { %7019 = vst.msk [vmem:[#allocation2 + $0x130] sm:$0xff] %vm943_vm1, %v6941_v10  ;;  %v5941_v11 = vadd.f32 %v5863_v23, %v5650_v15  ;;  %v6866_v30 = vld [vmem:[#allocation2 + $0x148] sm:$0xff]  ;;  %11923 = vmatprep.mubr.msk.f32.mxu1 %vm253_vm0, %v7133_v7  ;;  %v11752_v17 = vpop.f32.mrb[238].mxu0  ;;  %v5871_v7 = vld [vmem:[#allocation2 + $0x1a0] sm:$0xff]  ;;  %s14334_s20 = scalar_lea.vmem %s14722_s3, %s12131_s6 }
 0x2c5   : > { %6020 = vst.msk [vmem:[#allocation2 + $0x168] sm:$0xff] %vm943_vm1, %v5942_v50  ;;  %v6944_v24 = vadd.f32 %v11749_v8, %v6866_v30  ;;  %v6865_v25 = vld [vmem:[#allocation2 + $0x140] sm:$0xff]  ;;  %v6646_v53 = vpop.f32.mrb[239].mxu0  ;;  %12043 = vmatmul.mubr.msk.f32.gmra.mrb[88].mxu0 %vm253_vm0, %v8136_v14 }
 0x2c6   : > { %6019 = vst.msk [vmem:[#allocation2 + $0x160] sm:$0xff] %vm943_vm1, %v5941_v11  ;;  %v6943_v56 = vadd.f32 %v6865_v25, %v6636_v9  ;;  %v11633_v18 = vpop.f32.mrb[240].mxu1  ;;  %12045 = vmatprep.mubr.msk.f32.mxu0 %vm253_vm0, %v8137_v55  ;;  %v5874_v11 = vld [vmem:[#allocation2 + $0x1b8] sm:$0xff] }
 0x2c7   : > { %7022 = vst.msk [vmem:[#allocation2 + $0x148] sm:$0xff] %vm943_vm1, %v6944_v24  ;;  %v5944_v54 = vadd.f32 %v11633_v18, %v5866_v21  ;;  %v5660_v60 = vpop.f32.mrb[241].mxu1  ;;  %11924 = vmatmul.mubr.msk.f32.gmra.mrb[90].mxu1 %vm253_vm0, %v7134_v20 }
 0x2c8   : > { %7021 = vst.msk [vmem:[#allocation2 + $0x140] sm:$0xff] %vm943_vm1, %v6943_v56  ;;  %v5943_v32 = vadd.f32 %v5865_v58, %v5660_v60  ;;  %v6868_v22 = vld [vmem:[#allocation2 + $0x158] sm:$0xff]  ;;  %11926 = vmatprep.mubr.msk.f32.mxu1 %vm253_vm0, %v7135_v26  ;;  %v11755_v36 = vpop.f32.mrb[240].mxu0 }
 0x2c9   : > { %6022 = vst.msk [vmem:[#allocation2 + $0x178] sm:$0xff] %vm943_vm1, %v5944_v54  ;;  %v6946_v37 = vadd.f32 %v11752_v17, %v6868_v22  ;;  %v6867_v41 = vld [vmem:[#allocation2 + $0x150] sm:$0xff]  ;;  %v6656_v59 = vpop.f32.mrb[241].mxu0  ;;  %12046 = vmatmul.mubr.msk.f32.gmra.mrb[90].mxu0 %vm253_vm0, %v8138_v16  ;;  %v5876_v54 = vld [vmem:[#allocation2 + $0x1c8] sm:$0xff] }
 0x2ca   : > { %6021 = vst.msk [vmem:[#allocation2 + $0x170] sm:$0xff] %vm943_vm1, %v5943_v32  ;;  %v6945_v61 = vadd.f32 %v6867_v41, %v6646_v53  ;;  %v11636_v44 = vpop.f32.mrb[242].mxu1  ;;  %12048 = vmatprep.mubr.msk.f32.mxu0 %vm253_vm0, %v8139_v31  ;;  %v5873_v17 = vld [vmem:[#allocation2 + $0x1b0] sm:$0xff]  ;;  %v5875_v31 = vld [vmem:[#allocation2 + $0x1c0] sm:$0xff] }
 0x2cb   : > { %7024 = vst.msk [vmem:[#allocation2 + $0x158] sm:$0xff] %vm943_vm1, %v6946_v37  ;;  %v5946_v62 = vadd.f32 %v11636_v44, %v5868_v29  ;;  %v5670_v34 = vpop.f32.mrb[243].mxu1  ;;  %11927 = vmatmul.mubr.msk.f32.gmra.mrb[92].mxu1 %vm253_vm0, %v7136_v28  ;;  %v5878_v44 = vld [vmem:[#allocation2 + $0x1d8] sm:$0xff] }
 0x2cc   : > { %7023 = vst.msk [vmem:[#allocation2 + $0x150] sm:$0xff] %vm943_vm1, %v6945_v61  ;;  %v5945_v48 = vadd.f32 %v5867_v45, %v5670_v34  ;;  %v6870_v40 = vld [vmem:[#allocation2 + $0x168] sm:$0xff]  ;;  %v11758_v63 = vpop.f32.mrb[242].mxu0 }
 0x2cd   : > { %6024 = vst.msk [vmem:[#allocation2 + $0x188] sm:$0xff] %vm943_vm1, %v5946_v62  ;;  %v6948_v35 = vadd.f32 %v11755_v36, %v6870_v40  ;;  %v6869_v5 = vld [vmem:[#allocation2 + $0x160] sm:$0xff]  ;;  %v6666_v38 = vpop.f32.mrb[243].mxu0  ;;  %12049 = vmatmul.mubr.msk.f32.gmra.mrb[92].mxu0 %vm253_vm0, %v8140_v4  ;;  %v5877_v62 = vld [vmem:[#allocation2 + $0x1d0] sm:$0xff] }
 0x2ce   : > { %6023 = vst.msk [vmem:[#allocation2 + $0x180] sm:$0xff] %vm943_vm1, %v5945_v48  ;;  %v6947_v49 = vadd.f32 %v6869_v5, %v6656_v59  ;;  %v11639_v12 = vpop.f32.mrb[244].mxu1  ;;  %12051 = vmatprep.mubr.msk.f32.mxu0 %vm253_vm0, %v8141_v27 }
 0x2cf   : > { %7026 = vst.msk [vmem:[#allocation2 + $0x168] sm:$0xff] %vm943_vm1, %v6948_v35  ;;  %v5948_v52 = vadd.f32 %v11639_v12, %v5870_v2  ;;  %v5680_v57 = vpop.f32.mrb[245].mxu1  ;;  %v5879_v2 = vld [vmem:[#allocation2 + $0x1e0] sm:$0xff] }
 0x2d0   : > { %7025 = vst.msk [vmem:[#allocation2 + $0x160] sm:$0xff] %vm943_vm1, %v6947_v49  ;;  %v5947_v33 = vadd.f32 %v5869_v42, %v5680_v57  ;;  %v6872_v3 = vld [vmem:[#allocation2 + $0x178] sm:$0xff]  ;;  %v11761_v6 = vpop.f32.mrb[244].mxu0 }
 0x2d1   : > { %6026 = vst.msk [vmem:[#allocation2 + $0x198] sm:$0xff] %vm943_vm1, %v5948_v52  ;;  %v6950_v0 = vadd.f32 %v11758_v63, %v6872_v3  ;;  %v6871_v1 = vld [vmem:[#allocation2 + $0x170] sm:$0xff]  ;;  %v6676_v13 = vpop.f32.mrb[245].mxu0  ;;  %12052 = vmatmul.mubr.msk.f32.gmra.mrb[94].mxu0 %vm253_vm0, %v8142_v51 }
 0x2d2   : > { %6025 = vst.msk [vmem:[#allocation2 + $0x190] sm:$0xff] %vm943_vm1, %v5947_v33  ;;  %v6949_v43 = vadd.f32 %v6871_v1, %v6666_v38  ;;  %v11642_v8 = vpop.f32.mrb[246].mxu1  ;;  %v5880_v38 = vld [vmem:[#allocation2 + $0x1e8] sm:$0xff]  ;;  %v5882_v1 = vld [vmem:[#allocation2 + $0x1f8] sm:$0xff] }
 0x2d3   : > { %7028 = vst.msk [vmem:[#allocation2 + $0x178] sm:$0xff] %vm943_vm1, %v6950_v0  ;;  %v5950_v19 = vadd.f32 %v11642_v8, %v5872_v46  ;;  %v5690_v9 = vpop.f32.mrb[247].mxu1  ;;  %v5881_v8 = vld [vmem:[#allocation2 + $0x1f0] sm:$0xff] }
 0x2d4   : > { %7027 = vst.msk [vmem:[#allocation2 + $0x170] sm:$0xff] %vm943_vm1, %v6949_v43  ;;  %v5949_v10 = vadd.f32 %v5871_v7, %v5690_v9  ;;  %v6874_v39 = vld [vmem:[#allocation2 + $0x188] sm:$0xff]  ;;  %v11764_v47 = vpop.f32.mrb[246].mxu0 }
 0x2d5   : > { %6028 = vst.msk [vmem:[#allocation2 + $0x1a8] sm:$0xff] %vm943_vm1, %v5950_v19  ;;  %v6952_v14 = vadd.f32 %v11761_v6, %v6874_v39  ;;  %v6873_v50 = vld [vmem:[#allocation2 + $0x180] sm:$0xff]  ;;  %v6686_v15 = vpop.f32.mrb[247].mxu0 }
 0x2d6   : > { %6027 = vst.msk [vmem:[#allocation2 + $0x1a0] sm:$0xff] %vm943_vm1, %v5949_v10  ;;  %v6951_v23 = vadd.f32 %v6873_v50, %v6676_v13  ;;  %v11645_v55 = vpop.f32.mrb[248].mxu1  ;;  %v5884_v50 = vld [vmem:[#allocation2 + $0x208] sm:$0xff] }
 0x2d7   : > { %7030 = vst.msk [vmem:[#allocation2 + $0x188] sm:$0xff] %vm943_vm1, %v6952_v14  ;;  %v5952_v30 = vadd.f32 %v11645_v55, %v5874_v11  ;;  %v5700_v20 = vpop.f32.mrb[249].mxu1  ;;  %v5883_v55 = vld [vmem:[#allocation2 + $0x200] sm:$0xff] }
 0x2d8   : > { %7029 = vst.msk [vmem:[#allocation2 + $0x180] sm:$0xff] %vm943_vm1, %v6951_v23  ;;  %v5951_v24 = vadd.f32 %v5873_v17, %v5700_v20  ;;  %v6876_v25 = vld [vmem:[#allocation2 + $0x198] sm:$0xff]  ;;  %v11767_v53 = vpop.f32.mrb[248].mxu0 }
 0x2d9   : > { %6030 = vst.msk [vmem:[#allocation2 + $0x1b8] sm:$0xff] %vm943_vm1, %v5952_v30  ;;  %v6954_v26 = vadd.f32 %v11764_v47, %v6876_v25  ;;  %v6875_v56 = vld [vmem:[#allocation2 + $0x190] sm:$0xff]  ;;  %v6696_v18 = vpop.f32.mrb[249].mxu0 }
 0x2da   : > { %6029 = vst.msk [vmem:[#allocation2 + $0x1b0] sm:$0xff] %vm943_vm1, %v5951_v24  ;;  %v6953_v21 = vadd.f32 %v6875_v56, %v6686_v15  ;;  %v11648_v16 = vpop.f32.mrb[250].mxu1  ;;  %v5886_v56 = vld [vmem:[#allocation2 + $0x218] sm:$0xff] }
 0x2db   : > { %7032 = vst.msk [vmem:[#allocation2 + $0x198] sm:$0xff] %vm943_vm1, %v6954_v26  ;;  %v5954_v60 = vadd.f32 %v11648_v16, %v5876_v54  ;;  %v5710_v58 = vpop.f32.mrb[251].mxu1  ;;  %v5885_v16 = vld [vmem:[#allocation2 + $0x210] sm:$0xff] }
 0x2dc   : > { %7031 = vst.msk [vmem:[#allocation2 + $0x190] sm:$0xff] %vm943_vm1, %v6953_v21  ;;  %v5953_v32 = vadd.f32 %v5875_v31, %v5710_v58  ;;  %v6878_v22 = vld [vmem:[#allocation2 + $0x1a8] sm:$0xff]  ;;  %v11770_v28 = vpop.f32.mrb[250].mxu0 }
 0x2dd   : > { %6032 = vst.msk [vmem:[#allocation2 + $0x1c8] sm:$0xff] %vm943_vm1, %v5954_v60  ;;  %v6956_v36 = vadd.f32 %v11767_v53, %v6878_v22  ;;  %v6877_v37 = vld [vmem:[#allocation2 + $0x1a0] sm:$0xff]  ;;  %v6706_v41 = vpop.f32.mrb[251].mxu0 }
 0x2de   : > { %6031 = vst.msk [vmem:[#allocation2 + $0x1c0] sm:$0xff] %vm943_vm1, %v5953_v32  ;;  %v6955_v59 = vadd.f32 %v6877_v37, %v6696_v18  ;;  %v11651_v61 = vpop.f32.mrb[252].mxu1  ;;  %v5888_v37 = vld [vmem:[#allocation2 + $0x228] sm:$0xff] }
 0x2df   : > { %7034 = vst.msk [vmem:[#allocation2 + $0x1a8] sm:$0xff] %vm943_vm1, %v6956_v36  ;;  %v5956_v29 = vadd.f32 %v11651_v61, %v5878_v44  ;;  %v5720_v4 = vpop.f32.mrb[253].mxu1  ;;  %v5887_v61 = vld [vmem:[#allocation2 + $0x220] sm:$0xff] }
 0x2e0   : > { %7033 = vst.msk [vmem:[#allocation2 + $0x1a0] sm:$0xff] %vm943_vm1, %v6955_v59  ;;  %v5955_v34 = vadd.f32 %v5877_v62, %v5720_v4  ;;  %v6880_v45 = vld [vmem:[#allocation2 + $0x1b8] sm:$0xff]  ;;  %v11773_v27 = vpop.f32.mrb[252].mxu0 }
 0x2e1   : > { %6034 = vst.msk [vmem:[#allocation2 + $0x1d8] sm:$0xff] %vm943_vm1, %v5956_v29  ;;  %v6958_v48 = vadd.f32 %v11770_v28, %v6880_v45  ;;  %v6879_v40 = vld [vmem:[#allocation2 + $0x1b0] sm:$0xff]  ;;  %v6716_v63 = vpop.f32.mrb[253].mxu0 }
 0x2e2   : > { %6033 = vst.msk [vmem:[#allocation2 + $0x1d0] sm:$0xff] %vm943_vm1, %v5955_v34  ;;  %v6957_v35 = vadd.f32 %v6879_v40, %v6706_v41  ;;  %v11654_v5 = vpop.f32.mrb[254].mxu1  ;;  %v5890_v40 = vld [vmem:[#allocation2 + $0x238] sm:$0xff] }
 0x2e3   : > { %7036 = vst.msk [vmem:[#allocation2 + $0x1b8] sm:$0xff] %vm943_vm1, %v6958_v48  ;;  %v5958_v49 = vadd.f32 %v11654_v5, %v5880_v38  ;;  %v5730_v12 = vpop.f32.mrb[255].mxu1  ;;  %v5889_v5 = vld [vmem:[#allocation2 + $0x230] sm:$0xff] }
 0x2e4   : > { %7035 = vst.msk [vmem:[#allocation2 + $0x1b0] sm:$0xff] %vm943_vm1, %v6957_v35  ;;  %v5957_v51 = vadd.f32 %v5879_v2, %v5730_v12  ;;  %v6882_v52 = vld [vmem:[#allocation2 + $0x1c8] sm:$0xff]  ;;  %v11776_v57 = vpop.f32.mrb[254].mxu0 }
 0x2e5   : > { %6036 = vst.msk [vmem:[#allocation2 + $0x1e8] sm:$0xff] %vm943_vm1, %v5958_v49  ;;  %v6960_v42 = vadd.f32 %v11773_v27, %v6882_v52  ;;  %v6881_v33 = vld [vmem:[#allocation2 + $0x1c0] sm:$0xff]  ;;  %v6726_v3 = vpop.f32.mrb[255].mxu0 }
 0x2e6   : > { %6035 = vst.msk [vmem:[#allocation2 + $0x1e0] sm:$0xff] %vm943_vm1, %v5957_v51  ;;  %v6959_v6 = vadd.f32 %v6881_v33, %v6716_v63  ;;  %v11657_v0 = vpop.f32.mrb[0].mxu1  ;;  %v5892_v33 = vld [vmem:[#allocation2 + $0x248] sm:$0xff] }
 0x2e7   : > { %7038 = vst.msk [vmem:[#allocation2 + $0x1c8] sm:$0xff] %vm943_vm1, %v6960_v42  ;;  %v5960_v13 = vadd.f32 %v11657_v0, %v5882_v1  ;;  %v5740_v43 = vpop.f32.mrb[1].mxu1  ;;  %v5891_v0 = vld [vmem:[#allocation2 + $0x240] sm:$0xff] }
 0x2e8   : > { %7037 = vst.msk [vmem:[#allocation2 + $0x1c0] sm:$0xff] %vm943_vm1, %v6959_v6  ;;  %v5959_v46 = vadd.f32 %v5881_v8, %v5740_v43  ;;  %v6884_v19 = vld [vmem:[#allocation2 + $0x1d8] sm:$0xff]  ;;  %v11779_v9 = vpop.f32.mrb[0].mxu0 }
 0x2e9   : > { %6038 = vst.msk [vmem:[#allocation2 + $0x1f8] sm:$0xff] %vm943_vm1, %v5960_v13  ;;  %v6962_v7 = vadd.f32 %v11776_v57, %v6884_v19  ;;  %v6883_v10 = vld [vmem:[#allocation2 + $0x1d0] sm:$0xff]  ;;  %v6736_v39 = vpop.f32.mrb[1].mxu0 }
 0x2ea   : > { %6037 = vst.msk [vmem:[#allocation2 + $0x1f0] sm:$0xff] %vm943_vm1, %v5959_v46  ;;  %v6961_v47 = vadd.f32 %v6883_v10, %v6726_v3  ;;  %v11660_v14 = vpop.f32.mrb[2].mxu1  ;;  %v5894_v10 = vld [vmem:[#allocation2 + $0x258] sm:$0xff] }
 0x2eb   : > { %7040 = vst.msk [vmem:[#allocation2 + $0x1d8] sm:$0xff] %vm943_vm1, %v6962_v7  ;;  %v5962_v15 = vadd.f32 %v11660_v14, %v5884_v50  ;;  %v5750_v23 = vpop.f32.mrb[3].mxu1  ;;  %v5893_v14 = vld [vmem:[#allocation2 + $0x250] sm:$0xff] }
 0x2ec   : > { %7039 = vst.msk [vmem:[#allocation2 + $0x1d0] sm:$0xff] %vm943_vm1, %v6961_v47  ;;  %v5961_v11 = vadd.f32 %v5883_v55, %v5750_v23  ;;  %v6886_v30 = vld [vmem:[#allocation2 + $0x1e8] sm:$0xff]  ;;  %v11782_v20 = vpop.f32.mrb[2].mxu0 }
 0x2ed   : > { %6040 = vst.msk [vmem:[#allocation2 + $0x208] sm:$0xff] %vm943_vm1, %v5962_v15  ;;  %v6964_v17 = vadd.f32 %v11779_v9, %v6886_v30  ;;  %v6885_v24 = vld [vmem:[#allocation2 + $0x1e0] sm:$0xff]  ;;  %v6746_v25 = vpop.f32.mrb[3].mxu0 }
 0x2ee   : > { %6039 = vst.msk [vmem:[#allocation2 + $0x200] sm:$0xff] %vm943_vm1, %v5961_v11  ;;  %v6963_v53 = vadd.f32 %v6885_v24, %v6736_v39  ;;  %v11663_v26 = vpop.f32.mrb[4].mxu1  ;;  %v5896_v24 = vld [vmem:[#allocation2 + $0x268] sm:$0x3f] }
 0x2ef   : > { %7042 = vst.msk [vmem:[#allocation2 + $0x1e8] sm:$0xff] %vm943_vm1, %v6964_v17  ;;  %v5964_v18 = vadd.f32 %v11663_v26, %v5886_v56  ;;  %v5760_v21 = vpop.f32.mrb[5].mxu1  ;;  %v5895_v26 = vld [vmem:[#allocation2 + $0x260] sm:$0xff] }
 0x2f0   : > { %7041 = vst.msk [vmem:[#allocation2 + $0x1e0] sm:$0xff] %vm943_vm1, %v6963_v53  ;;  %v5963_v54 = vadd.f32 %v5885_v16, %v5760_v21  ;;  %v6888_v60 = vld [vmem:[#allocation2 + $0x1f8] sm:$0xff]  ;;  %v11785_v58 = vpop.f32.mrb[4].mxu0 }
 0x2f1   : > { %6042 = vst.msk [vmem:[#allocation2 + $0x218] sm:$0xff] %vm943_vm1, %v5964_v18  ;;  %v6966_v31 = vadd.f32 %v11782_v20, %v6888_v60  ;;  %v6887_v32 = vld [vmem:[#allocation2 + $0x1f0] sm:$0xff]  ;;  %v6756_v22 = vpop.f32.mrb[5].mxu0 }
 0x2f2   : > { %6041 = vst.msk [vmem:[#allocation2 + $0x210] sm:$0xff] %vm943_vm1, %v5963_v54  ;;  %v6965_v28 = vadd.f32 %v6887_v32, %v6746_v25  ;;  %v11666_v36 = vpop.f32.mrb[6].mxu1  ;;  %v7832_v32 = vld [vmem:[#allocation2 + $0x8] sm:$0xff] }
 0x2f3   : > { %7044 = vst.msk [vmem:[#allocation2 + $0x1f8] sm:$0xff] %vm943_vm1, %v6966_v31  ;;  %v5966_v41 = vadd.f32 %v11666_v36, %v5888_v37  ;;  %v5770_v59 = vpop.f32.mrb[7].mxu1  ;;  %v7831_v36 = vld [vmem:[#allocation2] sm:$0xff] }
 0x2f4   : > { %7043 = vst.msk [vmem:[#allocation2 + $0x1f0] sm:$0xff] %vm943_vm1, %v6965_v28  ;;  %v5965_v44 = vadd.f32 %v5887_v61, %v5770_v59  ;;  %v6890_v29 = vld [vmem:[#allocation2 + $0x208] sm:$0xff]  ;;  %v11788_v4 = vpop.f32.mrb[6].mxu0 }
 0x2f5   : > { %6044 = vst.msk [vmem:[#allocation2 + $0x228] sm:$0xff] %vm943_vm1, %v5966_v41  ;;  %v6968_v62 = vadd.f32 %v11785_v58, %v6890_v29  ;;  %v6889_v34 = vld [vmem:[#allocation2 + $0x200] sm:$0xff]  ;;  %v6766_v45 = vpop.f32.mrb[7].mxu0 }
 0x2f6   : > { %6043 = vst.msk [vmem:[#allocation2 + $0x220] sm:$0xff] %vm943_vm1, %v5965_v44  ;;  %v6967_v27 = vadd.f32 %v6889_v34, %v6756_v22  ;;  %v11669_v48 = vpop.f32.mrb[8].mxu1  ;;  %v7834_v34 = vld [vmem:[#allocation2 + $0x18] sm:$0xff] }
 0x2f7   : > { %7046 = vst.msk [vmem:[#allocation2 + $0x208] sm:$0xff] %vm943_vm1, %v6968_v62  ;;  %v5968_v63 = vadd.f32 %v11669_v48, %v5890_v40  ;;  %v5780_v35 = vpop.f32.mrb[9].mxu1  ;;  %v7833_v48 = vld [vmem:[#allocation2 + $0x10] sm:$0xff] }
 0x2f8   : > { %7045 = vst.msk [vmem:[#allocation2 + $0x200] sm:$0xff] %vm943_vm1, %v6967_v27  ;;  %v5967_v38 = vadd.f32 %v5889_v5, %v5780_v35  ;;  %v6892_v49 = vld [vmem:[#allocation2 + $0x218] sm:$0xff]  ;;  %v11791_v12 = vpop.f32.mrb[8].mxu0 }
 0x2f9   : > { %6046 = vst.msk [vmem:[#allocation2 + $0x238] sm:$0xff] %vm943_vm1, %v5968_v63  ;;  %v6970_v2 = vadd.f32 %v11788_v4, %v6892_v49  ;;  %v6891_v51 = vld [vmem:[#allocation2 + $0x210] sm:$0xff]  ;;  %v6776_v52 = vpop.f32.mrb[9].mxu0 }
 0x2fa   : > { %6045 = vst.msk [vmem:[#allocation2 + $0x230] sm:$0xff] %vm943_vm1, %v5967_v38  ;;  %v6969_v57 = vadd.f32 %v6891_v51, %v6766_v45  ;;  %v11672_v42 = vpop.f32.mrb[10].mxu1  ;;  %v7836_v51 = vld [vmem:[#allocation2 + $0x28] sm:$0xff] }
 0x2fb   : > { %7048 = vst.msk [vmem:[#allocation2 + $0x218] sm:$0xff] %vm943_vm1, %v6970_v2  ;;  %v5970_v3 = vadd.f32 %v11672_v42, %v5892_v33  ;;  %v5790_v6 = vpop.f32.mrb[11].mxu1  ;;  %v7835_v42 = vld [vmem:[#allocation2 + $0x20] sm:$0xff] }
 0x2fc   : > { %7047 = vst.msk [vmem:[#allocation2 + $0x210] sm:$0xff] %vm943_vm1, %v6969_v57  ;;  %v5969_v1 = vadd.f32 %v5891_v0, %v5790_v6  ;;  %v6894_v13 = vld [vmem:[#allocation2 + $0x228] sm:$0xff]  ;;  %v11794_v43 = vpop.f32.mrb[10].mxu0 }
 0x2fd   : > { %6048 = vst.msk [vmem:[#allocation2 + $0x248] sm:$0xff] %vm943_vm1, %v5970_v3  ;;  %v6972_v8 = vadd.f32 %v11791_v12, %v6894_v13  ;;  %v6893_v46 = vld [vmem:[#allocation2 + $0x220] sm:$0xff]  ;;  %v6786_v19 = vpop.f32.mrb[11].mxu0 }
 0x2fe   : > { %6047 = vst.msk [vmem:[#allocation2 + $0x240] sm:$0xff] %vm943_vm1, %v5969_v1  ;;  %v6971_v9 = vadd.f32 %v6893_v46, %v6776_v52  ;;  %v11675_v7 = vpop.f32.mrb[12].mxu1  ;;  %v7838_v46 = vld [vmem:[#allocation2 + $0x38] sm:$0xff] }
 0x2ff   : > { %7050 = vst.msk [vmem:[#allocation2 + $0x228] sm:$0xff] %vm943_vm1, %v6972_v8  ;;  %v5972_v39 = vadd.f32 %v11675_v7, %v5894_v10  ;;  %v5800_v47 = vpop.f32.mrb[13].mxu1  ;;  %v7837_v7 = vld [vmem:[#allocation2 + $0x30] sm:$0xff] }
 0x300   : > { %7049 = vst.msk [vmem:[#allocation2 + $0x220] sm:$0xff] %vm943_vm1, %v6971_v9  ;;  %v5971_v50 = vadd.f32 %v5893_v14, %v5800_v47  ;;  %v6896_v15 = vld [vmem:[#allocation2 + $0x238] sm:$0xff]  ;;  %v11797_v23 = vpop.f32.mrb[12].mxu0 }
 0x301   : > { %6050 = vst.msk [vmem:[#allocation2 + $0x258] sm:$0xff] %vm943_vm1, %v5972_v39  ;;  %v6974_v55 = vadd.f32 %v11794_v43, %v6896_v15  ;;  %v6895_v11 = vld [vmem:[#allocation2 + $0x230] sm:$0xff]  ;;  %v6796_v30 = vpop.f32.mrb[13].mxu0 }
 0x302   : > { %6049 = vst.msk [vmem:[#allocation2 + $0x250] sm:$0xff] %vm943_vm1, %v5971_v50  ;;  %v6973_v20 = vadd.f32 %v6895_v11, %v6786_v19  ;;  %v11678_v17 = vpop.f32.mrb[14].mxu1  ;;  %v7840_v11 = vld [vmem:[#allocation2 + $0x48] sm:$0xff] }
 0x303   : > { %7052 = vst.msk [vmem:[#allocation2 + $0x238] sm:$0xff] %vm943_vm1, %v6974_v55  ;;  %v5974_v25 = vadd.f32 %v11678_v17, %v5896_v24  ;;  %v5810_v53 = vpop.f32.mrb[15].mxu1  ;;  %v7839_v17 = vld [vmem:[#allocation2 + $0x40] sm:$0xff] }
 0x304   : > { %7051 = vst.msk [vmem:[#allocation2 + $0x230] sm:$0xff] %vm943_vm1, %v6973_v20  ;;  %v5973_v56 = vadd.f32 %v5895_v26, %v5810_v53  ;;  %v6898_v18 = vld [vmem:[#allocation2 + $0x248] sm:$0xff]  ;;  %v11800_v21 = vpop.f32.mrb[14].mxu0  ;;  %v14324_v24 = vld [vmem:[%s14721_s2] ss:$0 sm:$0xff] }
 0x305   : > { %6052 = vst.msk [vmem:[#allocation2 + $0x268] sm:$0x3f] %vm1021_vm2, %v5974_v25  ;;  %v6976_v16 = vadd.f32 %v11797_v23, %v6898_v18  ;;  %v6897_v54 = vld [vmem:[#allocation2 + $0x240] sm:$0xff]  ;;  %v6806_v60 = vpop.f32.mrb[15].mxu0 }
 0x306   : > { %6051 = vst.msk [vmem:[#allocation2 + $0x260] sm:$0xff] %vm943_vm1, %v5973_v56  ;;  %v6975_v58 = vadd.f32 %v6897_v54, %v6796_v30  ;;  %v11814_v31 = vpop.f32.mrb[16].mxu1 }
 0x307   : > { %7054 = vst.msk [vmem:[#allocation2 + $0x248] sm:$0xff] %vm943_vm1, %v6976_v16  ;;  %v7910_v22 = vadd.f32 %v11814_v31, %v7832_v32  ;;  %v7442_v28 = vpop.f32.mrb[17].mxu1 }
 0x308   : > { %7053 = vst.msk [vmem:[#allocation2 + $0x240] sm:$0xff] %vm943_vm1, %v6975_v58  ;;  %v7909_v37 = vadd.f32 %v7831_v36, %v7442_v28  ;;  %v6900_v41 = vld [vmem:[#allocation2 + $0x258] sm:$0xff]  ;;  %v11803_v59 = vpop.f32.mrb[16].mxu0  ;;  %v7841_v36 = vld [vmem:[#allocation2 + $0x50] sm:$0xff] }
 0x309   : > { %7988 = vst.msk [vmem:[#allocation2 + $0x8] sm:$0xff] %vm943_vm1, %v7910_v22  ;;  %v6978_v61 = vadd.f32 %v11800_v21, %v6900_v41  ;;  %v6899_v44 = vld [vmem:[#allocation2 + $0x250] sm:$0xff]  ;;  %v6816_v29 = vpop.f32.mrb[17].mxu0  ;;  %v7842_v58 = vld [vmem:[#allocation2 + $0x58] sm:$0xff] }
 0x30a   : > { %7987 = vst.msk [vmem:[#allocation2] sm:$0xff] %vm943_vm1, %v7909_v37  ;;  %v6977_v4 = vadd.f32 %v6899_v44, %v6806_v60  ;;  %v11817_v62 = vpop.f32.mrb[18].mxu1 }
 0x30b   : > { %7056 = vst.msk [vmem:[#allocation2 + $0x258] sm:$0xff] %vm943_vm1, %v6978_v61  ;;  %v7912_v45 = vadd.f32 %v11817_v62, %v7834_v34  ;;  %v7452_v27 = vpop.f32.mrb[19].mxu1 }
 0x30c   : > { %7055 = vst.msk [vmem:[#allocation2 + $0x250] sm:$0xff] %vm943_vm1, %v6977_v4  ;;  %v7911_v40 = vadd.f32 %v7833_v48, %v7452_v27  ;;  %v6902_v63 = vld [vmem:[#allocation2 + $0x268] sm:$0x3f]  ;;  %v11939_v35 = vpop.f32.mrb[18].mxu0 }
 0x30d   : > { %7990 = vst.msk [vmem:[#allocation2 + $0x18] sm:$0xff] %vm943_vm1, %v7912_v45  ;;  %v6980_v5 = vadd.f32 %v11803_v59, %v6902_v63  ;;  %v6901_v38 = vld [vmem:[#allocation2 + $0x260] sm:$0xff]  ;;  %v8448_v49 = vpop.f32.mrb[19].mxu0 }
 0x30e   : > { %7989 = vst.msk [vmem:[#allocation2 + $0x10] sm:$0xff] %vm943_vm1, %v7911_v40  ;;  %v6979_v12 = vadd.f32 %v6901_v38, %v6816_v29  ;;  %v11820_v2 = vpop.f32.mrb[20].mxu1  ;;  %v7844_v40 = vld [vmem:[#allocation2 + $0x68] sm:$0xff] }
 0x30f   : > { %7058 = vst.msk [vmem:[#allocation2 + $0x268] sm:$0x3f] %vm1021_vm2, %v6980_v5  ;;  %v7914_v52 = vadd.f32 %v11820_v2, %v7836_v51  ;;  %v7462_v57 = vpop.f32.mrb[21].mxu1 }
 0x310   : > { %7057 = vst.msk [vmem:[#allocation2 + $0x260] sm:$0xff] %vm943_vm1, %v6979_v12  ;;  %v7913_v33 = vadd.f32 %v7835_v42, %v7462_v57  ;;  %v8838_v3 = vld [vmem:[#allocation2 + $0x8] sm:$0xff]  ;;  %v11942_v6 = vpop.f32.mrb[20].mxu0 }
 0x311   : > { %7992 = vst.msk [vmem:[#allocation2 + $0x28] sm:$0xff] %vm943_vm1, %v7914_v52  ;;  %v8916_v0 = vadd.f32 %v11939_v35, %v8838_v3  ;;  %v8837_v1 = vld [vmem:[#allocation2] sm:$0xff]  ;;  %v8458_v13 = vpop.f32.mrb[21].mxu0 }
 0x312   : > { %7991 = vst.msk [vmem:[#allocation2 + $0x20] sm:$0xff] %vm943_vm1, %v7913_v33  ;;  %v8915_v43 = vadd.f32 %v8837_v1, %v8448_v49  ;;  %v11823_v8 = vpop.f32.mrb[22].mxu1  ;;  %v7843_v49 = vld [vmem:[#allocation2 + $0x60] sm:$0xff] }
 0x313   : > { %8994 = vst.msk [vmem:[#allocation2 + $0x8] sm:$0xff] %vm943_vm1, %v8916_v0  ;;  %v7916_v19 = vadd.f32 %v11823_v8, %v7838_v46  ;;  %v7472_v9 = vpop.f32.mrb[23].mxu1 }
 0x314   : > { %8993 = vst.msk [vmem:[#allocation2] sm:$0xff] %vm943_vm1, %v8915_v43  ;;  %v7915_v10 = vadd.f32 %v7837_v7, %v7472_v9  ;;  %v8840_v39 = vld [vmem:[#allocation2 + $0x18] sm:$0xff]  ;;  %v11945_v47 = vpop.f32.mrb[22].mxu0  ;;  %v7845_v7 = vld [vmem:[#allocation2 + $0x70] sm:$0xff] }
 0x315   : > { %7994 = vst.msk [vmem:[#allocation2 + $0x38] sm:$0xff] %vm943_vm1, %v7916_v19  ;;  %v8918_v14 = vadd.f32 %v11942_v6, %v8840_v39  ;;  %v8839_v50 = vld [vmem:[#allocation2 + $0x10] sm:$0xff]  ;;  %v8468_v15 = vpop.f32.mrb[23].mxu0  ;;  %v7846_v43 = vld [vmem:[#allocation2 + $0x78] sm:$0xff] }
 0x316   : > { %7993 = vst.msk [vmem:[#allocation2 + $0x30] sm:$0xff] %vm943_vm1, %v7915_v10  ;;  %v8917_v23 = vadd.f32 %v8839_v50, %v8458_v13  ;;  %v11826_v55 = vpop.f32.mrb[24].mxu1 }
 0x317   : > { %8996 = vst.msk [vmem:[#allocation2 + $0x18] sm:$0xff] %vm943_vm1, %v8918_v14  ;;  %v7918_v30 = vadd.f32 %v11826_v55, %v7840_v11  ;;  %v7482_v20 = vpop.f32.mrb[25].mxu1 }
 0x318   : > { %8995 = vst.msk [vmem:[#allocation2 + $0x10] sm:$0xff] %vm943_vm1, %v8917_v23  ;;  %v7917_v25 = vadd.f32 %v7839_v17, %v7482_v20  ;;  %v8842_v53 = vld [vmem:[#allocation2 + $0x28] sm:$0xff]  ;;  %v11948_v26 = vpop.f32.mrb[24].mxu0 }
 0x319   : > { %7996 = vst.msk [vmem:[#allocation2 + $0x48] sm:$0xff] %vm943_vm1, %v7918_v30  ;;  %v8920_v56 = vadd.f32 %v11945_v47, %v8842_v53  ;;  %v8841_v18 = vld [vmem:[#allocation2 + $0x20] sm:$0xff]  ;;  %v8478_v21 = vpop.f32.mrb[25].mxu0 }
 0x31a   : > { %v9072_v16 = vld [vmem:[#allocation2 + $0x8] sm:$0xff]  ;;  %7995 = vst.msk [vmem:[#allocation2 + $0x40] sm:$0xff] %vm943_vm1, %v7917_v25  ;;  %v8919_v54 = vadd.f32 %v8841_v18, %v8468_v15  ;;  %v11829_v60 = vpop.f32.mrb[26].mxu1 }
 0x31b   : > { %v9157_v31 = vadd.f32 %v14324_v24, %v9072_v16  ;;  %v9071_v32 = vld [vmem:[#allocation2] sm:$0xff]  ;;  %8998 = vst.msk [vmem:[#allocation2 + $0x28] sm:$0xff] %vm943_vm1, %v8920_v56  ;;  %v7920_v22 = vadd.f32 %v11829_v60, %v7842_v58  ;;  %v7492_v28 = vpop.f32.mrb[27].mxu1  ;;  %v7848_v25 = vld [vmem:[#allocation2 + $0x88] sm:$0xff] }
 0x31c   : > { %v9156_v37 = vadd.f32 %v14324_v24, %v9071_v32  ;;  %8997 = vst.msk [vmem:[#allocation2 + $0x20] sm:$0xff] %vm943_vm1, %v8919_v54  ;;  %v7919_v41 = vadd.f32 %v7841_v36, %v7492_v28  ;;  %v8844_v59 = vld [vmem:[#allocation2 + $0x38] sm:$0xff]  ;;  %v11951_v61 = vpop.f32.mrb[26].mxu0 }
 0x31d   : > { %v9235_v44 = vmax.f32 %v9157_v31, 0.0  ;;  %7998 = vst.msk [vmem:[#allocation2 + $0x58] sm:$0xff] %vm943_vm1, %v7920_v22  ;;  %v8922_v29 = vadd.f32 %v11948_v26, %v8844_v59  ;;  %v8843_v4 = vld [vmem:[#allocation2 + $0x30] sm:$0xff]  ;;  %v8488_v62 = vpop.f32.mrb[27].mxu0 }
 0x31e   : > { %v9234_v34 = vmax.f32 %v9156_v37, 0.0  ;;  %v9074_v45 = vld [vmem:[#allocation2 + $0x18] sm:$0xff]  ;;  %7997 = vst.msk [vmem:[#allocation2 + $0x50] sm:$0xff] %vm943_vm1, %v7919_v41  ;;  %v8921_v27 = vadd.f32 %v8843_v4, %v8478_v21  ;;  %v11832_v48 = vpop.f32.mrb[28].mxu1  ;;  %v7847_v21 = vld [vmem:[#allocation2 + $0x80] sm:$0xff] }
 0x31f   : > { %9313 = vst.msk [vmem:[%s14334_s20 + $0x8] sm:$0xff] %vm943_vm1, %v9235_v44  ;;  %v9159_v63 = vadd.f32 %v14324_v24, %v9074_v45  ;;  %v9073_v35 = vld [vmem:[#allocation2 + $0x10] sm:$0xff]  ;;  %9000 = vst.msk [vmem:[#allocation2 + $0x38] sm:$0xff] %vm943_vm1, %v8922_v29  ;;  %v7922_v5 = vadd.f32 %v11832_v48, %v7844_v40  ;;  %v7502_v38 = vpop.f32.mrb[29].mxu1 }
 0x320   : > { %9312 = vst.msk [vmem:[%s14334_s20] sm:$0xff] %vm943_vm1, %v9234_v34  ;;  %v9158_v12 = vadd.f32 %v14324_v24, %v9073_v35  ;;  %8999 = vst.msk [vmem:[#allocation2 + $0x30] sm:$0xff] %vm943_vm1, %v8921_v27  ;;  %v7921_v2 = vadd.f32 %v7843_v49, %v7502_v38  ;;  %v8846_v51 = vld [vmem:[#allocation2 + $0x48] sm:$0xff]  ;;  %v11954_v52 = vpop.f32.mrb[28].mxu0  ;;  %v7849_v34 = vld [vmem:[#allocation2 + $0x90] sm:$0xff] }
 0x321   : > { %v9237_v57 = vmax.f32 %v9159_v63, 0.0  ;;  %8000 = vst.msk [vmem:[#allocation2 + $0x68] sm:$0xff] %vm943_vm1, %v7922_v5  ;;  %v8924_v42 = vadd.f32 %v11951_v61, %v8846_v51  ;;  %v8845_v33 = vld [vmem:[#allocation2 + $0x40] sm:$0xff]  ;;  %v8498_v3 = vpop.f32.mrb[29].mxu0  ;;  %v7850_v61 = vld [vmem:[#allocation2 + $0x98] sm:$0xff] }
 0x322   : > { %v9236_v6 = vmax.f32 %v9158_v12, 0.0  ;;  %v9076_v0 = vld [vmem:[#allocation2 + $0x28] sm:$0xff]  ;;  %7999 = vst.msk [vmem:[#allocation2 + $0x60] sm:$0xff] %vm943_vm1, %v7921_v2  ;;  %v8923_v1 = vadd.f32 %v8845_v33, %v8488_v62  ;;  %v11835_v13 = vpop.f32.mrb[30].mxu1 }
 0x323   : > { %9315 = vst.msk [vmem:[%s14334_s20 + $0x18] sm:$0xff] %vm943_vm1, %v9237_v57  ;;  %v9161_v8 = vadd.f32 %v14324_v24, %v9076_v0  ;;  %v9075_v46 = vld [vmem:[#allocation2 + $0x20] sm:$0xff]  ;;  %9002 = vst.msk [vmem:[#allocation2 + $0x48] sm:$0xff] %vm943_vm1, %v8924_v42  ;;  %v7924_v19 = vadd.f32 %v11835_v13, %v7846_v43  ;;  %v7512_v9 = vpop.f32.mrb[31].mxu1 }
 0x324   : > { %9314 = vst.msk [vmem:[%s14334_s20 + $0x10] sm:$0xff] %vm943_vm1, %v9236_v6  ;;  %v9160_v10 = vadd.f32 %v14324_v24, %v9075_v46  ;;  %9001 = vst.msk [vmem:[#allocation2 + $0x40] sm:$0xff] %vm943_vm1, %v8923_v1  ;;  %v7923_v39 = vadd.f32 %v7845_v7, %v7512_v9  ;;  %v8848_v47 = vld [vmem:[#allocation2 + $0x58] sm:$0xff]  ;;  %v11957_v14 = vpop.f32.mrb[30].mxu0  ;;  %v7851_v6 = vld [vmem:[#allocation2 + $0xa0] sm:$0xff] }
 0x325   : > { %v9239_v50 = vmax.f32 %v9161_v8, 0.0  ;;  %8002 = vst.msk [vmem:[#allocation2 + $0x78] sm:$0xff] %vm943_vm1, %v7924_v19  ;;  %v8926_v15 = vadd.f32 %v11954_v52, %v8848_v47  ;;  %v8847_v23 = vld [vmem:[#allocation2 + $0x50] sm:$0xff]  ;;  %v8508_v55 = vpop.f32.mrb[31].mxu0  ;;  %v7852_v52 = vld [vmem:[#allocation2 + $0xa8] sm:$0xff] }
 0x326   : > { %v9238_v11 = vmax.f32 %v9160_v10, 0.0  ;;  %v9078_v30 = vld [vmem:[#allocation2 + $0x38] sm:$0xff]  ;;  %8001 = vst.msk [vmem:[#allocation2 + $0x70] sm:$0xff] %vm943_vm1, %v7923_v39  ;;  %v8925_v20 = vadd.f32 %v8847_v23, %v8498_v3  ;;  %v11838_v17 = vpop.f32.mrb[32].mxu1 }
 0x327   : > { %9317 = vst.msk [vmem:[%s14334_s20 + $0x28] sm:$0xff] %vm943_vm1, %v9239_v50  ;;  %v9163_v53 = vadd.f32 %v14324_v24, %v9078_v30  ;;  %v9077_v26 = vld [vmem:[#allocation2 + $0x30] sm:$0xff]  ;;  %9004 = vst.msk [vmem:[#allocation2 + $0x58] sm:$0xff] %vm943_vm1, %v8926_v15  ;;  %v7926_v56 = vadd.f32 %v11838_v17, %v7848_v25  ;;  %v7522_v18 = vpop.f32.mrb[33].mxu1 }
 0x328   : > { %9316 = vst.msk [vmem:[%s14334_s20 + $0x20] sm:$0xff] %vm943_vm1, %v9238_v11  ;;  %v9162_v16 = vadd.f32 %v14324_v24, %v9077_v26  ;;  %9003 = vst.msk [vmem:[#allocation2 + $0x50] sm:$0xff] %vm943_vm1, %v8925_v20  ;;  %v7925_v54 = vadd.f32 %v7847_v21, %v7522_v18  ;;  %v8850_v60 = vld [vmem:[#allocation2 + $0x68] sm:$0xff]  ;;  %v11960_v58 = vpop.f32.mrb[32].mxu0  ;;  %v7853_v11 = vld [vmem:[#allocation2 + $0xb0] sm:$0xff] }
 0x329   : > { %v9241_v31 = vmax.f32 %v9163_v53, 0.0  ;;  %8004 = vst.msk [vmem:[#allocation2 + $0x88] sm:$0xff] %vm943_vm1, %v7926_v56  ;;  %v8928_v32 = vadd.f32 %v11957_v14, %v8850_v60  ;;  %v8849_v22 = vld [vmem:[#allocation2 + $0x60] sm:$0xff]  ;;  %v8518_v28 = vpop.f32.mrb[33].mxu0  ;;  %v7854_v14 = vld [vmem:[#allocation2 + $0xb8] sm:$0xff] }
 0x32a   : > { %v9240_v36 = vmax.f32 %v9162_v16, 0.0  ;;  %v9080_v37 = vld [vmem:[#allocation2 + $0x48] sm:$0xff]  ;;  %8003 = vst.msk [vmem:[#allocation2 + $0x80] sm:$0xff] %vm943_vm1, %v7925_v54  ;;  %v8927_v41 = vadd.f32 %v8849_v22, %v8508_v55  ;;  %v11841_v59 = vpop.f32.mrb[34].mxu1 }
 0x32b   : > { %9319 = vst.msk [vmem:[%s14334_s20 + $0x38] sm:$0xff] %vm943_vm1, %v9241_v31  ;;  %v9165_v44 = vadd.f32 %v14324_v24, %v9080_v37  ;;  %v9079_v29 = vld [vmem:[#allocation2 + $0x40] sm:$0xff]  ;;  %9006 = vst.msk [vmem:[#allocation2 + $0x68] sm:$0xff] %vm943_vm1, %v8928_v32  ;;  %v7928_v4 = vadd.f32 %v11841_v59, %v7850_v61  ;;  %v7532_v62 = vpop.f32.mrb[35].mxu1 }
 0x32c   : > { %9318 = vst.msk [vmem:[%s14334_s20 + $0x30] sm:$0xff] %vm943_vm1, %v9240_v36  ;;  %v9164_v45 = vadd.f32 %v14324_v24, %v9079_v29  ;;  %9005 = vst.msk [vmem:[#allocation2 + $0x60] sm:$0xff] %vm943_vm1, %v8927_v41  ;;  %v7927_v27 = vadd.f32 %v7849_v34, %v7532_v62  ;;  %v8852_v48 = vld [vmem:[#allocation2 + $0x78] sm:$0xff]  ;;  %v11963_v40 = vpop.f32.mrb[34].mxu0  ;;  %v7855_v36 = vld [vmem:[#allocation2 + $0xc0] sm:$0xff]  ;;  %v12150_v34 = vmov 0.0  }
 0x32d   : > { %v9243_v63 = vmax.f32 %v9165_v44, 0.0  ;;  %8006 = vst.msk [vmem:[#allocation2 + $0x98] sm:$0xff] %vm943_vm1, %v7928_v4  ;;  %v8930_v35 = vadd.f32 %v11960_v58, %v8852_v48  ;;  %v8851_v5 = vld [vmem:[#allocation2 + $0x70] sm:$0xff]  ;;  %v8528_v38 = vpop.f32.mrb[35].mxu0  ;;  %v7856_v58 = vld [vmem:[#allocation2 + $0xc8] sm:$0xff] }
 0x32e   : > { %v9242_v49 = vmax.f32 %v9164_v45, 0.0  ;;  %v9082_v12 = vld [vmem:[#allocation2 + $0x58] sm:$0xff]  ;;  %8005 = vst.msk [vmem:[#allocation2 + $0x90] sm:$0xff] %vm943_vm1, %v7927_v27  ;;  %v8929_v2 = vadd.f32 %v8851_v5, %v8518_v28  ;;  %v11844_v51 = vpop.f32.mrb[36].mxu1 }
 0x32f   : > { %9321 = vst.msk [vmem:[%s14334_s20 + $0x48] sm:$0xff] %vm943_vm1, %v9243_v63  ;;  %v9167_v57 = vadd.f32 %v14324_v24, %v9082_v12  ;;  %v9081_v42 = vld [vmem:[#allocation2 + $0x50] sm:$0xff]  ;;  %9008 = vst.msk [vmem:[#allocation2 + $0x78] sm:$0xff] %vm943_vm1, %v8930_v35  ;;  %v7930_v33 = vadd.f32 %v11844_v51, %v7852_v52  ;;  %v7542_v3 = vpop.f32.mrb[37].mxu1  ;;  %v7858_v63 = vld [vmem:[#allocation2 + $0xd8] sm:$0xff] }
 0x330   : > { %9320 = vst.msk [vmem:[%s14334_s20 + $0x40] sm:$0xff] %vm943_vm1, %v9242_v49  ;;  %v9166_v0 = vadd.f32 %v14324_v24, %v9081_v42  ;;  %9007 = vst.msk [vmem:[#allocation2 + $0x70] sm:$0xff] %vm943_vm1, %v8929_v2  ;;  %v7929_v1 = vadd.f32 %v7851_v6, %v7542_v3  ;;  %v8854_v13 = vld [vmem:[#allocation2 + $0x88] sm:$0xff]  ;;  %v11966_v43 = vpop.f32.mrb[36].mxu0  ;;  %v7857_v12 = vld [vmem:[#allocation2 + $0xd0] sm:$0xff] }
 0x331   : > { %v9245_v8 = vmax.f32 %v9167_v57, 0.0  ;;  %8008 = vst.msk [vmem:[#allocation2 + $0xa8] sm:$0xff] %vm943_vm1, %v7930_v33  ;;  %v8932_v46 = vadd.f32 %v11963_v40, %v8854_v13  ;;  %v8853_v19 = vld [vmem:[#allocation2 + $0x80] sm:$0xff]  ;;  %v8538_v9 = vpop.f32.mrb[37].mxu0 }
 0x332   : > { %v9244_v7 = vmax.f32 %v9166_v0, 0.0  ;;  %v9084_v10 = vld [vmem:[#allocation2 + $0x68] sm:$0xff]  ;;  %8007 = vst.msk [vmem:[#allocation2 + $0xa0] sm:$0xff] %vm943_vm1, %v7929_v1  ;;  %v8931_v39 = vadd.f32 %v8853_v19, %v8528_v38  ;;  %v11847_v47 = vpop.f32.mrb[38].mxu1 }
 0x333   : > { %9323 = vst.msk [vmem:[%s14334_s20 + $0x58] sm:$0xff] %vm943_vm1, %v9245_v8  ;;  %v9169_v50 = vadd.f32 %v14324_v24, %v9084_v10  ;;  %v9083_v15 = vld [vmem:[#allocation2 + $0x60] sm:$0xff]  ;;  %9010 = vst.msk [vmem:[#allocation2 + $0x88] sm:$0xff] %vm943_vm1, %v8932_v46  ;;  %v7932_v23 = vadd.f32 %v11847_v47, %v7854_v14  ;;  %v7552_v55 = vpop.f32.mrb[39].mxu1  ;;  %v7860_v8 = vld [vmem:[#allocation2 + $0xe8] sm:$0xff] }
 0x334   : > { %9322 = vst.msk [vmem:[%s14334_s20 + $0x50] sm:$0xff] %vm943_vm1, %v9244_v7  ;;  %v9168_v30 = vadd.f32 %v14324_v24, %v9083_v15  ;;  %9009 = vst.msk [vmem:[#allocation2 + $0x80] sm:$0xff] %vm943_vm1, %v8931_v39  ;;  %v7931_v20 = vadd.f32 %v7853_v11, %v7552_v55  ;;  %v8856_v17 = vld [vmem:[#allocation2 + $0x98] sm:$0xff]  ;;  %v11969_v25 = vpop.f32.mrb[38].mxu0  ;;  %v7859_v10 = vld [vmem:[#allocation2 + $0xe0] sm:$0xff] }
 0x335   : > { %v9247_v53 = vmax.f32 %v9169_v50, 0.0  ;;  %8010 = vst.msk [vmem:[#allocation2 + $0xb8] sm:$0xff] %vm943_vm1, %v7932_v23  ;;  %v8934_v26 = vadd.f32 %v11966_v43, %v8856_v17  ;;  %v8855_v56 = vld [vmem:[#allocation2 + $0x90] sm:$0xff]  ;;  %v8548_v18 = vpop.f32.mrb[39].mxu0 }
 0x336   : > { %v9246_v21 = vmax.f32 %v9168_v30, 0.0  ;;  %v9086_v16 = vld [vmem:[#allocation2 + $0x78] sm:$0xff]  ;;  %8009 = vst.msk [vmem:[#allocation2 + $0xb0] sm:$0xff] %vm943_vm1, %v7931_v20  ;;  %v8933_v54 = vadd.f32 %v8855_v56, %v8538_v9  ;;  %v11850_v60 = vpop.f32.mrb[40].mxu1 }
 0x337   : > { %9325 = vst.msk [vmem:[%s14334_s20 + $0x68] sm:$0xff] %vm943_vm1, %v9247_v53  ;;  %v9171_v31 = vadd.f32 %v14324_v24, %v9086_v16  ;;  %v9085_v32 = vld [vmem:[#allocation2 + $0x70] sm:$0xff]  ;;  %9012 = vst.msk [vmem:[#allocation2 + $0x98] sm:$0xff] %vm943_vm1, %v8934_v26  ;;  %v7934_v22 = vadd.f32 %v11850_v60, %v7856_v58  ;;  %v7562_v28 = vpop.f32.mrb[41].mxu1  ;;  %v7862_v53 = vld [vmem:[#allocation2 + $0xf8] sm:$0xff] }
 0x338   : > { %9324 = vst.msk [vmem:[%s14334_s20 + $0x60] sm:$0xff] %vm943_vm1, %v9246_v21  ;;  %v9170_v37 = vadd.f32 %v14324_v24, %v9085_v32  ;;  %9011 = vst.msk [vmem:[#allocation2 + $0x90] sm:$0xff] %vm943_vm1, %v8933_v54  ;;  %v7933_v41 = vadd.f32 %v7855_v36, %v7562_v28  ;;  %v8858_v59 = vld [vmem:[#allocation2 + $0xa8] sm:$0xff]  ;;  %v11972_v61 = vpop.f32.mrb[40].mxu0  ;;  %v7861_v16 = vld [vmem:[#allocation2 + $0xf0] sm:$0xff] }
 0x339   : > { %v9249_v44 = vmax.f32 %v9171_v31, 0.0  ;;  %8012 = vst.msk [vmem:[#allocation2 + $0xc8] sm:$0xff] %vm943_vm1, %v7934_v22  ;;  %v8936_v29 = vadd.f32 %v11969_v25, %v8858_v59  ;;  %v8857_v4 = vld [vmem:[#allocation2 + $0xa0] sm:$0xff]  ;;  %v8558_v62 = vpop.f32.mrb[41].mxu0 }
 0x33a   : > { %9391 = vst.msk [vmem:[%s14334_s20 + $0x26e] sm:$0x3] %vm9390_vm3, %v12150_v34  ;;  %v9248_v45 = vmax.f32 %v9170_v37, 0.0  ;;  %v9088_v27 = vld [vmem:[#allocation2 + $0x88] sm:$0xff]  ;;  %v8935_v48 = vadd.f32 %v8857_v4, %v8548_v18  ;;  %v11853_v40 = vpop.f32.mrb[42].mxu1 }
 0x33b   : > { %8011 = vst.msk [vmem:[#allocation2 + $0xc0] sm:$0xff] %vm943_vm1, %v7933_v41  ;;  %9327 = vst.msk [vmem:[%s14334_s20 + $0x78] sm:$0xff] %vm943_vm1, %v9249_v44  ;;  %v9173_v35 = vadd.f32 %v14324_v24, %v9088_v27  ;;  %v9087_v5 = vld [vmem:[#allocation2 + $0x80] sm:$0xff]  ;;  %v7936_v38 = vadd.f32 %v11853_v40, %v7858_v63  ;;  %v7572_v49 = vpop.f32.mrb[43].mxu1  ;;  %v7864_v44 = vld [vmem:[#allocation2 + $0x108] sm:$0xff] }
 0x33c   : > { %9014 = vst.msk [vmem:[#allocation2 + $0xa8] sm:$0xff] %vm943_vm1, %v8936_v29  ;;  %9326 = vst.msk [vmem:[%s14334_s20 + $0x70] sm:$0xff] %vm943_vm1, %v9248_v45  ;;  %v9172_v2 = vadd.f32 %v14324_v24, %v9087_v5  ;;  %v7935_v51 = vadd.f32 %v7857_v12, %v7572_v49  ;;  %v8860_v52 = vld [vmem:[#allocation2 + $0xb8] sm:$0xff]  ;;  %v11975_v57 = vpop.f32.mrb[42].mxu0  ;;  %v7863_v45 = vld [vmem:[#allocation2 + $0x100] sm:$0xff] }
 0x33d   : > { %9013 = vst.msk [vmem:[#allocation2 + $0xa0] sm:$0xff] %vm943_vm1, %v8935_v48  ;;  %v9251_v42 = vmax.f32 %v9173_v35, 0.0  ;;  %8014 = vst.msk [vmem:[#allocation2 + $0xd8] sm:$0xff] %vm943_vm1, %v7936_v38  ;;  %v8938_v33 = vadd.f32 %v11972_v61, %v8860_v52  ;;  %v8859_v3 = vld [vmem:[#allocation2 + $0xb0] sm:$0xff]  ;;  %v8568_v6 = vpop.f32.mrb[43].mxu0 }
 0x33e   : > { %v9250_v0 = vmax.f32 %v9172_v2, 0.0  ;;  %v9090_v1 = vld [vmem:[#allocation2 + $0x98] sm:$0xff]  ;;  %8013 = vst.msk [vmem:[#allocation2 + $0xd0] sm:$0xff] %vm943_vm1, %v7935_v51  ;;  %v8937_v13 = vadd.f32 %v8859_v3, %v8558_v62  ;;  %v11856_v43 = vpop.f32.mrb[44].mxu1 }
 0x33f   : > { %9329 = vst.msk [vmem:[%s14334_s20 + $0x88] sm:$0xff] %vm943_vm1, %v9251_v42  ;;  %v9175_v46 = vadd.f32 %v14324_v24, %v9090_v1  ;;  %v9089_v19 = vld [vmem:[#allocation2 + $0x90] sm:$0xff]  ;;  %9016 = vst.msk [vmem:[#allocation2 + $0xb8] sm:$0xff] %vm943_vm1, %v8938_v33  ;;  %v7938_v9 = vadd.f32 %v11856_v43, %v7860_v8  ;;  %v7582_v7 = vpop.f32.mrb[45].mxu1 }
 0x340   : > { %9328 = vst.msk [vmem:[%s14334_s20 + $0x80] sm:$0xff] %vm943_vm1, %v9250_v0  ;;  %v9174_v39 = vadd.f32 %v14324_v24, %v9089_v19  ;;  %9015 = vst.msk [vmem:[#allocation2 + $0xb0] sm:$0xff] %vm943_vm1, %v8937_v13  ;;  %v7937_v47 = vadd.f32 %v7859_v10, %v7582_v7  ;;  %v8862_v14 = vld [vmem:[#allocation2 + $0xc8] sm:$0xff]  ;;  %v11978_v50 = vpop.f32.mrb[44].mxu0  ;;  %v7865_v0 = vld [vmem:[#allocation2 + $0x110] sm:$0xff] }
 0x341   : > { %v9253_v15 = vmax.f32 %v9175_v46, 0.0  ;;  %8016 = vst.msk [vmem:[#allocation2 + $0xe8] sm:$0xff] %vm943_vm1, %v7938_v9  ;;  %v8940_v23 = vadd.f32 %v11975_v57, %v8862_v14  ;;  %v8578_v11 = vpop.f32.mrb[45].mxu0  ;;  %v7866_v57 = vld [vmem:[#allocation2 + $0x118] sm:$0xff] }
 0x342   : > { %v8861_v55 = vld [vmem:[#allocation2 + $0xc0] sm:$0xff]  ;;  %v9252_v30 = vmax.f32 %v9174_v39, 0.0  ;;  %8015 = vst.msk [vmem:[#allocation2 + $0xe0] sm:$0xff] %vm943_vm1, %v7937_v47  ;;  %v11859_v25 = vpop.f32.mrb[46].mxu1 }
 0x343   : > { %v9092_v20 = vld [vmem:[#allocation2 + $0xa8] sm:$0xff]  ;;  %v8939_v17 = vadd.f32 %v8861_v55, %v8568_v6  ;;  %9331 = vst.msk [vmem:[%s14334_s20 + $0x98] sm:$0xff] %vm943_vm1, %v9253_v15  ;;  %9018 = vst.msk [vmem:[#allocation2 + $0xc8] sm:$0xff] %vm943_vm1, %v8940_v23  ;;  %v7940_v18 = vadd.f32 %v11859_v25, %v7862_v53  ;;  %v7592_v21 = vpop.f32.mrb[47].mxu1 }
 0x344   : > { %v9177_v26 = vadd.f32 %v14324_v24, %v9092_v20  ;;  %v9091_v56 = vld [vmem:[#allocation2 + $0xa0] sm:$0xff]  ;;  %9330 = vst.msk [vmem:[%s14334_s20 + $0x90] sm:$0xff] %vm943_vm1, %v9252_v30  ;;  %v7939_v60 = vadd.f32 %v7861_v16, %v7592_v21  ;;  %v8864_v58 = vld [vmem:[#allocation2 + $0xd8] sm:$0xff]  ;;  %v11981_v31 = vpop.f32.mrb[46].mxu0 }
 0x345   : > { %v9176_v54 = vadd.f32 %v14324_v24, %v9091_v56  ;;  %9017 = vst.msk [vmem:[#allocation2 + $0xc0] sm:$0xff] %vm943_vm1, %v8939_v17  ;;  %8018 = vst.msk [vmem:[#allocation2 + $0xf8] sm:$0xff] %vm943_vm1, %v7940_v18  ;;  %v8942_v22 = vadd.f32 %v11978_v50, %v8864_v58  ;;  %v8863_v28 = vld [vmem:[#allocation2 + $0xd0] sm:$0xff]  ;;  %v8588_v36 = vpop.f32.mrb[47].mxu0  ;;  %v7868_v50 = vld [vmem:[#allocation2 + $0x128] sm:$0xff] }
 0x346   : > { %v9255_v32 = vmax.f32 %v9177_v26, 0.0  ;;  %v9094_v41 = vld [vmem:[#allocation2 + $0xb8] sm:$0xff]  ;;  %8017 = vst.msk [vmem:[#allocation2 + $0xf0] sm:$0xff] %vm943_vm1, %v7939_v60  ;;  %v8941_v59 = vadd.f32 %v8863_v28, %v8578_v11  ;;  %v11862_v61 = vpop.f32.mrb[48].mxu1  ;;  %v7867_v30 = vld [vmem:[#allocation2 + $0x120] sm:$0xff] }
 0x347   : > { %v9254_v37 = vmax.f32 %v9176_v54, 0.0  ;;  %v9179_v29 = vadd.f32 %v14324_v24, %v9094_v41  ;;  %v9093_v4 = vld [vmem:[#allocation2 + $0xb0] sm:$0xff]  ;;  %9020 = vst.msk [vmem:[#allocation2 + $0xd8] sm:$0xff] %vm943_vm1, %v8942_v22  ;;  %v7942_v62 = vadd.f32 %v11862_v61, %v7864_v44  ;;  %v7602_v34 = vpop.f32.mrb[49].mxu1 }
 0x348   : > { %9333 = vst.msk [vmem:[%s14334_s20 + $0xa8] sm:$0xff] %vm943_vm1, %v9255_v32  ;;  %v9178_v27 = vadd.f32 %v14324_v24, %v9093_v4  ;;  %9019 = vst.msk [vmem:[#allocation2 + $0xd0] sm:$0xff] %vm943_vm1, %v8941_v59  ;;  %v7941_v48 = vadd.f32 %v7863_v45, %v7602_v34  ;;  %v8866_v40 = vld [vmem:[#allocation2 + $0xe8] sm:$0xff]  ;;  %v11984_v63 = vpop.f32.mrb[48].mxu0 }
 0x349   : > { %9332 = vst.msk [vmem:[%s14334_s20 + $0xa0] sm:$0xff] %vm943_vm1, %v9254_v37  ;;  %v9257_v35 = vmax.f32 %v9179_v29, 0.0  ;;  %8020 = vst.msk [vmem:[#allocation2 + $0x108] sm:$0xff] %vm943_vm1, %v7942_v62  ;;  %v8944_v5 = vadd.f32 %v11981_v31, %v8866_v40  ;;  %v8865_v38 = vld [vmem:[#allocation2 + $0xe0] sm:$0xff]  ;;  %v8598_v49 = vpop.f32.mrb[49].mxu0  ;;  %v7870_v31 = vld [vmem:[#allocation2 + $0x138] sm:$0xff] }
 0x34a   : > { %v9256_v12 = vmax.f32 %v9178_v27, 0.0  ;;  %v9096_v2 = vld [vmem:[#allocation2 + $0xc8] sm:$0xff]  ;;  %8019 = vst.msk [vmem:[#allocation2 + $0x100] sm:$0xff] %vm943_vm1, %v7941_v48  ;;  %v8943_v51 = vadd.f32 %v8865_v38, %v8588_v36  ;;  %v11865_v52 = vpop.f32.mrb[50].mxu1  ;;  %v7869_v37 = vld [vmem:[#allocation2 + $0x130] sm:$0xff] }
 0x34b   : > { %9335 = vst.msk [vmem:[%s14334_s20 + $0xb8] sm:$0xff] %vm943_vm1, %v9257_v35  ;;  %v9181_v42 = vadd.f32 %v14324_v24, %v9096_v2  ;;  %9022 = vst.msk [vmem:[#allocation2 + $0xe8] sm:$0xff] %vm943_vm1, %v8944_v5  ;;  %v7944_v3 = vadd.f32 %v11865_v52, %v7866_v57  ;;  %v7612_v6 = vpop.f32.mrb[51].mxu1 }
 0x34c   : > { %v9095_v33 = vld [vmem:[#allocation2 + $0xc0] sm:$0xff]  ;;  %9334 = vst.msk [vmem:[%s14334_s20 + $0xb0] sm:$0xff] %vm943_vm1, %v9256_v12  ;;  %9021 = vst.msk [vmem:[#allocation2 + $0xe0] sm:$0xff] %vm943_vm1, %v8943_v51  ;;  %v7943_v13 = vadd.f32 %v7865_v0, %v7612_v6  ;;  %v8868_v43 = vld [vmem:[#allocation2 + $0xf8] sm:$0xff]  ;;  %v11987_v8 = vpop.f32.mrb[50].mxu0 }
 0x34d   : > { %v9180_v1 = vadd.f32 %v14324_v24, %v9095_v33  ;;  %v9259_v46 = vmax.f32 %v9181_v42, 0.0  ;;  %8022 = vst.msk [vmem:[#allocation2 + $0x118] sm:$0xff] %vm943_vm1, %v7944_v3  ;;  %v8946_v19 = vadd.f32 %v11984_v63, %v8868_v43  ;;  %v8867_v9 = vld [vmem:[#allocation2 + $0xf0] sm:$0xff]  ;;  %v8608_v7 = vpop.f32.mrb[51].mxu0  ;;  %v7872_v63 = vld [vmem:[#allocation2 + $0x148] sm:$0xff]  ;;  %v7871_v12 = vld [vmem:[#allocation2 + $0x140] sm:$0xff] }
 0x34e   : > { %v9098_v39 = vld [vmem:[#allocation2 + $0xd8] sm:$0xff]  ;;  %8021 = vst.msk [vmem:[#allocation2 + $0x110] sm:$0xff] %vm943_vm1, %v7943_v13  ;;  %v8945_v47 = vadd.f32 %v8867_v9, %v8598_v49  ;;  %v11868_v14 = vpop.f32.mrb[52].mxu1 }
 0x34f   : > { %v9258_v10 = vmax.f32 %v9180_v1, 0.0  ;;  %9337 = vst.msk [vmem:[%s14334_s20 + $0xc8] sm:$0xff] %vm943_vm1, %v9259_v46  ;;  %v9183_v15 = vadd.f32 %v14324_v24, %v9098_v39  ;;  %v9097_v23 = vld [vmem:[#allocation2 + $0xd0] sm:$0xff]  ;;  %9024 = vst.msk [vmem:[#allocation2 + $0xf8] sm:$0xff] %vm943_vm1, %v8946_v19  ;;  %v7946_v55 = vadd.f32 %v11868_v14, %v7868_v50  ;;  %v7622_v11 = vpop.f32.mrb[53].mxu1 }
 0x350   : > { %v9182_v20 = vadd.f32 %v14324_v24, %v9097_v23  ;;  %9023 = vst.msk [vmem:[#allocation2 + $0xf0] sm:$0xff] %vm943_vm1, %v8945_v47  ;;  %v7945_v17 = vadd.f32 %v7867_v30, %v7622_v11  ;;  %v8870_v25 = vld [vmem:[#allocation2 + $0x108] sm:$0xff]  ;;  %v11990_v53 = vpop.f32.mrb[52].mxu0 }
 0x351   : > { %9336 = vst.msk [vmem:[%s14334_s20 + $0xc0] sm:$0xff] %vm943_vm1, %v9258_v10  ;;  %v9261_v26 = vmax.f32 %v9183_v15, 0.0  ;;  %8024 = vst.msk [vmem:[#allocation2 + $0x128] sm:$0xff] %vm943_vm1, %v7946_v55  ;;  %v8948_v56 = vadd.f32 %v11987_v8, %v8870_v25  ;;  %v8869_v18 = vld [vmem:[#allocation2 + $0x100] sm:$0xff]  ;;  %v8618_v21 = vpop.f32.mrb[53].mxu0  ;;  %v7874_v8 = vld [vmem:[#allocation2 + $0x158] sm:$0xff] }
 0x352   : > { %v9260_v16 = vmax.f32 %v9182_v20, 0.0  ;;  %v9100_v54 = vld [vmem:[#allocation2 + $0xe8] sm:$0xff]  ;;  %8023 = vst.msk [vmem:[#allocation2 + $0x120] sm:$0xff] %vm943_vm1, %v7945_v17  ;;  %v8947_v60 = vadd.f32 %v8869_v18, %v8608_v7  ;;  %v11871_v58 = vpop.f32.mrb[54].mxu1  ;;  %v7873_v10 = vld [vmem:[#allocation2 + $0x150] sm:$0xff] }
 0x353   : > { %9339 = vst.msk [vmem:[%s14334_s20 + $0xd8] sm:$0xff] %vm943_vm1, %v9261_v26  ;;  %v9185_v32 = vadd.f32 %v14324_v24, %v9100_v54  ;;  %v9099_v22 = vld [vmem:[#allocation2 + $0xe0] sm:$0xff]  ;;  %9026 = vst.msk [vmem:[#allocation2 + $0x108] sm:$0xff] %vm943_vm1, %v8948_v56  ;;  %v7948_v28 = vadd.f32 %v11871_v58, %v7870_v31  ;;  %v7632_v36 = vpop.f32.mrb[55].mxu1 }
 0x354   : > { %9338 = vst.msk [vmem:[%s14334_s20 + $0xd0] sm:$0xff] %vm943_vm1, %v9260_v16  ;;  %v9184_v41 = vadd.f32 %v14324_v24, %v9099_v22  ;;  %9025 = vst.msk [vmem:[#allocation2 + $0x100] sm:$0xff] %vm943_vm1, %v8947_v60  ;;  %v7947_v59 = vadd.f32 %v7869_v37, %v7632_v36  ;;  %v8872_v61 = vld [vmem:[#allocation2 + $0x118] sm:$0xff]  ;;  %v11993_v44 = vpop.f32.mrb[54].mxu0  ;;  %v7875_v16 = vld [vmem:[#allocation2 + $0x160] sm:$0xff] }
 0x355   : > { %v9263_v29 = vmax.f32 %v9185_v32, 0.0  ;;  %8026 = vst.msk [vmem:[#allocation2 + $0x138] sm:$0xff] %vm943_vm1, %v7948_v28  ;;  %v8950_v4 = vadd.f32 %v11990_v53, %v8872_v61  ;;  %v8871_v62 = vld [vmem:[#allocation2 + $0x110] sm:$0xff]  ;;  %v8628_v34 = vpop.f32.mrb[55].mxu0  ;;  %v7876_v53 = vld [vmem:[#allocation2 + $0x168] sm:$0xff] }
 0x356   : > { %v9262_v45 = vmax.f32 %v9184_v41, 0.0  ;;  %v9102_v27 = vld [vmem:[#allocation2 + $0xf8] sm:$0xff]  ;;  %8025 = vst.msk [vmem:[#allocation2 + $0x130] sm:$0xff] %vm943_vm1, %v7947_v59  ;;  %v8949_v48 = vadd.f32 %v8871_v62, %v8618_v21  ;;  %v11874_v40 = vpop.f32.mrb[56].mxu1 }
 0x357   : > { %9341 = vst.msk [vmem:[%s14334_s20 + $0xe8] sm:$0xff] %vm943_vm1, %v9263_v29  ;;  %v9187_v35 = vadd.f32 %v14324_v24, %v9102_v27  ;;  %v9101_v5 = vld [vmem:[#allocation2 + $0xf0] sm:$0xff]  ;;  %9028 = vst.msk [vmem:[#allocation2 + $0x118] sm:$0xff] %vm943_vm1, %v8950_v4  ;;  %v7950_v38 = vadd.f32 %v11874_v40, %v7872_v63  ;;  %v7642_v49 = vpop.f32.mrb[57].mxu1 }
 0x358   : > { %9340 = vst.msk [vmem:[%s14334_s20 + $0xe0] sm:$0xff] %vm943_vm1, %v9262_v45  ;;  %v9186_v2 = vadd.f32 %v14324_v24, %v9101_v5  ;;  %9027 = vst.msk [vmem:[#allocation2 + $0x110] sm:$0xff] %vm943_vm1, %v8949_v48  ;;  %v7949_v51 = vadd.f32 %v7871_v12, %v7642_v49  ;;  %v8874_v52 = vld [vmem:[#allocation2 + $0x128] sm:$0xff]  ;;  %v11996_v57 = vpop.f32.mrb[56].mxu0  ;;  %v7877_v45 = vld [vmem:[#allocation2 + $0x170] sm:$0xff] }
 0x359   : > { %v9265_v42 = vmax.f32 %v9187_v35, 0.0  ;;  %8028 = vst.msk [vmem:[#allocation2 + $0x148] sm:$0xff] %vm943_vm1, %v7950_v38  ;;  %v8952_v33 = vadd.f32 %v11993_v44, %v8874_v52  ;;  %v8873_v3 = vld [vmem:[#allocation2 + $0x120] sm:$0xff]  ;;  %v8638_v6 = vpop.f32.mrb[57].mxu0  ;;  %v7878_v44 = vld [vmem:[#allocation2 + $0x178] sm:$0xff] }
 0x35a   : > { %v9264_v0 = vmax.f32 %v9186_v2, 0.0  ;;  %v9104_v1 = vld [vmem:[#allocation2 + $0x108] sm:$0xff]  ;;  %8027 = vst.msk [vmem:[#allocation2 + $0x140] sm:$0xff] %vm943_vm1, %v7949_v51  ;;  %v8951_v13 = vadd.f32 %v8873_v3, %v8628_v34  ;;  %v11877_v43 = vpop.f32.mrb[58].mxu1 }
 0x35b   : > { %9343 = vst.msk [vmem:[%s14334_s20 + $0xf8] sm:$0xff] %vm943_vm1, %v9265_v42  ;;  %v9189_v46 = vadd.f32 %v14324_v24, %v9104_v1  ;;  %v9103_v19 = vld [vmem:[#allocation2 + $0x100] sm:$0xff]  ;;  %9030 = vst.msk [vmem:[#allocation2 + $0x128] sm:$0xff] %vm943_vm1, %v8952_v33  ;;  %v7952_v9 = vadd.f32 %v11877_v43, %v7874_v8  ;;  %v7652_v7 = vpop.f32.mrb[59].mxu1 }
 0x35c   : > { %9342 = vst.msk [vmem:[%s14334_s20 + $0xf0] sm:$0xff] %vm943_vm1, %v9264_v0  ;;  %v9188_v39 = vadd.f32 %v14324_v24, %v9103_v19  ;;  %9029 = vst.msk [vmem:[#allocation2 + $0x120] sm:$0xff] %vm943_vm1, %v8951_v13  ;;  %v7951_v47 = vadd.f32 %v7873_v10, %v7652_v7  ;;  %v8876_v14 = vld [vmem:[#allocation2 + $0x138] sm:$0xff]  ;;  %v11999_v50 = vpop.f32.mrb[58].mxu0  ;;  %v7879_v0 = vld [vmem:[#allocation2 + $0x180] sm:$0xff] }
 0x35d   : > { %v9267_v15 = vmax.f32 %v9189_v46, 0.0  ;;  %8030 = vst.msk [vmem:[#allocation2 + $0x158] sm:$0xff] %vm943_vm1, %v7952_v9  ;;  %v8954_v23 = vadd.f32 %v11996_v57, %v8876_v14  ;;  %v8875_v55 = vld [vmem:[#allocation2 + $0x130] sm:$0xff]  ;;  %v8648_v11 = vpop.f32.mrb[59].mxu0  ;;  %v7880_v57 = vld [vmem:[#allocation2 + $0x188] sm:$0xff] }
 0x35e   : > { %v9266_v30 = vmax.f32 %v9188_v39, 0.0  ;;  %v9106_v20 = vld [vmem:[#allocation2 + $0x118] sm:$0xff]  ;;  %8029 = vst.msk [vmem:[#allocation2 + $0x150] sm:$0xff] %vm943_vm1, %v7951_v47  ;;  %v8953_v17 = vadd.f32 %v8875_v55, %v8638_v6  ;;  %v11880_v25 = vpop.f32.mrb[60].mxu1 }
 0x35f   : > { %9345 = vst.msk [vmem:[%s14334_s20 + $0x108] sm:$0xff] %vm943_vm1, %v9267_v15  ;;  %v9191_v26 = vadd.f32 %v14324_v24, %v9106_v20  ;;  %v9105_v56 = vld [vmem:[#allocation2 + $0x110] sm:$0xff]  ;;  %9032 = vst.msk [vmem:[#allocation2 + $0x138] sm:$0xff] %vm943_vm1, %v8954_v23  ;;  %v7954_v18 = vadd.f32 %v11880_v25, %v7876_v53  ;;  %v7662_v21 = vpop.f32.mrb[61].mxu1 }
 0x360   : > { %9344 = vst.msk [vmem:[%s14334_s20 + $0x100] sm:$0xff] %vm943_vm1, %v9266_v30  ;;  %v9190_v54 = vadd.f32 %v14324_v24, %v9105_v56  ;;  %9031 = vst.msk [vmem:[#allocation2 + $0x130] sm:$0xff] %vm943_vm1, %v8953_v17  ;;  %v7953_v60 = vadd.f32 %v7875_v16, %v7662_v21  ;;  %v8878_v58 = vld [vmem:[#allocation2 + $0x148] sm:$0xff]  ;;  %v12002_v31 = vpop.f32.mrb[60].mxu0  ;;  %v7881_v30 = vld [vmem:[#allocation2 + $0x190] sm:$0xff] }
 0x361   : > { %v9269_v32 = vmax.f32 %v9191_v26, 0.0  ;;  %8032 = vst.msk [vmem:[#allocation2 + $0x168] sm:$0xff] %vm943_vm1, %v7954_v18  ;;  %v8956_v22 = vadd.f32 %v11999_v50, %v8878_v58  ;;  %v8877_v28 = vld [vmem:[#allocation2 + $0x140] sm:$0xff]  ;;  %v8658_v36 = vpop.f32.mrb[61].mxu0  ;;  %v7882_v50 = vld [vmem:[#allocation2 + $0x198] sm:$0xff] }
 0x362   : > { %v9268_v37 = vmax.f32 %v9190_v54, 0.0  ;;  %v9108_v41 = vld [vmem:[#allocation2 + $0x128] sm:$0xff]  ;;  %8031 = vst.msk [vmem:[#allocation2 + $0x160] sm:$0xff] %vm943_vm1, %v7953_v60  ;;  %v8955_v59 = vadd.f32 %v8877_v28, %v8648_v11  ;;  %v11883_v61 = vpop.f32.mrb[62].mxu1 }
 0x363   : > { %9347 = vst.msk [vmem:[%s14334_s20 + $0x118] sm:$0xff] %vm943_vm1, %v9269_v32  ;;  %v9193_v29 = vadd.f32 %v14324_v24, %v9108_v41  ;;  %v9107_v4 = vld [vmem:[#allocation2 + $0x120] sm:$0xff]  ;;  %9034 = vst.msk [vmem:[#allocation2 + $0x148] sm:$0xff] %vm943_vm1, %v8956_v22  ;;  %v7956_v62 = vadd.f32 %v11883_v61, %v7878_v44  ;;  %v7672_v34 = vpop.f32.mrb[63].mxu1 }
 0x364   : > { %9346 = vst.msk [vmem:[%s14334_s20 + $0x110] sm:$0xff] %vm943_vm1, %v9268_v37  ;;  %v9192_v27 = vadd.f32 %v14324_v24, %v9107_v4  ;;  %9033 = vst.msk [vmem:[#allocation2 + $0x140] sm:$0xff] %vm943_vm1, %v8955_v59  ;;  %v7955_v48 = vadd.f32 %v7877_v45, %v7672_v34  ;;  %v8880_v40 = vld [vmem:[#allocation2 + $0x158] sm:$0xff]  ;;  %v12005_v63 = vpop.f32.mrb[62].mxu0  ;;  %v7883_v37 = vld [vmem:[#allocation2 + $0x1a0] sm:$0xff] }
 0x365   : > { %v9271_v35 = vmax.f32 %v9193_v29, 0.0  ;;  %8034 = vst.msk [vmem:[#allocation2 + $0x178] sm:$0xff] %vm943_vm1, %v7956_v62  ;;  %v8958_v5 = vadd.f32 %v12002_v31, %v8880_v40  ;;  %v8879_v38 = vld [vmem:[#allocation2 + $0x150] sm:$0xff]  ;;  %v8668_v49 = vpop.f32.mrb[63].mxu0  ;;  %v14546_v31 = vld [vmem:[%s14721_s2] ss:$0 sm:$0xff] }
 0x366   : > { %v9270_v12 = vmax.f32 %v9192_v27, 0.0  ;;  %v9110_v2 = vld [vmem:[#allocation2 + $0x138] sm:$0xff]  ;;  %8033 = vst.msk [vmem:[#allocation2 + $0x170] sm:$0xff] %vm943_vm1, %v7955_v48  ;;  %v8957_v51 = vadd.f32 %v8879_v38, %v8658_v36  ;;  %v11886_v52 = vpop.f32.mrb[64].mxu1 }
 0x367   : > { %9349 = vst.msk [vmem:[%s14334_s20 + $0x128] sm:$0xff] %vm943_vm1, %v9271_v35  ;;  %v9195_v42 = vadd.f32 %v14324_v24, %v9110_v2  ;;  %v9109_v33 = vld [vmem:[#allocation2 + $0x130] sm:$0xff]  ;;  %9036 = vst.msk [vmem:[#allocation2 + $0x158] sm:$0xff] %vm943_vm1, %v8958_v5  ;;  %v7958_v3 = vadd.f32 %v11886_v52, %v7880_v57  ;;  %v7682_v6 = vpop.f32.mrb[65].mxu1 }
 0x368   : > { %9348 = vst.msk [vmem:[%s14334_s20 + $0x120] sm:$0xff] %vm943_vm1, %v9270_v12  ;;  %v9194_v1 = vadd.f32 %v14324_v24, %v9109_v33  ;;  %9035 = vst.msk [vmem:[#allocation2 + $0x150] sm:$0xff] %vm943_vm1, %v8957_v51  ;;  %v7957_v13 = vadd.f32 %v7879_v0, %v7682_v6  ;;  %v8882_v43 = vld [vmem:[#allocation2 + $0x168] sm:$0xff]  ;;  %v12008_v8 = vpop.f32.mrb[64].mxu0  ;;  %v7885_v12 = vld [vmem:[#allocation2 + $0x1b0] sm:$0xff] }
 0x369   : > { %v9273_v46 = vmax.f32 %v9195_v42, 0.0  ;;  %8036 = vst.msk [vmem:[#allocation2 + $0x188] sm:$0xff] %vm943_vm1, %v7958_v3  ;;  %v8960_v19 = vadd.f32 %v12005_v63, %v8882_v43  ;;  %v8881_v9 = vld [vmem:[#allocation2 + $0x160] sm:$0xff]  ;;  %v8678_v7 = vpop.f32.mrb[65].mxu0  ;;  %v7886_v63 = vld [vmem:[#allocation2 + $0x1b8] sm:$0xff] }
 0x36a   : > { %v9272_v10 = vmax.f32 %v9194_v1, 0.0  ;;  %v9112_v39 = vld [vmem:[#allocation2 + $0x148] sm:$0xff]  ;;  %8035 = vst.msk [vmem:[#allocation2 + $0x180] sm:$0xff] %vm943_vm1, %v7957_v13  ;;  %v8959_v47 = vadd.f32 %v8881_v9, %v8668_v49  ;;  %v11889_v14 = vpop.f32.mrb[66].mxu1 }
 0x36b   : > { %9351 = vst.msk [vmem:[%s14334_s20 + $0x138] sm:$0xff] %vm943_vm1, %v9273_v46  ;;  %v9197_v15 = vadd.f32 %v14324_v24, %v9112_v39  ;;  %v9111_v23 = vld [vmem:[#allocation2 + $0x140] sm:$0xff]  ;;  %9038 = vst.msk [vmem:[#allocation2 + $0x168] sm:$0xff] %vm943_vm1, %v8960_v19  ;;  %v7960_v55 = vadd.f32 %v11889_v14, %v7882_v50  ;;  %v7692_v11 = vpop.f32.mrb[67].mxu1 }
 0x36c   : > { %9350 = vst.msk [vmem:[%s14334_s20 + $0x130] sm:$0xff] %vm943_vm1, %v9272_v10  ;;  %v9196_v20 = vadd.f32 %v14324_v24, %v9111_v23  ;;  %9037 = vst.msk [vmem:[#allocation2 + $0x160] sm:$0xff] %vm943_vm1, %v8959_v47  ;;  %v7959_v17 = vadd.f32 %v7881_v30, %v7692_v11  ;;  %v8884_v25 = vld [vmem:[#allocation2 + $0x178] sm:$0xff]  ;;  %v12011_v53 = vpop.f32.mrb[66].mxu0  ;;  %v7884_v24 = vld [vmem:[#allocation2 + $0x1a8] sm:$0xff] }
 0x36d   : > { %v9275_v26 = vmax.f32 %v9197_v15, 0.0  ;;  %8038 = vst.msk [vmem:[#allocation2 + $0x198] sm:$0xff] %vm943_vm1, %v7960_v55  ;;  %v8962_v56 = vadd.f32 %v12008_v8, %v8884_v25  ;;  %v8883_v18 = vld [vmem:[#allocation2 + $0x170] sm:$0xff]  ;;  %v8688_v21 = vpop.f32.mrb[67].mxu0  ;;  %v7888_v8 = vld [vmem:[#allocation2 + $0x1c8] sm:$0xff]  ;;  %v7887_v10 = vld [vmem:[#allocation2 + $0x1c0] sm:$0xff] }
 0x36e   : > { %v9274_v16 = vmax.f32 %v9196_v20, 0.0  ;;  %v9114_v54 = vld [vmem:[#allocation2 + $0x158] sm:$0xff]  ;;  %8037 = vst.msk [vmem:[#allocation2 + $0x190] sm:$0xff] %vm943_vm1, %v7959_v17  ;;  %v8961_v60 = vadd.f32 %v8883_v18, %v8678_v7  ;;  %v11892_v58 = vpop.f32.mrb[68].mxu1 }
 0x36f   : > { %9353 = vst.msk [vmem:[%s14334_s20 + $0x148] sm:$0xff] %vm943_vm1, %v9275_v26  ;;  %v9199_v32 = vadd.f32 %v14546_v31, %v9114_v54  ;;  %v9113_v22 = vld [vmem:[#allocation2 + $0x150] sm:$0xff]  ;;  %9040 = vst.msk [vmem:[#allocation2 + $0x178] sm:$0xff] %vm943_vm1, %v8962_v56  ;;  %v7962_v28 = vadd.f32 %v11892_v58, %v7884_v24  ;;  %v7702_v36 = vpop.f32.mrb[69].mxu1 }
 0x370   : > { %9352 = vst.msk [vmem:[%s14334_s20 + $0x140] sm:$0xff] %vm943_vm1, %v9274_v16  ;;  %v9198_v41 = vadd.f32 %v14546_v31, %v9113_v22  ;;  %9039 = vst.msk [vmem:[#allocation2 + $0x170] sm:$0xff] %vm943_vm1, %v8961_v60  ;;  %v7961_v59 = vadd.f32 %v7883_v37, %v7702_v36  ;;  %v8886_v61 = vld [vmem:[#allocation2 + $0x188] sm:$0xff]  ;;  %v12014_v44 = vpop.f32.mrb[68].mxu0  ;;  %v7889_v16 = vld [vmem:[#allocation2 + $0x1d0] sm:$0xff] }
 0x371   : > { %v9277_v29 = vmax.f32 %v9199_v32, 0.0  ;;  %8040 = vst.msk [vmem:[#allocation2 + $0x1a8] sm:$0xff] %vm943_vm1, %v7962_v28  ;;  %v8964_v4 = vadd.f32 %v12011_v53, %v8886_v61  ;;  %v8885_v62 = vld [vmem:[#allocation2 + $0x180] sm:$0xff]  ;;  %v8698_v34 = vpop.f32.mrb[69].mxu0  ;;  %v7890_v53 = vld [vmem:[#allocation2 + $0x1d8] sm:$0xff] }
 0x372   : > { %v9276_v45 = vmax.f32 %v9198_v41, 0.0  ;;  %v9116_v27 = vld [vmem:[#allocation2 + $0x168] sm:$0xff]  ;;  %8039 = vst.msk [vmem:[#allocation2 + $0x1a0] sm:$0xff] %vm943_vm1, %v7961_v59  ;;  %v8963_v48 = vadd.f32 %v8885_v62, %v8688_v21  ;;  %v11895_v40 = vpop.f32.mrb[70].mxu1 }
 0x373   : > { %9355 = vst.msk [vmem:[%s14334_s20 + $0x158] sm:$0xff] %vm943_vm1, %v9277_v29  ;;  %v9201_v35 = vadd.f32 %v14546_v31, %v9116_v27  ;;  %v9115_v5 = vld [vmem:[#allocation2 + $0x160] sm:$0xff]  ;;  %9042 = vst.msk [vmem:[#allocation2 + $0x188] sm:$0xff] %vm943_vm1, %v8964_v4  ;;  %v7964_v38 = vadd.f32 %v11895_v40, %v7886_v63  ;;  %v7712_v49 = vpop.f32.mrb[71].mxu1 }
 0x374   : > { %9354 = vst.msk [vmem:[%s14334_s20 + $0x150] sm:$0xff] %vm943_vm1, %v9276_v45  ;;  %v9200_v2 = vadd.f32 %v14546_v31, %v9115_v5  ;;  %9041 = vst.msk [vmem:[#allocation2 + $0x180] sm:$0xff] %vm943_vm1, %v8963_v48  ;;  %v7963_v51 = vadd.f32 %v7885_v12, %v7712_v49  ;;  %v8888_v52 = vld [vmem:[#allocation2 + $0x198] sm:$0xff]  ;;  %v12017_v57 = vpop.f32.mrb[70].mxu0  ;;  %v7891_v45 = vld [vmem:[#allocation2 + $0x1e0] sm:$0xff] }
 0x375   : > { %v9279_v42 = vmax.f32 %v9201_v35, 0.0  ;;  %8042 = vst.msk [vmem:[#allocation2 + $0x1b8] sm:$0xff] %vm943_vm1, %v7964_v38  ;;  %v8966_v33 = vadd.f32 %v12014_v44, %v8888_v52  ;;  %v8887_v3 = vld [vmem:[#allocation2 + $0x190] sm:$0xff]  ;;  %v8708_v6 = vpop.f32.mrb[71].mxu0  ;;  %v7892_v44 = vld [vmem:[#allocation2 + $0x1e8] sm:$0xff] }
 0x376   : > { %v9278_v0 = vmax.f32 %v9200_v2, 0.0  ;;  %v9118_v1 = vld [vmem:[#allocation2 + $0x178] sm:$0xff]  ;;  %8041 = vst.msk [vmem:[#allocation2 + $0x1b0] sm:$0xff] %vm943_vm1, %v7963_v51  ;;  %v8965_v13 = vadd.f32 %v8887_v3, %v8698_v34  ;;  %v11898_v43 = vpop.f32.mrb[72].mxu1 }
 0x377   : > { %9357 = vst.msk [vmem:[%s14334_s20 + $0x168] sm:$0xff] %vm943_vm1, %v9279_v42  ;;  %v9203_v46 = vadd.f32 %v14546_v31, %v9118_v1  ;;  %v9117_v19 = vld [vmem:[#allocation2 + $0x170] sm:$0xff]  ;;  %9044 = vst.msk [vmem:[#allocation2 + $0x198] sm:$0xff] %vm943_vm1, %v8966_v33  ;;  %v7966_v9 = vadd.f32 %v11898_v43, %v7888_v8  ;;  %v7722_v7 = vpop.f32.mrb[73].mxu1 }
 0x378   : > { %9356 = vst.msk [vmem:[%s14334_s20 + $0x160] sm:$0xff] %vm943_vm1, %v9278_v0  ;;  %v9202_v39 = vadd.f32 %v14546_v31, %v9117_v19  ;;  %9043 = vst.msk [vmem:[#allocation2 + $0x190] sm:$0xff] %vm943_vm1, %v8965_v13  ;;  %v7965_v47 = vadd.f32 %v7887_v10, %v7722_v7  ;;  %v8890_v14 = vld [vmem:[#allocation2 + $0x1a8] sm:$0xff]  ;;  %v12020_v50 = vpop.f32.mrb[72].mxu0  ;;  %v7893_v0 = vld [vmem:[#allocation2 + $0x1f0] sm:$0xff] }
 0x379   : > { %v9281_v15 = vmax.f32 %v9203_v46, 0.0  ;;  %8044 = vst.msk [vmem:[#allocation2 + $0x1c8] sm:$0xff] %vm943_vm1, %v7966_v9  ;;  %v8968_v23 = vadd.f32 %v12017_v57, %v8890_v14  ;;  %v8889_v55 = vld [vmem:[#allocation2 + $0x1a0] sm:$0xff]  ;;  %v8718_v11 = vpop.f32.mrb[73].mxu0  ;;  %v7894_v57 = vld [vmem:[#allocation2 + $0x1f8] sm:$0xff] }
 0x37a   : > { %v9280_v30 = vmax.f32 %v9202_v39, 0.0  ;;  %v9120_v20 = vld [vmem:[#allocation2 + $0x188] sm:$0xff]  ;;  %8043 = vst.msk [vmem:[#allocation2 + $0x1c0] sm:$0xff] %vm943_vm1, %v7965_v47  ;;  %v8967_v17 = vadd.f32 %v8889_v55, %v8708_v6  ;;  %v11901_v25 = vpop.f32.mrb[74].mxu1 }
 0x37b   : > { %9359 = vst.msk [vmem:[%s14334_s20 + $0x178] sm:$0xff] %vm943_vm1, %v9281_v15  ;;  %v9205_v26 = vadd.f32 %v14546_v31, %v9120_v20  ;;  %v9119_v56 = vld [vmem:[#allocation2 + $0x180] sm:$0xff]  ;;  %9046 = vst.msk [vmem:[#allocation2 + $0x1a8] sm:$0xff] %vm943_vm1, %v8968_v23  ;;  %v7968_v18 = vadd.f32 %v11901_v25, %v7890_v53  ;;  %v7732_v21 = vpop.f32.mrb[75].mxu1 }
 0x37c   : > { %9358 = vst.msk [vmem:[%s14334_s20 + $0x170] sm:$0xff] %vm943_vm1, %v9280_v30  ;;  %v9204_v54 = vadd.f32 %v14546_v31, %v9119_v56  ;;  %9045 = vst.msk [vmem:[#allocation2 + $0x1a0] sm:$0xff] %vm943_vm1, %v8967_v17  ;;  %v7967_v60 = vadd.f32 %v7889_v16, %v7732_v21  ;;  %v8892_v58 = vld [vmem:[#allocation2 + $0x1b8] sm:$0xff]  ;;  %v12023_v24 = vpop.f32.mrb[74].mxu0  ;;  %v7895_v30 = vld [vmem:[#allocation2 + $0x200] sm:$0xff] }
 0x37d   : > { %v9283_v32 = vmax.f32 %v9205_v26, 0.0  ;;  %8046 = vst.msk [vmem:[#allocation2 + $0x1d8] sm:$0xff] %vm943_vm1, %v7968_v18  ;;  %v8970_v22 = vadd.f32 %v12020_v50, %v8892_v58  ;;  %v8891_v28 = vld [vmem:[#allocation2 + $0x1b0] sm:$0xff]  ;;  %v8728_v36 = vpop.f32.mrb[75].mxu0  ;;  %v7896_v50 = vld [vmem:[#allocation2 + $0x208] sm:$0xff] }
 0x37e   : > { %v9282_v37 = vmax.f32 %v9204_v54, 0.0  ;;  %v9122_v41 = vld [vmem:[#allocation2 + $0x198] sm:$0xff]  ;;  %8045 = vst.msk [vmem:[#allocation2 + $0x1d0] sm:$0xff] %vm943_vm1, %v7967_v60  ;;  %v8969_v59 = vadd.f32 %v8891_v28, %v8718_v11  ;;  %v11904_v61 = vpop.f32.mrb[76].mxu1 }
 0x37f   : > { %9361 = vst.msk [vmem:[%s14334_s20 + $0x188] sm:$0xff] %vm943_vm1, %v9283_v32  ;;  %v9207_v29 = vadd.f32 %v14546_v31, %v9122_v41  ;;  %v9121_v4 = vld [vmem:[#allocation2 + $0x190] sm:$0xff]  ;;  %9048 = vst.msk [vmem:[#allocation2 + $0x1b8] sm:$0xff] %vm943_vm1, %v8970_v22  ;;  %v7970_v62 = vadd.f32 %v11904_v61, %v7892_v44  ;;  %v7742_v34 = vpop.f32.mrb[77].mxu1 }
 0x380   : > { %9360 = vst.msk [vmem:[%s14334_s20 + $0x180] sm:$0xff] %vm943_vm1, %v9282_v37  ;;  %v9206_v27 = vadd.f32 %v14546_v31, %v9121_v4  ;;  %9047 = vst.msk [vmem:[#allocation2 + $0x1b0] sm:$0xff] %vm943_vm1, %v8969_v59  ;;  %v7969_v48 = vadd.f32 %v7891_v45, %v7742_v34  ;;  %v8894_v40 = vld [vmem:[#allocation2 + $0x1c8] sm:$0xff]  ;;  %v12026_v63 = vpop.f32.mrb[76].mxu0  ;;  %v7897_v37 = vld [vmem:[#allocation2 + $0x210] sm:$0xff] }
 0x381   : > { %v9285_v35 = vmax.f32 %v9207_v29, 0.0  ;;  %8048 = vst.msk [vmem:[#allocation2 + $0x1e8] sm:$0xff] %vm943_vm1, %v7970_v62  ;;  %v8972_v5 = vadd.f32 %v12023_v24, %v8894_v40  ;;  %v8893_v38 = vld [vmem:[#allocation2 + $0x1c0] sm:$0xff]  ;;  %v8738_v49 = vpop.f32.mrb[77].mxu0  ;;  %v7898_v24 = vld [vmem:[#allocation2 + $0x218] sm:$0xff] }
 0x382   : > { %v9284_v12 = vmax.f32 %v9206_v27, 0.0  ;;  %v9124_v2 = vld [vmem:[#allocation2 + $0x1a8] sm:$0xff]  ;;  %8047 = vst.msk [vmem:[#allocation2 + $0x1e0] sm:$0xff] %vm943_vm1, %v7969_v48  ;;  %v8971_v51 = vadd.f32 %v8893_v38, %v8728_v36  ;;  %v11907_v52 = vpop.f32.mrb[78].mxu1 }
 0x383   : > { %9363 = vst.msk [vmem:[%s14334_s20 + $0x198] sm:$0xff] %vm943_vm1, %v9285_v35  ;;  %v9209_v42 = vadd.f32 %v14546_v31, %v9124_v2  ;;  %v9123_v33 = vld [vmem:[#allocation2 + $0x1a0] sm:$0xff]  ;;  %9050 = vst.msk [vmem:[#allocation2 + $0x1c8] sm:$0xff] %vm943_vm1, %v8972_v5  ;;  %v7972_v3 = vadd.f32 %v11907_v52, %v7894_v57  ;;  %v7752_v6 = vpop.f32.mrb[79].mxu1 }
 0x384   : > { %9362 = vst.msk [vmem:[%s14334_s20 + $0x190] sm:$0xff] %vm943_vm1, %v9284_v12  ;;  %v9208_v1 = vadd.f32 %v14546_v31, %v9123_v33  ;;  %9049 = vst.msk [vmem:[#allocation2 + $0x1c0] sm:$0xff] %vm943_vm1, %v8971_v51  ;;  %v7971_v13 = vadd.f32 %v7893_v0, %v7752_v6  ;;  %v8896_v43 = vld [vmem:[#allocation2 + $0x1d8] sm:$0xff]  ;;  %v12029_v8 = vpop.f32.mrb[78].mxu0  ;;  %v7899_v12 = vld [vmem:[#allocation2 + $0x220] sm:$0xff] }
 0x385   : > { %v9287_v46 = vmax.f32 %v9209_v42, 0.0  ;;  %8050 = vst.msk [vmem:[#allocation2 + $0x1f8] sm:$0xff] %vm943_vm1, %v7972_v3  ;;  %v8974_v19 = vadd.f32 %v12026_v63, %v8896_v43  ;;  %v8895_v9 = vld [vmem:[#allocation2 + $0x1d0] sm:$0xff]  ;;  %v8748_v7 = vpop.f32.mrb[79].mxu0  ;;  %v7900_v63 = vld [vmem:[#allocation2 + $0x228] sm:$0xff] }
 0x386   : > { %v9286_v10 = vmax.f32 %v9208_v1, 0.0  ;;  %v9126_v39 = vld [vmem:[#allocation2 + $0x1b8] sm:$0xff]  ;;  %8049 = vst.msk [vmem:[#allocation2 + $0x1f0] sm:$0xff] %vm943_vm1, %v7971_v13  ;;  %v8973_v47 = vadd.f32 %v8895_v9, %v8738_v49  ;;  %v11910_v14 = vpop.f32.mrb[80].mxu1 }
 0x387   : > { %9365 = vst.msk [vmem:[%s14334_s20 + $0x1a8] sm:$0xff] %vm943_vm1, %v9287_v46  ;;  %v9211_v15 = vadd.f32 %v14546_v31, %v9126_v39  ;;  %v9125_v23 = vld [vmem:[#allocation2 + $0x1b0] sm:$0xff]  ;;  %9052 = vst.msk [vmem:[#allocation2 + $0x1d8] sm:$0xff] %vm943_vm1, %v8974_v19  ;;  %v7974_v55 = vadd.f32 %v11910_v14, %v7896_v50  ;;  %v7762_v11 = vpop.f32.mrb[81].mxu1 }
 0x388   : > { %9364 = vst.msk [vmem:[%s14334_s20 + $0x1a0] sm:$0xff] %vm943_vm1, %v9286_v10  ;;  %v9210_v20 = vadd.f32 %v14546_v31, %v9125_v23  ;;  %9051 = vst.msk [vmem:[#allocation2 + $0x1d0] sm:$0xff] %vm943_vm1, %v8973_v47  ;;  %v7973_v17 = vadd.f32 %v7895_v30, %v7762_v11  ;;  %v8898_v25 = vld [vmem:[#allocation2 + $0x1e8] sm:$0xff]  ;;  %v12032_v53 = vpop.f32.mrb[80].mxu0  ;;  %v7901_v10 = vld [vmem:[#allocation2 + $0x230] sm:$0xff] }
 0x389   : > { %v9289_v26 = vmax.f32 %v9211_v15, 0.0  ;;  %8052 = vst.msk [vmem:[#allocation2 + $0x208] sm:$0xff] %vm943_vm1, %v7974_v55  ;;  %v8976_v56 = vadd.f32 %v12029_v8, %v8898_v25  ;;  %v8897_v18 = vld [vmem:[#allocation2 + $0x1e0] sm:$0xff]  ;;  %v8758_v21 = vpop.f32.mrb[81].mxu0  ;;  %v7902_v8 = vld [vmem:[#allocation2 + $0x238] sm:$0xff] }
 0x38a   : > { %v9288_v16 = vmax.f32 %v9210_v20, 0.0  ;;  %v9128_v54 = vld [vmem:[#allocation2 + $0x1c8] sm:$0xff]  ;;  %8051 = vst.msk [vmem:[#allocation2 + $0x200] sm:$0xff] %vm943_vm1, %v7973_v17  ;;  %v8975_v60 = vadd.f32 %v8897_v18, %v8748_v7  ;;  %v11913_v58 = vpop.f32.mrb[82].mxu1 }
 0x38b   : > { %9367 = vst.msk [vmem:[%s14334_s20 + $0x1b8] sm:$0xff] %vm943_vm1, %v9289_v26  ;;  %v9213_v32 = vadd.f32 %v14546_v31, %v9128_v54  ;;  %v9127_v22 = vld [vmem:[#allocation2 + $0x1c0] sm:$0xff]  ;;  %9054 = vst.msk [vmem:[#allocation2 + $0x1e8] sm:$0xff] %vm943_vm1, %v8976_v56  ;;  %v7976_v28 = vadd.f32 %v11913_v58, %v7898_v24  ;;  %v7772_v36 = vpop.f32.mrb[83].mxu1 }
 0x38c   : > { %9366 = vst.msk [vmem:[%s14334_s20 + $0x1b0] sm:$0xff] %vm943_vm1, %v9288_v16  ;;  %v9212_v41 = vadd.f32 %v14546_v31, %v9127_v22  ;;  %9053 = vst.msk [vmem:[#allocation2 + $0x1e0] sm:$0xff] %vm943_vm1, %v8975_v60  ;;  %v7975_v59 = vadd.f32 %v7897_v37, %v7772_v36  ;;  %v8900_v61 = vld [vmem:[#allocation2 + $0x1f8] sm:$0xff]  ;;  %v12035_v44 = vpop.f32.mrb[82].mxu0  ;;  %v7903_v16 = vld [vmem:[#allocation2 + $0x240] sm:$0xff] }
 0x38d   : > { %v9291_v29 = vmax.f32 %v9213_v32, 0.0  ;;  %8054 = vst.msk [vmem:[#allocation2 + $0x218] sm:$0xff] %vm943_vm1, %v7976_v28  ;;  %v8978_v4 = vadd.f32 %v12032_v53, %v8900_v61  ;;  %v8899_v62 = vld [vmem:[#allocation2 + $0x1f0] sm:$0xff]  ;;  %v8768_v34 = vpop.f32.mrb[83].mxu0  ;;  %v7904_v53 = vld [vmem:[#allocation2 + $0x248] sm:$0xff] }
 0x38e   : > { %v9290_v45 = vmax.f32 %v9212_v41, 0.0  ;;  %v9130_v27 = vld [vmem:[#allocation2 + $0x1d8] sm:$0xff]  ;;  %8053 = vst.msk [vmem:[#allocation2 + $0x210] sm:$0xff] %vm943_vm1, %v7975_v59  ;;  %v8977_v48 = vadd.f32 %v8899_v62, %v8758_v21  ;;  %v11916_v40 = vpop.f32.mrb[84].mxu1 }
 0x38f   : > { %9369 = vst.msk [vmem:[%s14334_s20 + $0x1c8] sm:$0xff] %vm943_vm1, %v9291_v29  ;;  %v9215_v35 = vadd.f32 %v14546_v31, %v9130_v27  ;;  %v9129_v5 = vld [vmem:[#allocation2 + $0x1d0] sm:$0xff]  ;;  %9056 = vst.msk [vmem:[#allocation2 + $0x1f8] sm:$0xff] %vm943_vm1, %v8978_v4  ;;  %v7978_v38 = vadd.f32 %v11916_v40, %v7900_v63  ;;  %v7782_v49 = vpop.f32.mrb[85].mxu1 }
 0x390   : > { %9368 = vst.msk [vmem:[%s14334_s20 + $0x1c0] sm:$0xff] %vm943_vm1, %v9290_v45  ;;  %v9214_v2 = vadd.f32 %v14546_v31, %v9129_v5  ;;  %9055 = vst.msk [vmem:[#allocation2 + $0x1f0] sm:$0xff] %vm943_vm1, %v8977_v48  ;;  %v7977_v51 = vadd.f32 %v7899_v12, %v7782_v49  ;;  %v8902_v52 = vld [vmem:[#allocation2 + $0x208] sm:$0xff]  ;;  %v12038_v57 = vpop.f32.mrb[84].mxu0  ;;  %v7905_v45 = vld [vmem:[#allocation2 + $0x250] sm:$0xff] }
 0x391   : > { %v9293_v42 = vmax.f32 %v9215_v35, 0.0  ;;  %8056 = vst.msk [vmem:[#allocation2 + $0x228] sm:$0xff] %vm943_vm1, %v7978_v38  ;;  %v8980_v33 = vadd.f32 %v12035_v44, %v8902_v52  ;;  %v8901_v3 = vld [vmem:[#allocation2 + $0x200] sm:$0xff]  ;;  %v8778_v6 = vpop.f32.mrb[85].mxu0  ;;  %v7906_v44 = vld [vmem:[#allocation2 + $0x258] sm:$0xff] }
 0x392   : > { %v9292_v0 = vmax.f32 %v9214_v2, 0.0  ;;  %v9132_v1 = vld [vmem:[#allocation2 + $0x1e8] sm:$0xff]  ;;  %8055 = vst.msk [vmem:[#allocation2 + $0x220] sm:$0xff] %vm943_vm1, %v7977_v51  ;;  %v8979_v13 = vadd.f32 %v8901_v3, %v8768_v34  ;;  %v11919_v43 = vpop.f32.mrb[86].mxu1 }
 0x393   : > { %9371 = vst.msk [vmem:[%s14334_s20 + $0x1d8] sm:$0xff] %vm943_vm1, %v9293_v42  ;;  %v9217_v46 = vadd.f32 %v14546_v31, %v9132_v1  ;;  %v9131_v19 = vld [vmem:[#allocation2 + $0x1e0] sm:$0xff]  ;;  %9058 = vst.msk [vmem:[#allocation2 + $0x208] sm:$0xff] %vm943_vm1, %v8980_v33  ;;  %v7980_v9 = vadd.f32 %v11919_v43, %v7902_v8  ;;  %v7792_v7 = vpop.f32.mrb[87].mxu1 }
 0x394   : > { %9370 = vst.msk [vmem:[%s14334_s20 + $0x1d0] sm:$0xff] %vm943_vm1, %v9292_v0  ;;  %v9216_v39 = vadd.f32 %v14546_v31, %v9131_v19  ;;  %9057 = vst.msk [vmem:[#allocation2 + $0x200] sm:$0xff] %vm943_vm1, %v8979_v13  ;;  %v7979_v47 = vadd.f32 %v7901_v10, %v7792_v7  ;;  %v8904_v14 = vld [vmem:[#allocation2 + $0x218] sm:$0xff]  ;;  %v12041_v50 = vpop.f32.mrb[86].mxu0  ;;  %v7907_v0 = vld [vmem:[#allocation2 + $0x260] sm:$0xff] }
 0x395   : > { %v9295_v15 = vmax.f32 %v9217_v46, 0.0  ;;  %8058 = vst.msk [vmem:[#allocation2 + $0x238] sm:$0xff] %vm943_vm1, %v7980_v9  ;;  %v8982_v23 = vadd.f32 %v12038_v57, %v8904_v14  ;;  %v8903_v55 = vld [vmem:[#allocation2 + $0x210] sm:$0xff]  ;;  %v8788_v11 = vpop.f32.mrb[87].mxu0  ;;  %v7908_v57 = vld [vmem:[#allocation2 + $0x268] sm:$0x3f] }
 0x396   : > { %v9294_v30 = vmax.f32 %v9216_v39, 0.0  ;;  %v9134_v20 = vld [vmem:[#allocation2 + $0x1f8] sm:$0xff]  ;;  %8057 = vst.msk [vmem:[#allocation2 + $0x230] sm:$0xff] %vm943_vm1, %v7979_v47  ;;  %v8981_v17 = vadd.f32 %v8903_v55, %v8778_v6  ;;  %v11922_v25 = vpop.f32.mrb[88].mxu1 }
 0x397   : > { %9373 = vst.msk [vmem:[%s14334_s20 + $0x1e8] sm:$0xff] %vm943_vm1, %v9295_v15  ;;  %v9219_v26 = vadd.f32 %v14546_v31, %v9134_v20  ;;  %v9133_v56 = vld [vmem:[#allocation2 + $0x1f0] sm:$0xff]  ;;  %9060 = vst.msk [vmem:[#allocation2 + $0x218] sm:$0xff] %vm943_vm1, %v8982_v23  ;;  %v7982_v18 = vadd.f32 %v11922_v25, %v7904_v53  ;;  %v7802_v21 = vpop.f32.mrb[89].mxu1 }
 0x398   : > { %9372 = vst.msk [vmem:[%s14334_s20 + $0x1e0] sm:$0xff] %vm943_vm1, %v9294_v30  ;;  %v9218_v54 = vadd.f32 %v14546_v31, %v9133_v56  ;;  %9059 = vst.msk [vmem:[#allocation2 + $0x210] sm:$0xff] %vm943_vm1, %v8981_v17  ;;  %v7981_v60 = vadd.f32 %v7903_v16, %v7802_v21  ;;  %v8906_v58 = vld [vmem:[#allocation2 + $0x228] sm:$0xff]  ;;  %v12044_v24 = vpop.f32.mrb[88].mxu0 }
 0x399   : > { %v9297_v32 = vmax.f32 %v9219_v26, 0.0  ;;  %8060 = vst.msk [vmem:[#allocation2 + $0x248] sm:$0xff] %vm943_vm1, %v7982_v18  ;;  %v8984_v22 = vadd.f32 %v12041_v50, %v8906_v58  ;;  %v8905_v28 = vld [vmem:[#allocation2 + $0x220] sm:$0xff]  ;;  %v8798_v36 = vpop.f32.mrb[89].mxu0 }
 0x39a   : > { %v9296_v37 = vmax.f32 %v9218_v54, 0.0  ;;  %v9136_v41 = vld [vmem:[#allocation2 + $0x208] sm:$0xff]  ;;  %8059 = vst.msk [vmem:[#allocation2 + $0x240] sm:$0xff] %vm943_vm1, %v7981_v60  ;;  %v8983_v59 = vadd.f32 %v8905_v28, %v8788_v11  ;;  %v11925_v61 = vpop.f32.mrb[90].mxu1 }
 0x39b   : > { %9375 = vst.msk [vmem:[%s14334_s20 + $0x1f8] sm:$0xff] %vm943_vm1, %v9297_v32  ;;  %v9221_v29 = vadd.f32 %v14546_v31, %v9136_v41  ;;  %v9135_v4 = vld [vmem:[#allocation2 + $0x200] sm:$0xff]  ;;  %9062 = vst.msk [vmem:[#allocation2 + $0x228] sm:$0xff] %vm943_vm1, %v8984_v22  ;;  %v7984_v62 = vadd.f32 %v11925_v61, %v7906_v44  ;;  %v7812_v34 = vpop.f32.mrb[91].mxu1 }
 0x39c   : > { %9374 = vst.msk [vmem:[%s14334_s20 + $0x1f0] sm:$0xff] %vm943_vm1, %v9296_v37  ;;  %v9220_v27 = vadd.f32 %v14546_v31, %v9135_v4  ;;  %9061 = vst.msk [vmem:[#allocation2 + $0x220] sm:$0xff] %vm943_vm1, %v8983_v59  ;;  %v7983_v48 = vadd.f32 %v7905_v45, %v7812_v34  ;;  %v8908_v40 = vld [vmem:[#allocation2 + $0x238] sm:$0xff]  ;;  %v12047_v63 = vpop.f32.mrb[90].mxu0 }
 0x39d   : > { %v9299_v35 = vmax.f32 %v9221_v29, 0.0  ;;  %8062 = vst.msk [vmem:[#allocation2 + $0x258] sm:$0xff] %vm943_vm1, %v7984_v62  ;;  %v8986_v5 = vadd.f32 %v12044_v24, %v8908_v40  ;;  %v8907_v38 = vld [vmem:[#allocation2 + $0x230] sm:$0xff]  ;;  %v8808_v49 = vpop.f32.mrb[91].mxu0 }
 0x39e   : > { %v9298_v12 = vmax.f32 %v9220_v27, 0.0  ;;  %v9138_v2 = vld [vmem:[#allocation2 + $0x218] sm:$0xff]  ;;  %8061 = vst.msk [vmem:[#allocation2 + $0x250] sm:$0xff] %vm943_vm1, %v7983_v48  ;;  %v8985_v51 = vadd.f32 %v8907_v38, %v8798_v36  ;;  %v11928_v52 = vpop.f32.mrb[92].mxu1 }
 0x39f   : > { %9377 = vst.msk [vmem:[%s14334_s20 + $0x208] sm:$0xff] %vm943_vm1, %v9299_v35  ;;  %v9223_v42 = vadd.f32 %v14546_v31, %v9138_v2  ;;  %v9137_v33 = vld [vmem:[#allocation2 + $0x210] sm:$0xff]  ;;  %9064 = vst.msk [vmem:[#allocation2 + $0x238] sm:$0xff] %vm943_vm1, %v8986_v5  ;;  %v7986_v3 = vadd.f32 %v11928_v52, %v7908_v57  ;;  %v7822_v6 = vpop.f32.mrb[93].mxu1 }
 0x3a0   : > { %9376 = vst.msk [vmem:[%s14334_s20 + $0x200] sm:$0xff] %vm943_vm1, %v9298_v12  ;;  %v9222_v1 = vadd.f32 %v14546_v31, %v9137_v33  ;;  %9063 = vst.msk [vmem:[#allocation2 + $0x230] sm:$0xff] %vm943_vm1, %v8985_v51  ;;  %v7985_v13 = vadd.f32 %v7907_v0, %v7822_v6  ;;  %v8910_v43 = vld [vmem:[#allocation2 + $0x248] sm:$0xff]  ;;  %v12050_v8 = vpop.f32.mrb[92].mxu0 }
 0x3a1   : > { %v9301_v46 = vmax.f32 %v9223_v42, 0.0  ;;  %8064 = vst.msk [vmem:[#allocation2 + $0x268] sm:$0x3f] %vm1021_vm2, %v7986_v3  ;;  %v8988_v19 = vadd.f32 %v12047_v63, %v8910_v43  ;;  %v8909_v9 = vld [vmem:[#allocation2 + $0x240] sm:$0xff]  ;;  %v8818_v7 = vpop.f32.mrb[93].mxu0 }
 0x3a2   : > { %v9300_v10 = vmax.f32 %v9222_v1, 0.0  ;;  %v9140_v39 = vld [vmem:[#allocation2 + $0x228] sm:$0xff]  ;;  %8063 = vst.msk [vmem:[#allocation2 + $0x260] sm:$0xff] %vm943_vm1, %v7985_v13  ;;  %v8987_v47 = vadd.f32 %v8909_v9, %v8808_v49 }
 0x3a3   : > { %9379 = vst.msk [vmem:[%s14334_s20 + $0x218] sm:$0xff] %vm943_vm1, %v9301_v46  ;;  %v9225_v14 = vadd.f32 %v14546_v31, %v9140_v39  ;;  %v9139_v50 = vld [vmem:[#allocation2 + $0x220] sm:$0xff]  ;;  %9066 = vst.msk [vmem:[#allocation2 + $0x248] sm:$0xff] %vm943_vm1, %v8988_v19 }
 0x3a4   : > { %9378 = vst.msk [vmem:[%s14334_s20 + $0x210] sm:$0xff] %vm943_vm1, %v9300_v10  ;;  %v9224_v15 = vadd.f32 %v14546_v31, %v9139_v50  ;;  %9065 = vst.msk [vmem:[#allocation2 + $0x240] sm:$0xff] %vm943_vm1, %v8987_v47  ;;  %v8912_v23 = vld [vmem:[#allocation2 + $0x258] sm:$0xff]  ;;  %v12053_v55 = vpop.f32.mrb[94].mxu0 }
 0x3a5   : > { %v9303_v11 = vmax.f32 %v9225_v14, 0.0  ;;  %v8990_v30 = vadd.f32 %v12050_v8, %v8912_v23  ;;  %v8911_v20 = vld [vmem:[#allocation2 + $0x250] sm:$0xff]  ;;  %v8828_v17 = vpop.f32.mrb[95].mxu0 }
 0x3a6   : > { %v9302_v25 = vmax.f32 %v9224_v15, 0.0  ;;  %v9142_v53 = vld [vmem:[#allocation2 + $0x238] sm:$0xff]  ;;  %v8989_v26 = vadd.f32 %v8911_v20, %v8818_v7 }
 0x3a7   : > { %9381 = vst.msk [vmem:[%s14334_s20 + $0x228] sm:$0xff] %vm943_vm1, %v9303_v11  ;;  %v9227_v56 = vadd.f32 %v14546_v31, %v9142_v53  ;;  %v9141_v18 = vld [vmem:[#allocation2 + $0x230] sm:$0xff]  ;;  %9068 = vst.msk [vmem:[#allocation2 + $0x258] sm:$0xff] %vm943_vm1, %v8990_v30 }
 0x3a8   : > { %9380 = vst.msk [vmem:[%s14334_s20 + $0x220] sm:$0xff] %vm943_vm1, %v9302_v25  ;;  %v9226_v21 = vadd.f32 %v14546_v31, %v9141_v18  ;;  %9067 = vst.msk [vmem:[#allocation2 + $0x250] sm:$0xff] %vm943_vm1, %v8989_v26  ;;  %v8914_v16 = vld [vmem:[#allocation2 + $0x268] sm:$0x3f] }
 0x3a9   : > { %v9305_v54 = vmax.f32 %v9227_v56, 0.0  ;;  %v8992_v60 = vadd.f32 %v12053_v55, %v8914_v16  ;;  %v8913_v58 = vld [vmem:[#allocation2 + $0x260] sm:$0xff] }
 0x3aa   : > { %v9304_v24 = vmax.f32 %v9226_v21, 0.0  ;;  %v9144_v32 = vld [vmem:[#allocation2 + $0x248] sm:$0xff]  ;;  %v8991_v22 = vadd.f32 %v8913_v58, %v8828_v17 }
 0x3ab   : > { %9383 = vst.msk [vmem:[%s14334_s20 + $0x238] sm:$0xff] %vm943_vm1, %v9305_v54  ;;  %v9229_v28 = vadd.f32 %v14546_v31, %v9144_v32  ;;  %v9143_v36 = vld [vmem:[#allocation2 + $0x240] sm:$0xff] }
 0x3ac   : > { %9070 = vst.msk [vmem:[#allocation2 + $0x268] sm:$0x3f] %vm1021_vm2, %v8992_v60  ;;  %v9228_v37 = vadd.f32 %v14546_v31, %v9143_v36 }
 0x3ad   : > { %9382 = vst.msk [vmem:[%s14334_s20 + $0x230] sm:$0xff] %vm943_vm1, %v9304_v24  ;;  %9069 = vst.msk [vmem:[#allocation2 + $0x260] sm:$0xff] %vm943_vm1, %v8991_v22  ;;  %v9307_v41 = vmax.f32 %v9229_v28, 0.0 }
 0x3ae   : > { %v9306_v59 = vmax.f32 %v9228_v37, 0.0  ;;  %v9146_v61 = vld [vmem:[#allocation2 + $0x258] sm:$0xff] }
 0x3af   : > { %9385 = vst.msk [vmem:[%s14334_s20 + $0x248] sm:$0xff] %vm943_vm1, %v9307_v41  ;;  %v9231_v44 = vadd.f32 %v14546_v31, %v9146_v61  ;;  %v9145_v29 = vld [vmem:[#allocation2 + $0x250] sm:$0xff] }
 0x3b0   : > { %9384 = vst.msk [vmem:[%s14334_s20 + $0x240] sm:$0xff] %vm943_vm1, %v9306_v59  ;;  %v9230_v4 = vadd.f32 %v14546_v31, %v9145_v29 }
 0x3b1   : > { %v9309_v62 = vmax.f32 %v9231_v44, 0.0 }
 0x3b2   : > { %v9308_v34 = vmax.f32 %v9230_v4, 0.0 }
 0x3b3   : > { %v9148_v45 = vld [vmem:[#allocation2 + $0x268] sm:$0x3f]  ;;  %9387 = vst.msk [vmem:[%s14334_s20 + $0x258] sm:$0xff] %vm943_vm1, %v9309_v62 }
 0x3b4   : > { %v9233_v27 = vadd.f32 %v14546_v31, %v9148_v45  ;;  %v9147_v48 = vld [vmem:[#allocation2 + $0x260] sm:$0xff]  ;;  %9386 = vst.msk [vmem:[%s14334_s20 + $0x250] sm:$0xff] %vm943_vm1, %v9308_v34 }
 0x3b5   : > { %v9232_v40 = vadd.f32 %v14546_v31, %v9147_v48 }
 0x3b6   : > { %v9311_v63 = vmax.f32 %v9233_v27, 0.0 }
 0x3b7   : > { %v9310_v35 = vmax.f32 %v9232_v40, 0.0 }
 0x3b8   : > { %9389 = vst.msk [vmem:[%s14334_s20 + $0x268] sm:$0x3f] %vm1021_vm2, %v9311_v63 }
 0x3b9   : > { %9388 = vst.msk [vmem:[%s14334_s20 + $0x260] sm:$0xff] %vm943_vm1, %v9310_v35 }
 0x3ba PF: > { %s13_s12 = sadd.s32 1, %s12148_s12  }
 0x3bb   : > { %p10_p4 = scmp.ge.s32.totalorder %s13_s12, 4  }
 0x3bd   :  { %12 = sbr.rel (!%p10_p4) target bundleno = 1 (0x1), region = 70 }

</bundles_post_ra>
